<compile_context>
chip_gen: v7x
topology: tpu7x:2x2x1
jax: 0.10.0
libtpu: 0.0.40
codegen_flags: <defaults>
</compile_context>

<pallas_src>
import functools

import jax
import jax.numpy as jnp
from jax.experimental import pallas as pl
from jax.experimental.pallas import tpu as pltpu

VMEM_SPEC = pl.BlockSpec(memory_space=pltpu.MemorySpace.VMEM)
ANY_SPEC = pl.BlockSpec(memory_space=pl.ANY)

NUM_NODES = 100          # fc expects 128 * 100 inputs -> the graph has 100 nodes
N_PAD = 128              # node dim padded for (8,128)-aligned tiles
CHANNELS = [16, 64, 128, 256, 512, 256, 128]        # true ChebConv channel widths
CHANNELS_PAD = [128, 128, 128, 256, 512, 256, 128]  # lane-aligned widths used in the kernel


# ----------------------------- Pallas kernel ------------------------------- #

def _cheb_layer(L_bf, h_bf, w, bias, t_ref, fin):
    """One folded ChebConv(K=3) + bias + ReLU.

    With the recurrence constants folded into the weights in glue
    (W0' = W0 - W2, W1' = W1, W2' = 2*W2):
        Tx0 = H;  Tx1 = L_hat @ H;  Tx2' = L_hat @ Tx1
        out = relu([Tx0 | Tx1 | Tx2'] @ [W0'; W1'; W2'] + b)   (single wide-K MXU dot)
    t_ref is a persistent bf16 VMEM slab reused by every layer (128-aligned lane offsets).
    """
    tx1 = jnp.dot(L_bf, h_bf, preferred_element_type=jnp.float32).astype(jnp.bfloat16)
    tx2 = jnp.dot(L_bf, tx1, preferred_element_type=jnp.float32).astype(jnp.bfloat16)
    t_ref[:, 0:fin] = h_bf
    t_ref[:, fin:2 * fin] = tx1
    t_ref[:, 2 * fin:3 * fin] = tx2
    out = jnp.dot(t_ref[:, 0:3 * fin], w, preferred_element_type=jnp.float32) + bias
    return jnp.maximum(out, 0.0).astype(jnp.bfloat16)


def _fused_leukemia_gnn_kernel(
        l_ref, x_ref, w123_ref, b_ref, bfc_ref,
        w4_hbm, w5_hbm, w6_hbm, wfc_hbm,
        o_ref,
        w4_v, w5_v, w6_v, wfc_v, t_ref, sem, *, num_classes):
    """Entire forward pass in VMEM: 6x (ChebConv + ReLU) -> FC -> softmax."""
    # Kick off the big late-layer weight DMAs immediately so they overlap layers 1-3 compute.
    cp4 = pltpu.make_async_copy(w4_hbm, w4_v, sem.at[0]); cp4.start()
    cp5 = pltpu.make_async_copy(w5_hbm, w5_v, sem.at[1]); cp5.start()
    cp6 = pltpu.make_async_copy(w6_hbm, w6_v, sem.at[2]); cp6.start()
    cpf = pltpu.make_async_copy(wfc_hbm, wfc_v, sem.at[3]); cpf.start()

    L = l_ref[...]                                              # bf16 [Np, Np]
    h = x_ref[...]                                              # bf16 [Np, 128]

    # Layers 1-3: small weights, already VMEM-resident (auto-copied before body).
    h = _cheb_layer(L, h, w123_ref[:, 0:128],   b_ref[0:1, 0:128], t_ref, 128)
    h = _cheb_layer(L, h, w123_ref[:, 128:256], b_ref[1:2, 0:128], t_ref, 128)
    h = _cheb_layer(L, h, w123_ref[:, 256:512], b_ref[2:3, 0:256], t_ref, 128)
    # dropout(p=0.5): identity in eval mode

    # Layers 4-6: wait for each manually-prefetched weight just before use.
    cp4.wait()
    h = _cheb_layer(L, h, w4_v[...], b_ref[3:4, 0:512], t_ref, 256)
    cp5.wait()
    h = _cheb_layer(L, h, w5_v[...], b_ref[4:5, 0:256], t_ref, 512)
    cp6.wait()
    h = _cheb_layer(L, h, w6_v[...], b_ref[5:6, 0:128], t_ref, 256)

    # FC: logits[c] = sum_{n,f} h[n,f] * wfc[c,n,f] + b[c]  (node-major flatten folded into
    # wfc layout).  Pure VPU multiply + XLU reduce; avoids a degenerate [1,12800]x[12800,C]
    # MXU matmul and the reshape relayout.
    cpf.wait()
    hf = h.astype(jnp.float32)                                  # [Np, 128] f32
    cols = []
    for c in range(num_classes):
        s = jnp.sum(hf * wfc_v[c], axis=0, keepdims=True)       # [1, 128]
        cols.append(jnp.sum(s, axis=1, keepdims=True))          # [1, 1]
    logits = jnp.concatenate(cols, axis=1) + bfc_ref[...]       # [1, C]

    m = jnp.max(logits, axis=-1, keepdims=True)
    e = jnp.exp(logits - m)
    o_ref[...] = e / jnp.sum(e, axis=-1, keepdims=True)


# ------------------------------- Wrapper ----------------------------------- #

@jax.jit
def leukemia_gnn_forward(params, x_pad_bf16, l_pad_bf16):
    num_classes = params["bfc"].shape[1]
    kernel = functools.partial(_fused_leukemia_gnn_kernel, num_classes=num_classes)
    return pl.pallas_call(
        kernel,
        out_shape=jax.ShapeDtypeStruct((1, num_classes), jnp.float32),
        in_specs=[VMEM_SPEC,   # L_hat
                  VMEM_SPEC,   # x
                  VMEM_SPEC,   # w1|w2|w3 blob
                  VMEM_SPEC,   # biases [6,512]
                  VMEM_SPEC,   # fc bias
                  ANY_SPEC,    # w4 (HBM, manual DMA)
                  ANY_SPEC,    # w5
                  ANY_SPEC,    # w6
                  ANY_SPEC],   # fc weight
        out_specs=VMEM_SPEC,
        scratch_shapes=[
            pltpu.VMEM((768, 512), jnp.bfloat16),                 # w4 landing buffer
            pltpu.VMEM((1536, 256), jnp.bfloat16),                # w5 landing buffer
            pltpu.VMEM((768, 128), jnp.bfloat16),                 # w6 landing buffer
            pltpu.VMEM((num_classes, N_PAD, 128), jnp.float32),   # fc weight landing buffer
            pltpu.VMEM((N_PAD, 3 * 512), jnp.bfloat16),           # [Tx0|Tx1|Tx2] slab
            pltpu.SemaphoreType.DMA((4,)),
        ],
        compiler_params=pltpu.CompilerParams(vmem_limit_bytes=32 * 1024 * 1024),
    )(l_pad_bf16, x_pad_bf16, params["w123"], params["b_all"], params["bfc"],
      params["w4"], params["w5"], params["w6"], params["wfc"])


# --------------------------- Glue (pure JAX) -------------------------------- #

def build_scaled_laplacian(edge_index, edge_weight, num_nodes, pad_to):
    """Dense ChebConv-scaled Laplacian, zero-padded: L_hat = -D^{-1/2} A D^{-1/2}."""
    src, dst = edge_index[0], edge_index[1]
    A = jnp.zeros((num_nodes, num_nodes), jnp.float32).at[src, dst].add(edge_weight)
    deg = jnp.sum(A, axis=1)
    dinv = jnp.where(deg > 0, 1.0 / jnp.sqrt(deg), 0.0)
    L = -(dinv[:, None] * A * dinv[None, :])
    return jnp.zeros((pad_to, pad_to), jnp.float32).at[:num_nodes, :num_nodes].set(L)


def init_params(num_classes, key):
    w123_parts, w456 = [], []
    b_all = jnp.zeros((6, 512), jnp.float32)
    for i in range(6):
        cin, cout = CHANNELS[i], CHANNELS[i + 1]
        cin_p, cout_p = CHANNELS_PAD[i], CHANNELS_PAD[i + 1]
        scale = (6.0 / (cin + cout)) ** 0.5  # glorot-uniform, as in ChebConv.reset_parameters
        ws = []
        for _ in range(3):
            key, sub = jax.random.split(key)
            ws.append(jax.random.uniform(sub, (cin, cout), jnp.float32, -scale, scale))
        w0, w1, w2 = ws
        # Fold the Chebyshev recurrence (Tx2 = 2*L@Tx1 - Tx0) into the weights:
        #   Tx0@W0 + Tx1@W1 + Tx2@W2 == Tx0@(W0-W2) + Tx1@W1 + (L@Tx1)@(2*W2)
        folded = (w0 - w2, w1, 2.0 * w2)
        pads = [jnp.zeros((cin_p, cout_p), jnp.float32).at[:cin, :cout].set(w) for w in folded]
        w_cat = jnp.concatenate(pads, axis=0).astype(jnp.bfloat16)   # [3*cin_p, cout_p]
        if i < 3:
            w123_parts.append(w_cat)
        else:
            w456.append(w_cat)
        # ChebConv bias init: zeros (padded lanes stay zero so padded channels remain zero)
        b_all = b_all.at[i, :cout].set(jnp.zeros((cout,), jnp.float32))

    params = {
        "w123": jnp.concatenate(w123_parts, axis=1),   # [384, 512] bf16
        "w4": w456[0],                                 # [768, 512] bf16
        "w5": w456[1],                                 # [1536, 256] bf16
        "w6": w456[2],                                 # [768, 128] bf16
        "b_all": b_all,                                # [6, 512] f32
    }

    fc_in = 128 * NUM_NODES
    scale = 1.0 / (fc_in ** 0.5)
    key, sub = jax.random.split(key)
    w_fc = jax.random.uniform(sub, (fc_in, num_classes), jnp.float32, -scale, scale)
    key, sub = jax.random.split(key)
    b_fc = jax.random.uniform(sub, (num_classes,), jnp.float32, -scale, scale)
    # Node-major flatten (x.view(-1, 128*100)): flat index = node*128 + feat.
    w_fc_r = w_fc.reshape(NUM_NODES, 128, num_classes).transpose(2, 0, 1)   # [C, N, 128]
    params["wfc"] = jnp.zeros((num_classes, N_PAD, 128), jnp.float32).at[:, :NUM_NODES, :].set(w_fc_r)
    params["bfc"] = b_fc.reshape(1, -1)
    return params


# --------------------------------- Main ------------------------------------ #

if __name__ == "__main__":
    NUM_FEATURES = 16
    NUM_CLASSES = 2

    key = jax.random.PRNGKey(0)
    key, kx, kw, kp = jax.random.split(key, 4)

    # node features (padded to [128, 128] with zeros for clean tiles)
    x = jax.random.normal(kx, (NUM_NODES, NUM_FEATURES), jnp.float32)
    x_pad = jnp.zeros((N_PAD, CHANNELS_PAD[0]), jnp.float32)
    x_pad = x_pad.at[:NUM_NODES, :NUM_FEATURES].set(x)
    x_pad_bf16 = x_pad.astype(jnp.bfloat16)

    # simple undirected ring graph: edges (i, i+1) and (i+1, i)
    nodes = jnp.arange(NUM_NODES)
    src = jnp.concatenate([nodes, (nodes + 1) % NUM_NODES])
    dst = jnp.concatenate([(nodes + 1) % NUM_NODES, nodes])
    edge_index = jnp.stack([src, dst], axis=0)                       # [2, 200]
    ew_half = jax.random.uniform(kw, (NUM_NODES,), jnp.float32, 0.5, 1.5)
    edge_weight = jnp.concatenate([ew_half, ew_half])                # symmetric weights, [200]

    L_pad = build_scaled_laplacian(edge_index, edge_weight, NUM_NODES, N_PAD)
    L_pad_bf16 = L_pad.astype(jnp.bfloat16)

    params = init_params(NUM_CLASSES, kp)

    out = leukemia_gnn_forward(params, x_pad_bf16, L_pad_bf16)
    out = jax.block_until_ready(out)

    assert out.shape == (1, NUM_CLASSES), out.shape
    assert bool(jnp.all(jnp.isfinite(out)))
    assert abs(float(jnp.sum(out)) - 1.0) < 1e-4  # softmax rows sum to 1
    print("KERNEL_OK")
</pallas_src>

<mosaic_0001>
module attributes {stable_mosaic.version = 11 : i64} {
  func.func @_fused_leukemia_gnn_kernel(%arg0: memref<128x128xbf16, #tpu.memory_space<vmem>>, %arg1: memref<128x128xbf16, #tpu.memory_space<vmem>>, %arg2: memref<384x512xbf16, #tpu.memory_space<vmem>>, %arg3: memref<6x512xf32, #tpu.memory_space<vmem>>, %arg4: memref<1x2xf32, #tpu.memory_space<vmem>>, %arg5: memref<768x512xbf16, #tpu.memory_space<any>>, %arg6: memref<1536x256xbf16, #tpu.memory_space<any>>, %arg7: memref<768x128xbf16, #tpu.memory_space<any>>, %arg8: memref<2x128x128xf32, #tpu.memory_space<any>>, %arg9: memref<1x2xf32, #tpu.memory_space<vmem>>, %arg10: memref<768x512xbf16, #tpu.memory_space<vmem>>, %arg11: memref<1536x256xbf16, #tpu.memory_space<vmem>>, %arg12: memref<768x128xbf16, #tpu.memory_space<vmem>>, %arg13: memref<2x128x128xf32, #tpu.memory_space<vmem>>, %arg14: memref<128x1536xbf16, #tpu.memory_space<vmem>>, %arg15: memref<4x!tpu.dma_semaphore, #tpu.memory_space<semaphore_mem>>) attributes {dimension_semantics = [], scalar_prefetch = 0 : i64, scratch_operands = 6 : i64, tpu.core_type = #tpu.core_type<tc>} {
    %c0_i32 = arith.constant 0 : i32
    %0 = tpu.memref_slice %arg15[%c0_i32] : memref<4x!tpu.dma_semaphore, #tpu.memory_space<semaphore_mem>> -> memref<1x!tpu.dma_semaphore, #tpu.memory_space<semaphore_mem>>
    %1 = tpu.memref_squeeze %0 : memref<1x!tpu.dma_semaphore, #tpu.memory_space<semaphore_mem>> -> memref<!tpu.dma_semaphore, #tpu.memory_space<semaphore_mem>>
    tpu.enqueue_dma source(%arg5 : memref<768x512xbf16, #tpu.memory_space<any>>) target(%arg10 : memref<768x512xbf16, #tpu.memory_space<vmem>>) target_semaphore(%1 : memref<!tpu.dma_semaphore, #tpu.memory_space<semaphore_mem>>)
    %c1_i32 = arith.constant 1 : i32
    %2 = tpu.memref_slice %arg15[%c1_i32] : memref<4x!tpu.dma_semaphore, #tpu.memory_space<semaphore_mem>> -> memref<1x!tpu.dma_semaphore, #tpu.memory_space<semaphore_mem>>
    %3 = tpu.memref_squeeze %2 : memref<1x!tpu.dma_semaphore, #tpu.memory_space<semaphore_mem>> -> memref<!tpu.dma_semaphore, #tpu.memory_space<semaphore_mem>>
    tpu.enqueue_dma source(%arg6 : memref<1536x256xbf16, #tpu.memory_space<any>>) target(%arg11 : memref<1536x256xbf16, #tpu.memory_space<vmem>>) target_semaphore(%3 : memref<!tpu.dma_semaphore, #tpu.memory_space<semaphore_mem>>)
    %c2_i32 = arith.constant 2 : i32
    %4 = tpu.memref_slice %arg15[%c2_i32] : memref<4x!tpu.dma_semaphore, #tpu.memory_space<semaphore_mem>> -> memref<1x!tpu.dma_semaphore, #tpu.memory_space<semaphore_mem>>
    %5 = tpu.memref_squeeze %4 : memref<1x!tpu.dma_semaphore, #tpu.memory_space<semaphore_mem>> -> memref<!tpu.dma_semaphore, #tpu.memory_space<semaphore_mem>>
    tpu.enqueue_dma source(%arg7 : memref<768x128xbf16, #tpu.memory_space<any>>) target(%arg12 : memref<768x128xbf16, #tpu.memory_space<vmem>>) target_semaphore(%5 : memref<!tpu.dma_semaphore, #tpu.memory_space<semaphore_mem>>)
    %c3_i32 = arith.constant 3 : i32
    %6 = tpu.memref_slice %arg15[%c3_i32] : memref<4x!tpu.dma_semaphore, #tpu.memory_space<semaphore_mem>> -> memref<1x!tpu.dma_semaphore, #tpu.memory_space<semaphore_mem>>
    %7 = tpu.memref_squeeze %6 : memref<1x!tpu.dma_semaphore, #tpu.memory_space<semaphore_mem>> -> memref<!tpu.dma_semaphore, #tpu.memory_space<semaphore_mem>>
    tpu.enqueue_dma source(%arg8 : memref<2x128x128xf32, #tpu.memory_space<any>>) target(%arg13 : memref<2x128x128xf32, #tpu.memory_space<vmem>>) target_semaphore(%7 : memref<!tpu.dma_semaphore, #tpu.memory_space<semaphore_mem>>)
    %c0 = arith.constant 0 : index
    %c0_0 = arith.constant 0 : index
    %8 = vector.load %arg0[%c0, %c0_0] : memref<128x128xbf16, #tpu.memory_space<vmem>>, vector<128x128xbf16>
    %c0_1 = arith.constant 0 : index
    %c0_2 = arith.constant 0 : index
    %9 = vector.load %arg1[%c0_1, %c0_2] : memref<128x128xbf16, #tpu.memory_space<vmem>>, vector<128x128xbf16>
    %c0_3 = arith.constant 0 : index
    %c0_4 = arith.constant 0 : index
    %10 = vector.load %arg2[%c0_3, %c0_4] : memref<384x512xbf16, #tpu.memory_space<vmem>>, vector<384x128xbf16>
    %c0_5 = arith.constant 0 : index
    %c0_6 = arith.constant 0 : index
    %11 = vector.load %arg3[%c0_5, %c0_6] : memref<6x512xf32, #tpu.memory_space<vmem>>, vector<1x128xf32>
    %cst = arith.constant dense<0.000000e+00> : vector<128x128xf32>
    %12 = tpu.matmul %8, %9, %cst {dimension_numbers = #tpu.dot_dimension_numbers<[1], [0], [0], [1], [0, 0, 1, 1], [], []>} : vector<128x128xbf16>, vector<128x128xbf16>, vector<128x128xf32> -> vector<128x128xf32>
    %13 = arith.truncf %12 : vector<128x128xf32> to vector<128x128xbf16>
    %cst_7 = arith.constant dense<0.000000e+00> : vector<128x128xf32>
    %14 = tpu.matmul %8, %13, %cst_7 {dimension_numbers = #tpu.dot_dimension_numbers<[1], [0], [0], [1], [0, 0, 1, 1], [], []>} : vector<128x128xbf16>, vector<128x128xbf16>, vector<128x128xf32> -> vector<128x128xf32>
    %15 = arith.truncf %14 : vector<128x128xf32> to vector<128x128xbf16>
    %c0_8 = arith.constant 0 : index
    %c0_9 = arith.constant 0 : index
    %16 = vector.load %arg14[%c0_8, %c0_9] : memref<128x1536xbf16, #tpu.memory_space<vmem>>, vector<128x128xbf16>
    tpu.vector_store %arg14[%c0_8, %c0_9], %9 {strides = array<i32>} : memref<128x1536xbf16, #tpu.memory_space<vmem>>, vector<128x128xbf16>,
    %c0_10 = arith.constant 0 : index
    %c128 = arith.constant 128 : index
    %17 = vector.load %arg14[%c0_10, %c128] : memref<128x1536xbf16, #tpu.memory_space<vmem>>, vector<128x128xbf16>
    tpu.vector_store %arg14[%c0_10, %c128], %13 {strides = array<i32>} : memref<128x1536xbf16, #tpu.memory_space<vmem>>, vector<128x128xbf16>,
    %c0_11 = arith.constant 0 : index
    %c256 = arith.constant 256 : index
    %18 = vector.load %arg14[%c0_11, %c256] : memref<128x1536xbf16, #tpu.memory_space<vmem>>, vector<128x128xbf16>
    tpu.vector_store %arg14[%c0_11, %c256], %15 {strides = array<i32>} : memref<128x1536xbf16, #tpu.memory_space<vmem>>, vector<128x128xbf16>,
    %c0_12 = arith.constant 0 : index
    %c0_13 = arith.constant 0 : index
    %19 = vector.load %arg14[%c0_12, %c0_13] : memref<128x1536xbf16, #tpu.memory_space<vmem>>, vector<128x384xbf16>
    %cst_14 = arith.constant dense<0.000000e+00> : vector<128x128xf32>
    %20 = tpu.matmul %19, %10, %cst_14 {dimension_numbers = #tpu.dot_dimension_numbers<[1], [0], [0], [1], [0, 0, 1, 1], [], []>} : vector<128x384xbf16>, vector<384x128xbf16>, vector<128x128xf32> -> vector<128x128xf32>
    %21 = vector.broadcast %11 : vector<1x128xf32> to vector<128x128xf32>
    %22 = arith.addf %20, %21 : vector<128x128xf32>
    %cst_15 = arith.constant 0.000000e+00 : f32
    %23 = vector.broadcast %cst_15 : f32 to vector<128x128xf32>
    %24 = arith.maximumf %22, %23 : vector<128x128xf32>
    %25 = arith.truncf %24 : vector<128x128xf32> to vector<128x128xbf16>
    %c0_16 = arith.constant 0 : index
    %c128_17 = arith.constant 128 : index
    %26 = vector.load %arg2[%c0_16, %c128_17] : memref<384x512xbf16, #tpu.memory_space<vmem>>, vector<384x128xbf16>
    %c1 = arith.constant 1 : index
    %c0_18 = arith.constant 0 : index
    %27 = vector.load %arg3[%c1, %c0_18] : memref<6x512xf32, #tpu.memory_space<vmem>>, vector<1x128xf32>
    %cst_19 = arith.constant dense<0.000000e+00> : vector<128x128xf32>
    %28 = tpu.matmul %8, %25, %cst_19 {dimension_numbers = #tpu.dot_dimension_numbers<[1], [0], [0], [1], [0, 0, 1, 1], [], []>} : vector<128x128xbf16>, vector<128x128xbf16>, vector<128x128xf32> -> vector<128x128xf32>
    %29 = arith.truncf %28 : vector<128x128xf32> to vector<128x128xbf16>
    %cst_20 = arith.constant dense<0.000000e+00> : vector<128x128xf32>
    %30 = tpu.matmul %8, %29, %cst_20 {dimension_numbers = #tpu.dot_dimension_numbers<[1], [0], [0], [1], [0, 0, 1, 1], [], []>} : vector<128x128xbf16>, vector<128x128xbf16>, vector<128x128xf32> -> vector<128x128xf32>
    %31 = arith.truncf %30 : vector<128x128xf32> to vector<128x128xbf16>
    %c0_21 = arith.constant 0 : index
    %c0_22 = arith.constant 0 : index
    %32 = vector.load %arg14[%c0_21, %c0_22] : memref<128x1536xbf16, #tpu.memory_space<vmem>>, vector<128x128xbf16>
    tpu.vector_store %arg14[%c0_21, %c0_22], %25 {strides = array<i32>} : memref<128x1536xbf16, #tpu.memory_space<vmem>>, vector<128x128xbf16>,
    %c0_23 = arith.constant 0 : index
    %c128_24 = arith.constant 128 : index
    %33 = vector.load %arg14[%c0_23, %c128_24] : memref<128x1536xbf16, #tpu.memory_space<vmem>>, vector<128x128xbf16>
    tpu.vector_store %arg14[%c0_23, %c128_24], %29 {strides = array<i32>} : memref<128x1536xbf16, #tpu.memory_space<vmem>>, vector<128x128xbf16>,
    %c0_25 = arith.constant 0 : index
    %c256_26 = arith.constant 256 : index
    %34 = vector.load %arg14[%c0_25, %c256_26] : memref<128x1536xbf16, #tpu.memory_space<vmem>>, vector<128x128xbf16>
    tpu.vector_store %arg14[%c0_25, %c256_26], %31 {strides = array<i32>} : memref<128x1536xbf16, #tpu.memory_space<vmem>>, vector<128x128xbf16>,
    %c0_27 = arith.constant 0 : index
    %c0_28 = arith.constant 0 : index
    %35 = vector.load %arg14[%c0_27, %c0_28] : memref<128x1536xbf16, #tpu.memory_space<vmem>>, vector<128x384xbf16>
    %cst_29 = arith.constant dense<0.000000e+00> : vector<128x128xf32>
    %36 = tpu.matmul %35, %26, %cst_29 {dimension_numbers = #tpu.dot_dimension_numbers<[1], [0], [0], [1], [0, 0, 1, 1], [], []>} : vector<128x384xbf16>, vector<384x128xbf16>, vector<128x128xf32> -> vector<128x128xf32>
    %37 = vector.broadcast %27 : vector<1x128xf32> to vector<128x128xf32>
    %38 = arith.addf %36, %37 : vector<128x128xf32>
    %cst_30 = arith.constant 0.000000e+00 : f32
    %39 = vector.broadcast %cst_30 : f32 to vector<128x128xf32>
    %40 = arith.maximumf %38, %39 : vector<128x128xf32>
    %41 = arith.truncf %40 : vector<128x128xf32> to vector<128x128xbf16>
    %c0_31 = arith.constant 0 : index
    %c256_32 = arith.constant 256 : index
    %42 = vector.load %arg2[%c0_31, %c256_32] : memref<384x512xbf16, #tpu.memory_space<vmem>>, vector<384x256xbf16>
    %c2 = arith.constant 2 : index
    %c0_33 = arith.constant 0 : index
    %43 = vector.load %arg3[%c2, %c0_33] : memref<6x512xf32, #tpu.memory_space<vmem>>, vector<1x256xf32>
    %cst_34 = arith.constant dense<0.000000e+00> : vector<128x128xf32>
    %44 = tpu.matmul %8, %41, %cst_34 {dimension_numbers = #tpu.dot_dimension_numbers<[1], [0], [0], [1], [0, 0, 1, 1], [], []>} : vector<128x128xbf16>, vector<128x128xbf16>, vector<128x128xf32> -> vector<128x128xf32>
    %45 = arith.truncf %44 : vector<128x128xf32> to vector<128x128xbf16>
    %cst_35 = arith.constant dense<0.000000e+00> : vector<128x128xf32>
    %46 = tpu.matmul %8, %45, %cst_35 {dimension_numbers = #tpu.dot_dimension_numbers<[1], [0], [0], [1], [0, 0, 1, 1], [], []>} : vector<128x128xbf16>, vector<128x128xbf16>, vector<128x128xf32> -> vector<128x128xf32>
    %47 = arith.truncf %46 : vector<128x128xf32> to vector<128x128xbf16>
    %c0_36 = arith.constant 0 : index
    %c0_37 = arith.constant 0 : index
    %48 = vector.load %arg14[%c0_36, %c0_37] : memref<128x1536xbf16, #tpu.memory_space<vmem>>, vector<128x128xbf16>
    tpu.vector_store %arg14[%c0_36, %c0_37], %41 {strides = array<i32>} : memref<128x1536xbf16, #tpu.memory_space<vmem>>, vector<128x128xbf16>,
    %c0_38 = arith.constant 0 : index
    %c128_39 = arith.constant 128 : index
    %49 = vector.load %arg14[%c0_38, %c128_39] : memref<128x1536xbf16, #tpu.memory_space<vmem>>, vector<128x128xbf16>
    tpu.vector_store %arg14[%c0_38, %c128_39], %45 {strides = array<i32>} : memref<128x1536xbf16, #tpu.memory_space<vmem>>, vector<128x128xbf16>,
    %c0_40 = arith.constant 0 : index
    %c256_41 = arith.constant 256 : index
    %50 = vector.load %arg14[%c0_40, %c256_41] : memref<128x1536xbf16, #tpu.memory_space<vmem>>, vector<128x128xbf16>
    tpu.vector_store %arg14[%c0_40, %c256_41], %47 {strides = array<i32>} : memref<128x1536xbf16, #tpu.memory_space<vmem>>, vector<128x128xbf16>,
    %c0_42 = arith.constant 0 : index
    %c0_43 = arith.constant 0 : index
    %51 = vector.load %arg14[%c0_42, %c0_43] : memref<128x1536xbf16, #tpu.memory_space<vmem>>, vector<128x384xbf16>
    %cst_44 = arith.constant dense<0.000000e+00> : vector<128x256xf32>
    %52 = tpu.matmul %51, %42, %cst_44 {dimension_numbers = #tpu.dot_dimension_numbers<[1], [0], [0], [1], [0, 0, 1, 1], [], []>} : vector<128x384xbf16>, vector<384x256xbf16>, vector<128x256xf32> -> vector<128x256xf32>
    %53 = vector.broadcast %43 : vector<1x256xf32> to vector<128x256xf32>
    %54 = arith.addf %52, %53 : vector<128x256xf32>
    %cst_45 = arith.constant 0.000000e+00 : f32
    %55 = vector.broadcast %cst_45 : f32 to vector<128x256xf32>
    %56 = arith.maximumf %54, %55 : vector<128x256xf32>
    %57 = arith.truncf %56 : vector<128x256xf32> to vector<128x256xbf16>
    %c0_i32_46 = arith.constant 0 : i32
    %58 = tpu.memref_slice %arg15[%c0_i32_46] : memref<4x!tpu.dma_semaphore, #tpu.memory_space<semaphore_mem>> -> memref<1x!tpu.dma_semaphore, #tpu.memory_space<semaphore_mem>>
    %59 = tpu.memref_squeeze %58 : memref<1x!tpu.dma_semaphore, #tpu.memory_space<semaphore_mem>> -> memref<!tpu.dma_semaphore, #tpu.memory_space<semaphore_mem>>
    tpu.wait_dma2 semaphore(%59 : memref<!tpu.dma_semaphore, #tpu.memory_space<semaphore_mem>>) src(%arg5 : memref<768x512xbf16, #tpu.memory_space<any>>) dst(%arg10 : memref<768x512xbf16, #tpu.memory_space<vmem>>)
    %c0_47 = arith.constant 0 : index
    %c0_48 = arith.constant 0 : index
    %60 = vector.load %arg10[%c0_47, %c0_48] : memref<768x512xbf16, #tpu.memory_space<vmem>>, vector<768x512xbf16>
    %c3 = arith.constant 3 : index
    %c0_49 = arith.constant 0 : index
    %61 = vector.load %arg3[%c3, %c0_49] : memref<6x512xf32, #tpu.memory_space<vmem>>, vector<1x512xf32>
    %cst_50 = arith.constant dense<0.000000e+00> : vector<128x256xf32>
    %62 = tpu.matmul %8, %57, %cst_50 {dimension_numbers = #tpu.dot_dimension_numbers<[1], [0], [0], [1], [0, 0, 1, 1], [], []>} : vector<128x128xbf16>, vector<128x256xbf16>, vector<128x256xf32> -> vector<128x256xf32>
    %63 = arith.truncf %62 : vector<128x256xf32> to vector<128x256xbf16>
    %cst_51 = arith.constant dense<0.000000e+00> : vector<128x256xf32>
    %64 = tpu.matmul %8, %63, %cst_51 {dimension_numbers = #tpu.dot_dimension_numbers<[1], [0], [0], [1], [0, 0, 1, 1], [], []>} : vector<128x128xbf16>, vector<128x256xbf16>, vector<128x256xf32> -> vector<128x256xf32>
    %65 = arith.truncf %64 : vector<128x256xf32> to vector<128x256xbf16>
    %c0_52 = arith.constant 0 : index
    %c0_53 = arith.constant 0 : index
    %66 = vector.load %arg14[%c0_52, %c0_53] : memref<128x1536xbf16, #tpu.memory_space<vmem>>, vector<128x256xbf16>
    tpu.vector_store %arg14[%c0_52, %c0_53], %57 {strides = array<i32>} : memref<128x1536xbf16, #tpu.memory_space<vmem>>, vector<128x256xbf16>,
    %c0_54 = arith.constant 0 : index
    %c256_55 = arith.constant 256 : index
    %67 = vector.load %arg14[%c0_54, %c256_55] : memref<128x1536xbf16, #tpu.memory_space<vmem>>, vector<128x256xbf16>
    tpu.vector_store %arg14[%c0_54, %c256_55], %63 {strides = array<i32>} : memref<128x1536xbf16, #tpu.memory_space<vmem>>, vector<128x256xbf16>,
    %c0_56 = arith.constant 0 : index
    %c512 = arith.constant 512 : index
    %68 = vector.load %arg14[%c0_56, %c512] : memref<128x1536xbf16, #tpu.memory_space<vmem>>, vector<128x256xbf16>
    tpu.vector_store %arg14[%c0_56, %c512], %65 {strides = array<i32>} : memref<128x1536xbf16, #tpu.memory_space<vmem>>, vector<128x256xbf16>,
    %c0_57 = arith.constant 0 : index
    %c0_58 = arith.constant 0 : index
    %69 = vector.load %arg14[%c0_57, %c0_58] : memref<128x1536xbf16, #tpu.memory_space<vmem>>, vector<128x768xbf16>
    %cst_59 = arith.constant dense<0.000000e+00> : vector<128x512xf32>
    %70 = tpu.matmul %69, %60, %cst_59 {dimension_numbers = #tpu.dot_dimension_numbers<[1], [0], [0], [1], [0, 0, 1, 1], [], []>} : vector<128x768xbf16>, vector<768x512xbf16>, vector<128x512xf32> -> vector<128x512xf32>
    %71 = vector.broadcast %61 : vector<1x512xf32> to vector<128x512xf32>
    %72 = arith.addf %70, %71 : vector<128x512xf32>
    %cst_60 = arith.constant 0.000000e+00 : f32
    %73 = vector.broadcast %cst_60 : f32 to vector<128x512xf32>
    %74 = arith.maximumf %72, %73 : vector<128x512xf32>
    %75 = arith.truncf %74 : vector<128x512xf32> to vector<128x512xbf16>
    %c1_i32_61 = arith.constant 1 : i32
    %76 = tpu.memref_slice %arg15[%c1_i32_61] : memref<4x!tpu.dma_semaphore, #tpu.memory_space<semaphore_mem>> -> memref<1x!tpu.dma_semaphore, #tpu.memory_space<semaphore_mem>>
    %77 = tpu.memref_squeeze %76 : memref<1x!tpu.dma_semaphore, #tpu.memory_space<semaphore_mem>> -> memref<!tpu.dma_semaphore, #tpu.memory_space<semaphore_mem>>
    tpu.wait_dma2 semaphore(%77 : memref<!tpu.dma_semaphore, #tpu.memory_space<semaphore_mem>>) src(%arg6 : memref<1536x256xbf16, #tpu.memory_space<any>>) dst(%arg11 : memref<1536x256xbf16, #tpu.memory_space<vmem>>)
    %c0_62 = arith.constant 0 : index
    %c0_63 = arith.constant 0 : index
    %78 = vector.load %arg11[%c0_62, %c0_63] : memref<1536x256xbf16, #tpu.memory_space<vmem>>, vector<1536x256xbf16>
    %c4 = arith.constant 4 : index
    %c0_64 = arith.constant 0 : index
    %79 = vector.load %arg3[%c4, %c0_64] : memref<6x512xf32, #tpu.memory_space<vmem>>, vector<1x256xf32>
    %cst_65 = arith.constant dense<0.000000e+00> : vector<128x512xf32>
    %80 = tpu.matmul %8, %75, %cst_65 {dimension_numbers = #tpu.dot_dimension_numbers<[1], [0], [0], [1], [0, 0, 1, 1], [], []>} : vector<128x128xbf16>, vector<128x512xbf16>, vector<128x512xf32> -> vector<128x512xf32>
    %81 = arith.truncf %80 : vector<128x512xf32> to vector<128x512xbf16>
    %cst_66 = arith.constant dense<0.000000e+00> : vector<128x512xf32>
    %82 = tpu.matmul %8, %81, %cst_66 {dimension_numbers = #tpu.dot_dimension_numbers<[1], [0], [0], [1], [0, 0, 1, 1], [], []>} : vector<128x128xbf16>, vector<128x512xbf16>, vector<128x512xf32> -> vector<128x512xf32>
    %83 = arith.truncf %82 : vector<128x512xf32> to vector<128x512xbf16>
    %c0_67 = arith.constant 0 : index
    %c0_68 = arith.constant 0 : index
    %84 = vector.load %arg14[%c0_67, %c0_68] : memref<128x1536xbf16, #tpu.memory_space<vmem>>, vector<128x512xbf16>
    tpu.vector_store %arg14[%c0_67, %c0_68], %75 {strides = array<i32>} : memref<128x1536xbf16, #tpu.memory_space<vmem>>, vector<128x512xbf16>,
    %c0_69 = arith.constant 0 : index
    %c512_70 = arith.constant 512 : index
    %85 = vector.load %arg14[%c0_69, %c512_70] : memref<128x1536xbf16, #tpu.memory_space<vmem>>, vector<128x512xbf16>
    tpu.vector_store %arg14[%c0_69, %c512_70], %81 {strides = array<i32>} : memref<128x1536xbf16, #tpu.memory_space<vmem>>, vector<128x512xbf16>,
    %c0_71 = arith.constant 0 : index
    %c1024 = arith.constant 1024 : index
    %86 = vector.load %arg14[%c0_71, %c1024] : memref<128x1536xbf16, #tpu.memory_space<vmem>>, vector<128x512xbf16>
    tpu.vector_store %arg14[%c0_71, %c1024], %83 {strides = array<i32>} : memref<128x1536xbf16, #tpu.memory_space<vmem>>, vector<128x512xbf16>,
    %c0_72 = arith.constant 0 : index
    %c0_73 = arith.constant 0 : index
    %87 = vector.load %arg14[%c0_72, %c0_73] : memref<128x1536xbf16, #tpu.memory_space<vmem>>, vector<128x1536xbf16>
    %cst_74 = arith.constant dense<0.000000e+00> : vector<128x256xf32>
    %88 = tpu.matmul %87, %78, %cst_74 {dimension_numbers = #tpu.dot_dimension_numbers<[1], [0], [0], [1], [0, 0, 1, 1], [], []>} : vector<128x1536xbf16>, vector<1536x256xbf16>, vector<128x256xf32> -> vector<128x256xf32>
    %89 = vector.broadcast %79 : vector<1x256xf32> to vector<128x256xf32>
    %90 = arith.addf %88, %89 : vector<128x256xf32>
    %cst_75 = arith.constant 0.000000e+00 : f32
    %91 = vector.broadcast %cst_75 : f32 to vector<128x256xf32>
    %92 = arith.maximumf %90, %91 : vector<128x256xf32>
    %93 = arith.truncf %92 : vector<128x256xf32> to vector<128x256xbf16>
    %c2_i32_76 = arith.constant 2 : i32
    %94 = tpu.memref_slice %arg15[%c2_i32_76] : memref<4x!tpu.dma_semaphore, #tpu.memory_space<semaphore_mem>> -> memref<1x!tpu.dma_semaphore, #tpu.memory_space<semaphore_mem>>
    %95 = tpu.memref_squeeze %94 : memref<1x!tpu.dma_semaphore, #tpu.memory_space<semaphore_mem>> -> memref<!tpu.dma_semaphore, #tpu.memory_space<semaphore_mem>>
    tpu.wait_dma2 semaphore(%95 : memref<!tpu.dma_semaphore, #tpu.memory_space<semaphore_mem>>) src(%arg7 : memref<768x128xbf16, #tpu.memory_space<any>>) dst(%arg12 : memref<768x128xbf16, #tpu.memory_space<vmem>>)
    %c0_77 = arith.constant 0 : index
    %c0_78 = arith.constant 0 : index
    %96 = vector.load %arg12[%c0_77, %c0_78] : memref<768x128xbf16, #tpu.memory_space<vmem>>, vector<768x128xbf16>
    %c5 = arith.constant 5 : index
    %c0_79 = arith.constant 0 : index
    %97 = vector.load %arg3[%c5, %c0_79] : memref<6x512xf32, #tpu.memory_space<vmem>>, vector<1x128xf32>
    %cst_80 = arith.constant dense<0.000000e+00> : vector<128x256xf32>
    %98 = tpu.matmul %8, %93, %cst_80 {dimension_numbers = #tpu.dot_dimension_numbers<[1], [0], [0], [1], [0, 0, 1, 1], [], []>} : vector<128x128xbf16>, vector<128x256xbf16>, vector<128x256xf32> -> vector<128x256xf32>
    %99 = arith.truncf %98 : vector<128x256xf32> to vector<128x256xbf16>
    %cst_81 = arith.constant dense<0.000000e+00> : vector<128x256xf32>
    %100 = tpu.matmul %8, %99, %cst_81 {dimension_numbers = #tpu.dot_dimension_numbers<[1], [0], [0], [1], [0, 0, 1, 1], [], []>} : vector<128x128xbf16>, vector<128x256xbf16>, vector<128x256xf32> -> vector<128x256xf32>
    %101 = arith.truncf %100 : vector<128x256xf32> to vector<128x256xbf16>
    %c0_82 = arith.constant 0 : index
    %c0_83 = arith.constant 0 : index
    %102 = vector.load %arg14[%c0_82, %c0_83] : memref<128x1536xbf16, #tpu.memory_space<vmem>>, vector<128x256xbf16>
    tpu.vector_store %arg14[%c0_82, %c0_83], %93 {strides = array<i32>} : memref<128x1536xbf16, #tpu.memory_space<vmem>>, vector<128x256xbf16>,
    %c0_84 = arith.constant 0 : index
    %c256_85 = arith.constant 256 : index
    %103 = vector.load %arg14[%c0_84, %c256_85] : memref<128x1536xbf16, #tpu.memory_space<vmem>>, vector<128x256xbf16>
    tpu.vector_store %arg14[%c0_84, %c256_85], %99 {strides = array<i32>} : memref<128x1536xbf16, #tpu.memory_space<vmem>>, vector<128x256xbf16>,
    %c0_86 = arith.constant 0 : index
    %c512_87 = arith.constant 512 : index
    %104 = vector.load %arg14[%c0_86, %c512_87] : memref<128x1536xbf16, #tpu.memory_space<vmem>>, vector<128x256xbf16>
    tpu.vector_store %arg14[%c0_86, %c512_87], %101 {strides = array<i32>} : memref<128x1536xbf16, #tpu.memory_space<vmem>>, vector<128x256xbf16>,
    %c0_88 = arith.constant 0 : index
    %c0_89 = arith.constant 0 : index
    %105 = vector.load %arg14[%c0_88, %c0_89] : memref<128x1536xbf16, #tpu.memory_space<vmem>>, vector<128x768xbf16>
    %cst_90 = arith.constant dense<0.000000e+00> : vector<128x128xf32>
    %106 = tpu.matmul %105, %96, %cst_90 {dimension_numbers = #tpu.dot_dimension_numbers<[1], [0], [0], [1], [0, 0, 1, 1], [], []>} : vector<128x768xbf16>, vector<768x128xbf16>, vector<128x128xf32> -> vector<128x128xf32>
    %107 = vector.broadcast %97 : vector<1x128xf32> to vector<128x128xf32>
    %108 = arith.addf %106, %107 : vector<128x128xf32>
    %cst_91 = arith.constant 0.000000e+00 : f32
    %109 = vector.broadcast %cst_91 : f32 to vector<128x128xf32>
    %110 = arith.maximumf %108, %109 : vector<128x128xf32>
    %111 = arith.truncf %110 : vector<128x128xf32> to vector<128x128xbf16>
    %c3_i32_92 = arith.constant 3 : i32
    %112 = tpu.memref_slice %arg15[%c3_i32_92] : memref<4x!tpu.dma_semaphore, #tpu.memory_space<semaphore_mem>> -> memref<1x!tpu.dma_semaphore, #tpu.memory_space<semaphore_mem>>
    %113 = tpu.memref_squeeze %112 : memref<1x!tpu.dma_semaphore, #tpu.memory_space<semaphore_mem>> -> memref<!tpu.dma_semaphore, #tpu.memory_space<semaphore_mem>>
    tpu.wait_dma2 semaphore(%113 : memref<!tpu.dma_semaphore, #tpu.memory_space<semaphore_mem>>) src(%arg8 : memref<2x128x128xf32, #tpu.memory_space<any>>) dst(%arg13 : memref<2x128x128xf32, #tpu.memory_space<vmem>>)
    %114 = arith.extf %111 : vector<128x128xbf16> to vector<128x128xf32>
    %c0_93 = arith.constant 0 : index
    %c0_94 = arith.constant 0 : index
    %c0_95 = arith.constant 0 : index
    %115 = vector.load %arg13[%c0_93, %c0_94, %c0_95] : memref<2x128x128xf32, #tpu.memory_space<vmem>>, vector<1x128x128xf32>
    %116 = vector.shape_cast %115 : vector<1x128x128xf32> to vector<128x128xf32>
    %117 = arith.mulf %114, %116 : vector<128x128xf32>
    %cst_96 = arith.constant dense<0.000000e+00> : vector<128xf32>
    %118 = vector.multi_reduction <add>, %117, %cst_96 [0] : vector<128x128xf32> to vector<128xf32>
    %119 = vector.shape_cast %118 : vector<128xf32> to vector<1x128xf32>
    %cst_97 = arith.constant dense<0.000000e+00> : vector<1xf32>
    %120 = vector.multi_reduction <add>, %119, %cst_97 [1] : vector<1x128xf32> to vector<1xf32>
    %121 = vector.shape_cast %120 : vector<1xf32> to vector<1x1xf32>
    %c1_98 = arith.constant 1 : index
    %c0_99 = arith.constant 0 : index
    %c0_100 = arith.constant 0 : index
    %122 = vector.load %arg13[%c1_98, %c0_99, %c0_100] : memref<2x128x128xf32, #tpu.memory_space<vmem>>, vector<1x128x128xf32>
    %123 = vector.shape_cast %122 : vector<1x128x128xf32> to vector<128x128xf32>
    %124 = arith.mulf %114, %123 : vector<128x128xf32>
    %cst_101 = arith.constant dense<0.000000e+00> : vector<128xf32>
    %125 = vector.multi_reduction <add>, %124, %cst_101 [0] : vector<128x128xf32> to vector<128xf32>
    %126 = vector.shape_cast %125 : vector<128xf32> to vector<1x128xf32>
    %cst_102 = arith.constant dense<0.000000e+00> : vector<1xf32>
    %127 = vector.multi_reduction <add>, %126, %cst_102 [1] : vector<1x128xf32> to vector<1xf32>
    %128 = vector.shape_cast %127 : vector<1xf32> to vector<1x1xf32>
    %129 = tpu.concatenate %121, %128 in 1 : vector<1x1xf32>, vector<1x1xf32> -> vector<1x2xf32>
    %c0_103 = arith.constant 0 : index
    %c0_104 = arith.constant 0 : index
    %130 = vector.load %arg4[%c0_103, %c0_104] : memref<1x2xf32, #tpu.memory_space<vmem>>, vector<1x2xf32>
    %131 = arith.addf %129, %130 : vector<1x2xf32>
    %cst_105 = arith.constant dense<0xFF800000> : vector<1xf32>
    %132 = vector.multi_reduction <maximumf>, %131, %cst_105 [1] : vector<1x2xf32> to vector<1xf32>
    %133 = vector.shape_cast %132 : vector<1xf32> to vector<1x1xf32>
    %134 = vector.broadcast %133 : vector<1x1xf32> to vector<1x2xf32>
    %135 = arith.subf %131, %134 : vector<1x2xf32>
    %136 = math.exp %135 : vector<1x2xf32>
    %cst_106 = arith.constant dense<0.000000e+00> : vector<1xf32>
    %137 = vector.multi_reduction <add>, %136, %cst_106 [1] : vector<1x2xf32> to vector<1xf32>
    %138 = vector.shape_cast %137 : vector<1xf32> to vector<1x1xf32>
    %139 = vector.broadcast %138 : vector<1x1xf32> to vector<1x2xf32>
    %140 = arith.divf %136, %139 : vector<1x2xf32>
    %c0_107 = arith.constant 0 : index
    %c0_108 = arith.constant 0 : index
    %141 = vector.load %arg9[%c0_107, %c0_108] : memref<1x2xf32, #tpu.memory_space<vmem>>, vector<1x2xf32>
    tpu.vector_store %arg9[%c0_107, %c0_108], %140 {strides = array<i32>} : memref<1x2xf32, #tpu.memory_space<vmem>>, vector<1x2xf32>,
    return
  }
}

</mosaic_0001>

<bundles_post_ra>
// kernel: leukemia_gnn_forward.1
= control target key start
LH: loop header
LB: loop body
LE: loop exit
PB: predicated region body
PF: predicated region fallthrough
CT: control target
= control target key end

     0   :  { %14 = vsyncpa [#allocation9], 0  ;;  %s9751_s0 = inlined_call_operand.hbm [shape: bf16[128,128], index: 0, kind: input, shape index: {}]   ;;  %s9752_s1 = inlined_call_operand.hbm [shape: bf16[128,128], index: 1, kind: input, shape index: {}]   ;;  %s9753_s2 = inlined_call_operand.hbm [shape: bf16[384,512], index: 2, kind: input, shape index: {}]   ;;  %s9754_s3 = inlined_call_operand.hbm [shape: f32[6,512], index: 3, kind: input, shape index: {}]   ;;  %s9755_s4 = inlined_call_operand.vmem [shape: f32[1,2], index: 4, kind: input, shape index: {}]   ;;  %s9756_s5 = inlined_call_operand.hbm [shape: bf16[768,512], index: 5, kind: input, shape index: {}]   ;;  %s9757_s6 = inlined_call_operand.hbm [shape: bf16[1536,256], index: 6, kind: input, shape index: {}]   ;;  %s9758_s7 = inlined_call_operand.hbm [shape: bf16[768,128], index: 7, kind: input, shape index: {}]   ;;  %s9759_s8 = inlined_call_operand.hbm [shape: f32[2,128,128], index: 8, kind: input, shape index: {}]   ;;  %s9760_s9 = inlined_call_operand.hbm [shape: f32[1,2], index: 9, kind: output, shape index: {}]  }
   0x1   :  { %15 = vsyncpa [#allocation12], 0 }
   0x2   :  { %16 = vsyncpa [#allocation15], 0 }
   0x3   :  { %17 = vsyncpa [#allocation10], 0  ;;  %s7986_s30 = smov [#allocation11]   ;;  %s7987_s11 = smov [#allocation8]  }
   0x4   :  { %s35_s10 = sshll.u32 %s7986_s30, 4  ;;  %s23_s12 = sshll.u32 %s7987_s11, 4  ;;  %s36_s10 = int_to_ptr.vmem [resolvable:$true] %s35_s10  ;;  %s8057_s12 = int_to_ptr.vmem [resolvable:$true] %s23_s12 }
   0x5   :  { %s7816_s15 = scalar_lea.hbm %s9752_s1, 1024 }
   0x6   :  { %p7817_p0 = scmp.ne.s32.totalorder %s9752_s1, %s7816_s15  ;;  %p7820_p1 = scmp.lt.u32.totalorder %s7816_s15, %s9752_s1 }
   0x8   :  { %p7822_p2 = pnand %p7820_p1, %p7817_p0 }
   0xa   :  { %7825 = shalt.err (!%p7822_p2)
}
   0xb   :  { %s7826_s20 = scalar_lea.vmem %s36_s10, 1024  ;;  %p7831_p4 = scmp.lt.s32.totalorder %s36_s10, %s36_s10 }
   0xc   :  { %p7827_p3 = scmp.ne.s32.totalorder %s36_s10, %s7826_s20  ;;  %p7832_p5 = scmp.lt.s32.totalorder %s7826_s20, %s7826_s20 }
   0xe   :  { %p7833_p6 = por %p7832_p5, %p7831_p4 }
  0x10   :  { %p7834_p7 = pnand %p7833_p6, %p7827_p3 }
  0x12   :  { %7837 = shalt.err (!%p7834_p7)
}
  0x13   :  { %s7988_s21 = smov 64   ;;  %s7989_s22 = smov 4  }
  0x14   :  { %41 = dma.hbm_to_vmem [thread:$0]  %s9752_s1, 1024, %s36_s10, [#allocation12], %s7988_s21, %s7988_s21, %s7989_s22  }
  0x15   :  { %s7838_s27 = scalar_lea.hbm %s9751_s0, 1024 }
  0x16   :  { %p7839_p8 = scmp.ne.s32.totalorder %s9751_s0, %s7838_s27  ;;  %p7842_p9 = scmp.lt.u32.totalorder %s7838_s27, %s9751_s0 }
  0x18   :  { %p7844_p10 = pnand %p7842_p9, %p7839_p8 }
  0x1a   :  { %7847 = shalt.err (!%p7844_p10)
}
  0x1b   :  { %s7848_s13 = scalar_lea.vmem %s8057_s12, 1024  ;;  %p7853_p12 = scmp.lt.s32.totalorder %s8057_s12, %s8057_s12 }
  0x1c   :  { %p7849_p11 = scmp.ne.s32.totalorder %s8057_s12, %s7848_s13  ;;  %p7854_p13 = scmp.lt.s32.totalorder %s7848_s13, %s7848_s13 }
  0x1e   :  { %p7855_p0 = por %p7854_p13, %p7853_p12 }
  0x20   :  { %p7856_p1 = pnand %p7855_p0, %p7849_p11 }
  0x22   :  { %7859 = shalt.err (!%p7856_p1)
}
  0x23   :  { %29 = dma.hbm_to_vmem [thread:$0]  %s9751_s0, 1024, %s8057_s12, [#allocation9], %s7988_s21, %s7988_s21, %s7989_s22  }
  0x24   :  { %s7990_s14 = smov [#allocation13]   ;;  %s7860_s18 = scalar_lea.hbm %s9753_s2, 12288 }
  0x25   :  { %s47_s15 = sshll.u32 %s7990_s14, 4  ;;  %p7861_p2 = scmp.ne.s32.totalorder %s9753_s2, %s7860_s18  ;;  %s48_s15 = int_to_ptr.vmem [resolvable:$true] %s47_s15 }
  0x26   :  { %p7864_p3 = scmp.lt.u32.totalorder %s7860_s18, %s9753_s2 }
  0x28   :  { %p7866_p4 = pnand %p7864_p3, %p7861_p2 }
  0x2a   :  { %7869 = shalt.err (!%p7866_p4)
}
  0x2b   :  { %s7870_s25 = scalar_lea.vmem %s48_s15, 12288  ;;  %p7875_p6 = scmp.lt.s32.totalorder %s48_s15, %s48_s15 }
  0x2c   :  { %p7871_p5 = scmp.ne.s32.totalorder %s48_s15, %s7870_s25  ;;  %p7876_p7 = scmp.lt.s32.totalorder %s7870_s25, %s7870_s25 }
  0x2e   :  { %p7877_p8 = por %p7876_p7, %p7875_p6 }
  0x30   :  { %p7878_p9 = pnand %p7877_p8, %p7871_p5 }
  0x32   :  { %7881 = shalt.err (!%p7878_p9)
}
  0x33   :  { %s7991_s0 = smov 256   ;;  %s7992_s12 = smov 16  }
  0x34   :  { %53 = dma.hbm_to_vmem [thread:$0]  %s9753_s2, 12288, %s48_s15, [#allocation12], %s7991_s0, %s7991_s0, %s7992_s12  }
  0x35   :  { %s7993_s28 = smov [#allocation14]   ;;  %s7882_s13 = scalar_lea.hbm %s9754_s3, 512 }
  0x36   :  { %s60_s29 = sshll.u32 %s7993_s28, 4  ;;  %p7883_p10 = scmp.ne.s32.totalorder %s9754_s3, %s7882_s13  ;;  %s61_s29 = int_to_ptr.vmem [resolvable:$true] %s60_s29 }
  0x37   :  { %p7886_p11 = scmp.lt.u32.totalorder %s7882_s13, %s9754_s3 }
  0x39   :  { %p7888_p12 = pnand %p7886_p11, %p7883_p10 }
  0x3b   :  { %7891 = shalt.err (!%p7888_p12)
}
  0x3c   :  { %s7892_s17 = scalar_lea.vmem %s61_s29, 512  ;;  %p7897_p0 = scmp.lt.s32.totalorder %s61_s29, %s61_s29 }
  0x3d   :  { %p7893_p13 = scmp.ne.s32.totalorder %s61_s29, %s7892_s17  ;;  %p7898_p1 = scmp.lt.s32.totalorder %s7892_s17, %s7892_s17 }
  0x3f   :  { %p7899_p2 = por %p7898_p1, %p7897_p0 }
  0x41   :  { %p7900_p3 = pnand %p7899_p2, %p7893_p13 }
  0x43   :  { %7903 = shalt.err (!%p7900_p3)
}
  0x44   :  { %63 = dma.hbm_to_vmem [thread:$0]  %s9754_s3, 512, %s61_s29, [#allocation15]  }
  0x45   :  { %7970 = dma.done.wait [#allocation9], 1024  }
  0x46   :  { %7971 = vsyncadd [#allocation9], 4294966272 }
  0x47   :  { %7972 = dma.done.wait [#allocation12], 13312  }
  0x48   :  { %7973 = vsyncadd [#allocation12], 4294953984 }
  0x49   :  { %7974 = dma.done.wait [#allocation15], 512  }
  0x4a   :  { %7975 = vsyncadd [#allocation15], 4294966784  ;;  %s83_s18 = sld [smem:[#allocation0]]   ;;  %s7994_s19 = smov 512  }
  0x4b   :  { %95 = sst [smem:[#allocation18]] %s7994_s19  ;;  %s7995_s20 = smov [#allocation2]  }
  0x4c   :  { %97 = sst [smem:[#allocation18 + $0x1]] %s7994_s19  ;;  %s91_s23 = sshll.u32 %s7995_s20, 4  ;;  %s92_s23 = int_to_ptr.vmem [resolvable:$true] %s91_s23 }
  0x4d   :  { %99 = sst [smem:[#allocation18 + $0x2]] %s7989_s22  ;;  %s7996_s25 = smov 128  }
  0x4e   :  { %101 = sst [smem:[#allocation18 + $0x3]] %s7988_s21  ;;  %s7997_s12 = smov 2  }
  0x4f   :  { %107 = sst [smem:[#allocation18 + $0x6]] %s7991_s0  ;;  %s7998_s26 = smov [#allocation7]  }
  0x50   :  { %109 = sst [smem:[#allocation18 + $0x7]] %s7988_s21  ;;  %s6375_s3 = sshll.u32 %s83_s18, 26 }
  0x51   :  { %111 = sst [smem:[#allocation18 + $0x8]] %s7989_s22  ;;  %s6376_s24 = sadd.s32 134217728, %s6375_s3 }
  0x52   :  { %103 = sst [smem:[#allocation18 + $0x4]] %s7996_s25  ;;  %s7999_s27 = smov [#allocation17]  }
  0x53   :  { %105 = sst [smem:[#allocation18 + $0x5]] %s7997_s12  ;;  %s8000_s30 = smov [#allocation3]  }
  0x54   :  { %113 = dma.general %s9756_s5, 24576, %s92_s23, %s7998_s26, %s7999_s27, [#allocation18], %s6376_s24, 0  }
  0x55   :  { %130 = sst [smem:[#allocation20]] %s7991_s0  ;;  %s126_s11 = sshll.u32 %s8000_s30, 4  ;;  %s127_s11 = int_to_ptr.vmem [resolvable:$true] %s126_s11 }
  0x56   :  { %132 = sst [smem:[#allocation20 + $0x1]] %s7991_s0  ;;  %s8001_s13 = smov [#allocation7 + $0x1]  }
  0x57   :  { %134 = sst [smem:[#allocation20 + $0x2]] %s7997_s12  ;;  %s8002_s1 = smov [#allocation19]  }
  0x58   :  { %136 = sst [smem:[#allocation20 + $0x3]] %s7988_s21  ;;  %s7904_s17 = scalar_lea.hbm %s9758_s7, 6144 }
  0x59   :  { %138 = sst [smem:[#allocation20 + $0x4]] %s7996_s25  ;;  %p7905_p4 = scmp.ne.s32.totalorder %s9758_s7, %s7904_s17 }
  0x5a   :  { %140 = sst [smem:[#allocation20 + $0x5]] %s7997_s12  ;;  %p7908_p5 = scmp.lt.u32.totalorder %s7904_s17, %s9758_s7 }
  0x5b   :  { %142 = sst [smem:[#allocation20 + $0x6]] %s7996_s25 }
  0x5c   :  { %144 = sst [smem:[#allocation20 + $0x7]] %s7988_s21  ;;  %p7910_p6 = pnand %p7908_p5, %p7905_p4 }
  0x5d   :  { %146 = sst [smem:[#allocation20 + $0x8]] %s7989_s22  ;;  %s8005_s22 = smov [#allocation5]  }
  0x5e   :  { %148 = dma.general %s9757_s6, 24576, %s127_s11, %s8001_s13, %s8002_s1, [#allocation20], %s6376_s24, 0  }
  0x5f   :  { %v8136_v0 = vld [vmem:[#allocation11] sm:$0xff]   ;;  %v8138_v1 = vld [vmem:[#allocation11 + $0x8] sm:$0xff]   ;;  %v8143_v2 = vld [vmem:[#allocation11 + $0x10] sm:$0xff]   ;;  %s8004_s6 = smov [#allocation4]   ;;  %s169_s0 = sshll.u32 %s8005_s22, 4  ;;  %s170_s0 = int_to_ptr.vmem [resolvable:$true] %s169_s0 }
  0x60   :  { %6943 = vmatprep.subr.bf16.mxu0 %v8136_v0  ;;  %v8146_v3 = vld [vmem:[#allocation11 + $0x18] sm:$0xff]   ;;  %v8149_v4 = vld [vmem:[#allocation8] sm:$0xff]   ;;  %v8159_v6 = vld [vmem:[#allocation11 + $0x28] sm:$0xff]   ;;  %s157_s21 = sshll.u32 %s8004_s6, 4  ;;  %s158_s21 = int_to_ptr.vmem [resolvable:$true] %s157_s21 }
  0x61   :  { %6944 = vmatpush3.bf16.msra.mxu0 %v8136_v0  ;;  %9812 = vst [vmem:[#allocation35_spill] sm:$0xff] %v8149_v4  ;;  %6959 = vmatprep.mubr.bf16.mxu0 %v8149_v4  ;;  %v8155_v5 = vld [vmem:[#allocation11 + $0x20] sm:$0xff]   ;;  %v8163_v7 = vld [vmem:[#allocation11 + $0x30] sm:$0xff]   ;;  %v8167_v8 = vld [vmem:[#allocation11 + $0x38] sm:$0xff]  }
  0x62   :  { %6945 = vmatprep.subr.bf16.mxu0 %v8138_v1  ;;  %6991 = vmatprep.mubr.bf16.mxu1 %v8149_v4  ;;  %v8171_v9 = vld [vmem:[#allocation8 + $0x8] sm:$0xff]   ;;  %v7684_v10 = vld [vmem:[#allocation13 + $0x100] ss:$16 sps:$4 sm:$0xff]   ;;  %v8178_v16 = vld [vmem:[#allocation8 + $0x18] sm:$0xff]  }
  0x63   :  { %9813 = vst [vmem:[#allocation36_spill] sm:$0xff] %v8171_v9  ;;  %v8173_v11 = vld [vmem:[#allocation8 + $0x10] sm:$0xff]   ;;  %9815 = vst [vmem:[#allocation38_spill] sm:$0xff] %v8178_v16  ;;  %v8180_v17 = vld [vmem:[#allocation8 + $0x20] sm:$0xff]  }
  0x64   :  { %9814 = vst [vmem:[#allocation37_spill] sm:$0xff] %v8173_v11  ;;  %v7685_v12 = vld [vmem:[#allocation13] ss:$16 sps:$4 sm:$0xff]   ;;  %9816 = vst [vmem:[#allocation39_spill] sm:$0xff] %v8180_v17  ;;  %v8184_v22 = vld [vmem:[#allocation8 + $0x28] sm:$0xff]  }
  0x65   :  { %6946 = vmatpush3.bf16.msra.mxu0 %v8138_v1  ;;  %v7686_v13 = vld [vmem:[#allocation13 + $0x120] ss:$16 sps:$4 sm:$0xff]   ;;  %9817 = vst [vmem:[#allocation40_spill] sm:$0xff] %v8184_v22  ;;  %v8190_v28 = vld [vmem:[#allocation8 + $0x38] sm:$0xff]  }
  0x66   :  { %6947 = vmatprep.subr.bf16.mxu0 %v8143_v2  ;;  %v7687_v14 = vld [vmem:[#allocation13 + $0x20] ss:$16 sps:$4 sm:$0xff]   ;;  %9819 = vst [vmem:[#allocation42_spill] sm:$0xff] %v8190_v28 }
  0x67   :  { %v7688_v15 = vld [vmem:[#allocation13 + $0x140] ss:$16 sps:$4 sm:$0xff]  }
  0x68   :  { %v7689_v18 = vld [vmem:[#allocation13 + $0x40] ss:$16 sps:$4 sm:$0xff]  }
  0x69   :  { %6948 = vmatpush3.bf16.msra.mxu0 %v8143_v2  ;;  %v7690_v19 = vld [vmem:[#allocation13 + $0x160] ss:$16 sps:$4 sm:$0xff]  }
  0x6a   :  { %6949 = vmatprep.subr.bf16.mxu0 %v8146_v3  ;;  %v7691_v20 = vld [vmem:[#allocation13 + $0x60] ss:$16 sps:$4 sm:$0xff]  }
  0x6b   :  { %v7692_v21 = vld [vmem:[#allocation13 + $0x180] ss:$16 sps:$4 sm:$0xff]  }
  0x6c   :  { %v8186_v23 = vld [vmem:[#allocation8 + $0x30] sm:$0xff]  }
  0x6d   :  { %6950 = vmatpush3.bf16.msra.mxu0 %v8146_v3  ;;  %9818 = vst [vmem:[#allocation41_spill] sm:$0xff] %v8186_v23  ;;  %v7693_v24 = vld [vmem:[#allocation13 + $0x80] ss:$16 sps:$4 sm:$0xff]  }
  0x6e   :  { %6951 = vmatprep.subr.bf16.mxu0 %v8155_v5  ;;  %v7694_v25 = vld [vmem:[#allocation13 + $0x1a0] ss:$16 sps:$4 sm:$0xff]  }
  0x6f   :  { %v7695_v26 = vld [vmem:[#allocation13 + $0xa0] ss:$16 sps:$4 sm:$0xff]  }
  0x70   :  { %v7696_v27 = vld [vmem:[#allocation13 + $0x1c0] ss:$16 sps:$4 sm:$0xff]  }
  0x71   :  { %6952 = vmatpush3.bf16.msra.mxu0 %v8155_v5  ;;  %v7697_v29 = vld [vmem:[#allocation13 + $0xc0] ss:$16 sps:$4 sm:$0xff]  }
  0x72   :  { %6953 = vmatprep.subr.bf16.mxu0 %v8159_v6  ;;  %v7698_v30 = vld [vmem:[#allocation13 + $0x1e0] ss:$16 sps:$4 sm:$0xff]  }
  0x73   :  { %v7699_v31 = vld [vmem:[#allocation13 + $0xe0] ss:$16 sps:$4 sm:$0xff]  }
  0x74   :  { %v7700_v56 = vld [vmem:[#allocation13 + $0x200] ss:$16 sps:$4 sm:$0xff]  }
  0x75   :  { %6954 = vmatpush3.bf16.msra.mxu0 %v8159_v6  ;;  %v7701_v57 = vld [vmem:[#allocation13 + $0x220] ss:$16 sps:$4 sm:$0xff]  }
  0x76   :  { %6955 = vmatprep.subr.bf16.mxu0 %v8163_v7  ;;  %v7702_v58 = vld [vmem:[#allocation13 + $0x240] ss:$16 sps:$4 sm:$0xff]  }
  0x77   :  { %v7703_v59 = vld [vmem:[#allocation13 + $0x260] ss:$16 sps:$4 sm:$0xff]  }
  0x78   :  { %v7704_v60 = vld [vmem:[#allocation13 + $0x280] ss:$16 sps:$4 sm:$0xff]  }
  0x79   :  { %6956 = vmatpush3.bf16.msra.mxu0 %v8163_v7  ;;  %v7705_v61 = vld [vmem:[#allocation13 + $0x2a0] ss:$16 sps:$4 sm:$0xff]  }
  0x7a   :  { %6957 = vmatprep.subr.bf16.mxu0 %v8167_v8  ;;  %v7706_v62 = vld [vmem:[#allocation13 + $0x2c0] ss:$16 sps:$4 sm:$0xff]  }
  0x7b   :  { %v7707_v63 = vld [vmem:[#allocation13 + $0x2e0] ss:$16 sps:$4 sm:$0xff]  }
  0x7d   :  { %6958 = vmatpush3.bf16.msra.mxu0 %v8167_v8 }
  0x7e   :  { %6527 = vmatprep.subr.bf16.mxu0 %v7684_v10 }
  0x80   :  { %6960 = vmatmul.mubr.bf16.vlgmr.msra.gmra.mrb[0].mxu0 %v8171_v9 }
  0x81   :  { %6963 = vmatprep.mubr.bf16.mxu0 %v8173_v11  ;;  %6528 = vmatpush3.bf16.msra.mxu0 %v7685_v12 }
  0x82   :  { %6529 = vmatprep.subr.bf16.mxu0 %v7686_v13 }
  0x85   :  { %6530 = vmatpush3.bf16.msra.mxu0 %v7687_v14 }
  0x86   :  { %6531 = vmatprep.subr.bf16.mxu0 %v7688_v15 }
  0x88   :  { %6964 = vmatmul.mubr.bf16.gmra.mrb[4].mxu0 %v8178_v16 }
  0x89   :  { %6967 = vmatprep.mubr.bf16.mxu0 %v8180_v17  ;;  %6532 = vmatpush3.bf16.msra.mxu0 %v7689_v18 }
  0x8a   :  { %6533 = vmatprep.subr.bf16.mxu0 %v7690_v19 }
  0x8d   :  { %6534 = vmatpush3.bf16.msra.mxu0 %v7691_v20 }
  0x8e   :  { %6535 = vmatprep.subr.bf16.mxu0 %v7692_v21 }
  0x90   :  { %6968 = vmatmul.mubr.bf16.gmra.mrb[8].mxu0 %v8184_v22 }
  0x91   :  { %6971 = vmatprep.mubr.bf16.mxu0 %v8186_v23  ;;  %6536 = vmatpush3.bf16.msra.mxu0 %v7693_v24 }
  0x92   :  { %6537 = vmatprep.subr.bf16.mxu0 %v7694_v25 }
  0x95   :  { %6538 = vmatpush3.bf16.msra.mxu0 %v7695_v26 }
  0x96   :  { %6539 = vmatprep.subr.bf16.mxu0 %v7696_v27 }
  0x98   :  { %6972 = vmatmul.mubr.bf16.gmra.mrb[12].mxu0 %v8190_v28 }
  0x99   :  { %6540 = vmatpush3.bf16.msra.mxu0 %v7697_v29 }
  0x9a   :  { %6541 = vmatprep.subr.bf16.mxu0 %v7698_v30 }
  0x9d   :  { %6542 = vmatpush3.bf16.msra.mxu0 %v7699_v31 }
 0x153   :  { %v6961_v32 = vpop.f32.mrb[0].mxu0 }
 0x154   :  { %v384_v33 = vpop.f32.mrb[1].mxu0 }
 0x155   :  { %v6962_v34 = vpop.f32.mrb[2].mxu0 }
 0x156   :  { %v448_v35 = vpack.c.bf16 %v6962_v34, %v6961_v32  ;;  %v387_v36 = vpop.f32.mrb[3].mxu0 }
 0x157   :  { %v447_v37 = vpack.c.bf16 %v387_v36, %v384_v33 }
 0x159   :  { %6975 = vmatprep.subr.bf16.mxu1 %v447_v37  ;;  %784 = vmatprep.mubr.bf16.mxu0 %v447_v37 }
 0x15a   :  { %6976 = vmatpush3.bf16.msra.mxu1 %v447_v37  ;;  %785 = vmatmul.mubr.bf16.vlgmr.msra.gmra.mrb[16].mxu0 %v8136_v0 }
 0x15b   :  { %v6965_v38 = vpop.f32.mrb[4].mxu0  ;;  %6977 = vmatprep.subr.bf16.mxu1 %v448_v35  ;;  %792 = vmatprep.mubr.bf16.mxu0 %v448_v35 }
 0x15c   :  { %v400_v39 = vpop.f32.mrb[5].mxu0 }
 0x15d   :  { %v6966_v40 = vpop.f32.mrb[6].mxu0 }
 0x15e   :  { %v450_v41 = vpack.c.bf16 %v6966_v40, %v6965_v38  ;;  %v403_v42 = vpop.f32.mrb[7].mxu0  ;;  %6978 = vmatpush3.bf16.msra.mxu1 %v448_v35 }
 0x15f   :  { %v449_v43 = vpack.c.bf16 %v403_v42, %v400_v39 }
 0x161   :  { %6979 = vmatprep.subr.bf16.mxu1 %v449_v43 }
 0x162   :  { %6980 = vmatpush3.bf16.msra.mxu1 %v449_v43  ;;  %793 = vmatmul.mubr.bf16.gmra.mrb[20].mxu0 %v8138_v1 }
 0x163   :  { %v6969_v44 = vpop.f32.mrb[8].mxu0  ;;  %6981 = vmatprep.subr.bf16.mxu1 %v450_v41  ;;  %800 = vmatprep.mubr.bf16.mxu0 %v449_v43 }
 0x164   :  { %v416_v45 = vpop.f32.mrb[9].mxu0 }
 0x165   :  { %v6970_v46 = vpop.f32.mrb[10].mxu0 }
 0x166   :  { %v452_v47 = vpack.c.bf16 %v6970_v46, %v6969_v44  ;;  %v419_v48 = vpop.f32.mrb[11].mxu0  ;;  %6982 = vmatpush3.bf16.msra.mxu1 %v450_v41 }
 0x167   :  { %v451_v49 = vpack.c.bf16 %v419_v48, %v416_v45 }
 0x169   :  { %6983 = vmatprep.subr.bf16.mxu1 %v451_v49 }
 0x16a   :  { %6984 = vmatpush3.bf16.msra.mxu1 %v451_v49  ;;  %801 = vmatmul.mubr.bf16.gmra.mrb[24].mxu0 %v8143_v2 }
 0x16b   :  { %v6973_v50 = vpop.f32.mrb[12].mxu0  ;;  %6985 = vmatprep.subr.bf16.mxu1 %v452_v47  ;;  %808 = vmatprep.mubr.bf16.mxu0 %v450_v41 }
 0x16c   :  { %v432_v51 = vpop.f32.mrb[13].mxu0 }
 0x16d   :  { %v6974_v52 = vpop.f32.mrb[14].mxu0 }
 0x16e   :  { %v454_v53 = vpack.c.bf16 %v6974_v52, %v6973_v50  ;;  %v435_v54 = vpop.f32.mrb[15].mxu0  ;;  %6986 = vmatpush3.bf16.msra.mxu1 %v452_v47 }
 0x16f   :  { %v453_v55 = vpack.c.bf16 %v435_v54, %v432_v51 }
 0x171   :  { %6987 = vmatprep.subr.bf16.mxu1 %v453_v55 }
 0x172   :  { %6988 = vmatpush3.bf16.msra.mxu1 %v453_v55  ;;  %809 = vmatmul.mubr.bf16.gmra.mrb[28].mxu0 %v8146_v3 }
 0x173   :  { %6989 = vmatprep.subr.bf16.mxu1 %v454_v53  ;;  %816 = vmatprep.mubr.bf16.mxu0 %v451_v49 }
 0x176   :  { %6990 = vmatpush3.bf16.msra.mxu1 %v454_v53 }
 0x177   :  { %7007 = vmatprep.subr.bf16.mxu1 %v7700_v56 }
 0x179   :  { %6992 = vmatmul.mubr.bf16.vlgmr.msra.gmra.mrb[0].mxu1 %v8171_v9 }
 0x17a   :  { %817 = vmatmul.mubr.bf16.gmra.mrb[32].mxu0 %v8155_v5  ;;  %6995 = vmatprep.mubr.bf16.mxu1 %v8173_v11 }
 0x17b   :  { %824 = vmatprep.mubr.bf16.mxu0 %v452_v47  ;;  %7008 = vmatpush3.bf16.msra.mxu1 %v7700_v56 }
 0x17c   :  { %7009 = vmatprep.subr.bf16.mxu1 %v7701_v57 }
 0x17f   :  { %7010 = vmatpush3.bf16.msra.mxu1 %v7701_v57 }
 0x180   :  { %7011 = vmatprep.subr.bf16.mxu1 %v7702_v58 }
 0x181   :  { %6996 = vmatmul.mubr.bf16.gmra.mrb[4].mxu1 %v8178_v16 }
 0x182   :  { %825 = vmatmul.mubr.bf16.gmra.mrb[36].mxu0 %v8159_v6  ;;  %6999 = vmatprep.mubr.bf16.mxu1 %v8180_v17 }
 0x183   :  { %832 = vmatprep.mubr.bf16.mxu0 %v453_v55  ;;  %7012 = vmatpush3.bf16.msra.mxu1 %v7702_v58 }
 0x184   :  { %7013 = vmatprep.subr.bf16.mxu1 %v7703_v59 }
 0x187   :  { %7014 = vmatpush3.bf16.msra.mxu1 %v7703_v59 }
 0x188   :  { %7015 = vmatprep.subr.bf16.mxu1 %v7704_v60 }
 0x189   :  { %7000 = vmatmul.mubr.bf16.gmra.mrb[8].mxu1 %v8184_v22 }
 0x18a   :  { %833 = vmatmul.mubr.bf16.gmra.mrb[40].mxu0 %v8163_v7  ;;  %7003 = vmatprep.mubr.bf16.mxu1 %v8186_v23 }
 0x18b   :  { %840 = vmatprep.mubr.bf16.mxu0 %v454_v53  ;;  %7016 = vmatpush3.bf16.msra.mxu1 %v7704_v60 }
 0x18c   :  { %7017 = vmatprep.subr.bf16.mxu1 %v7705_v61 }
 0x18f   :  { %7018 = vmatpush3.bf16.msra.mxu1 %v7705_v61 }
 0x190   :  { %7019 = vmatprep.subr.bf16.mxu1 %v7706_v62 }
 0x191   :  { %7004 = vmatmul.mubr.bf16.gmra.mrb[12].mxu1 %v8190_v28 }
 0x192   :  { %841 = vmatmul.mubr.bf16.gmra.mrb[44].mxu0 %v8167_v8 }
 0x193   :  { %7020 = vmatpush3.bf16.msra.mxu1 %v7706_v62  ;;  %7087 = vmatprep.mubr.bf16.mxu0 %v8149_v4 }
 0x194   :  { %7021 = vmatprep.subr.bf16.mxu1 %v7707_v63 }
 0x197   :  { %7022 = vmatpush3.bf16.msra.mxu1 %v7707_v63 }
 0x22d   :  { %v6543_v0 = vpop.f32.mrb[16].mxu0 }
 0x22e   :  { %v6544_v1 = vpop.f32.mrb[17].mxu0 }
 0x22f   :  { %v8209_v2 = vadd.f32 %v6544_v1, %v6543_v0  ;;  %v6546_v3 = vpop.f32.mrb[18].mxu0 }
 0x230   :  { %v6547_v5 = vpop.f32.mrb[19].mxu0 }
 0x231   :  { %v8211_v6 = vadd.f32 %v6547_v5, %v6546_v3 }
 0x235   :  { %v6549_v7 = vpop.f32.mrb[20].mxu0 }
 0x236   :  { %v6550_v10 = vpop.f32.mrb[21].mxu0 }
 0x237   :  { %v8213_v12 = vadd.f32 %v6550_v10, %v6549_v7  ;;  %v6552_v13 = vpop.f32.mrb[22].mxu0 }
 0x238   :  { %v6553_v8 = vpop.f32.mrb[23].mxu0 }
 0x239   :  { %v8215_v14 = vadd.f32 %v6553_v8, %v6552_v13 }
 0x23d   :  { %v6555_v15 = vpop.f32.mrb[24].mxu0 }
 0x23e   :  { %v6556_v18 = vpop.f32.mrb[25].mxu0 }
 0x23f   :  { %v8217_v19 = vadd.f32 %v6556_v18, %v6555_v15  ;;  %v6558_v20 = vpop.f32.mrb[26].mxu0 }
 0x240   :  { %v6559_v21 = vpop.f32.mrb[27].mxu0 }
 0x241   :  { %v8219_v24 = vadd.f32 %v6559_v21, %v6558_v20 }
 0x245   :  { %v6561_v25 = vpop.f32.mrb[28].mxu0 }
 0x246   :  { %v6562_v26 = vpop.f32.mrb[29].mxu0 }
 0x247   :  { %v8221_v27 = vadd.f32 %v6562_v26, %v6561_v25  ;;  %v6564_v29 = vpop.f32.mrb[30].mxu0 }
 0x248   :  { %v6565_v30 = vpop.f32.mrb[31].mxu0 }
 0x249   :  { %v8223_v31 = vadd.f32 %v6565_v30, %v6564_v29 }
 0x24c   :  { %v6993_v32 = vpop.f32.mrb[0].mxu1 }
 0x24d   :  { %v489_v33 = vpop.f32.mrb[1].mxu1  ;;  %v6567_v34 = vpop.f32.mrb[32].mxu0 }
 0x24e   :  { %v6994_v35 = vpop.f32.mrb[2].mxu1  ;;  %v6568_v36 = vpop.f32.mrb[33].mxu0 }
 0x24f   :  { %v553_v37 = vpack.c.bf16 %v6994_v35, %v6993_v32  ;;  %v492_v38 = vpop.f32.mrb[3].mxu1  ;;  %v8225_v39 = vadd.f32 %v6568_v36, %v6567_v34  ;;  %v6570_v40 = vpop.f32.mrb[34].mxu0  ;;  %v8236_v32 = vld [vmem:[#allocation14] ss:$0 sm:$0xff] }
 0x250   :  { %v552_v41 = vpack.c.bf16 %v492_v38, %v489_v33  ;;  %v6571_v42 = vpop.f32.mrb[35].mxu0  ;;  %v795_v33 = vadd.f32 %v8213_v12, %v8236_v32  ;;  %v787_v35 = vadd.f32 %v8209_v2, %v8236_v32  ;;  %v798_v38 = vadd.f32 %v8215_v14, %v8236_v32 }
 0x251   :  { %v8227_v43 = vadd.f32 %v6571_v42, %v6570_v40  ;;  %v790_v42 = vadd.f32 %v8211_v6, %v8236_v32  ;;  %v811_v2 = vadd.f32 %v8221_v27, %v8236_v32 }
 0x252   :  { %7023 = vmatprep.mubr.bf16.mxu1 %v552_v41 }
 0x253   :  { %7024 = vmatmul.mubr.bf16.vlgmr.msra.gmra.mrb[16].mxu1 %v553_v37 }
 0x254   :  { %v6997_v44 = vpop.f32.mrb[4].mxu1 }
 0x255   :  { %v505_v45 = vpop.f32.mrb[5].mxu1  ;;  %v6573_v62 = vpop.f32.mrb[36].mxu0 }
 0x256   :  { %v6998_v46 = vpop.f32.mrb[6].mxu1  ;;  %v6574_v63 = vpop.f32.mrb[37].mxu0 }
 0x257   :  { %v555_v47 = vpack.c.bf16 %v6998_v46, %v6997_v44  ;;  %v508_v48 = vpop.f32.mrb[7].mxu1  ;;  %v6576_v0 = vpop.f32.mrb[38].mxu0  ;;  %v6575_v1 = vadd.f32 %v6574_v63, %v6573_v62 }
 0x258   :  { %v554_v49 = vpack.c.bf16 %v508_v48, %v505_v45  ;;  %v6577_v3 = vpop.f32.mrb[39].mxu0 }
 0x259   :  { %v6578_v5 = vadd.f32 %v6577_v3, %v6576_v0  ;;  %v819_v3 = vadd.f32 %v8225_v39, %v8236_v32 }
 0x25a   :  { %7027 = vmatprep.mubr.bf16.mxu1 %v554_v49 }
 0x25b   :  { %7028 = vmatmul.mubr.bf16.gmra.mrb[20].mxu1 %v555_v47 }
 0x25c   :  { %v7001_v50 = vpop.f32.mrb[8].mxu1 }
 0x25d   :  { %v521_v51 = vpop.f32.mrb[9].mxu1  ;;  %v6579_v7 = vpop.f32.mrb[40].mxu0 }
 0x25e   :  { %v7002_v52 = vpop.f32.mrb[10].mxu1  ;;  %v6580_v10 = vpop.f32.mrb[41].mxu0 }
 0x25f   :  { %v557_v53 = vpack.c.bf16 %v7002_v52, %v7001_v50  ;;  %v524_v54 = vpop.f32.mrb[11].mxu1  ;;  %v6582_v13 = vpop.f32.mrb[42].mxu0  ;;  %v8230_v8 = vadd.f32 %v6580_v10, %v6579_v7  ;;  %v803_v52 = vadd.f32 %v8217_v19, %v8236_v32 }
 0x260   :  { %v556_v55 = vpack.c.bf16 %v524_v54, %v521_v51  ;;  %v6583_v15 = vpop.f32.mrb[43].mxu0  ;;  %v814_v54 = vadd.f32 %v8223_v31, %v8236_v32  ;;  %v827_v31 = vadd.f32 %v6575_v1, %v8236_v32 }
 0x261   :  { %v8232_v18 = vadd.f32 %v6583_v15, %v6582_v13  ;;  %v830_v13 = vadd.f32 %v6578_v5, %v8236_v32 }
 0x262   :  { %7031 = vmatprep.mubr.bf16.mxu1 %v556_v55 }
 0x263   :  { %7032 = vmatmul.mubr.bf16.gmra.mrb[24].mxu1 %v557_v53 }
 0x264   :  { %v7005_v56 = vpop.f32.mrb[12].mxu1 }
 0x265   :  { %v537_v57 = vpop.f32.mrb[13].mxu1  ;;  %v6585_v20 = vpop.f32.mrb[44].mxu0 }
 0x266   :  { %v7006_v58 = vpop.f32.mrb[14].mxu1  ;;  %v6586_v21 = vpop.f32.mrb[45].mxu0 }
 0x267   :  { %v559_v59 = vpack.c.bf16 %v7006_v58, %v7005_v56  ;;  %v540_v60 = vpop.f32.mrb[15].mxu1  ;;  %v6587_v25 = vadd.f32 %v6586_v21, %v6585_v20  ;;  %v6588_v26 = vpop.f32.mrb[46].mxu0  ;;  %v822_v21 = vadd.f32 %v8227_v43, %v8236_v32 }
 0x268   :  { %v558_v61 = vpack.c.bf16 %v540_v60, %v537_v57  ;;  %v6589_v29 = vpop.f32.mrb[47].mxu0  ;;  %v806_v57 = vadd.f32 %v8219_v24, %v8236_v32 }
 0x269   :  { %v8234_v30 = vadd.f32 %v6589_v29, %v6588_v26 }
 0x26a   :  { %7035 = vmatprep.mubr.bf16.mxu1 %v558_v61 }
 0x26b   :  { %7036 = vmatmul.mubr.bf16.gmra.mrb[28].mxu1 %v559_v59  ;;  %v846_v43 = vadd.f32 %v8234_v30, %v8236_v32 }
 0x26c   :  { %7055 = vmatprep.mubr.bf16.mxu1 %v8149_v4 }
 0x326   :  { %v7025_v34 = vpop.f32.mrb[16].mxu1 }
 0x327   :  { %v892_v36 = vadd.f32 %v7025_v34, %v795_v33  ;;  %v883_v37 = vpop.f32.mrb[17].mxu1  ;;  %v843_v34 = vadd.f32 %v6587_v25, %v8236_v32  ;;  %v838_v25 = vadd.f32 %v8232_v18, %v8236_v32  ;;  %v7708_v18 = vld [vmem:[#allocation13 + $0x104] ss:$16 sps:$4 sm:$0xff]  }
 0x328   :  { %v884_v40 = vadd.f32 %v883_v37, %v787_v35  ;;  %v7026_v41 = vpop.f32.mrb[18].mxu1 }
 0x329   :  { %v895_v44 = vadd.f32 %v7026_v41, %v798_v38  ;;  %v886_v45 = vpop.f32.mrb[19].mxu1  ;;  %v948_v47 = vmax.f32 %v892_v36, 0.0 }
 0x32a   :  { %v887_v46 = vadd.f32 %v886_v45, %v790_v42  ;;  %v946_v12 = vmax.f32 %v884_v40, 0.0  ;;  %v835_v40 = vadd.f32 %v8230_v8, %v8236_v32  ;;  %v7709_v32 = vld [vmem:[#allocation13 + $0x4] ss:$16 sps:$4 sm:$0xff]  }
 0x32b   :  { %v949_v48 = vmax.f32 %v895_v44, 0.0 }
 0x32c   :  { %v947_v49 = vmax.f32 %v887_v46, 0.0 }
 0x32d   :  { %v8246_v50 = vpack.c.bf16 %v949_v48, %v948_v47 }
 0x32e   :  { %v8250_v51 = vpack.c.bf16 %v947_v49, %v946_v12  ;;  %v7029_v14 = vpop.f32.mrb[20].mxu1 }
 0x32f   :  { %v908_v53 = vadd.f32 %v7029_v14, %v811_v2  ;;  %v899_v6 = vpop.f32.mrb[21].mxu1 }
 0x330   :  { %v900_v55 = vadd.f32 %v899_v6, %v803_v52  ;;  %v7030_v56 = vpop.f32.mrb[22].mxu1  ;;  %7039 = vmatprep.subr.bf16.mxu1 %v8250_v51  ;;  %v7710_v52 = vld [vmem:[#allocation13 + $0x124] ss:$16 sps:$4 sm:$0xff]  }
 0x331   :  { %v911_v58 = vadd.f32 %v7030_v56, %v814_v54  ;;  %v902_v27 = vpop.f32.mrb[23].mxu1  ;;  %7040 = vmatpush3.bf16.msra.mxu1 %v8250_v51  ;;  %v952_v19 = vmax.f32 %v908_v53, 0.0  ;;  %v7711_v53 = vld [vmem:[#allocation13 + $0x24] ss:$16 sps:$4 sm:$0xff]  }
 0x332   :  { %v903_v59 = vadd.f32 %v902_v27, %v806_v57  ;;  %7041 = vmatprep.subr.bf16.mxu1 %v8246_v50  ;;  %v950_v61 = vmax.f32 %v900_v55, 0.0  ;;  %v7712_v6 = vld [vmem:[#allocation13 + $0x144] ss:$16 sps:$4 sm:$0xff]  }
 0x333   :  { %v953_v60 = vmax.f32 %v911_v58, 0.0  ;;  %v7713_v54 = vld [vmem:[#allocation13 + $0x44] ss:$16 sps:$4 sm:$0xff]  }
 0x334   :  { %v951_v62 = vmax.f32 %v903_v59, 0.0  ;;  %v7714_v55 = vld [vmem:[#allocation13 + $0x164] ss:$16 sps:$4 sm:$0xff]  }
 0x335   :  { %v8261_v63 = vpack.c.bf16 %v953_v60, %v952_v19  ;;  %7042 = vmatpush3.bf16.msra.mxu1 %v8246_v50  ;;  %v7715_v56 = vld [vmem:[#allocation13 + $0x64] ss:$16 sps:$4 sm:$0xff]  }
 0x336   :  { %v8265_v0 = vpack.c.bf16 %v951_v62, %v950_v61  ;;  %v7033_v24 = vpop.f32.mrb[24].mxu1  ;;  %v7716_v57 = vld [vmem:[#allocation13 + $0x184] ss:$16 sps:$4 sm:$0xff]  }
 0x337   :  { %v924_v7 = vadd.f32 %v7033_v24, %v827_v31  ;;  %v915_v10 = vpop.f32.mrb[25].mxu1  ;;  %v7717_v58 = vld [vmem:[#allocation13 + $0x84] ss:$16 sps:$4 sm:$0xff]  }
 0x338   :  { %v916_v15 = vadd.f32 %v915_v10, %v819_v3  ;;  %v7034_v20 = vpop.f32.mrb[26].mxu1  ;;  %7043 = vmatprep.subr.bf16.mxu1 %v8265_v0  ;;  %v7718_v27 = vld [vmem:[#allocation13 + $0x1a4] ss:$16 sps:$4 sm:$0xff]  }
 0x339   :  { %v927_v26 = vadd.f32 %v7034_v20, %v830_v13  ;;  %v918_v29 = vpop.f32.mrb[27].mxu1  ;;  %7044 = vmatpush3.bf16.msra.mxu1 %v8265_v0  ;;  %v956_v33 = vmax.f32 %v924_v7, 0.0  ;;  %v7719_v59 = vld [vmem:[#allocation13 + $0xa4] ss:$16 sps:$4 sm:$0xff]  }
 0x33a   :  { %v919_v1 = vadd.f32 %v918_v29, %v822_v21  ;;  %7045 = vmatprep.subr.bf16.mxu1 %v8261_v63  ;;  %v954_v35 = vmax.f32 %v916_v15, 0.0  ;;  %v7720_v19 = vld [vmem:[#allocation13 + $0x1c4] ss:$16 sps:$4 sm:$0xff]  }
 0x33b   :  { %v957_v39 = vmax.f32 %v927_v26, 0.0  ;;  %v7721_v60 = vld [vmem:[#allocation13 + $0xc4] ss:$16 sps:$4 sm:$0xff]  }
 0x33c   :  { %v955_v5 = vmax.f32 %v919_v1, 0.0  ;;  %v7722_v61 = vld [vmem:[#allocation13 + $0x1e4] ss:$16 sps:$4 sm:$0xff]  }
 0x33d   :  { %v8276_v36 = vpack.c.bf16 %v957_v39, %v956_v33  ;;  %7046 = vmatpush3.bf16.msra.mxu1 %v8261_v63  ;;  %v7723_v62 = vld [vmem:[#allocation13 + $0xe4] ss:$16 sps:$4 sm:$0xff]  }
 0x33e   :  { %v8281_v37 = vpack.c.bf16 %v955_v5, %v954_v35  ;;  %v7037_v38 = vpop.f32.mrb[28].mxu1 }
 0x33f   :  { %v940_v41 = vadd.f32 %v7037_v38, %v843_v34  ;;  %v931_v42 = vpop.f32.mrb[29].mxu1 }
 0x340   :  { %v932_v44 = vadd.f32 %v931_v42, %v835_v40  ;;  %v7038_v45 = vpop.f32.mrb[30].mxu1  ;;  %7047 = vmatprep.subr.bf16.mxu1 %v8281_v37 }
 0x341   :  { %v943_v46 = vadd.f32 %v7038_v45, %v846_v43  ;;  %v934_v47 = vpop.f32.mrb[31].mxu1  ;;  %7048 = vmatpush3.bf16.msra.mxu1 %v8281_v37  ;;  %v960_v48 = vmax.f32 %v940_v41, 0.0  ;;  %v7727_v45 = vld [vmem:[#allocation13 + $0x264] ss:$16 sps:$4 sm:$0xff]  }
 0x342   :  { %v935_v30 = vadd.f32 %v934_v47, %v838_v25  ;;  %7049 = vmatprep.subr.bf16.mxu1 %v8276_v36  ;;  %v958_v49 = vmax.f32 %v932_v44, 0.0  ;;  %v8310_v44 = vld [vmem:[#allocation8 + $0x8] sm:$0xff]   ;;  %v7728_v25 = vld [vmem:[#allocation13 + $0x284] ss:$16 sps:$4 sm:$0xff]  }
 0x343   :  { %v961_v12 = vmax.f32 %v943_v46, 0.0  ;;  %v7729_v46 = vld [vmem:[#allocation13 + $0x2a4] ss:$16 sps:$4 sm:$0xff]  }
 0x344   :  { %v959_v8 = vmax.f32 %v935_v30, 0.0  ;;  %v7730_v47 = vld [vmem:[#allocation13 + $0x2c4] ss:$16 sps:$4 sm:$0xff]  }
 0x345   :  { %v8290_v2 = vpack.c.bf16 %v961_v12, %v960_v48  ;;  %7050 = vmatpush3.bf16.msra.mxu1 %v8276_v36  ;;  %v7731_v30 = vld [vmem:[#allocation13 + $0x2e4] ss:$16 sps:$4 sm:$0xff]  }
 0x346   :  { %v8293_v14 = vpack.c.bf16 %v959_v8, %v958_v49 }
 0x348   :  { %7051 = vmatprep.subr.bf16.mxu1 %v8293_v14 }
 0x349   :  { %7052 = vmatpush3.bf16.msra.mxu1 %v8293_v14 }
 0x34a   :  { %7053 = vmatprep.subr.bf16.mxu1 %v8290_v2 }
 0x34d   :  { %7054 = vmatpush3.bf16.msra.mxu1 %v8290_v2 }
 0x34e   :  { %6639 = vmatprep.subr.bf16.mxu1 %v7708_v18 }
 0x350   :  { %7056 = vmatmul.mubr.bf16.vlgmr.msra.gmra.mrb[32].mxu1 %v8171_v9 }
 0x351   :  { %7059 = vmatprep.mubr.bf16.mxu1 %v8173_v11  ;;  %6640 = vmatpush3.bf16.msra.mxu1 %v7709_v32 }
 0x352   :  { %6641 = vmatprep.subr.bf16.mxu1 %v7710_v52 }
 0x355   :  { %6642 = vmatpush3.bf16.msra.mxu1 %v7711_v53 }
 0x356   :  { %6643 = vmatprep.subr.bf16.mxu1 %v7712_v6 }
 0x358   :  { %7060 = vmatmul.mubr.bf16.gmra.mrb[36].mxu1 %v8178_v16 }
 0x359   :  { %7063 = vmatprep.mubr.bf16.mxu1 %v8180_v17  ;;  %6644 = vmatpush3.bf16.msra.mxu1 %v7713_v54 }
 0x35a   :  { %6645 = vmatprep.subr.bf16.mxu1 %v7714_v55 }
 0x35d   :  { %6646 = vmatpush3.bf16.msra.mxu1 %v7715_v56 }
 0x35e   :  { %6647 = vmatprep.subr.bf16.mxu1 %v7716_v57 }
 0x360   :  { %7064 = vmatmul.mubr.bf16.gmra.mrb[40].mxu1 %v8184_v22 }
 0x361   :  { %7067 = vmatprep.mubr.bf16.mxu1 %v8186_v23  ;;  %6648 = vmatpush3.bf16.msra.mxu1 %v7717_v58 }
 0x362   :  { %6649 = vmatprep.subr.bf16.mxu1 %v7718_v27 }
 0x365   :  { %6650 = vmatpush3.bf16.msra.mxu1 %v7719_v59 }
 0x366   :  { %6651 = vmatprep.subr.bf16.mxu1 %v7720_v19 }
 0x368   :  { %7068 = vmatmul.mubr.bf16.gmra.mrb[44].mxu1 %v8190_v28 }
 0x369   :  { %6652 = vmatpush3.bf16.msra.mxu1 %v7721_v60 }
 0x36a   :  { %6653 = vmatprep.subr.bf16.mxu1 %v7722_v61 }
 0x36d   :  { %6654 = vmatpush3.bf16.msra.mxu1 %v7723_v62 }
 0x423   :  { %v7057_v31 = vpop.f32.mrb[32].mxu1 }
 0x424   :  { %v1053_v24 = vpop.f32.mrb[33].mxu1 }
 0x425   :  { %v7058_v3 = vpop.f32.mrb[34].mxu1 }
 0x426   :  { %v1117_v7 = vpack.c.bf16 %v7058_v3, %v7057_v31  ;;  %v1056_v10 = vpop.f32.mrb[35].mxu1 }
 0x427   :  { %v1116_v13 = vpack.c.bf16 %v1056_v10, %v1053_v24 }
 0x429   :  { %7071 = vmatprep.subr.bf16.mxu0 %v1116_v13  ;;  %1453 = vmatprep.mubr.bf16.mxu1 %v1116_v13 }
 0x42a   :  { %7072 = vmatpush3.bf16.msra.mxu0 %v1116_v13  ;;  %1454 = vmatmul.mubr.bf16.vlgmr.msra.gmra.mrb[48].mxu1 %v8250_v51 }
 0x42b   :  { %v7061_v15 = vpop.f32.mrb[36].mxu1  ;;  %7073 = vmatprep.subr.bf16.mxu0 %v1117_v7  ;;  %1461 = vmatprep.mubr.bf16.mxu1 %v1117_v7 }
 0x42c   :  { %v1069_v20 = vpop.f32.mrb[37].mxu1 }
 0x42d   :  { %v7062_v21 = vpop.f32.mrb[38].mxu1 }
 0x42e   :  { %v1119_v26 = vpack.c.bf16 %v7062_v21, %v7061_v15  ;;  %v1072_v29 = vpop.f32.mrb[39].mxu1  ;;  %7074 = vmatpush3.bf16.msra.mxu0 %v1117_v7 }
 0x42f   :  { %v1118_v1 = vpack.c.bf16 %v1072_v29, %v1069_v20 }
 0x431   :  { %7075 = vmatprep.subr.bf16.mxu0 %v1118_v1 }
 0x432   :  { %7076 = vmatpush3.bf16.msra.mxu0 %v1118_v1  ;;  %1462 = vmatmul.mubr.bf16.gmra.mrb[52].mxu1 %v8246_v50 }
 0x433   :  { %v7065_v33 = vpop.f32.mrb[40].mxu1  ;;  %7077 = vmatprep.subr.bf16.mxu0 %v1119_v26  ;;  %1469 = vmatprep.mubr.bf16.mxu1 %v1118_v1 }
 0x434   :  { %v1085_v39 = vpop.f32.mrb[41].mxu1 }
 0x435   :  { %v7066_v34 = vpop.f32.mrb[42].mxu1 }
 0x436   :  { %v1121_v35 = vpack.c.bf16 %v7066_v34, %v7065_v33  ;;  %v1088_v51 = vpop.f32.mrb[43].mxu1  ;;  %7078 = vmatpush3.bf16.msra.mxu0 %v1119_v26 }
 0x437   :  { %v1120_v5 = vpack.c.bf16 %v1088_v51, %v1085_v39 }
 0x439   :  { %7079 = vmatprep.subr.bf16.mxu0 %v1120_v5 }
 0x43a   :  { %7080 = vmatpush3.bf16.msra.mxu0 %v1120_v5  ;;  %1470 = vmatmul.mubr.bf16.gmra.mrb[56].mxu1 %v8265_v0  ;;  %v7724_v0 = vld [vmem:[#allocation13 + $0x204] ss:$16 sps:$4 sm:$0xff]  }
 0x43b   :  { %v7069_v43 = vpop.f32.mrb[44].mxu1  ;;  %7081 = vmatprep.subr.bf16.mxu0 %v1121_v35  ;;  %1477 = vmatprep.mubr.bf16.mxu1 %v1119_v26 }
 0x43c   :  { %v1101_v38 = vpop.f32.mrb[45].mxu1 }
 0x43d   :  { %v7070_v40 = vpop.f32.mrb[46].mxu1 }
 0x43e   :  { %v1123_v41 = vpack.c.bf16 %v7070_v40, %v7069_v43  ;;  %v1104_v50 = vpop.f32.mrb[47].mxu1  ;;  %7082 = vmatpush3.bf16.msra.mxu0 %v1121_v35 }
 0x43f   :  { %v1122_v42 = vpack.c.bf16 %v1104_v50, %v1101_v38 }
 0x441   :  { %7083 = vmatprep.subr.bf16.mxu0 %v1122_v42 }
 0x442   :  { %7084 = vmatpush3.bf16.msra.mxu0 %v1122_v42  ;;  %1478 = vmatmul.mubr.bf16.gmra.mrb[60].mxu1 %v8261_v63  ;;  %v8323_v63 = vld [vmem:[#allocation8] sm:$0xff]  }
 0x443   :  { %7085 = vmatprep.subr.bf16.mxu0 %v1123_v41  ;;  %1485 = vmatprep.mubr.bf16.mxu1 %v1120_v5 }
 0x446   :  { %7086 = vmatpush3.bf16.msra.mxu0 %v1123_v41 }
 0x447   :  { %7103 = vmatprep.subr.bf16.mxu0 %v7724_v0 }
 0x449   :  { %7088 = vmatmul.mubr.bf16.vlgmr.msra.gmra.mrb[48].mxu0 %v8310_v44 }
 0x44a   :  { %1486 = vmatmul.mubr.bf16.gmra.mrb[64].mxu1 %v8281_v37  ;;  %7091 = vmatprep.mubr.bf16.mxu0 %v8173_v11  ;;  %v7726_v37 = vld [vmem:[#allocation13 + $0x244] ss:$16 sps:$4 sm:$0xff]  }
 0x44b   :  { %1493 = vmatprep.mubr.bf16.mxu1 %v1121_v35  ;;  %7104 = vmatpush3.bf16.msra.mxu0 %v7724_v0 }
 0x451   :  { %7092 = vmatmul.mubr.bf16.gmra.mrb[52].mxu0 %v8178_v16 }
 0x452   :  { %1494 = vmatmul.mubr.bf16.gmra.mrb[68].mxu1 %v8276_v36  ;;  %7095 = vmatprep.mubr.bf16.mxu0 %v8180_v17  ;;  %v7725_v36 = vld [vmem:[#allocation13 + $0x224] ss:$16 sps:$4 sm:$0xff]  }
 0x453   :  { %1501 = vmatprep.mubr.bf16.mxu1 %v1122_v42  ;;  %7105 = vmatprep.subr.bf16.mxu0 %v7725_v36 }
 0x454   :  { %7106 = vmatpush3.bf16.msra.mxu0 %v7725_v36 }
 0x455   :  { %7107 = vmatprep.subr.bf16.mxu0 %v7726_v37 }
 0x458   :  { %7108 = vmatpush3.bf16.msra.mxu0 %v7726_v37 }
 0x459   :  { %7096 = vmatmul.mubr.bf16.gmra.mrb[56].mxu0 %v8184_v22  ;;  %7109 = vmatprep.subr.bf16.mxu0 %v7727_v45 }
 0x45a   :  { %1502 = vmatmul.mubr.bf16.gmra.mrb[72].mxu1 %v8293_v14  ;;  %7099 = vmatprep.mubr.bf16.mxu0 %v8186_v23 }
 0x45b   :  { %1509 = vmatprep.mubr.bf16.mxu1 %v1123_v41 }
 0x45c   :  { %7110 = vmatpush3.bf16.msra.mxu0 %v7727_v45 }
 0x45d   :  { %7111 = vmatprep.subr.bf16.mxu0 %v7728_v25 }
 0x460   :  { %7112 = vmatpush3.bf16.msra.mxu0 %v7728_v25 }
 0x461   :  { %7100 = vmatmul.mubr.bf16.gmra.mrb[60].mxu0 %v8190_v28  ;;  %7113 = vmatprep.subr.bf16.mxu0 %v7729_v46 }
 0x462   :  { %1510 = vmatmul.mubr.bf16.gmra.mrb[76].mxu1 %v8290_v2 }
 0x463   :  { %7183 = vmatprep.mubr.bf16.mxu1 %v8323_v63 }
 0x464   :  { %7114 = vmatpush3.bf16.msra.mxu0 %v7729_v46 }
 0x465   :  { %7115 = vmatprep.subr.bf16.mxu0 %v7730_v47 }
 0x468   :  { %7116 = vmatpush3.bf16.msra.mxu0 %v7730_v47 }
 0x469   :  { %7117 = vmatprep.subr.bf16.mxu0 %v7731_v30 }
 0x46c   :  { %7118 = vmatpush3.bf16.msra.mxu0 %v7731_v30 }
 0x4fd   :  { %v6655_v48 = vpop.f32.mrb[48].mxu1 }
 0x4fe   :  { %v6656_v12 = vpop.f32.mrb[49].mxu1 }
 0x4ff   :  { %v8326_v49 = vadd.f32 %v6656_v12, %v6655_v48  ;;  %v6658_v8 = vpop.f32.mrb[50].mxu1 }
 0x500   :  { %v6659_v2 = vpop.f32.mrb[51].mxu1 }
 0x501   :  { %v8328_v14 = vadd.f32 %v6659_v2, %v6658_v8 }
 0x505   :  { %v6661_v18 = vpop.f32.mrb[52].mxu1 }
 0x506   :  { %v6662_v32 = vpop.f32.mrb[53].mxu1 }
 0x507   :  { %v8330_v52 = vadd.f32 %v6662_v32, %v6661_v18  ;;  %v6664_v53 = vpop.f32.mrb[54].mxu1 }
 0x508   :  { %v6665_v6 = vpop.f32.mrb[55].mxu1 }
 0x509   :  { %v8332_v54 = vadd.f32 %v6665_v6, %v6664_v53 }
 0x50d   :  { %v6667_v55 = vpop.f32.mrb[56].mxu1 }
 0x50e   :  { %v6668_v56 = vpop.f32.mrb[57].mxu1 }
 0x50f   :  { %v8334_v57 = vadd.f32 %v6668_v56, %v6667_v55  ;;  %v6670_v58 = vpop.f32.mrb[58].mxu1 }
 0x510   :  { %v6671_v27 = vpop.f32.mrb[59].mxu1 }
 0x511   :  { %v8336_v59 = vadd.f32 %v6671_v27, %v6670_v58 }
 0x515   :  { %v6673_v19 = vpop.f32.mrb[60].mxu1 }
 0x516   :  { %v6674_v60 = vpop.f32.mrb[61].mxu1 }
 0x517   :  { %v8338_v61 = vadd.f32 %v6674_v60, %v6673_v19  ;;  %v6676_v62 = vpop.f32.mrb[62].mxu1 }
 0x518   :  { %v6677_v31 = vpop.f32.mrb[63].mxu1 }
 0x519   :  { %v8340_v24 = vadd.f32 %v6677_v31, %v6676_v62 }
 0x51c   :  { %v7089_v3 = vpop.f32.mrb[48].mxu0 }
 0x51d   :  { %v1158_v7 = vpop.f32.mrb[49].mxu0  ;;  %v6679_v10 = vpop.f32.mrb[64].mxu1 }
 0x51e   :  { %v7090_v13 = vpop.f32.mrb[50].mxu0  ;;  %v6680_v15 = vpop.f32.mrb[65].mxu1 }
 0x51f   :  { %v1222_v20 = vpack.c.bf16 %v7090_v13, %v7089_v3  ;;  %v8342_v21 = vadd.f32 %v6680_v15, %v6679_v10  ;;  %v1161_v26 = vpop.f32.mrb[51].mxu0  ;;  %v6682_v29 = vpop.f32.mrb[66].mxu1  ;;  %v8359_v10 = vld [vmem:[#allocation14 + $0x1] ss:$0 sm:$0xff] }
 0x520   :  { %v1221_v1 = vpack.c.bf16 %v1161_v26, %v1158_v7  ;;  %v6683_v33 = vpop.f32.mrb[67].mxu1  ;;  %v1464_v13 = vadd.f32 %v8330_v52, %v8359_v10 }
 0x521   :  { %v8344_v39 = vadd.f32 %v6683_v33, %v6682_v29 }
 0x522   :  { %7119 = vmatprep.mubr.bf16.mxu0 %v1221_v1  ;;  %v1467_v1 = vadd.f32 %v8332_v54, %v8359_v10 }
 0x523   :  { %7120 = vmatmul.mubr.bf16.vlgmr.msra.gmra.mrb[64].mxu0 %v1222_v20  ;;  %v1456_v20 = vadd.f32 %v8326_v49, %v8359_v10  ;;  %v1480_v49 = vadd.f32 %v8338_v61, %v8359_v10 }
 0x524   :  { %v7093_v34 = vpop.f32.mrb[52].mxu0 }
 0x525   :  { %v1174_v35 = vpop.f32.mrb[53].mxu0  ;;  %v6685_v51 = vpop.f32.mrb[68].mxu1 }
 0x526   :  { %v7094_v5 = vpop.f32.mrb[54].mxu0  ;;  %v6686_v43 = vpop.f32.mrb[69].mxu1 }
 0x527   :  { %v1224_v38 = vpack.c.bf16 %v7094_v5, %v7093_v34  ;;  %v8346_v40 = vadd.f32 %v6686_v43, %v6685_v51  ;;  %v1177_v41 = vpop.f32.mrb[55].mxu0  ;;  %v6688_v50 = vpop.f32.mrb[70].mxu1 }
 0x528   :  { %v1223_v42 = vpack.c.bf16 %v1177_v41, %v1174_v35  ;;  %v6689_v0 = vpop.f32.mrb[71].mxu1  ;;  %v1459_v35 = vadd.f32 %v8328_v14, %v8359_v10 }
 0x529   :  { %v8348_v36 = vadd.f32 %v6689_v0, %v6688_v50  ;;  %v1472_v0 = vadd.f32 %v8334_v57, %v8359_v10 }
 0x52a   :  { %7123 = vmatprep.mubr.bf16.mxu0 %v1223_v42 }
 0x52b   :  { %7124 = vmatmul.mubr.bf16.gmra.mrb[68].mxu0 %v1224_v38 }
 0x52c   :  { %v7097_v37 = vpop.f32.mrb[56].mxu0 }
 0x52d   :  { %v1190_v45 = vpop.f32.mrb[57].mxu0  ;;  %v6691_v25 = vpop.f32.mrb[72].mxu1 }
 0x52e   :  { %v7098_v46 = vpop.f32.mrb[58].mxu0  ;;  %v6692_v47 = vpop.f32.mrb[73].mxu1 }
 0x52f   :  { %v1226_v30 = vpack.c.bf16 %v7098_v46, %v7097_v37  ;;  %v8350_v48 = vadd.f32 %v6692_v47, %v6691_v25  ;;  %v1193_v12 = vpop.f32.mrb[59].mxu0  ;;  %v6694_v8 = vpop.f32.mrb[74].mxu1  ;;  %v1475_v47 = vadd.f32 %v8336_v59, %v8359_v10 }
 0x530   :  { %v1225_v2 = vpack.c.bf16 %v1193_v12, %v1190_v45  ;;  %v6695_v18 = vpop.f32.mrb[75].mxu1  ;;  %v1483_v45 = vadd.f32 %v8340_v24, %v8359_v10  ;;  %v1496_v24 = vadd.f32 %v8346_v40, %v8359_v10 }
 0x531   :  { %v8352_v32 = vadd.f32 %v6695_v18, %v6694_v8 }
 0x532   :  { %7127 = vmatprep.mubr.bf16.mxu0 %v1225_v2 }
 0x533   :  { %7128 = vmatmul.mubr.bf16.gmra.mrb[72].mxu0 %v1226_v30 }
 0x534   :  { %v7101_v53 = vpop.f32.mrb[60].mxu0 }
 0x535   :  { %v1206_v6 = vpop.f32.mrb[61].mxu0  ;;  %v6697_v55 = vpop.f32.mrb[76].mxu1 }
 0x536   :  { %v7102_v56 = vpop.f32.mrb[62].mxu0  ;;  %v6698_v58 = vpop.f32.mrb[77].mxu1 }
 0x537   :  { %v1228_v27 = vpack.c.bf16 %v7102_v56, %v7101_v53  ;;  %v8354_v19 = vadd.f32 %v6698_v58, %v6697_v55  ;;  %v1209_v60 = vpop.f32.mrb[63].mxu0  ;;  %v6700_v62 = vpop.f32.mrb[78].mxu1  ;;  %v1488_v55 = vadd.f32 %v8342_v21, %v8359_v10 }
 0x538   :  { %v1227_v31 = vpack.c.bf16 %v1209_v60, %v1206_v6  ;;  %v6701_v3 = vpop.f32.mrb[79].mxu1 }
 0x539   :  { %v8356_v7 = vadd.f32 %v6701_v3, %v6700_v62 }
 0x53a   :  { %7131 = vmatprep.mubr.bf16.mxu0 %v1227_v31  ;;  %v1491_v31 = vadd.f32 %v8344_v39, %v8359_v10 }
 0x53b   :  { %7132 = vmatmul.mubr.bf16.gmra.mrb[76].mxu0 %v1228_v27  ;;  %v1499_v27 = vadd.f32 %v8348_v36, %v8359_v10  ;;  %v1512_v36 = vadd.f32 %v8354_v19, %v8359_v10 }
 0x53c   :  { %7151 = vmatprep.mubr.bf16.mxu0 %v8323_v63 }
 0x5f6   :  { %v7121_v15 = vpop.f32.mrb[64].mxu0 }
 0x5f7   :  { %v1561_v26 = vadd.f32 %v7121_v15, %v1464_v13  ;;  %v1552_v29 = vpop.f32.mrb[65].mxu0 }
 0x5f8   :  { %v1553_v33 = vadd.f32 %v1552_v29, %v1456_v20  ;;  %v7122_v34 = vpop.f32.mrb[66].mxu0 }
 0x5f9   :  { %v1564_v63 = vadd.f32 %v7122_v34, %v1467_v1  ;;  %v1555_v51 = vpop.f32.mrb[67].mxu0  ;;  %v1617_v43 = vmax.f32 %v1561_v26, 0.0 }
 0x5fa   :  { %v1556_v5 = vadd.f32 %v1555_v51, %v1459_v35  ;;  %v1615_v52 = vmax.f32 %v1553_v33, 0.0  ;;  %v1504_v33 = vadd.f32 %v8350_v48, %v8359_v10 }
 0x5fb   :  { %v1618_v38 = vmax.f32 %v1564_v63, 0.0  ;;  %v1515_v63 = vadd.f32 %v8356_v7, %v8359_v10 }
 0x5fc   :  { %v1616_v41 = vmax.f32 %v1556_v5, 0.0 }
 0x5fd   :  { %v8369_v50 = vpack.c.bf16 %v1618_v38, %v1617_v43  ;;  %v1507_v43 = vadd.f32 %v8352_v32, %v8359_v10  ;;  %v7734_v32 = vld [vmem:[#allocation13 + $0xc] ss:$16 sps:$4 sm:$0xff]   ;;  %v7732_v10 = vld [vmem:[#allocation13 + $0x8] ss:$16 sps:$4 sm:$0xff]  }
 0x5fe   :  { %v8373_v42 = vpack.c.bf16 %v1616_v41, %v1615_v52  ;;  %v7125_v54 = vpop.f32.mrb[68].mxu0 }
 0x5ff   :  { %v1577_v37 = vadd.f32 %v7125_v54, %v1480_v49  ;;  %v1568_v14 = vpop.f32.mrb[69].mxu0 }
 0x600   :  { %v1569_v25 = vadd.f32 %v1568_v14, %v1472_v0  ;;  %v7126_v46 = vpop.f32.mrb[70].mxu0  ;;  %7135 = vmatprep.subr.bf16.mxu0 %v8373_v42  ;;  %v8426_v14 = vld [vmem:[#allocation8 + $0x10] sm:$0xff]  }
 0x601   :  { %v1580_v30 = vadd.f32 %v7126_v46, %v1483_v45  ;;  %v1571_v61 = vpop.f32.mrb[71].mxu0  ;;  %7136 = vmatpush3.bf16.msra.mxu0 %v8373_v42  ;;  %v1621_v57 = vmax.f32 %v1577_v37, 0.0  ;;  %v7737_v37 = vld [vmem:[#allocation13 + $0x2c] ss:$16 sps:$4 sm:$0xff]   ;;  %v7735_v45 = vld [vmem:[#allocation13 + $0x28] ss:$16 sps:$4 sm:$0xff]  }
 0x602   :  { %v1572_v12 = vadd.f32 %v1571_v61, %v1475_v47  ;;  %7137 = vmatprep.subr.bf16.mxu0 %v8369_v50  ;;  %v1619_v2 = vmax.f32 %v1569_v25, 0.0  ;;  %v7740_v25 = vld [vmem:[#allocation13 + $0x4c] ss:$16 sps:$4 sm:$0xff]   ;;  %v7738_v46 = vld [vmem:[#allocation13 + $0x48] ss:$16 sps:$4 sm:$0xff]   ;;  %v8432_v61 = vld [vmem:[#allocation8 + $0x20] sm:$0xff]  }
 0x603   :  { %v1622_v8 = vmax.f32 %v1580_v30, 0.0  ;;  %v7743_v47 = vld [vmem:[#allocation13 + $0x6c] ss:$16 sps:$4 sm:$0xff]  }
 0x604   :  { %v1620_v18 = vmax.f32 %v1572_v12, 0.0  ;;  %v8429_v30 = vld [vmem:[#allocation8 + $0x18] sm:$0xff]  }
 0x605   :  { %v8384_v53 = vpack.c.bf16 %v1622_v8, %v1621_v57  ;;  %7138 = vmatpush3.bf16.msra.mxu0 %v8369_v50  ;;  %v7741_v12 = vld [vmem:[#allocation13 + $0x68] ss:$16 sps:$4 sm:$0xff]   ;;  %v7746_v57 = vld [vmem:[#allocation13 + $0x8c] ss:$16 sps:$4 sm:$0xff]  }
 0x606   :  { %v8389_v6 = vpack.c.bf16 %v1620_v18, %v1619_v2  ;;  %v7129_v59 = vpop.f32.mrb[72].mxu0  ;;  %v7744_v8 = vld [vmem:[#allocation13 + $0x88] ss:$16 sps:$4 sm:$0xff]   ;;  %v7749_v2 = vld [vmem:[#allocation13 + $0xac] ss:$16 sps:$4 sm:$0xff]  }
 0x607   :  { %v1593_v56 = vadd.f32 %v7129_v59, %v1496_v24  ;;  %v1584_v58 = vpop.f32.mrb[73].mxu0  ;;  %v8435_v18 = vld [vmem:[#allocation8 + $0x28] sm:$0xff]   ;;  %v8438_v24 = vld [vmem:[#allocation8 + $0x30] sm:$0xff]  }
 0x608   :  { %v1585_v60 = vadd.f32 %v1584_v58, %v1488_v55  ;;  %v7130_v62 = vpop.f32.mrb[74].mxu0  ;;  %7139 = vmatprep.subr.bf16.mxu0 %v8389_v6  ;;  %v7747_v59 = vld [vmem:[#allocation13 + $0xa8] ss:$16 sps:$4 sm:$0xff]   ;;  %v7752_v55 = vld [vmem:[#allocation13 + $0xcc] ss:$16 sps:$4 sm:$0xff]  }
 0x609   :  { %v1596_v3 = vadd.f32 %v7130_v62, %v1499_v27  ;;  %v1587_v40 = vpop.f32.mrb[75].mxu0  ;;  %7140 = vmatpush3.bf16.msra.mxu0 %v8389_v6  ;;  %v1625_v21 = vmax.f32 %v1593_v56, 0.0  ;;  %v7750_v56 = vld [vmem:[#allocation13 + $0xc8] ss:$16 sps:$4 sm:$0xff]   ;;  %v7755_v58 = vld [vmem:[#allocation13 + $0xec] ss:$16 sps:$4 sm:$0xff]  }
 0x60a   :  { %v1588_v13 = vadd.f32 %v1587_v40, %v1491_v31  ;;  %7141 = vmatprep.subr.bf16.mxu0 %v8384_v53  ;;  %v1623_v20 = vmax.f32 %v1585_v60, 0.0  ;;  %v8441_v27 = vld [vmem:[#allocation8 + $0x38] sm:$0xff]  }
 0x60b   :  { %v1626_v15 = vmax.f32 %v1596_v3, 0.0  ;;  %v7753_v60 = vld [vmem:[#allocation13 + $0xe8] ss:$16 sps:$4 sm:$0xff]   ;;  %v7758_v62 = vld [vmem:[#allocation13 + $0x10c] ss:$16 sps:$4 sm:$0xff]  }
 0x60c   :  { %v1624_v26 = vmax.f32 %v1588_v13, 0.0  ;;  %v7756_v31 = vld [vmem:[#allocation13 + $0x108] ss:$16 sps:$4 sm:$0xff]   ;;  %v7761_v3 = vld [vmem:[#allocation13 + $0x12c] ss:$16 sps:$4 sm:$0xff]  }
 0x60d   :  { %v8400_v29 = vpack.c.bf16 %v1626_v15, %v1625_v21  ;;  %7142 = vmatpush3.bf16.msra.mxu0 %v8384_v53  ;;  %v7759_v40 = vld [vmem:[#allocation13 + $0x128] ss:$16 sps:$4 sm:$0xff]   ;;  %v7764_v13 = vld [vmem:[#allocation13 + $0x14c] ss:$16 sps:$4 sm:$0xff]  }
 0x60e   :  { %v8405_v1 = vpack.c.bf16 %v1624_v26, %v1623_v20  ;;  %v7133_v39 = vpop.f32.mrb[76].mxu0  ;;  %v7762_v21 = vld [vmem:[#allocation13 + $0x148] ss:$16 sps:$4 sm:$0xff]   ;;  %v7767_v15 = vld [vmem:[#allocation13 + $0x16c] ss:$16 sps:$4 sm:$0xff]  }
 0x60f   :  { %v1609_v34 = vadd.f32 %v7133_v39, %v1512_v36  ;;  %v1600_v35 = vpop.f32.mrb[77].mxu0  ;;  %v7765_v20 = vld [vmem:[#allocation13 + $0x168] ss:$16 sps:$4 sm:$0xff]   ;;  %v7770_v26 = vld [vmem:[#allocation13 + $0x18c] ss:$16 sps:$4 sm:$0xff]  }
 0x610   :  { %v1601_v51 = vadd.f32 %v1600_v35, %v1504_v33  ;;  %v7134_v5 = vpop.f32.mrb[78].mxu0  ;;  %7143 = vmatprep.subr.bf16.mxu0 %v8405_v1  ;;  %v7768_v36 = vld [vmem:[#allocation13 + $0x188] ss:$16 sps:$4 sm:$0xff]   ;;  %v7773_v39 = vld [vmem:[#allocation13 + $0x1ac] ss:$16 sps:$4 sm:$0xff]  }
 0x611   :  { %v1612_v38 = vadd.f32 %v7134_v5, %v1515_v63  ;;  %v1603_v19 = vpop.f32.mrb[79].mxu0  ;;  %7144 = vmatpush3.bf16.msra.mxu0 %v8405_v1  ;;  %v1629_v48 = vmax.f32 %v1609_v34, 0.0  ;;  %v7771_v33 = vld [vmem:[#allocation13 + $0x1a8] ss:$16 sps:$4 sm:$0xff]   ;;  %v7776_v34 = vld [vmem:[#allocation13 + $0x1cc] ss:$16 sps:$4 sm:$0xff]  }
 0x612   :  { %v1604_v52 = vadd.f32 %v1603_v19, %v1507_v43  ;;  %7145 = vmatprep.subr.bf16.mxu0 %v8400_v29  ;;  %v1627_v49 = vmax.f32 %v1601_v51, 0.0  ;;  %v7774_v35 = vld [vmem:[#allocation13 + $0x1c8] ss:$16 sps:$4 sm:$0xff]   ;;  %v7779_v63 = vld [vmem:[#allocation13 + $0x1ec] ss:$16 sps:$4 sm:$0xff]  }
 0x613   :  { %v1630_v41 = vmax.f32 %v1612_v38, 0.0  ;;  %v7777_v51 = vld [vmem:[#allocation13 + $0x1e8] ss:$16 sps:$4 sm:$0xff]   ;;  %v7782_v5 = vld [vmem:[#allocation13 + $0x20c] ss:$16 sps:$4 sm:$0xff]  }
 0x614   :  { %v1628_v54 = vmax.f32 %v1604_v52, 0.0 }
 0x615   :  { %v8416_v0 = vpack.c.bf16 %v1630_v41, %v1629_v48  ;;  %7146 = vmatpush3.bf16.msra.mxu0 %v8400_v29 }
 0x616   :  { %v8419_v7 = vpack.c.bf16 %v1628_v54, %v1627_v49  ;;  %v7780_v49 = vld [vmem:[#allocation13 + $0x208] ss:$16 sps:$4 sm:$0xff]   ;;  %v7785_v54 = vld [vmem:[#allocation13 + $0x22c] ss:$16 sps:$4 sm:$0xff]  }
 0x618   :  { %7147 = vmatprep.subr.bf16.mxu0 %v8419_v7 }
 0x619   :  { %7148 = vmatpush3.bf16.msra.mxu0 %v8419_v7 }
 0x61a   :  { %7149 = vmatprep.subr.bf16.mxu0 %v8416_v0 }
 0x61d   :  { %7150 = vmatpush3.bf16.msra.mxu0 %v8416_v0 }
 0x61e   :  { %2198 = vmatprep.subr.bf16.mxu0 %v7734_v32 }
 0x620   :  { %7152 = vmatmul.mubr.bf16.vlgmr.msra.gmra.mrb[80].mxu0 %v8310_v44 }
 0x621   :  { %7155 = vmatprep.mubr.bf16.mxu0 %v8426_v14  ;;  %2199 = vmatpush1.bf16.msra.mxu0 %v7732_v10 }
 0x622   :  { %2200 = vmatprep.subr.bf16.mxu0 %v7737_v37  ;;  %v7783_v37 = vld [vmem:[#allocation13 + $0x228] ss:$16 sps:$4 sm:$0xff]  }
 0x625   :  { %2201 = vmatpush1.bf16.msra.mxu0 %v7735_v45 }
 0x626   :  { %2202 = vmatprep.subr.bf16.mxu0 %v7740_v25  ;;  %v7788_v25 = vld [vmem:[#allocation13 + $0x24c] ss:$16 sps:$4 sm:$0xff]  }
 0x628   :  { %7156 = vmatmul.mubr.bf16.gmra.mrb[84].mxu0 %v8429_v30 }
 0x629   :  { %7159 = vmatprep.mubr.bf16.mxu0 %v8432_v61  ;;  %2203 = vmatpush1.bf16.msra.mxu0 %v7738_v46 }
 0x62a   :  { %2204 = vmatprep.subr.bf16.mxu0 %v7743_v47 }
 0x62d   :  { %2205 = vmatpush1.bf16.msra.mxu0 %v7741_v12 }
 0x62e   :  { %2206 = vmatprep.subr.bf16.mxu0 %v7746_v57  ;;  %v7786_v57 = vld [vmem:[#allocation13 + $0x248] ss:$16 sps:$4 sm:$0xff]  }
 0x630   :  { %7160 = vmatmul.mubr.bf16.gmra.mrb[88].mxu0 %v8435_v18 }
 0x631   :  { %7163 = vmatprep.mubr.bf16.mxu0 %v8438_v24  ;;  %2207 = vmatpush1.bf16.msra.mxu0 %v7744_v8  ;;  %v7791_v8 = vld [vmem:[#allocation13 + $0x26c] ss:$16 sps:$4 sm:$0xff]  }
 0x632   :  { %2208 = vmatprep.subr.bf16.mxu0 %v7749_v2 }
 0x635   :  { %2209 = vmatpush1.bf16.msra.mxu0 %v7747_v59  ;;  %v7789_v59 = vld [vmem:[#allocation13 + $0x268] ss:$16 sps:$4 sm:$0xff]  }
 0x636   :  { %2210 = vmatprep.subr.bf16.mxu0 %v7752_v55 }
 0x638   :  { %7164 = vmatmul.mubr.bf16.gmra.mrb[92].mxu0 %v8441_v27 }
 0x639   :  { %2211 = vmatpush1.bf16.msra.mxu0 %v7750_v56  ;;  %v7794_v56 = vld [vmem:[#allocation13 + $0x28c] ss:$16 sps:$4 sm:$0xff]  }
 0x63a   :  { %2212 = vmatprep.subr.bf16.mxu0 %v7755_v58 }
 0x63d   :  { %2213 = vmatpush1.bf16.msra.mxu0 %v7753_v60 }
 0x63e   :  { %2214 = vmatprep.subr.bf16.mxu0 %v7758_v62 }
 0x641   :  { %2215 = vmatpush1.bf16.msra.mxu0 %v7756_v31  ;;  %v7792_v31 = vld [vmem:[#allocation13 + $0x288] ss:$16 sps:$4 sm:$0xff]  }
 0x642   :  { %2216 = vmatprep.subr.bf16.mxu0 %v7761_v3  ;;  %v7797_v3 = vld [vmem:[#allocation13 + $0x2ac] ss:$16 sps:$4 sm:$0xff]  }
 0x645   :  { %2217 = vmatpush1.bf16.msra.mxu0 %v7759_v40 }
 0x646   :  { %2218 = vmatprep.subr.bf16.mxu0 %v7764_v13  ;;  %v7795_v13 = vld [vmem:[#allocation13 + $0x2a8] ss:$16 sps:$4 sm:$0xff]  }
 0x649   :  { %2219 = vmatpush1.bf16.msra.mxu0 %v7762_v21 }
 0x64a   :  { %2220 = vmatprep.subr.bf16.mxu0 %v7767_v15  ;;  %v7800_v15 = vld [vmem:[#allocation13 + $0x2cc] ss:$16 sps:$4 sm:$0xff]  }
 0x64d   :  { %2221 = vmatpush1.bf16.msra.mxu0 %v7765_v20 }
 0x64e   :  { %2222 = vmatprep.subr.bf16.mxu0 %v7770_v26 }
 0x651   :  { %2223 = vmatpush1.bf16.msra.mxu0 %v7768_v36 }
 0x652   :  { %2224 = vmatprep.subr.bf16.mxu0 %v7773_v39  ;;  %v7798_v39 = vld [vmem:[#allocation13 + $0x2c8] ss:$16 sps:$4 sm:$0xff]  }
 0x655   :  { %2225 = vmatpush1.bf16.msra.mxu0 %v7771_v33 }
 0x656   :  { %2226 = vmatprep.subr.bf16.mxu0 %v7776_v34 }
 0x659   :  { %2227 = vmatpush1.bf16.msra.mxu0 %v7774_v35 }
 0x65a   :  { %2228 = vmatprep.subr.bf16.mxu0 %v7779_v63 }
 0x65d   :  { %2229 = vmatpush1.bf16.msra.mxu0 %v7777_v51 }
 0x65e   :  { %2311 = vmatprep.subr.bf16.mxu0 %v7782_v5 }
 0x6f3   :  { %v7153_v43 = vpop.f32.mrb[80].mxu0 }
 0x6f4   :  { %v1723_v38 = vpop.f32.mrb[81].mxu0 }
 0x6f5   :  { %v7154_v19 = vpop.f32.mrb[82].mxu0 }
 0x6f6   :  { %v1787_v52 = vpack.c.bf16 %v7154_v19, %v7153_v43  ;;  %v1726_v48 = vpop.f32.mrb[83].mxu0 }
 0x6f7   :  { %v1786_v41 = vpack.c.bf16 %v1726_v48, %v1723_v38 }
 0x6f9   :  { %7167 = vmatprep.subr.bf16.mxu1 %v1786_v41  ;;  %2230 = vmatprep.mubr.bf16.mxu0 %v1786_v41 }
 0x6fa   :  { %7168 = vmatpush3.bf16.msra.mxu1 %v1786_v41  ;;  %2231 = vmatmul.mubr.bf16.vlgmr.msra.gmra.mrb[96].mxu0 %v8373_v42 }
 0x6fb   :  { %v7157_v32 = vpop.f32.mrb[84].mxu0  ;;  %7169 = vmatprep.subr.bf16.mxu1 %v1787_v52  ;;  %2240 = vmatprep.mubr.bf16.mxu0 %v1787_v52 }
 0x6fc   :  { %v1739_v10 = vpop.f32.mrb[85].mxu0  ;;  %2312 = vmatpush1.bf16.msra.mxu0 %v7780_v49 }
 0x6fd   :  { %v7158_v45 = vpop.f32.mrb[86].mxu0  ;;  %2313 = vmatprep.subr.bf16.mxu0 %v7785_v54 }
 0x6fe   :  { %v1789_v46 = vpack.c.bf16 %v7158_v45, %v7157_v32  ;;  %v1742_v47 = vpop.f32.mrb[87].mxu0  ;;  %7170 = vmatpush3.bf16.msra.mxu1 %v1787_v52 }
 0x6ff   :  { %v1788_v12 = vpack.c.bf16 %v1742_v47, %v1739_v10 }
 0x700   :  { %2314 = vmatpush1.bf16.msra.mxu0 %v7783_v37 }
 0x701   :  { %7171 = vmatprep.subr.bf16.mxu1 %v1788_v12  ;;  %2315 = vmatprep.subr.bf16.mxu0 %v7788_v25 }
 0x702   :  { %7172 = vmatpush3.bf16.msra.mxu1 %v1788_v12  ;;  %2241 = vmatmul.mubr.bf16.gmra.mrb[100].mxu0 %v8369_v50 }
 0x703   :  { %v7161_v42 = vpop.f32.mrb[88].mxu0  ;;  %7173 = vmatprep.subr.bf16.mxu1 %v1789_v46  ;;  %2250 = vmatprep.mubr.bf16.mxu0 %v1788_v12 }
 0x704   :  { %v1755_v2 = vpop.f32.mrb[89].mxu0  ;;  %2316 = vmatpush1.bf16.msra.mxu0 %v7786_v57 }
 0x705   :  { %v7162_v55 = vpop.f32.mrb[90].mxu0  ;;  %2317 = vmatprep.subr.bf16.mxu0 %v7791_v8 }
 0x706   :  { %v1791_v58 = vpack.c.bf16 %v7162_v55, %v7161_v42  ;;  %v1758_v60 = vpop.f32.mrb[91].mxu0  ;;  %7174 = vmatpush3.bf16.msra.mxu1 %v1789_v46 }
 0x707   :  { %v1790_v62 = vpack.c.bf16 %v1758_v60, %v1755_v2 }
 0x708   :  { %2318 = vmatpush1.bf16.msra.mxu0 %v7789_v59 }
 0x709   :  { %7175 = vmatprep.subr.bf16.mxu1 %v1790_v62  ;;  %2319 = vmatprep.subr.bf16.mxu0 %v7794_v56 }
 0x70a   :  { %7176 = vmatpush3.bf16.msra.mxu1 %v1790_v62  ;;  %2251 = vmatmul.mubr.bf16.gmra.mrb[104].mxu0 %v8389_v6  ;;  %v9761_v6 = vmov 0  }
 0x70b   :  { %v7165_v50 = vpop.f32.mrb[92].mxu0  ;;  %2260 = vmatprep.mubr.bf16.mxu0 %v1789_v46  ;;  %7177 = vmatprep.subr.bf16.mxu1 %v1791_v58 }
 0x70c   :  { %v1771_v40 = vpop.f32.mrb[93].mxu0  ;;  %2320 = vmatpush1.bf16.msra.mxu0 %v7792_v31 }
 0x70d   :  { %v7166_v21 = vpop.f32.mrb[94].mxu0  ;;  %2321 = vmatprep.subr.bf16.mxu0 %v7797_v3 }
 0x70e   :  { %v1793_v20 = vpack.c.bf16 %v7166_v21, %v7165_v50  ;;  %v1774_v26 = vpop.f32.mrb[95].mxu0  ;;  %7178 = vmatpush3.bf16.msra.mxu1 %v1791_v58 }
 0x70f   :  { %v1792_v36 = vpack.c.bf16 %v1774_v26, %v1771_v40 }
 0x710   :  { %2322 = vmatpush1.bf16.msra.mxu0 %v7795_v13 }
 0x711   :  { %7179 = vmatprep.subr.bf16.mxu1 %v1792_v36  ;;  %2323 = vmatprep.subr.bf16.mxu0 %v7800_v15 }
 0x712   :  { %7180 = vmatpush3.bf16.msra.mxu1 %v1792_v36  ;;  %2261 = vmatmul.mubr.bf16.gmra.mrb[108].mxu0 %v8384_v53  ;;  %v7801_v53 = vld [vmem:[#allocation13 + $0x2e8] ss:$16 sps:$4 sm:$0xff]  }
 0x713   :  { %7181 = vmatprep.subr.bf16.mxu1 %v1793_v20  ;;  %2270 = vmatprep.mubr.bf16.mxu0 %v1790_v62 }
 0x714   :  { %2324 = vmatpush1.bf16.msra.mxu0 %v7798_v39 }
 0x716   :  { %7182 = vmatpush3.bf16.msra.mxu1 %v1793_v20 }
 0x719   :  { %7184 = vmatmul.mubr.bf16.vlgmr.msra.gmra.mrb[80].mxu1 %v8310_v44  ;;  %v7803_v44 = vld [vmem:[#allocation13 + $0x2ec] ss:$16 sps:$4 sm:$0xff]  }
 0x71a   :  { %2271 = vmatmul.mubr.bf16.gmra.mrb[112].mxu0 %v8405_v1  ;;  %7187 = vmatprep.mubr.bf16.mxu1 %v8426_v14 }
 0x71b   :  { %2280 = vmatprep.mubr.bf16.mxu0 %v1791_v58  ;;  %2325 = vmatprep.subr.bf16.mxu0 %v7803_v44 }
 0x71c   :  { %2326 = vmatpush1.bf16.msra.mxu0 %v7801_v53 }
 0x721   :  { %7188 = vmatmul.mubr.bf16.gmra.mrb[84].mxu1 %v8429_v30 }
 0x722   :  { %2281 = vmatmul.mubr.bf16.gmra.mrb[116].mxu0 %v8400_v29  ;;  %7191 = vmatprep.mubr.bf16.mxu1 %v8432_v61 }
 0x723   :  { %2290 = vmatprep.mubr.bf16.mxu0 %v1792_v36 }
 0x729   :  { %7192 = vmatmul.mubr.bf16.gmra.mrb[88].mxu1 %v8435_v18 }
 0x72a   :  { %2291 = vmatmul.mubr.bf16.gmra.mrb[120].mxu0 %v8419_v7  ;;  %7195 = vmatprep.mubr.bf16.mxu1 %v8438_v24 }
 0x72b   :  { %2300 = vmatprep.mubr.bf16.mxu0 %v1793_v20 }
 0x731   :  { %7196 = vmatmul.mubr.bf16.gmra.mrb[92].mxu1 %v8441_v27 }
 0x732   :  { %2301 = vmatmul.mubr.bf16.gmra.mrb[124].mxu0 %v8416_v0 }
 0x733   :  { %2343 = vmatprep.mubr.bf16.mxu0 %v9761_v6 }
 0x7ec   :  { %v7185_v29 = vpop.f32.mrb[80].mxu1 }
 0x7ed   :  { %v1828_v1 = vpop.f32.mrb[81].mxu1 }
 0x7ee   :  { %v7186_v14 = vpop.f32.mrb[82].mxu1 }
 0x7ef   :  { %v1892_v30 = vpack.c.bf16 %v7186_v14, %v7185_v29  ;;  %v1831_v61 = vpop.f32.mrb[83].mxu1 }
 0x7f0   :  { %v1891_v7 = vpack.c.bf16 %v1831_v61, %v1828_v1 }
 0x7f2   :  { %2344 = vmatmul.mubr.bf16.vlgmr.msra.gmra.mrb[96].mxu0 %v1891_v7 }
 0x7f3   :  { %2353 = vmatprep.mubr.bf16.mxu0 %v9761_v6 }
 0x7f4   :  { %v7189_v18 = vpop.f32.mrb[84].mxu1 }
 0x7f5   :  { %v1844_v24 = vpop.f32.mrb[85].mxu1 }
 0x7f6   :  { %v7190_v27 = vpop.f32.mrb[86].mxu1 }
 0x7f7   :  { %v1894_v0 = vpack.c.bf16 %v7190_v27, %v7189_v18  ;;  %v1847_v33 = vpop.f32.mrb[87].mxu1 }
 0x7f8   :  { %v1893_v34 = vpack.c.bf16 %v1847_v33, %v1844_v24 }
 0x7fa   :  { %2354 = vmatmul.mubr.bf16.gmra.mrb[100].mxu0 %v1892_v30 }
 0x7fb   :  { %2363 = vmatprep.mubr.bf16.mxu0 %v9761_v6 }
 0x7fc   :  { %v7193_v35 = vpop.f32.mrb[88].mxu1 }
 0x7fd   :  { %v1860_v63 = vpop.f32.mrb[89].mxu1 }
 0x7fe   :  { %v7194_v51 = vpop.f32.mrb[90].mxu1 }
 0x7ff   :  { %v1896_v5 = vpack.c.bf16 %v7194_v51, %v7193_v35  ;;  %v1863_v43 = vpop.f32.mrb[91].mxu1 }
 0x800   :  { %v1895_v38 = vpack.c.bf16 %v1863_v43, %v1860_v63 }
 0x802   :  { %2364 = vmatmul.mubr.bf16.gmra.mrb[104].mxu0 %v1893_v34 }
 0x803   :  { %2373 = vmatprep.mubr.bf16.mxu0 %v9761_v6 }
 0x804   :  { %v7197_v19 = vpop.f32.mrb[92].mxu1 }
 0x805   :  { %v1876_v52 = vpop.f32.mrb[93].mxu1 }
 0x806   :  { %v7198_v48 = vpop.f32.mrb[94].mxu1 }
 0x807   :  { %v1898_v41 = vpack.c.bf16 %v7198_v48, %v7197_v19  ;;  %v1879_v49 = vpop.f32.mrb[95].mxu1 }
 0x808   :  { %v1897_v54 = vpack.c.bf16 %v1879_v49, %v1876_v52 }
 0x80a   :  { %2374 = vmatmul.mubr.bf16.gmra.mrb[108].mxu0 %v1894_v0 }
 0x80b   :  { %2383 = vmatprep.mubr.bf16.mxu0 %v9761_v6 }
 0x812   :  { %2384 = vmatmul.mubr.bf16.gmra.mrb[112].mxu0 %v1895_v38 }
 0x813   :  { %2393 = vmatprep.mubr.bf16.mxu0 %v9761_v6 }
 0x81a   :  { %2394 = vmatmul.mubr.bf16.gmra.mrb[116].mxu0 %v1896_v5 }
 0x81b   :  { %2403 = vmatprep.mubr.bf16.mxu0 %v9761_v6 }
 0x822   :  { %2404 = vmatmul.mubr.bf16.gmra.mrb[120].mxu0 %v1897_v54 }
 0x823   :  { %2413 = vmatprep.mubr.bf16.mxu0 %v9761_v6 }
 0x82a   :  { %2414 = vmatmul.mubr.bf16.gmra.mrb[124].mxu0 %v1898_v41 }
 0x82b   :  { %7913 = shalt.err (!%p7910_p6)  }
 0x82c   :  { %s7914_s20 = scalar_lea.vmem %s158_s21, 6144  ;;  %p7919_p8 = scmp.lt.s32.totalorder %s158_s21, %s158_s21 }
 0x82d   :  { %p7915_p7 = scmp.ne.s32.totalorder %s158_s21, %s7914_s20  ;;  %p7920_p9 = scmp.lt.s32.totalorder %s7914_s20, %s7914_s20 }
 0x82f   :  { %p7921_p10 = por %p7920_p9, %p7919_p8 }
 0x831   :  { %p7922_p11 = pnand %p7921_p10, %p7915_p7 }
 0x833   :  { %7925 = shalt.err (!%p7922_p11)  }
 0x834   :  { %160 = dma.hbm_to_vmem [thread:$0]  %s9758_s7, 6144, %s158_s21, [#allocation7 + $0x2] }
 0x835   :  { %s7926_s12 = scalar_lea.hbm %s9759_s8, 4096 }
 0x836   :  { %p7927_p12 = scmp.ne.s32.totalorder %s9759_s8, %s7926_s12  ;;  %p7930_p13 = scmp.lt.u32.totalorder %s7926_s12, %s9759_s8 }
 0x838   :  { %p7932_p0 = pnand %p7930_p13, %p7927_p12 }
 0x83a   :  { %7935 = shalt.err (!%p7932_p0)  }
 0x83b   :  { %s7936_s30 = scalar_lea.vmem %s170_s0, 4096  ;;  %p7941_p2 = scmp.lt.s32.totalorder %s170_s0, %s170_s0 }
 0x83c   :  { %p7937_p1 = scmp.ne.s32.totalorder %s170_s0, %s7936_s30  ;;  %p7942_p3 = scmp.lt.s32.totalorder %s7936_s30, %s7936_s30 }
 0x83e   :  { %p7943_p4 = por %p7942_p3, %p7941_p2 }
 0x840   :  { %p7944_p5 = pnand %p7943_p4, %p7937_p1 }
 0x842   :  { %7947 = shalt.err (!%p7944_p5)  }
 0x843   :  { %172 = dma.hbm_to_vmem [thread:$0]  %s9759_s8, 4096, %s170_s0, [#allocation7 + $0x3]  ;;  %v1948_v32 = vlaneseq  ;;  %v1688_v45 = vld [vmem:[#allocation14 + $0x2] ss:$8 sm:$0x3]  ;;  %2702 = vmatprep.mubr.bf16.mxu1 %v9761_v6 }
 0x845   :  { %v8491_v10 = vshrl.u32 %v1948_v32, 7 }
 0x847   :  { %v8494_v37 = vsub.s32 0, %v8491_v10  ;;  %v8497_v25 = vsub.s32 1, %v8491_v10 }
 0x849   :  { %9820 = vst [vmem:[#allocation43_spill] sm:$0xff] %v8494_v37  ;;  %9821 = vst [vmem:[#allocation44_spill] sm:$0xff] %v8497_v25  ;;  %v8500_v46 = vrot.slane %v1688_v45, %v8494_v37  ;;  %v8503_v47 = vrot.slane %v1688_v45, %v8497_v25 }
 0x8c5   :  { %v2345_v12 = vpop.f32.mrb[96].mxu0 }
 0x8c6   :  { %v7199_v57 = vadd.f32 %v2345_v12, %v8500_v46  ;;  %v2347_v8 = vpop.f32.mrb[97].mxu0 }
 0x8c7   :  { %v7200_v42 = vadd.f32 %v2347_v8, %v8503_v47  ;;  %v2349_v2 = vpop.f32.mrb[98].mxu0 }
 0x8c8   :  { %v7201_v59 = vadd.f32 %v2349_v2, %v8500_v46  ;;  %v2351_v55 = vpop.f32.mrb[99].mxu0  ;;  %v2424_v58 = vmax.f32 %v7199_v57, 0.0 }
 0x8c9   :  { %v7202_v56 = vadd.f32 %v2351_v55, %v8503_v47  ;;  %v2425_v62 = vmax.f32 %v7200_v42, 0.0 }
 0x8ca   :  { %v2426_v60 = vmax.f32 %v7201_v59, 0.0 }
 0x8cb   :  { %v2427_v31 = vmax.f32 %v7202_v56, 0.0 }
 0x8cc   :  { %v8509_v3 = vpack.c.bf16 %v2426_v60, %v2424_v58 }
 0x8cd   :  { %v8511_v50 = vpack.c.bf16 %v2427_v31, %v2425_v62  ;;  %v2355_v40 = vpop.f32.mrb[100].mxu0 }
 0x8ce   :  { %v7203_v13 = vadd.f32 %v2355_v40, %v8500_v46  ;;  %v2357_v21 = vpop.f32.mrb[101].mxu0 }
 0x8cf   :  { %v7204_v15 = vadd.f32 %v2357_v21, %v8503_v47  ;;  %v2359_v20 = vpop.f32.mrb[102].mxu0  ;;  %2670 = vmatprep.subr.bf16.mxu1 %v8511_v50 }
 0x8d0   :  { %v7205_v26 = vadd.f32 %v2359_v20, %v8500_v46  ;;  %v2361_v36 = vpop.f32.mrb[103].mxu0  ;;  %v2428_v44 = vmax.f32 %v7203_v13, 0.0 }
 0x8d1   :  { %v7206_v39 = vadd.f32 %v2361_v36, %v8503_v47  ;;  %v2429_v29 = vmax.f32 %v7204_v15, 0.0 }
 0x8d2   :  { %v2430_v53 = vmax.f32 %v7205_v26, 0.0 }
 0x8d3   :  { %v2431_v1 = vmax.f32 %v7206_v39, 0.0 }
 0x8d4   :  { %v8517_v14 = vpack.c.bf16 %v2430_v53, %v2428_v44 }
 0x8d5   :  { %v8519_v30 = vpack.c.bf16 %v2431_v1, %v2429_v29  ;;  %v2365_v61 = vpop.f32.mrb[104].mxu0 }
 0x8d6   :  { %v7207_v7 = vadd.f32 %v2365_v61, %v8500_v46  ;;  %v2367_v18 = vpop.f32.mrb[105].mxu0 }
 0x8d7   :  { %v7208_v24 = vadd.f32 %v2367_v18, %v8503_v47  ;;  %v2369_v27 = vpop.f32.mrb[106].mxu0 }
 0x8d8   :  { %v7209_v0 = vadd.f32 %v2369_v27, %v8500_v46  ;;  %v2371_v33 = vpop.f32.mrb[107].mxu0  ;;  %v2432_v35 = vmax.f32 %v7207_v7, 0.0 }
 0x8d9   :  { %v7210_v34 = vadd.f32 %v2371_v33, %v8503_v47  ;;  %v2433_v51 = vmax.f32 %v7208_v24, 0.0 }
 0x8da   :  { %v2434_v63 = vmax.f32 %v7209_v0, 0.0 }
 0x8db   :  { %v2435_v5 = vmax.f32 %v7210_v34, 0.0 }
 0x8dc   :  { %v8525_v43 = vpack.c.bf16 %v2434_v63, %v2432_v35 }
 0x8dd   :  { %v8527_v38 = vpack.c.bf16 %v2435_v5, %v2433_v51  ;;  %v2375_v19 = vpop.f32.mrb[108].mxu0 }
 0x8de   :  { %v7211_v52 = vadd.f32 %v2375_v19, %v8500_v46  ;;  %v2377_v48 = vpop.f32.mrb[109].mxu0 }
 0x8df   :  { %v7212_v41 = vadd.f32 %v2377_v48, %v8503_v47  ;;  %v2379_v49 = vpop.f32.mrb[110].mxu0 }
 0x8e0   :  { %v7213_v54 = vadd.f32 %v2379_v49, %v8500_v46  ;;  %v2381_v32 = vpop.f32.mrb[111].mxu0  ;;  %v2436_v12 = vmax.f32 %v7211_v52, 0.0 }
 0x8e1   :  { %v7214_v45 = vadd.f32 %v2381_v32, %v8503_v47  ;;  %v2437_v8 = vmax.f32 %v7212_v41, 0.0 }
 0x8e2   :  { %v2438_v57 = vmax.f32 %v7213_v54, 0.0 }
 0x8e3   :  { %v2439_v42 = vmax.f32 %v7214_v45, 0.0 }
 0x8e4   :  { %v8533_v2 = vpack.c.bf16 %v2438_v57, %v2436_v12 }
 0x8e5   :  { %v8535_v59 = vpack.c.bf16 %v2439_v42, %v2437_v8  ;;  %v2385_v55 = vpop.f32.mrb[112].mxu0 }
 0x8e6   :  { %v7215_v56 = vadd.f32 %v2385_v55, %v8500_v46  ;;  %v2387_v58 = vpop.f32.mrb[113].mxu0 }
 0x8e7   :  { %v7216_v60 = vadd.f32 %v2387_v58, %v8503_v47  ;;  %v2389_v62 = vpop.f32.mrb[114].mxu0 }
 0x8e8   :  { %v7217_v31 = vadd.f32 %v2389_v62, %v8500_v46  ;;  %v2391_v40 = vpop.f32.mrb[115].mxu0  ;;  %v2440_v21 = vmax.f32 %v7215_v56, 0.0 }
 0x8e9   :  { %v7218_v13 = vadd.f32 %v2391_v40, %v8503_v47  ;;  %v2441_v20 = vmax.f32 %v7216_v60, 0.0 }
 0x8ea   :  { %v2442_v15 = vmax.f32 %v7217_v31, 0.0 }
 0x8eb   :  { %v2443_v26 = vmax.f32 %v7218_v13, 0.0 }
 0x8ec   :  { %v8541_v36 = vpack.c.bf16 %v2442_v15, %v2440_v21 }
 0x8ed   :  { %v8543_v39 = vpack.c.bf16 %v2443_v26, %v2441_v20  ;;  %v2395_v44 = vpop.f32.mrb[116].mxu0 }
 0x8ee   :  { %v7219_v53 = vadd.f32 %v2395_v44, %v8500_v46  ;;  %v2397_v29 = vpop.f32.mrb[117].mxu0 }
 0x8ef   :  { %v7220_v1 = vadd.f32 %v2397_v29, %v8503_v47  ;;  %v2399_v61 = vpop.f32.mrb[118].mxu0 }
 0x8f0   :  { %v7221_v7 = vadd.f32 %v2399_v61, %v8500_v46  ;;  %v2401_v18 = vpop.f32.mrb[119].mxu0  ;;  %v2444_v27 = vmax.f32 %v7219_v53, 0.0 }
 0x8f1   :  { %v7222_v24 = vadd.f32 %v2401_v18, %v8503_v47  ;;  %v2445_v33 = vmax.f32 %v7220_v1, 0.0 }
 0x8f2   :  { %v2446_v0 = vmax.f32 %v7221_v7, 0.0 }
 0x8f3   :  { %v2447_v34 = vmax.f32 %v7222_v24, 0.0 }
 0x8f4   :  { %v8549_v35 = vpack.c.bf16 %v2446_v0, %v2444_v27 }
 0x8f5   :  { %v8551_v63 = vpack.c.bf16 %v2447_v34, %v2445_v33  ;;  %v2405_v51 = vpop.f32.mrb[120].mxu0 }
 0x8f6   :  { %v7223_v5 = vadd.f32 %v2405_v51, %v8500_v46  ;;  %v2407_v19 = vpop.f32.mrb[121].mxu0 }
 0x8f7   :  { %v7224_v52 = vadd.f32 %v2407_v19, %v8503_v47  ;;  %v2409_v48 = vpop.f32.mrb[122].mxu0 }
 0x8f8   :  { %v7225_v41 = vadd.f32 %v2409_v48, %v8500_v46  ;;  %v2411_v49 = vpop.f32.mrb[123].mxu0  ;;  %v2448_v32 = vmax.f32 %v7223_v5, 0.0 }
 0x8f9   :  { %v7226_v54 = vadd.f32 %v2411_v49, %v8503_v47  ;;  %v2449_v12 = vmax.f32 %v7224_v52, 0.0 }
 0x8fa   :  { %v2450_v45 = vmax.f32 %v7225_v41, 0.0 }
 0x8fb   :  { %v2451_v57 = vmax.f32 %v7226_v54, 0.0 }
 0x8fc   :  { %v8557_v8 = vpack.c.bf16 %v2450_v45, %v2448_v32 }
 0x8fd   :  { %v8559_v42 = vpack.c.bf16 %v2451_v57, %v2449_v12  ;;  %v2415_v55 = vpop.f32.mrb[124].mxu0 }
 0x8fe   :  { %v7227_v56 = vadd.f32 %v2415_v55, %v8500_v46  ;;  %v2417_v58 = vpop.f32.mrb[125].mxu0 }
 0x8ff   :  { %v7228_v60 = vadd.f32 %v2417_v58, %v8503_v47  ;;  %v2419_v62 = vpop.f32.mrb[126].mxu0 }
 0x900   :  { %v7229_v31 = vadd.f32 %v2419_v62, %v8500_v46  ;;  %v2421_v40 = vpop.f32.mrb[127].mxu0  ;;  %v2452_v21 = vmax.f32 %v7227_v56, 0.0 }
 0x901   :  { %v7230_v13 = vadd.f32 %v2421_v40, %v8503_v47  ;;  %v2453_v20 = vmax.f32 %v7228_v60, 0.0 }
 0x902   :  { %v2454_v15 = vmax.f32 %v7229_v31, 0.0 }
 0x903   :  { %v2455_v26 = vmax.f32 %v7230_v13, 0.0 }
 0x904   :  { %v8565_v44 = vpack.c.bf16 %v2454_v15, %v2452_v21 }
 0x905   :  { %v8567_v53 = vpack.c.bf16 %v2455_v26, %v2453_v20 }
 0x906   :  { %7976 = dma.done.wait [#allocation7], 24576 }
 0x907   :  { %7977 = vsyncadd [#allocation7], 4294942720  ;;  %2671 = vmatpush1.bf16.msra.mxu1 %v8509_v3  ;;  %3416 = vmatprep.mubr.bf16.mxu0 %v8511_v50  ;;  %v2479_v46 = vld [vmem:[#allocation2 + $0x18] sm:$0xff]  ;;  %v2478_v47 = vld [vmem:[#allocation2 + $0x10] sm:$0xff] }
 0x908   :  { %2672 = vmatprep.subr.bf16.mxu1 %v8519_v30  ;;  %v2483_v29 = vld [vmem:[#allocation2 + $0x38] sm:$0xff]  ;;  %3384 = vmatprep.subr.bf16.mxu0 %v2479_v46  ;;  %v2482_v1 = vld [vmem:[#allocation2 + $0x30] sm:$0xff] }
 0x909   :  { %3385 = vmatpush1.bf16.msra.mxu0 %v2478_v47  ;;  %v2487_v61 = vld [vmem:[#allocation2 + $0x58] sm:$0xff]  ;;  %v2486_v7 = vld [vmem:[#allocation2 + $0x50] sm:$0xff] }
 0x90a   :  { %3386 = vmatprep.subr.bf16.mxu0 %v2483_v29  ;;  %v2491_v18 = vld [vmem:[#allocation2 + $0x78] sm:$0xff]  ;;  %v2490_v24 = vld [vmem:[#allocation2 + $0x70] sm:$0xff] }
 0x90b   :  { %2673 = vmatpush1.bf16.msra.mxu1 %v8517_v14  ;;  %v2495_v27 = vld [vmem:[#allocation2 + $0x98] sm:$0xff]  ;;  %v2494_v0 = vld [vmem:[#allocation2 + $0x90] sm:$0xff] }
 0x90c   :  { %2674 = vmatprep.subr.bf16.mxu1 %v8527_v38  ;;  %v2499_v33 = vld [vmem:[#allocation2 + $0xb8] sm:$0xff]  ;;  %v2498_v34 = vld [vmem:[#allocation2 + $0xb0] sm:$0xff] }
 0x90d   :  { %3387 = vmatpush1.bf16.msra.mxu0 %v2482_v1  ;;  %v2503_v51 = vld [vmem:[#allocation2 + $0xd8] sm:$0xff]  ;;  %v2502_v5 = vld [vmem:[#allocation2 + $0xd0] sm:$0xff] }
 0x90e   :  { %3388 = vmatprep.subr.bf16.mxu0 %v2487_v61  ;;  %v2507_v19 = vld [vmem:[#allocation2 + $0xf8] sm:$0xff]  ;;  %v2506_v52 = vld [vmem:[#allocation2 + $0xf0] sm:$0xff] }
 0x90f   :  { %2675 = vmatpush1.bf16.msra.mxu1 %v8525_v43  ;;  %v2511_v48 = vld [vmem:[#allocation2 + $0x118] sm:$0xff]  ;;  %v2510_v41 = vld [vmem:[#allocation2 + $0x110] sm:$0xff] }
 0x910   :  { %2676 = vmatprep.subr.bf16.mxu1 %v8535_v59  ;;  %v2515_v49 = vld [vmem:[#allocation2 + $0x138] sm:$0xff]  ;;  %v2514_v54 = vld [vmem:[#allocation2 + $0x130] sm:$0xff] }
 0x911   :  { %3389 = vmatpush1.bf16.msra.mxu0 %v2486_v7  ;;  %v2519_v32 = vld [vmem:[#allocation2 + $0x158] sm:$0xff]  ;;  %v2518_v45 = vld [vmem:[#allocation2 + $0x150] sm:$0xff] }
 0x912   :  { %3390 = vmatprep.subr.bf16.mxu0 %v2491_v18  ;;  %v2523_v12 = vld [vmem:[#allocation2 + $0x178] sm:$0xff]  ;;  %v2522_v57 = vld [vmem:[#allocation2 + $0x170] sm:$0xff] }
 0x913   :  { %2677 = vmatpush1.bf16.msra.mxu1 %v8533_v2  ;;  %v2527_v55 = vld [vmem:[#allocation2 + $0x198] sm:$0xff]  ;;  %v2526_v56 = vld [vmem:[#allocation2 + $0x190] sm:$0xff] }
 0x914   :  { %2678 = vmatprep.subr.bf16.mxu1 %v8543_v39  ;;  %v2531_v58 = vld [vmem:[#allocation2 + $0x1b8] sm:$0xff]  ;;  %v2530_v60 = vld [vmem:[#allocation2 + $0x1b0] sm:$0xff] }
 0x915   :  { %3391 = vmatpush1.bf16.msra.mxu0 %v2490_v24  ;;  %v2535_v62 = vld [vmem:[#allocation2 + $0x1d8] sm:$0xff]  ;;  %v2534_v31 = vld [vmem:[#allocation2 + $0x1d0] sm:$0xff] }
 0x916   :  { %3392 = vmatprep.subr.bf16.mxu0 %v2495_v27  ;;  %v2539_v40 = vld [vmem:[#allocation2 + $0x1f8] sm:$0xff]  ;;  %v2538_v13 = vld [vmem:[#allocation2 + $0x1f0] sm:$0xff] }
 0x917   :  { %2679 = vmatpush1.bf16.msra.mxu1 %v8541_v36  ;;  %v2543_v21 = vld [vmem:[#allocation2 + $0x218] sm:$0xff]  ;;  %v2542_v15 = vld [vmem:[#allocation2 + $0x210] sm:$0xff] }
 0x918   :  { %2680 = vmatprep.subr.bf16.mxu1 %v8551_v63  ;;  %v2547_v20 = vld [vmem:[#allocation2 + $0x238] sm:$0xff]  ;;  %v2546_v26 = vld [vmem:[#allocation2 + $0x230] sm:$0xff] }
 0x919   :  { %3393 = vmatpush1.bf16.msra.mxu0 %v2494_v0  ;;  %v2551_v46 = vld [vmem:[#allocation2 + $0x258] sm:$0xff]  ;;  %v2550_v47 = vld [vmem:[#allocation2 + $0x250] sm:$0xff] }
 0x91a   :  { %3394 = vmatprep.subr.bf16.mxu0 %v2499_v33  ;;  %v2555_v29 = vld [vmem:[#allocation2 + $0x278] sm:$0xff]  ;;  %v2554_v1 = vld [vmem:[#allocation2 + $0x270] sm:$0xff] }
 0x91b   :  { %2681 = vmatpush1.bf16.msra.mxu1 %v8549_v35  ;;  %v2559_v61 = vld [vmem:[#allocation2 + $0x298] sm:$0xff]  ;;  %v2558_v7 = vld [vmem:[#allocation2 + $0x290] sm:$0xff] }
 0x91c   :  { %2682 = vmatprep.subr.bf16.mxu1 %v8559_v42  ;;  %v2563_v18 = vld [vmem:[#allocation2 + $0x2b8] sm:$0xff]  ;;  %v2562_v24 = vld [vmem:[#allocation2 + $0x2b0] sm:$0xff] }
 0x91d   :  { %3395 = vmatpush1.bf16.msra.mxu0 %v2498_v34  ;;  %v2567_v27 = vld [vmem:[#allocation2 + $0x2d8] sm:$0xff]  ;;  %v2566_v0 = vld [vmem:[#allocation2 + $0x2d0] sm:$0xff] }
 0x91e   :  { %3396 = vmatprep.subr.bf16.mxu0 %v2503_v51  ;;  %v2571_v33 = vld [vmem:[#allocation2 + $0x2f8] sm:$0xff]  ;;  %v2570_v34 = vld [vmem:[#allocation2 + $0x2f0] sm:$0xff] }
 0x91f   :  { %2683 = vmatpush1.bf16.msra.mxu1 %v8557_v8  ;;  %v2575_v51 = vld [vmem:[#allocation2 + $0x318] sm:$0xff] }
 0x920   :  { %2684 = vmatprep.subr.bf16.mxu1 %v8567_v53 }
 0x921   :  { %3397 = vmatpush1.bf16.msra.mxu0 %v2502_v5  ;;  %v2574_v5 = vld [vmem:[#allocation2 + $0x310] sm:$0xff] }
 0x922   :  { %3398 = vmatprep.subr.bf16.mxu0 %v2507_v19  ;;  %v2579_v19 = vld [vmem:[#allocation2 + $0x338] sm:$0xff] }
 0x923   :  { %2685 = vmatpush1.bf16.msra.mxu1 %v8565_v44 }
 0x925   :  { %3399 = vmatpush1.bf16.msra.mxu0 %v2506_v52  ;;  %v2578_v52 = vld [vmem:[#allocation2 + $0x330] sm:$0xff] }
 0x926   :  { %2703 = vmatmul.mubr.bf16.vlgmr.msra.gmra.mrb[96].mxu1 %v8149_v4  ;;  %3400 = vmatprep.subr.bf16.mxu0 %v2511_v48  ;;  %v2583_v48 = vld [vmem:[#allocation2 + $0x358] sm:$0xff] }
 0x927   :  { %2712 = vmatprep.mubr.bf16.mxu1 %v9761_v6 }
 0x929   :  { %3401 = vmatpush1.bf16.msra.mxu0 %v2510_v41  ;;  %v2582_v41 = vld [vmem:[#allocation2 + $0x350] sm:$0xff] }
 0x92a   :  { %3402 = vmatprep.subr.bf16.mxu0 %v2515_v49  ;;  %v2587_v49 = vld [vmem:[#allocation2 + $0x378] sm:$0xff] }
 0x92d   :  { %3403 = vmatpush1.bf16.msra.mxu0 %v2514_v54  ;;  %v2586_v54 = vld [vmem:[#allocation2 + $0x370] sm:$0xff] }
 0x92e   :  { %2713 = vmatmul.mubr.bf16.gmra.mrb[100].mxu1 %v8171_v9  ;;  %3404 = vmatprep.subr.bf16.mxu0 %v2519_v32  ;;  %v2591_v32 = vld [vmem:[#allocation2 + $0x398] sm:$0xff] }
 0x92f   :  { %2722 = vmatprep.mubr.bf16.mxu1 %v9761_v6 }
 0x931   :  { %3405 = vmatpush1.bf16.msra.mxu0 %v2518_v45  ;;  %v2590_v45 = vld [vmem:[#allocation2 + $0x390] sm:$0xff] }
 0x932   :  { %3406 = vmatprep.subr.bf16.mxu0 %v2523_v12  ;;  %v2595_v12 = vld [vmem:[#allocation2 + $0x3b8] sm:$0xff] }
 0x935   :  { %3407 = vmatpush1.bf16.msra.mxu0 %v2522_v57  ;;  %v2594_v57 = vld [vmem:[#allocation2 + $0x3b0] sm:$0xff] }
 0x936   :  { %2723 = vmatmul.mubr.bf16.gmra.mrb[104].mxu1 %v8173_v11  ;;  %3408 = vmatprep.subr.bf16.mxu0 %v2527_v55  ;;  %v2599_v55 = vld [vmem:[#allocation2 + $0x3d8] sm:$0xff] }
 0x937   :  { %2732 = vmatprep.mubr.bf16.mxu1 %v9761_v6 }
 0x939   :  { %3409 = vmatpush1.bf16.msra.mxu0 %v2526_v56  ;;  %v2598_v56 = vld [vmem:[#allocation2 + $0x3d0] sm:$0xff] }
 0x93a   :  { %3410 = vmatprep.subr.bf16.mxu0 %v2531_v58  ;;  %v2603_v58 = vld [vmem:[#allocation2 + $0x3f8] sm:$0xff] }
 0x93d   :  { %3411 = vmatpush1.bf16.msra.mxu0 %v2530_v60  ;;  %v2602_v60 = vld [vmem:[#allocation2 + $0x3f0] sm:$0xff] }
 0x93e   :  { %2733 = vmatmul.mubr.bf16.gmra.mrb[108].mxu1 %v8178_v16  ;;  %3412 = vmatprep.subr.bf16.mxu0 %v2535_v62 }
 0x93f   :  { %2742 = vmatprep.mubr.bf16.mxu1 %v9761_v6 }
 0x941   :  { %3413 = vmatpush1.bf16.msra.mxu0 %v2534_v31 }
 0x942   :  { %3414 = vmatprep.subr.bf16.mxu0 %v2539_v40 }
 0x945   :  { %3415 = vmatpush1.bf16.msra.mxu0 %v2538_v13 }
 0x946   :  { %2743 = vmatmul.mubr.bf16.gmra.mrb[112].mxu1 %v8180_v17  ;;  %3497 = vmatprep.subr.bf16.mxu0 %v2543_v21 }
 0x947   :  { %2752 = vmatprep.mubr.bf16.mxu1 %v9761_v6 }
 0x948   :  { %3417 = vmatmul.mubr.bf16.vlgmr.msra.gmra.mrb[128].mxu0 %v8509_v3 }
 0x949   :  { %3498 = vmatpush1.bf16.msra.mxu0 %v2542_v15  ;;  %3426 = vmatprep.mubr.bf16.mxu0 %v8519_v30 }
 0x94a   :  { %3499 = vmatprep.subr.bf16.mxu0 %v2547_v20 }
 0x94d   :  { %3500 = vmatpush1.bf16.msra.mxu0 %v2546_v26 }
 0x94e   :  { %2753 = vmatmul.mubr.bf16.gmra.mrb[116].mxu1 %v8184_v22  ;;  %3501 = vmatprep.subr.bf16.mxu0 %v2551_v46 }
 0x94f   :  { %2762 = vmatprep.mubr.bf16.mxu1 %v9761_v6 }
 0x950   :  { %3427 = vmatmul.mubr.bf16.gmra.mrb[132].mxu0 %v8517_v14 }
 0x951   :  { %3502 = vmatpush1.bf16.msra.mxu0 %v2550_v47  ;;  %3436 = vmatprep.mubr.bf16.mxu0 %v8527_v38 }
 0x952   :  { %3503 = vmatprep.subr.bf16.mxu0 %v2555_v29 }
 0x955   :  { %3504 = vmatpush1.bf16.msra.mxu0 %v2554_v1 }
 0x956   :  { %2763 = vmatmul.mubr.bf16.gmra.mrb[120].mxu1 %v8186_v23  ;;  %3505 = vmatprep.subr.bf16.mxu0 %v2559_v61 }
 0x957   :  { %2772 = vmatprep.mubr.bf16.mxu1 %v9761_v6 }
 0x958   :  { %3437 = vmatmul.mubr.bf16.gmra.mrb[136].mxu0 %v8525_v43 }
 0x959   :  { %3506 = vmatpush1.bf16.msra.mxu0 %v2558_v7  ;;  %3446 = vmatprep.mubr.bf16.mxu0 %v8535_v59 }
 0x95a   :  { %3507 = vmatprep.subr.bf16.mxu0 %v2563_v18 }
 0x95d   :  { %3508 = vmatpush1.bf16.msra.mxu0 %v2562_v24 }
 0x95e   :  { %2773 = vmatmul.mubr.bf16.gmra.mrb[124].mxu1 %v8190_v28  ;;  %3509 = vmatprep.subr.bf16.mxu0 %v2567_v27 }
 0x95f   :  { %2831 = vmatprep.mubr.bf16.mxu1 %v9761_v6 }
 0x960   :  { %3447 = vmatmul.mubr.bf16.gmra.mrb[140].mxu0 %v8533_v2 }
 0x961   :  { %3510 = vmatpush1.bf16.msra.mxu0 %v2566_v0  ;;  %3456 = vmatprep.mubr.bf16.mxu0 %v8543_v39 }
 0x962   :  { %3511 = vmatprep.subr.bf16.mxu0 %v2571_v33 }
 0x965   :  { %3512 = vmatpush1.bf16.msra.mxu0 %v2570_v34 }
 0x966   :  { %3513 = vmatprep.subr.bf16.mxu0 %v2575_v51 }
 0x968   :  { %3457 = vmatmul.mubr.bf16.gmra.mrb[144].mxu0 %v8541_v36 }
 0x969   :  { %3514 = vmatpush1.bf16.msra.mxu0 %v2574_v5  ;;  %3466 = vmatprep.mubr.bf16.mxu0 %v8551_v63 }
 0x96a   :  { %3515 = vmatprep.subr.bf16.mxu0 %v2579_v19 }
 0x96d   :  { %3516 = vmatpush1.bf16.msra.mxu0 %v2578_v52 }
 0x96e   :  { %3517 = vmatprep.subr.bf16.mxu0 %v2583_v48 }
 0x970   :  { %3467 = vmatmul.mubr.bf16.gmra.mrb[148].mxu0 %v8549_v35 }
 0x971   :  { %3518 = vmatpush1.bf16.msra.mxu0 %v2582_v41  ;;  %3476 = vmatprep.mubr.bf16.mxu0 %v8559_v42 }
 0x972   :  { %3519 = vmatprep.subr.bf16.mxu0 %v2587_v49 }
 0x975   :  { %3520 = vmatpush1.bf16.msra.mxu0 %v2586_v54 }
 0x976   :  { %3521 = vmatprep.subr.bf16.mxu0 %v2591_v32 }
 0x978   :  { %3477 = vmatmul.mubr.bf16.gmra.mrb[152].mxu0 %v8557_v8 }
 0x979   :  { %3522 = vmatpush1.bf16.msra.mxu0 %v2590_v45  ;;  %3486 = vmatprep.mubr.bf16.mxu0 %v8567_v53 }
 0x97a   :  { %3523 = vmatprep.subr.bf16.mxu0 %v2595_v12 }
 0x97d   :  { %3524 = vmatpush1.bf16.msra.mxu0 %v2594_v57 }
 0x97e   :  { %3525 = vmatprep.subr.bf16.mxu0 %v2599_v55 }
 0x980   :  { %3487 = vmatmul.mubr.bf16.gmra.mrb[156].mxu0 %v8565_v44 }
 0x981   :  { %3526 = vmatpush1.bf16.msra.mxu0 %v2598_v56 }
 0x982   :  { %3527 = vmatprep.subr.bf16.mxu0 %v2603_v58 }
 0x985   :  { %3528 = vmatpush1.bf16.msra.mxu0 %v2602_v60 }
 0x9f9   :  { %v2704_v62 = vpop.f32.mrb[96].mxu1 }
 0x9fa   :  { %v2706_v31 = vpop.f32.mrb[97].mxu1 }
 0x9fb   :  { %v2708_v40 = vpop.f32.mrb[98].mxu1 }
 0x9fc   :  { %v8618_v13 = vpack.c.bf16 %v2708_v40, %v2704_v62  ;;  %v2710_v21 = vpop.f32.mrb[99].mxu1 }
 0x9fd   :  { %v8620_v15 = vpack.c.bf16 %v2710_v21, %v2706_v31 }
 0x9ff   :  { %2799 = vmatprep.subr.bf16.mxu1 %v8620_v15  ;;  %3529 = vmatprep.mubr.bf16.mxu0 %v8620_v15 }
 0xa00   :  { %2800 = vmatpush1.bf16.msra.mxu1 %v8618_v13  ;;  %3530 = vmatmul.mubr.bf16.vlgmr.msra.gmra.mrb[128].mxu0 %v8618_v13 }
 0xa01   :  { %v2714_v20 = vpop.f32.mrb[100].mxu1 }
 0xa02   :  { %v2716_v26 = vpop.f32.mrb[101].mxu1 }
 0xa03   :  { %v2718_v46 = vpop.f32.mrb[102].mxu1 }
 0xa04   :  { %v8626_v47 = vpack.c.bf16 %v2718_v46, %v2714_v20  ;;  %v2720_v29 = vpop.f32.mrb[103].mxu1 }
 0xa05   :  { %v8628_v1 = vpack.c.bf16 %v2720_v29, %v2716_v26 }
 0xa07   :  { %2801 = vmatprep.subr.bf16.mxu1 %v8628_v1  ;;  %3539 = vmatprep.mubr.bf16.mxu0 %v8628_v1 }
 0xa08   :  { %2802 = vmatpush1.bf16.msra.mxu1 %v8626_v47  ;;  %3540 = vmatmul.mubr.bf16.gmra.mrb[132].mxu0 %v8626_v47 }
 0xa09   :  { %v2724_v61 = vpop.f32.mrb[104].mxu1 }
 0xa0a   :  { %v2726_v7 = vpop.f32.mrb[105].mxu1 }
 0xa0b   :  { %v2728_v18 = vpop.f32.mrb[106].mxu1 }
 0xa0c   :  { %v8634_v24 = vpack.c.bf16 %v2728_v18, %v2724_v61  ;;  %v2730_v27 = vpop.f32.mrb[107].mxu1 }
 0xa0d   :  { %v8636_v0 = vpack.c.bf16 %v2730_v27, %v2726_v7 }
 0xa0f   :  { %2803 = vmatprep.subr.bf16.mxu1 %v8636_v0  ;;  %3549 = vmatprep.mubr.bf16.mxu0 %v8636_v0 }
 0xa10   :  { %2804 = vmatpush1.bf16.msra.mxu1 %v8634_v24  ;;  %3550 = vmatmul.mubr.bf16.gmra.mrb[136].mxu0 %v8634_v24 }
 0xa11   :  { %v2734_v33 = vpop.f32.mrb[108].mxu1 }
 0xa12   :  { %v2736_v34 = vpop.f32.mrb[109].mxu1 }
 0xa13   :  { %v2738_v51 = vpop.f32.mrb[110].mxu1 }
 0xa14   :  { %v8642_v5 = vpack.c.bf16 %v2738_v51, %v2734_v33  ;;  %v2740_v19 = vpop.f32.mrb[111].mxu1  ;;  %v2477_v33 = vld [vmem:[#allocation2 + $0x8] sm:$0xff] }
 0xa15   :  { %v8644_v52 = vpack.c.bf16 %v2740_v19, %v2736_v34  ;;  %v2476_v34 = vld [vmem:[#allocation2] sm:$0xff]  ;;  %v2481_v51 = vld [vmem:[#allocation2 + $0x28] sm:$0xff] }
 0xa16   :  { %v2480_v19 = vld [vmem:[#allocation2 + $0x20] sm:$0xff] }
 0xa17   :  { %2805 = vmatprep.subr.bf16.mxu1 %v8644_v52  ;;  %3559 = vmatprep.mubr.bf16.mxu0 %v8644_v52 }
 0xa18   :  { %2806 = vmatpush1.bf16.msra.mxu1 %v8642_v5  ;;  %3560 = vmatmul.mubr.bf16.gmra.mrb[140].mxu0 %v8642_v5 }
 0xa19   :  { %v2744_v48 = vpop.f32.mrb[112].mxu1 }
 0xa1a   :  { %v2746_v41 = vpop.f32.mrb[113].mxu1 }
 0xa1b   :  { %v2748_v49 = vpop.f32.mrb[114].mxu1 }
 0xa1c   :  { %v8650_v54 = vpack.c.bf16 %v2748_v49, %v2744_v48  ;;  %v2750_v32 = vpop.f32.mrb[115].mxu1  ;;  %v2485_v48 = vld [vmem:[#allocation2 + $0x48] sm:$0xff] }
 0xa1d   :  { %v8652_v45 = vpack.c.bf16 %v2750_v32, %v2746_v41  ;;  %v2484_v41 = vld [vmem:[#allocation2 + $0x40] sm:$0xff]  ;;  %v2489_v49 = vld [vmem:[#allocation2 + $0x68] sm:$0xff] }
 0xa1e   :  { %v2488_v32 = vld [vmem:[#allocation2 + $0x60] sm:$0xff] }
 0xa1f   :  { %2807 = vmatprep.subr.bf16.mxu1 %v8652_v45  ;;  %3569 = vmatprep.mubr.bf16.mxu0 %v8652_v45 }
 0xa20   :  { %2808 = vmatpush1.bf16.msra.mxu1 %v8650_v54  ;;  %3570 = vmatmul.mubr.bf16.gmra.mrb[144].mxu0 %v8650_v54 }
 0xa21   :  { %v2754_v12 = vpop.f32.mrb[116].mxu1 }
 0xa22   :  { %v2756_v57 = vpop.f32.mrb[117].mxu1 }
 0xa23   :  { %v2758_v55 = vpop.f32.mrb[118].mxu1 }
 0xa24   :  { %v8658_v56 = vpack.c.bf16 %v2758_v55, %v2754_v12  ;;  %v2760_v58 = vpop.f32.mrb[119].mxu1  ;;  %v2493_v12 = vld [vmem:[#allocation2 + $0x88] sm:$0xff] }
 0xa25   :  { %v8660_v60 = vpack.c.bf16 %v2760_v58, %v2756_v57  ;;  %v2492_v57 = vld [vmem:[#allocation2 + $0x80] sm:$0xff]  ;;  %v2497_v55 = vld [vmem:[#allocation2 + $0xa8] sm:$0xff] }
 0xa26   :  { %v2496_v58 = vld [vmem:[#allocation2 + $0xa0] sm:$0xff] }
 0xa27   :  { %2809 = vmatprep.subr.bf16.mxu1 %v8660_v60  ;;  %3579 = vmatprep.mubr.bf16.mxu0 %v8660_v60 }
 0xa28   :  { %2810 = vmatpush1.bf16.msra.mxu1 %v8658_v56  ;;  %3580 = vmatmul.mubr.bf16.gmra.mrb[148].mxu0 %v8658_v56 }
 0xa29   :  { %v2764_v62 = vpop.f32.mrb[120].mxu1 }
 0xa2a   :  { %v2766_v31 = vpop.f32.mrb[121].mxu1 }
 0xa2b   :  { %v2768_v40 = vpop.f32.mrb[122].mxu1 }
 0xa2c   :  { %v8666_v21 = vpack.c.bf16 %v2768_v40, %v2764_v62  ;;  %v2770_v20 = vpop.f32.mrb[123].mxu1  ;;  %v2501_v62 = vld [vmem:[#allocation2 + $0xc8] sm:$0xff] }
 0xa2d   :  { %v8668_v26 = vpack.c.bf16 %v2770_v20, %v2766_v31  ;;  %v2500_v31 = vld [vmem:[#allocation2 + $0xc0] sm:$0xff]  ;;  %v2505_v40 = vld [vmem:[#allocation2 + $0xe8] sm:$0xff]  ;;  %v2607_v20 = vld [vmem:[#allocation2 + $0x418] sm:$0xff] }
 0xa2e   :  { %3610 = vmatprep.subr.bf16.mxu0 %v2607_v20  ;;  %v2525_v20 = vld [vmem:[#allocation2 + $0x188] sm:$0xff] }
 0xa2f   :  { %2811 = vmatprep.subr.bf16.mxu1 %v8668_v26  ;;  %3589 = vmatprep.mubr.bf16.mxu0 %v8668_v26 }
 0xa30   :  { %2812 = vmatpush1.bf16.msra.mxu1 %v8666_v21  ;;  %3590 = vmatmul.mubr.bf16.gmra.mrb[152].mxu0 %v8666_v21 }
 0xa31   :  { %v2774_v46 = vpop.f32.mrb[124].mxu1 }
 0xa32   :  { %v2776_v29 = vpop.f32.mrb[125].mxu1 }
 0xa33   :  { %v2778_v61 = vpop.f32.mrb[126].mxu1 }
 0xa34   :  { %v8674_v7 = vpack.c.bf16 %v2778_v61, %v2774_v46  ;;  %v2780_v18 = vpop.f32.mrb[127].mxu1  ;;  %v2504_v46 = vld [vmem:[#allocation2 + $0xe0] sm:$0xff]  ;;  %v2611_v61 = vld [vmem:[#allocation2 + $0x438] sm:$0xff] }
 0xa35   :  { %v8676_v27 = vpack.c.bf16 %v2780_v18, %v2776_v29  ;;  %v2606_v29 = vld [vmem:[#allocation2 + $0x410] sm:$0xff]  ;;  %v2509_v18 = vld [vmem:[#allocation2 + $0x108] sm:$0xff] }
 0xa36   :  { %3611 = vmatpush1.bf16.msra.mxu0 %v2606_v29  ;;  %v2524_v29 = vld [vmem:[#allocation2 + $0x180] sm:$0xff] }
 0xa37   :  { %2813 = vmatprep.subr.bf16.mxu1 %v8676_v27  ;;  %3599 = vmatprep.mubr.bf16.mxu0 %v8676_v27 }
 0xa38   :  { %2814 = vmatpush1.bf16.msra.mxu1 %v8674_v7  ;;  %3600 = vmatmul.mubr.bf16.gmra.mrb[156].mxu0 %v8674_v7 }
 0xa39   :  { %3045 = vmatprep.subr.bf16.mxu1 %v2477_v33  ;;  %3612 = vmatprep.subr.bf16.mxu0 %v2611_v61  ;;  %v2610_v33 = vld [vmem:[#allocation2 + $0x430] sm:$0xff]  ;;  %v2529_v61 = vld [vmem:[#allocation2 + $0x1a8] sm:$0xff] }
 0xa3a   :  { %3613 = vmatpush1.bf16.msra.mxu0 %v2610_v33  ;;  %v2528_v33 = vld [vmem:[#allocation2 + $0x1a0] sm:$0xff] }
 0xa3b   :  { %2832 = vmatmul.mubr.bf16.vlgmr.msra.gmra.mrb[128].mxu1 %v8149_v4 }
 0xa3c   :  { %3046 = vmatpush1.bf16.msra.mxu1 %v2476_v34  ;;  %2841 = vmatprep.mubr.bf16.mxu1 %v9761_v6  ;;  %v2508_v34 = vld [vmem:[#allocation2 + $0x100] sm:$0xff] }
 0xa3d   :  { %3047 = vmatprep.subr.bf16.mxu1 %v2481_v51  ;;  %v2513_v51 = vld [vmem:[#allocation2 + $0x128] sm:$0xff] }
 0xa40   :  { %3048 = vmatpush1.bf16.msra.mxu1 %v2480_v19  ;;  %v2615_v19 = vld [vmem:[#allocation2 + $0x458] sm:$0xff] }
 0xa41   :  { %3049 = vmatprep.subr.bf16.mxu1 %v2485_v48  ;;  %v2512_v48 = vld [vmem:[#allocation2 + $0x120] sm:$0xff]  ;;  %3614 = vmatprep.subr.bf16.mxu0 %v2615_v19  ;;  %v2533_v19 = vld [vmem:[#allocation2 + $0x1c8] sm:$0xff] }
 0xa43   :  { %2842 = vmatmul.mubr.bf16.gmra.mrb[132].mxu1 %v8171_v9 }
 0xa44   :  { %3050 = vmatpush1.bf16.msra.mxu1 %v2484_v41  ;;  %2851 = vmatprep.mubr.bf16.mxu1 %v9761_v6  ;;  %v2614_v41 = vld [vmem:[#allocation2 + $0x450] sm:$0xff] }
 0xa45   :  { %3051 = vmatprep.subr.bf16.mxu1 %v2489_v49  ;;  %v2619_v49 = vld [vmem:[#allocation2 + $0x478] sm:$0xff]  ;;  %3615 = vmatpush1.bf16.msra.mxu0 %v2614_v41  ;;  %v2532_v41 = vld [vmem:[#allocation2 + $0x1c0] sm:$0xff] }
 0xa46   :  { %3616 = vmatprep.subr.bf16.mxu0 %v2619_v49  ;;  %v2537_v49 = vld [vmem:[#allocation2 + $0x1e8] sm:$0xff] }
 0xa48   :  { %3052 = vmatpush1.bf16.msra.mxu1 %v2488_v32  ;;  %v2517_v32 = vld [vmem:[#allocation2 + $0x148] sm:$0xff] }
 0xa49   :  { %3053 = vmatprep.subr.bf16.mxu1 %v2493_v12  ;;  %v2618_v12 = vld [vmem:[#allocation2 + $0x470] sm:$0xff] }
 0xa4a   :  { %3617 = vmatpush1.bf16.msra.mxu0 %v2618_v12  ;;  %v2638_v12 = vld [vmem:[#allocation2 + $0x510] sm:$0xff] }
 0xa4b   :  { %2852 = vmatmul.mubr.bf16.gmra.mrb[136].mxu1 %v8173_v11 }
 0xa4c   :  { %3054 = vmatpush1.bf16.msra.mxu1 %v2492_v57  ;;  %2861 = vmatprep.mubr.bf16.mxu1 %v9761_v6  ;;  %v2516_v57 = vld [vmem:[#allocation2 + $0x140] sm:$0xff] }
 0xa4d   :  { %3055 = vmatprep.subr.bf16.mxu1 %v2497_v55  ;;  %v2521_v55 = vld [vmem:[#allocation2 + $0x168] sm:$0xff] }
 0xa50   :  { %3056 = vmatpush1.bf16.msra.mxu1 %v2496_v58  ;;  %v2623_v58 = vld [vmem:[#allocation2 + $0x498] sm:$0xff] }
 0xa51   :  { %3057 = vmatprep.subr.bf16.mxu1 %v2501_v62  ;;  %v2520_v62 = vld [vmem:[#allocation2 + $0x160] sm:$0xff]  ;;  %3618 = vmatprep.subr.bf16.mxu0 %v2623_v58  ;;  %v2541_v58 = vld [vmem:[#allocation2 + $0x208] sm:$0xff] }
 0xa53   :  { %2862 = vmatmul.mubr.bf16.gmra.mrb[140].mxu1 %v8178_v16 }
 0xa54   :  { %3058 = vmatpush1.bf16.msra.mxu1 %v2500_v31  ;;  %2871 = vmatprep.mubr.bf16.mxu1 %v9761_v6  ;;  %v2622_v31 = vld [vmem:[#allocation2 + $0x490] sm:$0xff] }
 0xa55   :  { %3059 = vmatprep.subr.bf16.mxu1 %v2505_v40  ;;  %v2627_v40 = vld [vmem:[#allocation2 + $0x4b8] sm:$0xff]  ;;  %3619 = vmatpush1.bf16.msra.mxu0 %v2622_v31 }
 0xa56   :  { %3620 = vmatprep.subr.bf16.mxu0 %v2627_v40  ;;  %v2647_v31 = vld [vmem:[#allocation2 + $0x558] sm:$0xff]  ;;  %v2540_v40 = vld [vmem:[#allocation2 + $0x200] sm:$0xff] }
 0xa58   :  { %3060 = vmatpush1.bf16.msra.mxu1 %v2504_v46  ;;  %v2626_v46 = vld [vmem:[#allocation2 + $0x4b0] sm:$0xff] }
 0xa59   :  { %3061 = vmatprep.subr.bf16.mxu1 %v2509_v18  ;;  %3621 = vmatpush1.bf16.msra.mxu0 %v2626_v46  ;;  %v2631_v18 = vld [vmem:[#allocation2 + $0x4d8] sm:$0xff]  ;;  %v2646_v46 = vld [vmem:[#allocation2 + $0x550] sm:$0xff] }
 0xa5a   :  { %3622 = vmatprep.subr.bf16.mxu0 %v2631_v18  ;;  %v2650_v18 = vld [vmem:[#allocation2 + $0x570] sm:$0xff] }
 0xa5b   :  { %2872 = vmatmul.mubr.bf16.gmra.mrb[144].mxu1 %v8180_v17 }
 0xa5c   :  { %3062 = vmatpush1.bf16.msra.mxu1 %v2508_v34  ;;  %2881 = vmatprep.mubr.bf16.mxu1 %v9761_v6  ;;  %v2630_v34 = vld [vmem:[#allocation2 + $0x4d0] sm:$0xff] }
 0xa5d   :  { %3063 = vmatprep.subr.bf16.mxu1 %v2513_v51  ;;  %v2635_v51 = vld [vmem:[#allocation2 + $0x4f8] sm:$0xff]  ;;  %3623 = vmatpush1.bf16.msra.mxu0 %v2630_v34  ;;  %v2548_v34 = vld [vmem:[#allocation2 + $0x240] sm:$0xff] }
 0xa5e   :  { %3624 = vmatprep.subr.bf16.mxu0 %v2635_v51  ;;  %v2553_v51 = vld [vmem:[#allocation2 + $0x268] sm:$0xff] }
 0xa60   :  { %3064 = vmatpush1.bf16.msra.mxu1 %v2512_v48  ;;  %v2634_v48 = vld [vmem:[#allocation2 + $0x4f0] sm:$0xff] }
 0xa61   :  { %3065 = vmatprep.subr.bf16.mxu1 %v2517_v32  ;;  %3625 = vmatpush1.bf16.msra.mxu0 %v2634_v48  ;;  %v2639_v32 = vld [vmem:[#allocation2 + $0x518] sm:$0xff]  ;;  %v2557_v48 = vld [vmem:[#allocation2 + $0x288] sm:$0xff] }
 0xa62   :  { %3626 = vmatprep.subr.bf16.mxu0 %v2639_v32  ;;  %v2556_v32 = vld [vmem:[#allocation2 + $0x280] sm:$0xff] }
 0xa63   :  { %2882 = vmatmul.mubr.bf16.gmra.mrb[148].mxu1 %v8184_v22 }
 0xa64   :  { %3066 = vmatpush1.bf16.msra.mxu1 %v2516_v57  ;;  %2891 = vmatprep.mubr.bf16.mxu1 %v9761_v6  ;;  %v2643_v57 = vld [vmem:[#allocation2 + $0x538] sm:$0xff] }
 0xa65   :  { %3067 = vmatprep.subr.bf16.mxu1 %v2521_v55  ;;  %v2536_v55 = vld [vmem:[#allocation2 + $0x1e0] sm:$0xff]  ;;  %3627 = vmatpush1.bf16.msra.mxu0 %v2638_v12  ;;  %v2561_v12 = vld [vmem:[#allocation2 + $0x2a8] sm:$0xff] }
 0xa66   :  { %3628 = vmatprep.subr.bf16.mxu0 %v2643_v57  ;;  %v2565_v57 = vld [vmem:[#allocation2 + $0x2c8] sm:$0xff] }
 0xa68   :  { %3068 = vmatpush1.bf16.msra.mxu1 %v2520_v62  ;;  %v2642_v62 = vld [vmem:[#allocation2 + $0x530] sm:$0xff] }
 0xa69   :  { %3069 = vmatprep.subr.bf16.mxu1 %v2525_v20  ;;  %v2545_v20 = vld [vmem:[#allocation2 + $0x228] sm:$0xff]  ;;  %3629 = vmatpush1.bf16.msra.mxu0 %v2642_v62  ;;  %v2666_v62 = vld [vmem:[#allocation2 + $0x5f0] sm:$0xff] }
 0xa6a   :  { %3630 = vmatprep.subr.bf16.mxu0 %v2647_v31  ;;  %v2569_v31 = vld [vmem:[#allocation2 + $0x2e8] sm:$0xff] }
 0xa6b   :  { %2892 = vmatmul.mubr.bf16.gmra.mrb[152].mxu1 %v8186_v23 }
 0xa6c   :  { %3070 = vmatpush1.bf16.msra.mxu1 %v2524_v29  ;;  %2901 = vmatprep.mubr.bf16.mxu1 %v9761_v6  ;;  %v2544_v29 = vld [vmem:[#allocation2 + $0x220] sm:$0xff] }
 0xa6d   :  { %3071 = vmatprep.subr.bf16.mxu1 %v2529_v61  ;;  %v2549_v61 = vld [vmem:[#allocation2 + $0x248] sm:$0xff]  ;;  %3631 = vmatpush1.bf16.msra.mxu0 %v2646_v46  ;;  %v2576_v46 = vld [vmem:[#allocation2 + $0x320] sm:$0xff] }
 0xa70   :  { %3072 = vmatpush1.bf16.msra.mxu1 %v2528_v33  ;;  %v2655_v33 = vld [vmem:[#allocation2 + $0x598] sm:$0xff] }
 0xa71   :  { %3073 = vmatprep.subr.bf16.mxu1 %v2533_v19  ;;  %v2552_v19 = vld [vmem:[#allocation2 + $0x260] sm:$0xff] }
 0xa73   :  { %2902 = vmatmul.mubr.bf16.gmra.mrb[156].mxu1 %v8190_v28 }
 0xa74   :  { %3074 = vmatpush1.bf16.msra.mxu1 %v2532_v41  ;;  %3077 = vmatprep.mubr.bf16.mxu1 %v8511_v50  ;;  %v2651_v50 = vld [vmem:[#allocation2 + $0x578] sm:$0xff]  ;;  %v2658_v41 = vld [vmem:[#allocation2 + $0x5b0] sm:$0xff] }
 0xa75   :  { %3075 = vmatprep.subr.bf16.mxu1 %v2537_v49  ;;  %3632 = vmatprep.subr.bf16.mxu0 %v2651_v50  ;;  %v2663_v49 = vld [vmem:[#allocation2 + $0x5d8] sm:$0xff]  ;;  %v2581_v50 = vld [vmem:[#allocation2 + $0x348] sm:$0xff] }
 0xa76   :  { %3633 = vmatpush1.bf16.msra.mxu0 %v2650_v18  ;;  %v2593_v18 = vld [vmem:[#allocation2 + $0x3a8] sm:$0xff] }
 0xa77   :  { %3634 = vmatprep.subr.bf16.mxu0 %v2655_v33  ;;  %v2597_v33 = vld [vmem:[#allocation2 + $0x3c8] sm:$0xff] }
 0xa78   :  { %3076 = vmatpush1.bf16.msra.mxu1 %v2536_v55  ;;  %v2667_v55 = vld [vmem:[#allocation2 + $0x5f8] sm:$0xff] }
 0xa79   :  { %3158 = vmatprep.subr.bf16.mxu1 %v2541_v58  ;;  %v2564_v58 = vld [vmem:[#allocation2 + $0x2c0] sm:$0xff] }
 0xa7b   :  { %3078 = vmatmul.mubr.bf16.vlgmr.msra.gmra.mrb[160].mxu1 %v8509_v3  ;;  %v2654_v3 = vld [vmem:[#allocation2 + $0x590] sm:$0xff] }
 0xa7c   :  { %3159 = vmatpush1.bf16.msra.mxu1 %v2540_v40  ;;  %3087 = vmatprep.mubr.bf16.mxu1 %v8519_v30  ;;  %v2659_v30 = vld [vmem:[#allocation2 + $0x5b8] sm:$0xff]  ;;  %v2572_v40 = vld [vmem:[#allocation2 + $0x300] sm:$0xff] }
 0xa7d   :  { %3160 = vmatprep.subr.bf16.mxu1 %v2545_v20  ;;  %3635 = vmatpush1.bf16.msra.mxu0 %v2654_v3  ;;  %v2577_v20 = vld [vmem:[#allocation2 + $0x328] sm:$0xff] }
 0xa7e   :  { %3636 = vmatprep.subr.bf16.mxu0 %v2659_v30  ;;  %v2609_v3 = vld [vmem:[#allocation2 + $0x428] sm:$0xff] }
 0xa7f   :  { %v2613_v30 = vld [vmem:[#allocation2 + $0x448] sm:$0xff] }
 0xa80   :  { %3161 = vmatpush1.bf16.msra.mxu1 %v2544_v29  ;;  %v2585_v29 = vld [vmem:[#allocation2 + $0x368] sm:$0xff] }
 0xa81   :  { %3162 = vmatprep.subr.bf16.mxu1 %v2549_v61  ;;  %3637 = vmatpush1.bf16.msra.mxu0 %v2658_v41  ;;  %v2589_v61 = vld [vmem:[#allocation2 + $0x388] sm:$0xff]  ;;  %v2624_v41 = vld [vmem:[#allocation2 + $0x4a0] sm:$0xff] }
 0xa82   :  { %3638 = vmatprep.subr.bf16.mxu0 %v2663_v49  ;;  %v2629_v49 = vld [vmem:[#allocation2 + $0x4c8] sm:$0xff] }
 0xa83   :  { %3088 = vmatmul.mubr.bf16.gmra.mrb[164].mxu1 %v8517_v14  ;;  %v2560_v14 = vld [vmem:[#allocation2 + $0x2a0] sm:$0xff] }
 0xa84   :  { %3163 = vmatpush1.bf16.msra.mxu1 %v2548_v34  ;;  %3097 = vmatprep.mubr.bf16.mxu1 %v8527_v38  ;;  %v2662_v38 = vld [vmem:[#allocation2 + $0x5d0] sm:$0xff]  ;;  %v2601_v34 = vld [vmem:[#allocation2 + $0x3e8] sm:$0xff] }
 0xa85   :  { %3164 = vmatprep.subr.bf16.mxu1 %v2553_v51  ;;  %3639 = vmatpush1.bf16.msra.mxu0 %v2662_v38  ;;  %v2605_v51 = vld [vmem:[#allocation2 + $0x408] sm:$0xff] }
 0xa86   :  { %3640 = vmatprep.subr.bf16.mxu0 %v2667_v55  ;;  %v2645_v38 = vld [vmem:[#allocation2 + $0x548] sm:$0xff] }
 0xa87   :  { %v2653_v55 = vld [vmem:[#allocation2 + $0x588] sm:$0xff] }
 0xa88   :  { %3165 = vmatpush1.bf16.msra.mxu1 %v2552_v19  ;;  %v2617_v19 = vld [vmem:[#allocation2 + $0x468] sm:$0xff] }
 0xa89   :  { %3166 = vmatprep.subr.bf16.mxu1 %v2557_v48  ;;  %3641 = vmatpush1.bf16.msra.mxu0 %v2666_v62  ;;  %v2621_v48 = vld [vmem:[#allocation2 + $0x488] sm:$0xff] }
 0xa8a   :  { %v2661_v62 = vld [vmem:[#allocation2 + $0x5c8] sm:$0xff] }
 0xa8b   :  { %3098 = vmatmul.mubr.bf16.gmra.mrb[168].mxu1 %v8525_v43  ;;  %v2568_v43 = vld [vmem:[#allocation2 + $0x2e0] sm:$0xff] }
 0xa8c   :  { %3167 = vmatpush1.bf16.msra.mxu1 %v2556_v32  ;;  %3107 = vmatprep.mubr.bf16.mxu1 %v8535_v59  ;;  %v2573_v59 = vld [vmem:[#allocation2 + $0x308] sm:$0xff]  ;;  %v2632_v32 = vld [vmem:[#allocation2 + $0x4e0] sm:$0xff] }
 0xa8d   :  { %3168 = vmatprep.subr.bf16.mxu1 %v2561_v12  ;;  %v2637_v12 = vld [vmem:[#allocation2 + $0x508] sm:$0xff] }
 0xa90   :  { %3169 = vmatpush1.bf16.msra.mxu1 %v2560_v14  ;;  %v2640_v14 = vld [vmem:[#allocation2 + $0x520] sm:$0xff] }
 0xa91   :  { %3170 = vmatprep.subr.bf16.mxu1 %v2565_v57  ;;  %v2648_v57 = vld [vmem:[#allocation2 + $0x560] sm:$0xff] }
 0xa93   :  { %3108 = vmatmul.mubr.bf16.gmra.mrb[172].mxu1 %v8533_v2  ;;  %v2580_v2 = vld [vmem:[#allocation2 + $0x340] sm:$0xff] }
 0xa94   :  { %3171 = vmatpush1.bf16.msra.mxu1 %v2564_v58  ;;  %3117 = vmatprep.mubr.bf16.mxu1 %v8543_v39  ;;  %v2584_v39 = vld [vmem:[#allocation2 + $0x360] sm:$0xff] }
 0xa95   :  { %3172 = vmatprep.subr.bf16.mxu1 %v2569_v31  ;;  %v2656_v58 = vld [vmem:[#allocation2 + $0x5a0] sm:$0xff] }
 0xa96   :  { %v2664_v31 = vld [vmem:[#allocation2 + $0x5e0] sm:$0xff] }
 0xa98   :  { %3173 = vmatpush1.bf16.msra.mxu1 %v2568_v43 }
 0xa99   :  { %3174 = vmatprep.subr.bf16.mxu1 %v2573_v59 }
 0xa9b   :  { %3118 = vmatmul.mubr.bf16.gmra.mrb[176].mxu1 %v8541_v36  ;;  %v2588_v36 = vld [vmem:[#allocation2 + $0x380] sm:$0xff] }
 0xa9c   :  { %3175 = vmatpush1.bf16.msra.mxu1 %v2572_v40  ;;  %3127 = vmatprep.mubr.bf16.mxu1 %v8551_v63  ;;  %v2592_v63 = vld [vmem:[#allocation2 + $0x3a0] sm:$0xff] }
 0xa9d   :  { %3176 = vmatprep.subr.bf16.mxu1 %v2577_v20 }
 0xaa0   :  { %3177 = vmatpush1.bf16.msra.mxu1 %v2576_v46 }
 0xaa1   :  { %3178 = vmatprep.subr.bf16.mxu1 %v2581_v50 }
 0xaa3   :  { %3128 = vmatmul.mubr.bf16.gmra.mrb[180].mxu1 %v8549_v35  ;;  %v2596_v35 = vld [vmem:[#allocation2 + $0x3c0] sm:$0xff] }
 0xaa4   :  { %3179 = vmatpush1.bf16.msra.mxu1 %v2580_v2  ;;  %3137 = vmatprep.mubr.bf16.mxu1 %v8559_v42  ;;  %v2600_v42 = vld [vmem:[#allocation2 + $0x3e0] sm:$0xff] }
 0xaa5   :  { %3180 = vmatprep.subr.bf16.mxu1 %v2585_v29 }
 0xaa8   :  { %3181 = vmatpush1.bf16.msra.mxu1 %v2584_v39 }
 0xaa9   :  { %3182 = vmatprep.subr.bf16.mxu1 %v2589_v61 }
 0xaab   :  { %3138 = vmatmul.mubr.bf16.gmra.mrb[184].mxu1 %v8557_v8  ;;  %v2604_v8 = vld [vmem:[#allocation2 + $0x400] sm:$0xff] }
 0xaac   :  { %3183 = vmatpush1.bf16.msra.mxu1 %v2588_v36  ;;  %3147 = vmatprep.mubr.bf16.mxu1 %v8567_v53  ;;  %v2608_v53 = vld [vmem:[#allocation2 + $0x420] sm:$0xff] }
 0xaad   :  { %3184 = vmatprep.subr.bf16.mxu1 %v2593_v18 }
 0xab0   :  { %3185 = vmatpush1.bf16.msra.mxu1 %v2592_v63 }
 0xab1   :  { %3186 = vmatprep.subr.bf16.mxu1 %v2597_v33 }
 0xab3   :  { %3148 = vmatmul.mubr.bf16.gmra.mrb[188].mxu1 %v8565_v44  ;;  %v2612_v44 = vld [vmem:[#allocation2 + $0x440] sm:$0xff] }
 0xab4   :  { %3187 = vmatpush1.bf16.msra.mxu1 %v2596_v35  ;;  %3190 = vmatprep.mubr.bf16.mxu1 %v8620_v15  ;;  %v2616_v15 = vld [vmem:[#allocation2 + $0x460] sm:$0xff] }
 0xab5   :  { %3188 = vmatprep.subr.bf16.mxu1 %v2601_v34 }
 0xab8   :  { %3189 = vmatpush1.bf16.msra.mxu1 %v2600_v42 }
 0xab9   :  { %3271 = vmatprep.subr.bf16.mxu1 %v2605_v51 }
 0xabb   :  { %3191 = vmatmul.mubr.bf16.vlgmr.msra.gmra.mrb[160].mxu1 %v8618_v13  ;;  %v2620_v13 = vld [vmem:[#allocation2 + $0x480] sm:$0xff] }
 0xabc   :  { %3200 = vmatprep.mubr.bf16.mxu1 %v8628_v1  ;;  %3272 = vmatpush1.bf16.msra.mxu1 %v2604_v8  ;;  %v2625_v1 = vld [vmem:[#allocation2 + $0x4a8] sm:$0xff] }
 0xabd   :  { %3273 = vmatprep.subr.bf16.mxu1 %v2609_v3 }
 0xac0   :  { %3274 = vmatpush1.bf16.msra.mxu1 %v2608_v53 }
 0xac1   :  { %3275 = vmatprep.subr.bf16.mxu1 %v2613_v30 }
 0xac3   :  { %3201 = vmatmul.mubr.bf16.gmra.mrb[164].mxu1 %v8626_v47  ;;  %v2628_v47 = vld [vmem:[#allocation2 + $0x4c0] sm:$0xff] }
 0xac4   :  { %3210 = vmatprep.mubr.bf16.mxu1 %v8636_v0  ;;  %3276 = vmatpush1.bf16.msra.mxu1 %v2612_v44  ;;  %v2633_v0 = vld [vmem:[#allocation2 + $0x4e8] sm:$0xff] }
 0xac5   :  { %3277 = vmatprep.subr.bf16.mxu1 %v2617_v19 }
 0xac8   :  { %3278 = vmatpush1.bf16.msra.mxu1 %v2616_v15 }
 0xac9   :  { %3279 = vmatprep.subr.bf16.mxu1 %v2621_v48 }
 0xacb   :  { %3211 = vmatmul.mubr.bf16.gmra.mrb[168].mxu1 %v8634_v24  ;;  %v2636_v24 = vld [vmem:[#allocation2 + $0x500] sm:$0xff] }
 0xacc   :  { %3220 = vmatprep.mubr.bf16.mxu1 %v8644_v52  ;;  %3280 = vmatpush1.bf16.msra.mxu1 %v2620_v13  ;;  %v2641_v52 = vld [vmem:[#allocation2 + $0x528] sm:$0xff] }
 0xacd   :  { %3281 = vmatprep.subr.bf16.mxu1 %v2625_v1 }
 0xad0   :  { %3282 = vmatpush1.bf16.msra.mxu1 %v2624_v41 }
 0xad1   :  { %3283 = vmatprep.subr.bf16.mxu1 %v2629_v49 }
 0xad3   :  { %3221 = vmatmul.mubr.bf16.gmra.mrb[172].mxu1 %v8642_v5  ;;  %v2644_v5 = vld [vmem:[#allocation2 + $0x540] sm:$0xff] }
 0xad4   :  { %3230 = vmatprep.mubr.bf16.mxu1 %v8652_v45  ;;  %3284 = vmatpush1.bf16.msra.mxu1 %v2628_v47  ;;  %v2649_v45 = vld [vmem:[#allocation2 + $0x568] sm:$0xff] }
 0xad5   :  { %3285 = vmatprep.subr.bf16.mxu1 %v2633_v0 }
 0xad8   :  { %3286 = vmatpush1.bf16.msra.mxu1 %v2632_v32 }
 0xad9   :  { %3287 = vmatprep.subr.bf16.mxu1 %v2637_v12 }
 0xadb   :  { %3231 = vmatmul.mubr.bf16.gmra.mrb[176].mxu1 %v8650_v54  ;;  %v2652_v54 = vld [vmem:[#allocation2 + $0x580] sm:$0xff] }
 0xadc   :  { %3240 = vmatprep.mubr.bf16.mxu1 %v8660_v60  ;;  %3288 = vmatpush1.bf16.msra.mxu1 %v2636_v24  ;;  %v2657_v60 = vld [vmem:[#allocation2 + $0x5a8] sm:$0xff] }
 0xadd   :  { %3289 = vmatprep.subr.bf16.mxu1 %v2641_v52 }
 0xae0   :  { %3290 = vmatpush1.bf16.msra.mxu1 %v2640_v14 }
 0xae1   :  { %3291 = vmatprep.subr.bf16.mxu1 %v2645_v38 }
 0xae3   :  { %3241 = vmatmul.mubr.bf16.gmra.mrb[180].mxu1 %v8658_v56  ;;  %v2660_v56 = vld [vmem:[#allocation2 + $0x5c0] sm:$0xff] }
 0xae4   :  { %3250 = vmatprep.mubr.bf16.mxu1 %v8668_v26  ;;  %3292 = vmatpush1.bf16.msra.mxu1 %v2644_v5  ;;  %v2665_v26 = vld [vmem:[#allocation2 + $0x5e8] sm:$0xff] }
 0xae5   :  { %3293 = vmatprep.subr.bf16.mxu1 %v2649_v45 }
 0xae8   :  { %3294 = vmatpush1.bf16.msra.mxu1 %v2648_v57 }
 0xae9   :  { %3295 = vmatprep.subr.bf16.mxu1 %v2653_v55 }
 0xaeb   :  { %3251 = vmatmul.mubr.bf16.gmra.mrb[184].mxu1 %v8666_v21 }
 0xaec   :  { %3260 = vmatprep.mubr.bf16.mxu1 %v8676_v27  ;;  %3296 = vmatpush1.bf16.msra.mxu1 %v2652_v54 }
 0xaed   :  { %3297 = vmatprep.subr.bf16.mxu1 %v2657_v60 }
 0xaf0   :  { %3298 = vmatpush1.bf16.msra.mxu1 %v2656_v58 }
 0xaf1   :  { %3299 = vmatprep.subr.bf16.mxu1 %v2661_v62  ;;  %v3035_v62 = vsub.s32 2, %v8491_v10 }
 0xaf3   :  { %3261 = vmatmul.mubr.bf16.gmra.mrb[188].mxu1 %v8674_v7 }
 0xaf4   :  { %3300 = vmatpush1.bf16.msra.mxu1 %v2660_v56  ;;  %v2669_v56 = vld [vmem:[#allocation14 + $0x3] ss:$8 sm:$0xf] }
 0xaf5   :  { %3301 = vmatprep.subr.bf16.mxu1 %v2665_v26  ;;  %v3039_v26 = vsub.s32 3, %v8491_v10 }
 0xaf8   :  { %3302 = vmatpush1.bf16.msra.mxu1 %v2664_v31  ;;  %v8732_v31 = vrot.slane %v2669_v56, %v8494_v37 }
 0xb0e   :  { %v2833_v43 = vpop.f32.mrb[128].mxu1 }
 0xb0f   :  { %v2835_v59 = vpop.f32.mrb[129].mxu1 }
 0xb10   :  { %v2837_v40 = vpop.f32.mrb[130].mxu1 }
 0xb11   :  { %v2912_v21 = vpack.c.bf16 %v2837_v40, %v2833_v43  ;;  %v2839_v20 = vpop.f32.mrb[131].mxu1  ;;  %v8734_v43 = vrot.slane %v2669_v56, %v3035_v62  ;;  %v8739_v40 = vrot.slane %v2669_v56, %v3039_v26 }
 0xb12   :  { %v2913_v27 = vpack.c.bf16 %v2839_v20, %v2835_v59  ;;  %v8737_v59 = vrot.slane %v2669_v56, %v8497_v25 }
 0xb14   :  { %3303 = vmatprep.mubr.bf16.mxu1 %v2913_v27  ;;  %3642 = vmatprep.mubr.bf16.mxu0 %v2913_v27 }
 0xb15   :  { %3304 = vmatmul.mubr.bf16.vlgmr.msra.gmra.mrb[160].mxu1 %v2912_v21  ;;  %3643 = vmatmul.mubr.bf16.vlgmr.msra.gmra.mrb[128].mxu0 %v2912_v21 }
 0xb16   :  { %v2843_v46 = vpop.f32.mrb[132].mxu1 }
 0xb17   :  { %v2845_v50 = vpop.f32.mrb[133].mxu1 }
 0xb18   :  { %v2847_v2 = vpop.f32.mrb[134].mxu1 }
 0xb19   :  { %v2914_v29 = vpack.c.bf16 %v2847_v2, %v2843_v46  ;;  %v2849_v39 = vpop.f32.mrb[135].mxu1 }
 0xb1a   :  { %v2915_v7 = vpack.c.bf16 %v2849_v39, %v2845_v50 }
 0xb1c   :  { %3313 = vmatprep.mubr.bf16.mxu1 %v2915_v7  ;;  %3652 = vmatprep.mubr.bf16.mxu0 %v2915_v7 }
 0xb1d   :  { %3314 = vmatmul.mubr.bf16.gmra.mrb[164].mxu1 %v2914_v29  ;;  %3653 = vmatmul.mubr.bf16.gmra.mrb[132].mxu0 %v2914_v29 }
 0xb1e   :  { %v2853_v61 = vpop.f32.mrb[136].mxu1 }
 0xb1f   :  { %v2855_v36 = vpop.f32.mrb[137].mxu1 }
 0xb20   :  { %v2857_v18 = vpop.f32.mrb[138].mxu1 }
 0xb21   :  { %v2916_v63 = vpack.c.bf16 %v2857_v18, %v2853_v61  ;;  %v2859_v33 = vpop.f32.mrb[139].mxu1 }
 0xb22   :  { %v2917_v35 = vpack.c.bf16 %v2859_v33, %v2855_v36 }
 0xb24   :  { %3323 = vmatprep.mubr.bf16.mxu1 %v2917_v35  ;;  %3662 = vmatprep.mubr.bf16.mxu0 %v2917_v35 }
 0xb25   :  { %3324 = vmatmul.mubr.bf16.gmra.mrb[168].mxu1 %v2916_v63  ;;  %3663 = vmatmul.mubr.bf16.gmra.mrb[136].mxu0 %v2916_v63 }
 0xb26   :  { %v2863_v34 = vpop.f32.mrb[140].mxu1 }
 0xb27   :  { %v2865_v42 = vpop.f32.mrb[141].mxu1 }
 0xb28   :  { %v2867_v51 = vpop.f32.mrb[142].mxu1 }
 0xb29   :  { %v2918_v8 = vpack.c.bf16 %v2867_v51, %v2863_v34  ;;  %v2869_v3 = vpop.f32.mrb[143].mxu1 }
 0xb2a   :  { %v2919_v53 = vpack.c.bf16 %v2869_v3, %v2865_v42 }
 0xb2c   :  { %3333 = vmatprep.mubr.bf16.mxu1 %v2919_v53  ;;  %3672 = vmatprep.mubr.bf16.mxu0 %v2919_v53 }
 0xb2d   :  { %3334 = vmatmul.mubr.bf16.gmra.mrb[172].mxu1 %v2918_v8  ;;  %3673 = vmatmul.mubr.bf16.gmra.mrb[140].mxu0 %v2918_v8 }
 0xb2e   :  { %v2873_v30 = vpop.f32.mrb[144].mxu1 }
 0xb2f   :  { %v2875_v44 = vpop.f32.mrb[145].mxu1 }
 0xb30   :  { %v2877_v19 = vpop.f32.mrb[146].mxu1 }
 0xb31   :  { %v2920_v15 = vpack.c.bf16 %v2877_v19, %v2873_v30  ;;  %v2879_v48 = vpop.f32.mrb[147].mxu1 }
 0xb32   :  { %v2921_v13 = vpack.c.bf16 %v2879_v48, %v2875_v44 }
 0xb34   :  { %3343 = vmatprep.mubr.bf16.mxu1 %v2921_v13  ;;  %3682 = vmatprep.mubr.bf16.mxu0 %v2921_v13 }
 0xb35   :  { %3344 = vmatmul.mubr.bf16.gmra.mrb[176].mxu1 %v2920_v15  ;;  %3683 = vmatmul.mubr.bf16.gmra.mrb[144].mxu0 %v2920_v15 }
 0xb36   :  { %v2883_v1 = vpop.f32.mrb[148].mxu1 }
 0xb37   :  { %v2885_v41 = vpop.f32.mrb[149].mxu1 }
 0xb38   :  { %v2887_v49 = vpop.f32.mrb[150].mxu1 }
 0xb39   :  { %v2922_v47 = vpack.c.bf16 %v2887_v49, %v2883_v1  ;;  %v2889_v0 = vpop.f32.mrb[151].mxu1 }
 0xb3a   :  { %v2923_v32 = vpack.c.bf16 %v2889_v0, %v2885_v41 }
 0xb3c   :  { %3353 = vmatprep.mubr.bf16.mxu1 %v2923_v32  ;;  %3692 = vmatprep.mubr.bf16.mxu0 %v2923_v32 }
 0xb3d   :  { %3354 = vmatmul.mubr.bf16.gmra.mrb[180].mxu1 %v2922_v47  ;;  %3693 = vmatmul.mubr.bf16.gmra.mrb[148].mxu0 %v2922_v47 }
 0xb3e   :  { %v2893_v12 = vpop.f32.mrb[152].mxu1 }
 0xb3f   :  { %v2895_v24 = vpop.f32.mrb[153].mxu1 }
 0xb40   :  { %v2897_v52 = vpop.f32.mrb[154].mxu1 }
 0xb41   :  { %v2924_v14 = vpack.c.bf16 %v2897_v52, %v2893_v12  ;;  %v2899_v38 = vpop.f32.mrb[155].mxu1 }
 0xb42   :  { %v2925_v5 = vpack.c.bf16 %v2899_v38, %v2895_v24 }
 0xb44   :  { %3363 = vmatprep.mubr.bf16.mxu1 %v2925_v5  ;;  %3702 = vmatprep.mubr.bf16.mxu0 %v2925_v5 }
 0xb45   :  { %3364 = vmatmul.mubr.bf16.gmra.mrb[184].mxu1 %v2924_v14  ;;  %3703 = vmatmul.mubr.bf16.gmra.mrb[152].mxu0 %v2924_v14 }
 0xb46   :  { %v2903_v45 = vpop.f32.mrb[156].mxu1 }
 0xb47   :  { %v2905_v57 = vpop.f32.mrb[157].mxu1 }
 0xb48   :  { %v2907_v55 = vpop.f32.mrb[158].mxu1 }
 0xb49   :  { %v2926_v54 = vpack.c.bf16 %v2907_v55, %v2903_v45  ;;  %v2909_v60 = vpop.f32.mrb[159].mxu1 }
 0xb4a   :  { %v2927_v58 = vpack.c.bf16 %v2909_v60, %v2905_v57 }
 0xb4c   :  { %3373 = vmatprep.mubr.bf16.mxu1 %v2927_v58  ;;  %3712 = vmatprep.mubr.bf16.mxu0 %v2927_v58 }
 0xb4d   :  { %3374 = vmatmul.mubr.bf16.gmra.mrb[188].mxu1 %v2926_v54  ;;  %3713 = vmatmul.mubr.bf16.gmra.mrb[156].mxu0 %v2926_v54 }
 0xbe8   :  { %v3305_v21 = vpop.f32.mrb[160].mxu1  ;;  %v3644_v20 = vpop.f32.mrb[128].mxu0 }
 0xbe9   :  { %v7231_v27 = vadd.f32 %v3305_v21, %v8732_v31  ;;  %v7263_v46 = vadd.f32 %v3644_v20, %v8734_v43  ;;  %v3307_v50 = vpop.f32.mrb[161].mxu1  ;;  %v3646_v2 = vpop.f32.mrb[129].mxu0 }
 0xbea   :  { %v7232_v10 = vadd.f32 %v3307_v50, %v8737_v59  ;;  %v7264_v29 = vadd.f32 %v3646_v2, %v8739_v40  ;;  %v3309_v39 = vpop.f32.mrb[162].mxu1  ;;  %v3648_v7 = vpop.f32.mrb[130].mxu0 }
 0xbeb   :  { %v7233_v61 = vadd.f32 %v3309_v39, %v8732_v31  ;;  %v7265_v36 = vadd.f32 %v3648_v7, %v8734_v43  ;;  %v3311_v18 = vpop.f32.mrb[163].mxu1  ;;  %v3650_v63 = vpop.f32.mrb[131].mxu0  ;;  %v3723_v34 = vmax.f32 %v7231_v27, 0.0  ;;  %v3725_v42 = vmax.f32 %v7263_v46, 0.0 }
 0xbec   :  { %v7234_v33 = vadd.f32 %v3311_v18, %v8737_v59  ;;  %v7266_v35 = vadd.f32 %v3650_v63, %v8739_v40  ;;  %v3724_v3 = vmax.f32 %v7232_v10, 0.0  ;;  %v3726_v53 = vmax.f32 %v7264_v29, 0.0 }
 0xbed   :  { %v3727_v51 = vmax.f32 %v7233_v61, 0.0  ;;  %v3729_v8 = vmax.f32 %v7265_v36, 0.0 }
 0xbee   :  { %v3728_v30 = vmax.f32 %v7234_v33, 0.0  ;;  %v3730_v44 = vmax.f32 %v7266_v35, 0.0 }
 0xbef   :  { %v8749_v19 = vpack.c.bf16 %v3727_v51, %v3723_v34  ;;  %v8751_v15 = vpack.c.bf16 %v3729_v8, %v3725_v42 }
 0xbf0   :  { %v8753_v48 = vpack.c.bf16 %v3728_v30, %v3724_v3  ;;  %v8755_v13 = vpack.c.bf16 %v3730_v44, %v3726_v53  ;;  %v3315_v1 = vpop.f32.mrb[164].mxu1  ;;  %v3654_v41 = vpop.f32.mrb[132].mxu0 }
 0xbf1   :  { %v7235_v49 = vadd.f32 %v3315_v1, %v8732_v31  ;;  %v7267_v47 = vadd.f32 %v3654_v41, %v8734_v43  ;;  %v3317_v0 = vpop.f32.mrb[165].mxu1  ;;  %v3656_v32 = vpop.f32.mrb[133].mxu0 }
 0xbf2   :  { %v7236_v12 = vadd.f32 %v3317_v0, %v8737_v59  ;;  %v7268_v24 = vadd.f32 %v3656_v32, %v8739_v40  ;;  %v3319_v52 = vpop.f32.mrb[166].mxu1  ;;  %v3658_v14 = vpop.f32.mrb[134].mxu0  ;;  %4017 = vmatprep.subr.bf16.mxu1 %v8753_v48 }
 0xbf3   :  { %v7237_v38 = vadd.f32 %v3319_v52, %v8732_v31  ;;  %v7269_v5 = vadd.f32 %v3658_v14, %v8734_v43  ;;  %v3321_v45 = vpop.f32.mrb[167].mxu1  ;;  %v3660_v57 = vpop.f32.mrb[135].mxu0  ;;  %v3731_v60 = vmax.f32 %v7235_v49, 0.0  ;;  %v3733_v58 = vmax.f32 %v7267_v47, 0.0 }
 0xbf4   :  { %v7238_v55 = vadd.f32 %v3321_v45, %v8737_v59  ;;  %v7270_v54 = vadd.f32 %v3660_v57, %v8739_v40  ;;  %v3732_v26 = vmax.f32 %v7236_v12, 0.0  ;;  %v3734_v21 = vmax.f32 %v7268_v24, 0.0 }
 0xbf5   :  { %v3735_v62 = vmax.f32 %v7237_v38, 0.0  ;;  %v3737_v56 = vmax.f32 %v7269_v5, 0.0 }
 0xbf6   :  { %v3736_v20 = vmax.f32 %v7238_v55, 0.0  ;;  %v3738_v27 = vmax.f32 %v7270_v54, 0.0 }
 0xbf7   :  { %v8765_v46 = vpack.c.bf16 %v3735_v62, %v3731_v60  ;;  %v8767_v50 = vpack.c.bf16 %v3737_v56, %v3733_v58 }
 0xbf8   :  { %v8769_v2 = vpack.c.bf16 %v3736_v20, %v3732_v26  ;;  %v8771_v10 = vpack.c.bf16 %v3738_v27, %v3734_v21  ;;  %v3325_v29 = vpop.f32.mrb[168].mxu1  ;;  %v3664_v39 = vpop.f32.mrb[136].mxu0 }
 0xbf9   :  { %v7239_v7 = vadd.f32 %v3325_v29, %v8732_v31  ;;  %v7271_v61 = vadd.f32 %v3664_v39, %v8734_v43  ;;  %v3327_v36 = vpop.f32.mrb[169].mxu1  ;;  %v3666_v18 = vpop.f32.mrb[137].mxu0 }
 0xbfa   :  { %v7240_v63 = vadd.f32 %v3327_v36, %v8737_v59  ;;  %v7272_v33 = vadd.f32 %v3666_v18, %v8739_v40  ;;  %v3329_v35 = vpop.f32.mrb[170].mxu1  ;;  %v3668_v34 = vpop.f32.mrb[138].mxu0 }
 0xbfb   :  { %v7241_v42 = vadd.f32 %v3329_v35, %v8732_v31  ;;  %v7273_v51 = vadd.f32 %v3668_v34, %v8734_v43  ;;  %v3331_v8 = vpop.f32.mrb[171].mxu1  ;;  %v3670_v3 = vpop.f32.mrb[139].mxu0  ;;  %v3739_v44 = vmax.f32 %v7239_v7, 0.0  ;;  %v3741_v1 = vmax.f32 %v7271_v61, 0.0 }
 0xbfc   :  { %v7242_v53 = vadd.f32 %v3331_v8, %v8737_v59  ;;  %v7274_v30 = vadd.f32 %v3670_v3, %v8739_v40  ;;  %v3740_v47 = vmax.f32 %v7240_v63, 0.0  ;;  %v3742_v0 = vmax.f32 %v7272_v33, 0.0 }
 0xbfd   :  { %v3743_v41 = vmax.f32 %v7241_v42, 0.0  ;;  %v3745_v49 = vmax.f32 %v7273_v51, 0.0 }
 0xbfe   :  { %v3744_v32 = vmax.f32 %v7242_v53, 0.0  ;;  %v3746_v12 = vmax.f32 %v7274_v30, 0.0 }
 0xbff   :  { %v8781_v24 = vpack.c.bf16 %v3743_v41, %v3739_v44  ;;  %v8783_v52 = vpack.c.bf16 %v3745_v49, %v3741_v1 }
 0xc00   :  { %v8785_v14 = vpack.c.bf16 %v3744_v32, %v3740_v47  ;;  %v8787_v38 = vpack.c.bf16 %v3746_v12, %v3742_v0  ;;  %v3335_v5 = vpop.f32.mrb[172].mxu1  ;;  %v3674_v45 = vpop.f32.mrb[140].mxu0 }
 0xc01   :  { %v7243_v57 = vadd.f32 %v3335_v5, %v8732_v31  ;;  %v7275_v55 = vadd.f32 %v3674_v45, %v8734_v43  ;;  %v3337_v54 = vpop.f32.mrb[173].mxu1  ;;  %v3676_v60 = vpop.f32.mrb[141].mxu0 }
 0xc02   :  { %v7244_v58 = vadd.f32 %v3337_v54, %v8737_v59  ;;  %v7276_v62 = vadd.f32 %v3676_v60, %v8739_v40  ;;  %v3339_v56 = vpop.f32.mrb[174].mxu1  ;;  %v3678_v26 = vpop.f32.mrb[142].mxu0 }
 0xc03   :  { %v7245_v21 = vadd.f32 %v3339_v56, %v8732_v31  ;;  %v7277_v20 = vadd.f32 %v3678_v26, %v8734_v43  ;;  %v3341_v27 = vpop.f32.mrb[175].mxu1  ;;  %v3680_v29 = vpop.f32.mrb[143].mxu0  ;;  %v3747_v61 = vmax.f32 %v7243_v57, 0.0  ;;  %v3749_v36 = vmax.f32 %v7275_v55, 0.0 }
 0xc04   :  { %v7246_v39 = vadd.f32 %v3341_v27, %v8737_v59  ;;  %v7278_v7 = vadd.f32 %v3680_v29, %v8739_v40  ;;  %v3748_v33 = vmax.f32 %v7244_v58, 0.0  ;;  %v3750_v35 = vmax.f32 %v7276_v62, 0.0 }
 0xc05   :  { %v3751_v18 = vmax.f32 %v7245_v21, 0.0  ;;  %v3753_v63 = vmax.f32 %v7277_v20, 0.0 }
 0xc06   :  { %v3752_v34 = vmax.f32 %v7246_v39, 0.0  ;;  %v3754_v42 = vmax.f32 %v7278_v7, 0.0 }
 0xc07   :  { %v8797_v51 = vpack.c.bf16 %v3751_v18, %v3747_v61  ;;  %v8799_v8 = vpack.c.bf16 %v3753_v63, %v3749_v36 }
 0xc08   :  { %v8801_v3 = vpack.c.bf16 %v3752_v34, %v3748_v33  ;;  %v8803_v53 = vpack.c.bf16 %v3754_v42, %v3750_v35  ;;  %v3345_v30 = vpop.f32.mrb[176].mxu1  ;;  %v3684_v44 = vpop.f32.mrb[144].mxu0 }
 0xc09   :  { %v7247_v1 = vadd.f32 %v3345_v30, %v8732_v31  ;;  %v7279_v41 = vadd.f32 %v3684_v44, %v8734_v43  ;;  %v3347_v49 = vpop.f32.mrb[177].mxu1  ;;  %v3686_v47 = vpop.f32.mrb[145].mxu0 }
 0xc0a   :  { %v7248_v0 = vadd.f32 %v3347_v49, %v8737_v59  ;;  %v7280_v32 = vadd.f32 %v3686_v47, %v8739_v40  ;;  %v3349_v12 = vpop.f32.mrb[178].mxu1  ;;  %v3688_v5 = vpop.f32.mrb[146].mxu0 }
 0xc0b   :  { %v7249_v45 = vadd.f32 %v3349_v12, %v8732_v31  ;;  %v7281_v57 = vadd.f32 %v3688_v5, %v8734_v43  ;;  %v3351_v55 = vpop.f32.mrb[179].mxu1  ;;  %v3690_v54 = vpop.f32.mrb[147].mxu0  ;;  %v3755_v62 = vmax.f32 %v7247_v1, 0.0  ;;  %v3757_v56 = vmax.f32 %v7279_v41, 0.0 }
 0xc0c   :  { %v7250_v60 = vadd.f32 %v3351_v55, %v8737_v59  ;;  %v7282_v58 = vadd.f32 %v3690_v54, %v8739_v40  ;;  %v3756_v20 = vmax.f32 %v7248_v0, 0.0  ;;  %v3758_v27 = vmax.f32 %v7280_v32, 0.0 }
 0xc0d   :  { %v3759_v26 = vmax.f32 %v7249_v45, 0.0  ;;  %v3761_v21 = vmax.f32 %v7281_v57, 0.0 }
 0xc0e   :  { %v3760_v29 = vmax.f32 %v7250_v60, 0.0  ;;  %v3762_v39 = vmax.f32 %v7282_v58, 0.0 }
 0xc0f   :  { %v8813_v7 = vpack.c.bf16 %v3759_v26, %v3755_v62  ;;  %v8815_v61 = vpack.c.bf16 %v3761_v21, %v3757_v56 }
 0xc10   :  { %v8817_v36 = vpack.c.bf16 %v3760_v29, %v3756_v20  ;;  %v8819_v18 = vpack.c.bf16 %v3762_v39, %v3758_v27  ;;  %v3355_v63 = vpop.f32.mrb[180].mxu1  ;;  %v3694_v33 = vpop.f32.mrb[148].mxu0 }
 0xc11   :  { %v7251_v35 = vadd.f32 %v3355_v63, %v8732_v31  ;;  %v7283_v34 = vadd.f32 %v3694_v33, %v8734_v43  ;;  %v3357_v42 = vpop.f32.mrb[181].mxu1  ;;  %v3696_v30 = vpop.f32.mrb[149].mxu0 }
 0xc12   :  { %v7252_v44 = vadd.f32 %v3357_v42, %v8737_v59  ;;  %v7284_v1 = vadd.f32 %v3696_v30, %v8739_v40  ;;  %v3359_v41 = vpop.f32.mrb[182].mxu1  ;;  %v3698_v49 = vpop.f32.mrb[150].mxu0 }
 0xc13   :  { %v7253_v47 = vadd.f32 %v3359_v41, %v8732_v31  ;;  %v7285_v0 = vadd.f32 %v3698_v49, %v8734_v43  ;;  %v3361_v32 = vpop.f32.mrb[183].mxu1  ;;  %v3700_v12 = vpop.f32.mrb[151].mxu0  ;;  %v3763_v57 = vmax.f32 %v7251_v35, 0.0  ;;  %v3765_v55 = vmax.f32 %v7283_v34, 0.0 }
 0xc14   :  { %v7254_v5 = vadd.f32 %v3361_v32, %v8737_v59  ;;  %v7286_v45 = vadd.f32 %v3700_v12, %v8739_v40  ;;  %v3764_v58 = vmax.f32 %v7252_v44, 0.0  ;;  %v3766_v62 = vmax.f32 %v7284_v1, 0.0 }
 0xc15   :  { %v3767_v54 = vmax.f32 %v7253_v47, 0.0  ;;  %v3769_v60 = vmax.f32 %v7285_v0, 0.0 }
 0xc16   :  { %v3768_v56 = vmax.f32 %v7254_v5, 0.0  ;;  %v3770_v26 = vmax.f32 %v7286_v45, 0.0 }
 0xc17   :  { %v8829_v21 = vpack.c.bf16 %v3767_v54, %v3763_v57  ;;  %v8831_v20 = vpack.c.bf16 %v3769_v60, %v3765_v55 }
 0xc18   :  { %v8833_v27 = vpack.c.bf16 %v3768_v56, %v3764_v58  ;;  %v8835_v29 = vpack.c.bf16 %v3770_v26, %v3766_v62  ;;  %v3365_v39 = vpop.f32.mrb[184].mxu1  ;;  %v3704_v63 = vpop.f32.mrb[152].mxu0 }
 0xc19   :  { %v7255_v33 = vadd.f32 %v3365_v39, %v8732_v31  ;;  %v7287_v35 = vadd.f32 %v3704_v63, %v8734_v43  ;;  %v3367_v34 = vpop.f32.mrb[185].mxu1  ;;  %v3706_v42 = vpop.f32.mrb[153].mxu0 }
 0xc1a   :  { %v7256_v30 = vadd.f32 %v3367_v34, %v8737_v59  ;;  %v7288_v44 = vadd.f32 %v3706_v42, %v8739_v40  ;;  %v3369_v1 = vpop.f32.mrb[186].mxu1  ;;  %v3708_v41 = vpop.f32.mrb[154].mxu0 }
 0xc1b   :  { %v7257_v49 = vadd.f32 %v3369_v1, %v8732_v31  ;;  %v7289_v47 = vadd.f32 %v3708_v41, %v8734_v43  ;;  %v3371_v0 = vpop.f32.mrb[187].mxu1  ;;  %v3710_v32 = vpop.f32.mrb[155].mxu0  ;;  %v3771_v45 = vmax.f32 %v7255_v33, 0.0  ;;  %v3773_v57 = vmax.f32 %v7287_v35, 0.0 }
 0xc1c   :  { %v7258_v12 = vadd.f32 %v3371_v0, %v8737_v59  ;;  %v7290_v5 = vadd.f32 %v3710_v32, %v8739_v40  ;;  %v3772_v60 = vmax.f32 %v7256_v30, 0.0  ;;  %v3774_v58 = vmax.f32 %v7288_v44, 0.0 }
 0xc1d   :  { %v3775_v55 = vmax.f32 %v7257_v49, 0.0  ;;  %v3777_v54 = vmax.f32 %v7289_v47, 0.0 }
 0xc1e   :  { %v3776_v62 = vmax.f32 %v7258_v12, 0.0  ;;  %v3778_v56 = vmax.f32 %v7290_v5, 0.0 }
 0xc1f   :  { %v8845_v26 = vpack.c.bf16 %v3775_v55, %v3771_v45  ;;  %v8847_v39 = vpack.c.bf16 %v3777_v54, %v3773_v57 }
 0xc20   :  { %v8849_v63 = vpack.c.bf16 %v3776_v62, %v3772_v60  ;;  %v8851_v34 = vpack.c.bf16 %v3778_v56, %v3774_v58  ;;  %v3375_v42 = vpop.f32.mrb[188].mxu1  ;;  %v3714_v1 = vpop.f32.mrb[156].mxu0 }
 0xc21   :  { %v7259_v41 = vadd.f32 %v3375_v42, %v8732_v31  ;;  %v7291_v33 = vadd.f32 %v3714_v1, %v8734_v43  ;;  %v3377_v35 = vpop.f32.mrb[189].mxu1  ;;  %v3716_v49 = vpop.f32.mrb[157].mxu0 }
 0xc22   :  { %v7260_v30 = vadd.f32 %v3377_v35, %v8737_v59  ;;  %v7292_v44 = vadd.f32 %v3716_v49, %v8739_v40  ;;  %v3379_v47 = vpop.f32.mrb[190].mxu1  ;;  %v3718_v0 = vpop.f32.mrb[158].mxu0 }
 0xc23   :  { %v7261_v32 = vadd.f32 %v3379_v47, %v8732_v31  ;;  %v7293_v12 = vadd.f32 %v3718_v0, %v8734_v43  ;;  %v3381_v5 = vpop.f32.mrb[191].mxu1  ;;  %v3720_v45 = vpop.f32.mrb[159].mxu0  ;;  %v3779_v54 = vmax.f32 %v7259_v41, 0.0  ;;  %v3781_v60 = vmax.f32 %v7291_v33, 0.0 }
 0xc24   :  { %v7262_v57 = vadd.f32 %v3381_v5, %v8737_v59  ;;  %v7294_v55 = vadd.f32 %v3720_v45, %v8739_v40  ;;  %v3780_v56 = vmax.f32 %v7260_v30, 0.0  ;;  %v3782_v42 = vmax.f32 %v7292_v44, 0.0 }
 0xc25   :  { %v3783_v58 = vmax.f32 %v7261_v32, 0.0  ;;  %v3785_v62 = vmax.f32 %v7293_v12, 0.0  ;;  %v9822_v59 = vmov 0  }
 0xc26   :  { %v3784_v1 = vmax.f32 %v7262_v57, 0.0  ;;  %v3786_v35 = vmax.f32 %v7294_v55, 0.0  ;;  %4049 = vmatprep.mubr.bf16.mxu1 %v9822_v59 }
 0xc27   :  { %v8861_v49 = vpack.c.bf16 %v3783_v58, %v3779_v54  ;;  %v8863_v6 = vpack.c.bf16 %v3785_v62, %v3781_v60 }
 0xc28   :  { %v8865_v31 = vpack.c.bf16 %v3784_v1, %v3780_v56  ;;  %v8867_v43 = vpack.c.bf16 %v3786_v35, %v3782_v42 }
 0xc29   :  { %7978 = dma.done.wait [#allocation7 + $0x1], 24576 }
 0xc2a   :  { %7979 = vsyncadd [#allocation7 + $0x1], 4294942720  ;;  %4018 = vmatpush1.bf16.msra.mxu1 %v8749_v19  ;;  %4130 = vmatprep.subr.bf16.mxu0 %v8755_v13 }
 0xc2b   :  { %4019 = vmatprep.subr.bf16.mxu1 %v8769_v2  ;;  %4131 = vmatpush1.bf16.msra.mxu0 %v8751_v15 }
 0xc2c   :  { %4132 = vmatprep.subr.bf16.mxu0 %v8771_v10  ;;  %4162 = vmatprep.mubr.bf16.mxu0 %v9822_v59 }
 0xc2e   :  { %4020 = vmatpush1.bf16.msra.mxu1 %v8765_v46 }
 0xc2f   :  { %4021 = vmatprep.subr.bf16.mxu1 %v8785_v14  ;;  %4133 = vmatpush1.bf16.msra.mxu0 %v8767_v50 }
 0xc30   :  { %4134 = vmatprep.subr.bf16.mxu0 %v8787_v38 }
 0xc32   :  { %4022 = vmatpush1.bf16.msra.mxu1 %v8781_v24 }
 0xc33   :  { %4023 = vmatprep.subr.bf16.mxu1 %v8801_v3  ;;  %4135 = vmatpush1.bf16.msra.mxu0 %v8783_v52 }
 0xc34   :  { %4136 = vmatprep.subr.bf16.mxu0 %v8803_v53 }
 0xc36   :  { %4024 = vmatpush1.bf16.msra.mxu1 %v8797_v51 }
 0xc37   :  { %4025 = vmatprep.subr.bf16.mxu1 %v8817_v36  ;;  %4137 = vmatpush1.bf16.msra.mxu0 %v8799_v8 }
 0xc38   :  { %4138 = vmatprep.subr.bf16.mxu0 %v8819_v18 }
 0xc3a   :  { %4026 = vmatpush1.bf16.msra.mxu1 %v8813_v7 }
 0xc3b   :  { %4027 = vmatprep.subr.bf16.mxu1 %v8833_v27  ;;  %4139 = vmatpush1.bf16.msra.mxu0 %v8815_v61 }
 0xc3c   :  { %4140 = vmatprep.subr.bf16.mxu0 %v8835_v29 }
 0xc3e   :  { %4028 = vmatpush1.bf16.msra.mxu1 %v8829_v21 }
 0xc3f   :  { %4029 = vmatprep.subr.bf16.mxu1 %v8849_v63  ;;  %4141 = vmatpush1.bf16.msra.mxu0 %v8831_v20 }
 0xc40   :  { %4142 = vmatprep.subr.bf16.mxu0 %v8851_v34 }
 0xc42   :  { %4030 = vmatpush1.bf16.msra.mxu1 %v8845_v26 }
 0xc43   :  { %4031 = vmatprep.subr.bf16.mxu1 %v8865_v31  ;;  %4143 = vmatpush1.bf16.msra.mxu0 %v8847_v39 }
 0xc44   :  { %4144 = vmatprep.subr.bf16.mxu0 %v8867_v43 }
 0xc46   :  { %4032 = vmatpush1.bf16.msra.mxu1 %v8861_v49 }
 0xc47   :  { %4145 = vmatpush1.bf16.msra.mxu0 %v8863_v6 }
 0xc49   :  { %4050 = vmatmul.mubr.bf16.vlgmr.msra.gmra.mrb[192].mxu1 %v8149_v4 }
 0xc4a   :  { %4059 = vmatprep.mubr.bf16.mxu1 %v9822_v59  ;;  %4163 = vmatmul.mubr.bf16.vlgmr.msra.gmra.mrb[160].mxu0 %v8149_v4 }
 0xc4b   :  { %4172 = vmatprep.mubr.bf16.mxu0 %v9822_v59 }
 0xc51   :  { %4060 = vmatmul.mubr.bf16.gmra.mrb[196].mxu1 %v8171_v9 }
 0xc52   :  { %4069 = vmatprep.mubr.bf16.mxu1 %v9822_v59  ;;  %4173 = vmatmul.mubr.bf16.gmra.mrb[164].mxu0 %v8171_v9 }
 0xc53   :  { %4182 = vmatprep.mubr.bf16.mxu0 %v9822_v59 }
 0xc59   :  { %4070 = vmatmul.mubr.bf16.gmra.mrb[200].mxu1 %v8173_v11 }
 0xc5a   :  { %4079 = vmatprep.mubr.bf16.mxu1 %v9822_v59  ;;  %4183 = vmatmul.mubr.bf16.gmra.mrb[168].mxu0 %v8173_v11 }
 0xc5b   :  { %4192 = vmatprep.mubr.bf16.mxu0 %v9822_v59 }
 0xc61   :  { %4080 = vmatmul.mubr.bf16.gmra.mrb[204].mxu1 %v8178_v16 }
 0xc62   :  { %4089 = vmatprep.mubr.bf16.mxu1 %v9822_v59  ;;  %4193 = vmatmul.mubr.bf16.gmra.mrb[172].mxu0 %v8178_v16 }
 0xc63   :  { %4202 = vmatprep.mubr.bf16.mxu0 %v9822_v59 }
 0xc69   :  { %4090 = vmatmul.mubr.bf16.gmra.mrb[208].mxu1 %v8180_v17 }
 0xc6a   :  { %4099 = vmatprep.mubr.bf16.mxu1 %v9822_v59  ;;  %4203 = vmatmul.mubr.bf16.gmra.mrb[176].mxu0 %v8180_v17 }
 0xc6b   :  { %4212 = vmatprep.mubr.bf16.mxu0 %v9822_v59 }
 0xc71   :  { %4100 = vmatmul.mubr.bf16.gmra.mrb[212].mxu1 %v8184_v22 }
 0xc72   :  { %4109 = vmatprep.mubr.bf16.mxu1 %v9822_v59  ;;  %4213 = vmatmul.mubr.bf16.gmra.mrb[180].mxu0 %v8184_v22 }
 0xc73   :  { %4222 = vmatprep.mubr.bf16.mxu0 %v9822_v59 }
 0xc79   :  { %4110 = vmatmul.mubr.bf16.gmra.mrb[216].mxu1 %v8186_v23 }
 0xc7a   :  { %4119 = vmatprep.mubr.bf16.mxu1 %v9822_v59  ;;  %4223 = vmatmul.mubr.bf16.gmra.mrb[184].mxu0 %v8186_v23 }
 0xc7b   :  { %4232 = vmatprep.mubr.bf16.mxu0 %v9822_v59 }
 0xc81   :  { %4120 = vmatmul.mubr.bf16.gmra.mrb[220].mxu1 %v8190_v28 }
 0xc82   :  { %4233 = vmatmul.mubr.bf16.gmra.mrb[188].mxu0 %v8190_v28  ;;  %4307 = vmatprep.mubr.bf16.mxu1 %v9822_v59 }
 0xc83   :  { %4420 = vmatprep.mubr.bf16.mxu0 %v9822_v59 }
 0xd1c   :  { %v4051_v40 = vpop.f32.mrb[192].mxu1 }
 0xd1d   :  { %v4053_v41 = vpop.f32.mrb[193].mxu1 }
 0xd1e   :  { %v4055_v33 = vpop.f32.mrb[194].mxu1 }
 0xd1f   :  { %v8935_v30 = vpack.c.bf16 %v4055_v33, %v4051_v40  ;;  %v4057_v44 = vpop.f32.mrb[195].mxu1 }
 0xd20   :  { %v8937_v47 = vpack.c.bf16 %v4057_v44, %v4053_v41  ;;  %v4164_v44 = vpop.f32.mrb[160].mxu0 }
 0xd22   :  { %4275 = vmatprep.subr.bf16.mxu1 %v8937_v47 }
 0xd23   :  { %4276 = vmatpush1.bf16.msra.mxu1 %v8935_v30 }
 0xd24   :  { %v4061_v0 = vpop.f32.mrb[196].mxu1 }
 0xd25   :  { %v4063_v32 = vpop.f32.mrb[197].mxu1 }
 0xd26   :  { %v4065_v12 = vpop.f32.mrb[198].mxu1 }
 0xd27   :  { %v8941_v5 = vpack.c.bf16 %v4065_v12, %v4061_v0  ;;  %v4067_v45 = vpop.f32.mrb[199].mxu1 }
 0xd28   :  { %v8943_v57 = vpack.c.bf16 %v4067_v45, %v4063_v32  ;;  %v4166_v45 = vpop.f32.mrb[161].mxu0 }
 0xd2a   :  { %4277 = vmatprep.subr.bf16.mxu1 %v8943_v57 }
 0xd2b   :  { %4278 = vmatpush1.bf16.msra.mxu1 %v8941_v5 }
 0xd2c   :  { %v4071_v55 = vpop.f32.mrb[200].mxu1 }
 0xd2d   :  { %v4073_v54 = vpop.f32.mrb[201].mxu1 }
 0xd2e   :  { %v4075_v60 = vpop.f32.mrb[202].mxu1 }
 0xd2f   :  { %v8947_v58 = vpack.c.bf16 %v4075_v60, %v4071_v55  ;;  %v4077_v62 = vpop.f32.mrb[203].mxu1  ;;  %v4168_v60 = vpop.f32.mrb[162].mxu0 }
 0xd30   :  { %v8949_v56 = vpack.c.bf16 %v4077_v62, %v4073_v54 }
 0xd32   :  { %4279 = vmatprep.subr.bf16.mxu1 %v8949_v56 }
 0xd33   :  { %4280 = vmatpush1.bf16.msra.mxu1 %v8947_v58 }
 0xd34   :  { %v4081_v42 = vpop.f32.mrb[204].mxu1 }
 0xd35   :  { %v4083_v1 = vpop.f32.mrb[205].mxu1 }
 0xd36   :  { %v4085_v35 = vpop.f32.mrb[206].mxu1 }
 0xd37   :  { %v8953_v40 = vpack.c.bf16 %v4085_v35, %v4081_v42  ;;  %v4087_v41 = vpop.f32.mrb[207].mxu1  ;;  %v8963_v42 = vpack.c.bf16 %v4168_v60, %v4164_v44  ;;  %v4170_v35 = vpop.f32.mrb[163].mxu0 }
 0xd38   :  { %v8955_v33 = vpack.c.bf16 %v4087_v41, %v4083_v1  ;;  %v8965_v1 = vpack.c.bf16 %v4170_v35, %v4166_v45  ;;  %v4174_v41 = vpop.f32.mrb[164].mxu0 }
 0xd39   :  { %9825 = vst [vmem:[#allocation47_spill] sm:$0xff] %v8963_v42  ;;  %v4176_v37 = vpop.f32.mrb[165].mxu0 }
 0xd3a   :  { %4281 = vmatprep.subr.bf16.mxu1 %v8955_v33  ;;  %9826 = vst [vmem:[#allocation48_spill] sm:$0xff] %v8965_v1  ;;  %4388 = vmatprep.subr.bf16.mxu0 %v8965_v1 }
 0xd3b   :  { %4282 = vmatpush1.bf16.msra.mxu1 %v8953_v40  ;;  %4389 = vmatpush1.bf16.msra.mxu0 %v8963_v42 }
 0xd3c   :  { %v4091_v0 = vpop.f32.mrb[208].mxu1 }
 0xd3d   :  { %v4093_v32 = vpop.f32.mrb[209].mxu1 }
 0xd3e   :  { %v4095_v12 = vpop.f32.mrb[210].mxu1 }
 0xd3f   :  { %v8959_v55 = vpack.c.bf16 %v4095_v12, %v4091_v0  ;;  %v4097_v54 = vpop.f32.mrb[211].mxu1 }
 0xd40   :  { %v8961_v62 = vpack.c.bf16 %v4097_v54, %v4093_v32  ;;  %v4178_v54 = vpop.f32.mrb[166].mxu0 }
 0xd41   :  { %9823 = vst [vmem:[#allocation45_spill] sm:$0xff] %v8959_v55  ;;  %v8975_v45 = vpack.c.bf16 %v4178_v54, %v4174_v41  ;;  %v4180_v35 = vpop.f32.mrb[167].mxu0 }
 0xd42   :  { %9824 = vst [vmem:[#allocation46_spill] sm:$0xff] %v8961_v62  ;;  %4283 = vmatprep.subr.bf16.mxu1 %v8961_v62  ;;  %v8977_v62 = vpack.c.bf16 %v4180_v35, %v4176_v37  ;;  %v4184_v42 = vpop.f32.mrb[168].mxu0 }
 0xd43   :  { %4284 = vmatpush1.bf16.msra.mxu1 %v8959_v55  ;;  %9829 = vst [vmem:[#allocation51_spill] sm:$0xff] %v8975_v45  ;;  %v4186_v55 = vpop.f32.mrb[169].mxu0 }
 0xd44   :  { %v4101_v25 = vpop.f32.mrb[212].mxu1  ;;  %9830 = vst [vmem:[#allocation52_spill] sm:$0xff] %v8977_v62  ;;  %4390 = vmatprep.subr.bf16.mxu0 %v8977_v62 }
 0xd45   :  { %v4103_v0 = vpop.f32.mrb[213].mxu1  ;;  %4391 = vmatpush1.bf16.msra.mxu0 %v8975_v45 }
 0xd46   :  { %v4105_v12 = vpop.f32.mrb[214].mxu1 }
 0xd47   :  { %v8971_v32 = vpack.c.bf16 %v4105_v12, %v4101_v25  ;;  %v4107_v44 = vpop.f32.mrb[215].mxu1 }
 0xd48   :  { %v8973_v60 = vpack.c.bf16 %v4107_v44, %v4103_v0  ;;  %v4188_v44 = vpop.f32.mrb[170].mxu0 }
 0xd49   :  { %9827 = vst [vmem:[#allocation49_spill] sm:$0xff] %v8971_v32  ;;  %v8987_v37 = vpack.c.bf16 %v4188_v44, %v4184_v42  ;;  %v4190_v35 = vpop.f32.mrb[171].mxu0 }
 0xd4a   :  { %9828 = vst [vmem:[#allocation50_spill] sm:$0xff] %v8973_v60  ;;  %4285 = vmatprep.subr.bf16.mxu1 %v8973_v60  ;;  %v8989_v60 = vpack.c.bf16 %v4190_v35, %v4186_v55  ;;  %v4194_v45 = vpop.f32.mrb[172].mxu0 }
 0xd4b   :  { %4286 = vmatpush1.bf16.msra.mxu1 %v8971_v32  ;;  %9833 = vst [vmem:[#allocation55_spill] sm:$0xff] %v8987_v37  ;;  %v4196_v32 = vpop.f32.mrb[173].mxu0 }
 0xd4c   :  { %v4111_v1 = vpop.f32.mrb[216].mxu1  ;;  %9834 = vst [vmem:[#allocation56_spill] sm:$0xff] %v8989_v60  ;;  %4392 = vmatprep.subr.bf16.mxu0 %v8989_v60 }
 0xd4d   :  { %v4113_v25 = vpop.f32.mrb[217].mxu1  ;;  %4393 = vmatpush1.bf16.msra.mxu0 %v8987_v37 }
 0xd4e   :  { %v4115_v12 = vpop.f32.mrb[218].mxu1 }
 0xd4f   :  { %v8983_v0 = vpack.c.bf16 %v4115_v12, %v4111_v1  ;;  %v4117_v41 = vpop.f32.mrb[219].mxu1 }
 0xd50   :  { %v8985_v54 = vpack.c.bf16 %v4117_v41, %v4113_v25  ;;  %v4198_v41 = vpop.f32.mrb[174].mxu0 }
 0xd51   :  { %9831 = vst [vmem:[#allocation53_spill] sm:$0xff] %v8983_v0  ;;  %v8999_v55 = vpack.c.bf16 %v4198_v41, %v4194_v45  ;;  %v4200_v35 = vpop.f32.mrb[175].mxu0 }
 0xd52   :  { %9832 = vst [vmem:[#allocation54_spill] sm:$0xff] %v8985_v54  ;;  %4287 = vmatprep.subr.bf16.mxu1 %v8985_v54  ;;  %v3824_v54 = vld [vmem:[#allocation3 + $0x8] sm:$0xff]  ;;  %v4204_v37 = vpop.f32.mrb[176].mxu0 }
 0xd53   :  { %4288 = vmatpush1.bf16.msra.mxu1 %v8983_v0  ;;  %9835 = vst [vmem:[#allocation57_spill] sm:$0xff] %v8999_v55  ;;  %v9001_v0 = vpack.c.bf16 %v4200_v35, %v4196_v32  ;;  %v4206_v45 = vpop.f32.mrb[177].mxu0  ;;  %v3828_v35 = vld [vmem:[#allocation3 + $0x28] sm:$0xff] }
 0xd54   :  { %v4121_v62 = vpop.f32.mrb[220].mxu1  ;;  %v4208_v32 = vpop.f32.mrb[178].mxu0 }
 0xd55   :  { %v4123_v1 = vpop.f32.mrb[221].mxu1  ;;  %9836 = vst [vmem:[#allocation58_spill] sm:$0xff] %v9001_v0  ;;  %4394 = vmatprep.subr.bf16.mxu0 %v9001_v0  ;;  %v4210_v41 = vpop.f32.mrb[179].mxu0 }
 0xd56   :  { %v4125_v12 = vpop.f32.mrb[222].mxu1  ;;  %4395 = vmatpush1.bf16.msra.mxu0 %v8999_v55  ;;  %v9011_v0 = vpack.c.bf16 %v4210_v41, %v4206_v45  ;;  %v3827_v55 = vld [vmem:[#allocation3 + $0x20] sm:$0xff] }
 0xd57   :  { %v8995_v25 = vpack.c.bf16 %v4125_v12, %v4121_v62  ;;  %v4127_v42 = vpop.f32.mrb[223].mxu1  ;;  %v3823_v62 = vld [vmem:[#allocation3] sm:$0xff]  ;;  %v3826_v12 = vld [vmem:[#allocation3 + $0x18] sm:$0xff] }
 0xd58   :  { %v8997_v44 = vpack.c.bf16 %v4127_v42, %v4123_v1  ;;  %v3825_v1 = vld [vmem:[#allocation3 + $0x10] sm:$0xff]  ;;  %v9009_v42 = vpack.c.bf16 %v4208_v32, %v4204_v37  ;;  %9838 = vst [vmem:[#allocation60_spill] sm:$0xff] %v9011_v0  ;;  %4396 = vmatprep.subr.bf16.mxu0 %v9011_v0 }
 0xd5a   :  { %4289 = vmatprep.subr.bf16.mxu1 %v8997_v44  ;;  %9837 = vst [vmem:[#allocation59_spill] sm:$0xff] %v9009_v42  ;;  %4397 = vmatpush1.bf16.msra.mxu0 %v9009_v42  ;;  %v3831_v42 = vld [vmem:[#allocation3 + $0x40] sm:$0xff] }
 0xd5b   :  { %4290 = vmatpush1.bf16.msra.mxu1 %v8995_v25 }
 0xd5c   :  { %4736 = vmatprep.subr.bf16.mxu1 %v3824_v54  ;;  %v4214_v54 = vpop.f32.mrb[180].mxu0 }
 0xd5d   :  { %v4216_v60 = vpop.f32.mrb[181].mxu0 }
 0xd5e   :  { %4308 = vmatmul.mubr.bf16.vlgmr.msra.gmra.mrb[224].mxu1 %v8149_v4  ;;  %v4218_v37 = vpop.f32.mrb[182].mxu0 }
 0xd5f   :  { %4737 = vmatpush1.bf16.msra.mxu1 %v3823_v62  ;;  %4317 = vmatprep.mubr.bf16.mxu1 %v9822_v59  ;;  %v3830_v62 = vld [vmem:[#allocation3 + $0x38] sm:$0xff]  ;;  %v9017_v45 = vpack.c.bf16 %v4218_v37, %v4214_v54  ;;  %v4220_v32 = vpop.f32.mrb[183].mxu0 }
 0xd60   :  { %4738 = vmatprep.subr.bf16.mxu1 %v3826_v12  ;;  %v3829_v12 = vld [vmem:[#allocation3 + $0x30] sm:$0xff]  ;;  %v9019_v41 = vpack.c.bf16 %v4220_v32, %v4216_v60 }
 0xd61   :  { %9839 = vst [vmem:[#allocation61_spill] sm:$0xff] %v9017_v45 }
 0xd62   :  { %9840 = vst [vmem:[#allocation62_spill] sm:$0xff] %v9019_v41  ;;  %4398 = vmatprep.subr.bf16.mxu0 %v9019_v41 }
 0xd63   :  { %4739 = vmatpush1.bf16.msra.mxu1 %v3825_v1  ;;  %v3832_v1 = vld [vmem:[#allocation3 + $0x48] sm:$0xff]  ;;  %4399 = vmatpush1.bf16.msra.mxu0 %v9017_v45  ;;  %v3835_v45 = vld [vmem:[#allocation3 + $0x60] sm:$0xff] }
 0xd64   :  { %4740 = vmatprep.subr.bf16.mxu1 %v3828_v35  ;;  %v4224_v35 = vpop.f32.mrb[184].mxu0 }
 0xd65   :  { %v4226_v0 = vpop.f32.mrb[185].mxu0 }
 0xd66   :  { %4318 = vmatmul.mubr.bf16.gmra.mrb[228].mxu1 %v8171_v9  ;;  %v4228_v54 = vpop.f32.mrb[186].mxu0 }
 0xd67   :  { %4741 = vmatpush1.bf16.msra.mxu1 %v3827_v55  ;;  %4327 = vmatprep.mubr.bf16.mxu1 %v9822_v59  ;;  %v3834_v55 = vld [vmem:[#allocation3 + $0x58] sm:$0xff]  ;;  %v9025_v60 = vpack.c.bf16 %v4228_v54, %v4224_v35  ;;  %v4230_v37 = vpop.f32.mrb[187].mxu0 }
 0xd68   :  { %4742 = vmatprep.subr.bf16.mxu1 %v3830_v62  ;;  %v3833_v62 = vld [vmem:[#allocation3 + $0x50] sm:$0xff]  ;;  %v9027_v32 = vpack.c.bf16 %v4230_v37, %v4226_v0 }
 0xd69   :  { %9841 = vst [vmem:[#allocation63_spill] sm:$0xff] %v9025_v60 }
 0xd6a   :  { %4400 = vmatprep.subr.bf16.mxu0 %v9027_v32 }
 0xd6b   :  { %4743 = vmatpush1.bf16.msra.mxu1 %v3829_v12  ;;  %v3836_v12 = vld [vmem:[#allocation3 + $0x68] sm:$0xff]  ;;  %4401 = vmatpush1.bf16.msra.mxu0 %v9025_v60  ;;  %v3842_v60 = vld [vmem:[#allocation3 + $0x98] sm:$0xff] }
 0xd6c   :  { %4744 = vmatprep.subr.bf16.mxu1 %v3832_v1  ;;  %v4234_v1 = vpop.f32.mrb[188].mxu0 }
 0xd6d   :  { %v4236_v41 = vpop.f32.mrb[189].mxu0 }
 0xd6e   :  { %4328 = vmatmul.mubr.bf16.gmra.mrb[232].mxu1 %v8173_v11  ;;  %v4238_v35 = vpop.f32.mrb[190].mxu0 }
 0xd6f   :  { %4745 = vmatpush1.bf16.msra.mxu1 %v3831_v42  ;;  %4337 = vmatprep.mubr.bf16.mxu1 %v9822_v59  ;;  %v3838_v42 = vld [vmem:[#allocation3 + $0x78] sm:$0xff]  ;;  %v9033_v0 = vpack.c.bf16 %v4238_v35, %v4234_v1  ;;  %v4240_v54 = vpop.f32.mrb[191].mxu0  ;;  %v3844_v1 = vld [vmem:[#allocation3 + $0xa8] sm:$0xff]  ;;  %v3845_v35 = vld [vmem:[#allocation3 + $0xb0] sm:$0xff] }
 0xd70   :  { %4746 = vmatprep.subr.bf16.mxu1 %v3834_v55  ;;  %v3837_v55 = vld [vmem:[#allocation3 + $0x70] sm:$0xff]  ;;  %v9035_v37 = vpack.c.bf16 %v4240_v54, %v4236_v41  ;;  %v3843_v41 = vld [vmem:[#allocation3 + $0xa0] sm:$0xff]  ;;  %v3850_v54 = vld [vmem:[#allocation3 + $0xd8] sm:$0xff] }
 0xd72   :  { %4402 = vmatprep.subr.bf16.mxu0 %v9035_v37 }
 0xd73   :  { %4747 = vmatpush1.bf16.msra.mxu1 %v3833_v62  ;;  %v3840_v62 = vld [vmem:[#allocation3 + $0x88] sm:$0xff]  ;;  %4403 = vmatpush1.bf16.msra.mxu0 %v9033_v0 }
 0xd74   :  { %4748 = vmatprep.subr.bf16.mxu1 %v3836_v12  ;;  %v3839_v12 = vld [vmem:[#allocation3 + $0x80] sm:$0xff] }
 0xd76   :  { %4338 = vmatmul.mubr.bf16.gmra.mrb[236].mxu1 %v8178_v16  ;;  %4421 = vmatmul.mubr.bf16.vlgmr.msra.gmra.mrb[192].mxu0 %v8149_v4  ;;  %v3968_v4 = vld [vmem:[#allocation3 + $0x488] sm:$0xff] }
 0xd77   :  { %4749 = vmatpush1.bf16.msra.mxu1 %v3835_v45  ;;  %4347 = vmatprep.mubr.bf16.mxu1 %v9822_v59  ;;  %v3841_v45 = vld [vmem:[#allocation3 + $0x90] sm:$0xff] }
 0xd78   :  { %4750 = vmatprep.subr.bf16.mxu1 %v3838_v42  ;;  %4430 = vmatprep.mubr.bf16.mxu0 %v9822_v59  ;;  %v3846_v42 = vld [vmem:[#allocation3 + $0xb8] sm:$0xff] }
 0xd7b   :  { %4751 = vmatpush1.bf16.msra.mxu1 %v3837_v55  ;;  %v3847_v55 = vld [vmem:[#allocation3 + $0xc0] sm:$0xff] }
 0xd7c   :  { %4752 = vmatprep.subr.bf16.mxu1 %v3840_v62  ;;  %v3849_v62 = vld [vmem:[#allocation3 + $0xd0] sm:$0xff] }
 0xd7e   :  { %4348 = vmatmul.mubr.bf16.gmra.mrb[240].mxu1 %v8180_v17  ;;  %4431 = vmatmul.mubr.bf16.gmra.mrb[196].mxu0 %v8171_v9 }
 0xd7f   :  { %4753 = vmatpush1.bf16.msra.mxu1 %v3839_v12  ;;  %4357 = vmatprep.mubr.bf16.mxu1 %v9822_v59  ;;  %v3852_v12 = vld [vmem:[#allocation3 + $0xe8] sm:$0xff] }
 0xd80   :  { %4754 = vmatprep.subr.bf16.mxu1 %v3842_v60  ;;  %v3848_v60 = vld [vmem:[#allocation3 + $0xc8] sm:$0xff]  ;;  %4440 = vmatprep.mubr.bf16.mxu0 %v9822_v59 }
 0xd83   :  { %4755 = vmatpush1.bf16.msra.mxu1 %v3841_v45  ;;  %v3851_v45 = vld [vmem:[#allocation3 + $0xe0] sm:$0xff] }
 0xd84   :  { %4756 = vmatprep.subr.bf16.mxu1 %v3844_v1  ;;  %v3854_v1 = vld [vmem:[#allocation3 + $0xf8] sm:$0xff] }
 0xd86   :  { %4358 = vmatmul.mubr.bf16.gmra.mrb[244].mxu1 %v8184_v22  ;;  %4441 = vmatmul.mubr.bf16.gmra.mrb[200].mxu0 %v8173_v11  ;;  %v3966_v11 = vld [vmem:[#allocation3 + $0x478] sm:$0xff] }
 0xd87   :  { %4757 = vmatpush1.bf16.msra.mxu1 %v3843_v41  ;;  %4367 = vmatprep.mubr.bf16.mxu1 %v9822_v59  ;;  %v3853_v41 = vld [vmem:[#allocation3 + $0xf0] sm:$0xff] }
 0xd88   :  { %4758 = vmatprep.subr.bf16.mxu1 %v3846_v42  ;;  %4450 = vmatprep.mubr.bf16.mxu0 %v9822_v59  ;;  %v3856_v42 = vld [vmem:[#allocation3 + $0x108] sm:$0xff] }
 0xd8b   :  { %4759 = vmatpush1.bf16.msra.mxu1 %v3845_v35  ;;  %v3855_v35 = vld [vmem:[#allocation3 + $0x100] sm:$0xff] }
 0xd8c   :  { %4760 = vmatprep.subr.bf16.mxu1 %v3848_v60  ;;  %v3858_v60 = vld [vmem:[#allocation3 + $0x118] sm:$0xff] }
 0xd8e   :  { %4368 = vmatmul.mubr.bf16.gmra.mrb[248].mxu1 %v8186_v23  ;;  %4451 = vmatmul.mubr.bf16.gmra.mrb[204].mxu0 %v8178_v16  ;;  %v3963_v16 = vld [vmem:[#allocation3 + $0x460] sm:$0xff] }
 0xd8f   :  { %4761 = vmatpush1.bf16.msra.mxu1 %v3847_v55  ;;  %4377 = vmatprep.mubr.bf16.mxu1 %v9822_v59  ;;  %v3857_v55 = vld [vmem:[#allocation3 + $0x110] sm:$0xff] }
 0xd90   :  { %4762 = vmatprep.subr.bf16.mxu1 %v3850_v54  ;;  %4460 = vmatprep.mubr.bf16.mxu0 %v9822_v59  ;;  %v3859_v54 = vld [vmem:[#allocation3 + $0x120] sm:$0xff] }
 0xd93   :  { %4763 = vmatpush1.bf16.msra.mxu1 %v3849_v62  ;;  %v3862_v62 = vld [vmem:[#allocation3 + $0x138] sm:$0xff] }
 0xd94   :  { %4764 = vmatprep.subr.bf16.mxu1 %v3852_v12  ;;  %v3863_v12 = vld [vmem:[#allocation3 + $0x140] sm:$0xff] }
 0xd96   :  { %4378 = vmatmul.mubr.bf16.gmra.mrb[252].mxu1 %v8190_v28  ;;  %4461 = vmatmul.mubr.bf16.gmra.mrb[208].mxu0 %v8180_v17  ;;  %v3964_v17 = vld [vmem:[#allocation3 + $0x468] sm:$0xff] }
 0xd97   :  { %4765 = vmatpush1.bf16.msra.mxu1 %v3851_v45  ;;  %4768 = vmatprep.mubr.bf16.mxu1 %v8753_v48  ;;  %v3860_v48 = vld [vmem:[#allocation3 + $0x128] sm:$0xff]  ;;  %v3866_v45 = vld [vmem:[#allocation3 + $0x158] sm:$0xff] }
 0xd98   :  { %4766 = vmatprep.subr.bf16.mxu1 %v3854_v1  ;;  %4470 = vmatprep.mubr.bf16.mxu0 %v9822_v59  ;;  %v3867_v1 = vld [vmem:[#allocation3 + $0x160] sm:$0xff] }
 0xd9b   :  { %4767 = vmatpush1.bf16.msra.mxu1 %v3853_v41  ;;  %v3870_v41 = vld [vmem:[#allocation3 + $0x178] sm:$0xff] }
 0xd9c   :  { %4849 = vmatprep.subr.bf16.mxu1 %v3856_v42  ;;  %v3871_v42 = vld [vmem:[#allocation3 + $0x180] sm:$0xff] }
 0xd9e   :  { %4769 = vmatmul.mubr.bf16.vlgmr.msra.gmra.mrb[0].mxu1 %v8749_v19  ;;  %v3861_v19 = vld [vmem:[#allocation3 + $0x130] sm:$0xff]  ;;  %4471 = vmatmul.mubr.bf16.gmra.mrb[212].mxu0 %v8184_v22 }
 0xd9f   :  { %4850 = vmatpush1.bf16.msra.mxu1 %v3855_v35  ;;  %4778 = vmatprep.mubr.bf16.mxu1 %v8769_v2  ;;  %v3864_v2 = vld [vmem:[#allocation3 + $0x148] sm:$0xff]  ;;  %v3874_v35 = vld [vmem:[#allocation3 + $0x198] sm:$0xff]  ;;  %v3961_v22 = vld [vmem:[#allocation3 + $0x450] sm:$0xff] }
 0xda0   :  { %4851 = vmatprep.subr.bf16.mxu1 %v3858_v60  ;;  %4480 = vmatprep.mubr.bf16.mxu0 %v9822_v59  ;;  %v3873_v60 = vld [vmem:[#allocation3 + $0x190] sm:$0xff] }
 0xda3   :  { %4852 = vmatpush1.bf16.msra.mxu1 %v3857_v55  ;;  %v3878_v55 = vld [vmem:[#allocation3 + $0x1b8] sm:$0xff] }
 0xda4   :  { %4853 = vmatprep.subr.bf16.mxu1 %v3860_v48  ;;  %v3877_v48 = vld [vmem:[#allocation3 + $0x1b0] sm:$0xff] }
 0xda6   :  { %4779 = vmatmul.mubr.bf16.gmra.mrb[4].mxu1 %v8765_v46  ;;  %v3865_v46 = vld [vmem:[#allocation3 + $0x150] sm:$0xff]  ;;  %4481 = vmatmul.mubr.bf16.gmra.mrb[216].mxu0 %v8186_v23  ;;  %v9856_v23 = vld [vmem:[#allocation58_spill] sm:$0xff] }
 0xda7   :  { %4854 = vmatpush1.bf16.msra.mxu1 %v3859_v54  ;;  %4788 = vmatprep.mubr.bf16.mxu1 %v8785_v14  ;;  %v3868_v14 = vld [vmem:[#allocation3 + $0x168] sm:$0xff] }
 0xda8   :  { %4855 = vmatprep.subr.bf16.mxu1 %v3862_v62  ;;  %4490 = vmatprep.mubr.bf16.mxu0 %v9822_v59  ;;  %v3880_v54 = vld [vmem:[#allocation3 + $0x1c8] sm:$0xff]  ;;  %v3882_v62 = vld [vmem:[#allocation3 + $0x1d8] sm:$0xff]  ;;  %v3967_v59 = vld [vmem:[#allocation3 + $0x480] sm:$0xff] }
 0xdab   :  { %4856 = vmatpush1.bf16.msra.mxu1 %v3861_v19  ;;  %v3884_v19 = vld [vmem:[#allocation3 + $0x1e8] sm:$0xff] }
 0xdac   :  { %4857 = vmatprep.subr.bf16.mxu1 %v3864_v2  ;;  %v3886_v2 = vld [vmem:[#allocation3 + $0x1f8] sm:$0xff] }
 0xdae   :  { %4789 = vmatmul.mubr.bf16.gmra.mrb[8].mxu1 %v8781_v24  ;;  %v3869_v24 = vld [vmem:[#allocation3 + $0x170] sm:$0xff]  ;;  %4491 = vmatmul.mubr.bf16.gmra.mrb[220].mxu0 %v8190_v28  ;;  %v9854_v28 = vld [vmem:[#allocation55_spill] sm:$0xff] }
 0xdaf   :  { %4858 = vmatpush1.bf16.msra.mxu1 %v3863_v12  ;;  %4798 = vmatprep.mubr.bf16.mxu1 %v8801_v3  ;;  %v3872_v3 = vld [vmem:[#allocation3 + $0x188] sm:$0xff] }
 0xdb0   :  { %4859 = vmatprep.subr.bf16.mxu1 %v3866_v45  ;;  %v3888_v12 = vld [vmem:[#allocation3 + $0x208] sm:$0xff]  ;;  %v3890_v45 = vld [vmem:[#allocation3 + $0x218] sm:$0xff] }
 0xdb3   :  { %4860 = vmatpush1.bf16.msra.mxu1 %v3865_v46  ;;  %v3892_v46 = vld [vmem:[#allocation3 + $0x228] sm:$0xff] }
 0xdb4   :  { %4861 = vmatprep.subr.bf16.mxu1 %v3868_v14  ;;  %v3894_v14 = vld [vmem:[#allocation3 + $0x238] sm:$0xff] }
 0xdb6   :  { %4799 = vmatmul.mubr.bf16.gmra.mrb[12].mxu1 %v8797_v51  ;;  %v3876_v51 = vld [vmem:[#allocation3 + $0x1a8] sm:$0xff] }
 0xdb7   :  { %4862 = vmatpush1.bf16.msra.mxu1 %v3867_v1  ;;  %4808 = vmatprep.mubr.bf16.mxu1 %v8817_v36  ;;  %v3875_v36 = vld [vmem:[#allocation3 + $0x1a0] sm:$0xff]  ;;  %v3896_v1 = vld [vmem:[#allocation3 + $0x248] sm:$0xff] }
 0xdb8   :  { %4863 = vmatprep.subr.bf16.mxu1 %v3870_v41  ;;  %v3898_v41 = vld [vmem:[#allocation3 + $0x258] sm:$0xff] }
 0xdbb   :  { %4864 = vmatpush1.bf16.msra.mxu1 %v3869_v24  ;;  %v3900_v24 = vld [vmem:[#allocation3 + $0x268] sm:$0xff] }
 0xdbc   :  { %4865 = vmatprep.subr.bf16.mxu1 %v3872_v3  ;;  %v3902_v3 = vld [vmem:[#allocation3 + $0x278] sm:$0xff] }
 0xdbe   :  { %4809 = vmatmul.mubr.bf16.gmra.mrb[16].mxu1 %v8813_v7  ;;  %v3879_v7 = vld [vmem:[#allocation3 + $0x1c0] sm:$0xff] }
 0xdbf   :  { %4866 = vmatpush1.bf16.msra.mxu1 %v3871_v42  ;;  %4818 = vmatprep.mubr.bf16.mxu1 %v8833_v27  ;;  %v3881_v27 = vld [vmem:[#allocation3 + $0x1d0] sm:$0xff]  ;;  %v3904_v42 = vld [vmem:[#allocation3 + $0x288] sm:$0xff] }
 0xdc0   :  { %4867 = vmatprep.subr.bf16.mxu1 %v3874_v35  ;;  %v3906_v35 = vld [vmem:[#allocation3 + $0x298] sm:$0xff] }
 0xdc3   :  { %4868 = vmatpush1.bf16.msra.mxu1 %v3873_v60  ;;  %v3908_v60 = vld [vmem:[#allocation3 + $0x2a8] sm:$0xff] }
 0xdc4   :  { %4869 = vmatprep.subr.bf16.mxu1 %v3876_v51  ;;  %v3910_v51 = vld [vmem:[#allocation3 + $0x2b8] sm:$0xff] }
 0xdc6   :  { %4819 = vmatmul.mubr.bf16.gmra.mrb[20].mxu1 %v8829_v21  ;;  %v3883_v21 = vld [vmem:[#allocation3 + $0x1e0] sm:$0xff] }
 0xdc7   :  { %4870 = vmatpush1.bf16.msra.mxu1 %v3875_v36  ;;  %4828 = vmatprep.mubr.bf16.mxu1 %v8849_v63  ;;  %v3885_v63 = vld [vmem:[#allocation3 + $0x1f0] sm:$0xff]  ;;  %v3912_v36 = vld [vmem:[#allocation3 + $0x2c8] sm:$0xff] }
 0xdc8   :  { %4871 = vmatprep.subr.bf16.mxu1 %v3878_v55  ;;  %v3914_v55 = vld [vmem:[#allocation3 + $0x2d8] sm:$0xff] }
 0xdcb   :  { %4872 = vmatpush1.bf16.msra.mxu1 %v3877_v48  ;;  %v3916_v48 = vld [vmem:[#allocation3 + $0x2e8] sm:$0xff] }
 0xdcc   :  { %4873 = vmatprep.subr.bf16.mxu1 %v3880_v54  ;;  %v3918_v54 = vld [vmem:[#allocation3 + $0x2f8] sm:$0xff] }
 0xdce   :  { %4829 = vmatmul.mubr.bf16.gmra.mrb[24].mxu1 %v8845_v26  ;;  %v3887_v26 = vld [vmem:[#allocation3 + $0x200] sm:$0xff] }
 0xdcf   :  { %4874 = vmatpush1.bf16.msra.mxu1 %v3879_v7  ;;  %4838 = vmatprep.mubr.bf16.mxu1 %v8865_v31  ;;  %v3889_v31 = vld [vmem:[#allocation3 + $0x210] sm:$0xff]  ;;  %v3920_v7 = vld [vmem:[#allocation3 + $0x308] sm:$0xff] }
 0xdd0   :  { %4875 = vmatprep.subr.bf16.mxu1 %v3882_v62  ;;  %v3922_v62 = vld [vmem:[#allocation3 + $0x318] sm:$0xff] }
 0xdd3   :  { %4876 = vmatpush1.bf16.msra.mxu1 %v3881_v27  ;;  %v3924_v27 = vld [vmem:[#allocation3 + $0x328] sm:$0xff] }
 0xdd4   :  { %4877 = vmatprep.subr.bf16.mxu1 %v3884_v19  ;;  %v3926_v19 = vld [vmem:[#allocation3 + $0x338] sm:$0xff] }
 0xdd6   :  { %4839 = vmatmul.mubr.bf16.gmra.mrb[28].mxu1 %v8861_v49  ;;  %v3891_v49 = vld [vmem:[#allocation3 + $0x220] sm:$0xff] }
 0xdd7   :  { %4878 = vmatpush1.bf16.msra.mxu1 %v3883_v21  ;;  %4881 = vmatprep.mubr.bf16.mxu1 %v8755_v13  ;;  %v3893_v13 = vld [vmem:[#allocation3 + $0x230] sm:$0xff]  ;;  %v3928_v21 = vld [vmem:[#allocation3 + $0x348] sm:$0xff] }
 0xdd8   :  { %4879 = vmatprep.subr.bf16.mxu1 %v3886_v2  ;;  %v3929_v2 = vld [vmem:[#allocation3 + $0x350] sm:$0xff] }
 0xddb   :  { %4880 = vmatpush1.bf16.msra.mxu1 %v3885_v63 }
 0xddc   :  { %4962 = vmatprep.subr.bf16.mxu1 %v3888_v12 }
 0xdde   :  { %4882 = vmatmul.mubr.bf16.vlgmr.msra.gmra.mrb[0].mxu1 %v8751_v15  ;;  %v3895_v15 = vld [vmem:[#allocation3 + $0x240] sm:$0xff] }
 0xddf   :  { %4963 = vmatpush1.bf16.msra.mxu1 %v3887_v26  ;;  %4891 = vmatprep.mubr.bf16.mxu1 %v8771_v10  ;;  %v3897_v10 = vld [vmem:[#allocation3 + $0x250] sm:$0xff]  ;;  %v3962_v26 = vld [vmem:[#allocation3 + $0x458] sm:$0xff] }
 0xde0   :  { %4964 = vmatprep.subr.bf16.mxu1 %v3890_v45 }
 0xde3   :  { %4965 = vmatpush1.bf16.msra.mxu1 %v3889_v31  ;;  %v3934_v31 = vld [vmem:[#allocation3 + $0x378] sm:$0xff] }
 0xde4   :  { %4966 = vmatprep.subr.bf16.mxu1 %v3892_v46  ;;  %v9842_v46 = vld [vmem:[#allocation46_spill] sm:$0xff] }
 0xde6   :  { %4892 = vmatmul.mubr.bf16.gmra.mrb[4].mxu1 %v8767_v50  ;;  %v3899_v50 = vld [vmem:[#allocation3 + $0x260] sm:$0xff] }
 0xde7   :  { %4967 = vmatpush1.bf16.msra.mxu1 %v3891_v49  ;;  %4901 = vmatprep.mubr.bf16.mxu1 %v8787_v38  ;;  %v3901_v38 = vld [vmem:[#allocation3 + $0x270] sm:$0xff] }
 0xde8   :  { %4968 = vmatprep.subr.bf16.mxu1 %v3894_v14  ;;  %v3933_v49 = vld [vmem:[#allocation3 + $0x370] sm:$0xff] }
 0xdeb   :  { %4969 = vmatpush1.bf16.msra.mxu1 %v3893_v13  ;;  %v3936_v13 = vld [vmem:[#allocation3 + $0x388] sm:$0xff] }
 0xdec   :  { %4970 = vmatprep.subr.bf16.mxu1 %v3896_v1 }
 0xdee   :  { %4902 = vmatmul.mubr.bf16.gmra.mrb[8].mxu1 %v8783_v52  ;;  %v3903_v52 = vld [vmem:[#allocation3 + $0x280] sm:$0xff] }
 0xdef   :  { %4971 = vmatpush1.bf16.msra.mxu1 %v3895_v15  ;;  %4911 = vmatprep.mubr.bf16.mxu1 %v8803_v53  ;;  %v3905_v53 = vld [vmem:[#allocation3 + $0x290] sm:$0xff] }
 0xdf0   :  { %4972 = vmatprep.subr.bf16.mxu1 %v3898_v41  ;;  %v3960_v41 = vld [vmem:[#allocation3 + $0x448] sm:$0xff] }
 0xdf3   :  { %4973 = vmatpush1.bf16.msra.mxu1 %v3897_v10 }
 0xdf4   :  { %4974 = vmatprep.subr.bf16.mxu1 %v3900_v24 }
 0xdf6   :  { %4912 = vmatmul.mubr.bf16.gmra.mrb[12].mxu1 %v8799_v8  ;;  %v3907_v8 = vld [vmem:[#allocation3 + $0x2a0] sm:$0xff] }
 0xdf7   :  { %4975 = vmatpush1.bf16.msra.mxu1 %v3899_v50  ;;  %4921 = vmatprep.mubr.bf16.mxu1 %v8819_v18  ;;  %v3909_v18 = vld [vmem:[#allocation3 + $0x2b0] sm:$0xff]  ;;  %v3938_v50 = vld [vmem:[#allocation3 + $0x398] sm:$0xff] }
 0xdf8   :  { %4976 = vmatprep.subr.bf16.mxu1 %v3902_v3  ;;  %v9843_v3 = vld [vmem:[#allocation45_spill] sm:$0xff] }
 0xdfb   :  { %4977 = vmatpush1.bf16.msra.mxu1 %v3901_v38  ;;  %v9844_v38 = vld [vmem:[#allocation50_spill] sm:$0xff] }
 0xdfc   :  { %4978 = vmatprep.subr.bf16.mxu1 %v3904_v42  ;;  %v3937_v42 = vld [vmem:[#allocation3 + $0x390] sm:$0xff] }
 0xdfe   :  { %4922 = vmatmul.mubr.bf16.gmra.mrb[16].mxu1 %v8815_v61  ;;  %v3911_v61 = vld [vmem:[#allocation3 + $0x2c0] sm:$0xff] }
 0xdff   :  { %4979 = vmatpush1.bf16.msra.mxu1 %v3903_v52  ;;  %4931 = vmatprep.mubr.bf16.mxu1 %v8835_v29  ;;  %v3913_v29 = vld [vmem:[#allocation3 + $0x2d0] sm:$0xff] }
 0xe00   :  { %4980 = vmatprep.subr.bf16.mxu1 %v3906_v35  ;;  %v3940_v35 = vld [vmem:[#allocation3 + $0x3a8] sm:$0xff] }
 0xe03   :  { %4981 = vmatpush1.bf16.msra.mxu1 %v3905_v53 }
 0xe04   :  { %4982 = vmatprep.subr.bf16.mxu1 %v3908_v60 }
 0xe06   :  { %4932 = vmatmul.mubr.bf16.gmra.mrb[20].mxu1 %v8831_v20  ;;  %v3915_v20 = vld [vmem:[#allocation3 + $0x2e0] sm:$0xff] }
 0xe07   :  { %4983 = vmatpush1.bf16.msra.mxu1 %v3907_v8  ;;  %4941 = vmatprep.mubr.bf16.mxu1 %v8851_v34  ;;  %v3917_v34 = vld [vmem:[#allocation3 + $0x2f0] sm:$0xff] }
 0xe08   :  { %4984 = vmatprep.subr.bf16.mxu1 %v3910_v51  ;;  %v3957_v8 = vld [vmem:[#allocation3 + $0x430] sm:$0xff] }
 0xe0b   :  { %4985 = vmatpush1.bf16.msra.mxu1 %v3909_v18  ;;  %v3939_v18 = vld [vmem:[#allocation3 + $0x3a0] sm:$0xff] }
 0xe0c   :  { %4986 = vmatprep.subr.bf16.mxu1 %v3912_v36 }
 0xe0e   :  { %4942 = vmatmul.mubr.bf16.gmra.mrb[24].mxu1 %v8847_v39  ;;  %v3919_v39 = vld [vmem:[#allocation3 + $0x300] sm:$0xff] }
 0xe0f   :  { %4987 = vmatpush1.bf16.msra.mxu1 %v3911_v61  ;;  %4951 = vmatprep.mubr.bf16.mxu1 %v8867_v43  ;;  %v3921_v43 = vld [vmem:[#allocation3 + $0x310] sm:$0xff]  ;;  %v3942_v61 = vld [vmem:[#allocation3 + $0x3b8] sm:$0xff] }
 0xe10   :  { %4988 = vmatprep.subr.bf16.mxu1 %v3914_v55  ;;  %v9845_v55 = vld [vmem:[#allocation49_spill] sm:$0xff] }
 0xe13   :  { %4989 = vmatpush1.bf16.msra.mxu1 %v3913_v29  ;;  %v9846_v29 = vld [vmem:[#allocation54_spill] sm:$0xff] }
 0xe14   :  { %4990 = vmatprep.subr.bf16.mxu1 %v3916_v48  ;;  %v3941_v48 = vld [vmem:[#allocation3 + $0x3b0] sm:$0xff] }
 0xe16   :  { %4952 = vmatmul.mubr.bf16.gmra.mrb[28].mxu1 %v8863_v6  ;;  %v3923_v6 = vld [vmem:[#allocation3 + $0x320] sm:$0xff] }
 0xe17   :  { %4991 = vmatpush1.bf16.msra.mxu1 %v3915_v20  ;;  %4994 = vmatprep.mubr.bf16.mxu1 %v8937_v47  ;;  %v3925_v47 = vld [vmem:[#allocation3 + $0x330] sm:$0xff] }
 0xe18   :  { %4992 = vmatprep.subr.bf16.mxu1 %v3918_v54  ;;  %v3944_v54 = vld [vmem:[#allocation3 + $0x3c8] sm:$0xff] }
 0xe1b   :  { %4993 = vmatpush1.bf16.msra.mxu1 %v3917_v34 }
 0xe1c   :  { %5075 = vmatprep.subr.bf16.mxu1 %v3920_v7 }
 0xe1e   :  { %4995 = vmatmul.mubr.bf16.vlgmr.msra.gmra.mrb[0].mxu1 %v8935_v30  ;;  %v3927_v30 = vld [vmem:[#allocation3 + $0x340] sm:$0xff] }
 0xe1f   :  { %5004 = vmatprep.mubr.bf16.mxu1 %v8943_v57  ;;  %5076 = vmatpush1.bf16.msra.mxu1 %v3919_v39  ;;  %v3930_v57 = vld [vmem:[#allocation3 + $0x358] sm:$0xff]  ;;  %v9851_v39 = vld [vmem:[#allocation51_spill] sm:$0xff] }
 0xe20   :  { %5077 = vmatprep.subr.bf16.mxu1 %v3922_v62 }
 0xe23   :  { %5078 = vmatpush1.bf16.msra.mxu1 %v3921_v43  ;;  %v3943_v43 = vld [vmem:[#allocation3 + $0x3c0] sm:$0xff] }
 0xe24   :  { %5079 = vmatprep.subr.bf16.mxu1 %v3924_v27  ;;  %v9852_v27 = vld [vmem:[#allocation56_spill] sm:$0xff] }
 0xe26   :  { %5005 = vmatmul.mubr.bf16.gmra.mrb[4].mxu1 %v8941_v5  ;;  %v3932_v5 = vld [vmem:[#allocation3 + $0x368] sm:$0xff] }
 0xe27   :  { %5014 = vmatprep.mubr.bf16.mxu1 %v8949_v56  ;;  %5080 = vmatpush1.bf16.msra.mxu1 %v3923_v6  ;;  %v3946_v6 = vld [vmem:[#allocation3 + $0x3d8] sm:$0xff] }
 0xe28   :  { %5081 = vmatprep.subr.bf16.mxu1 %v3926_v19  ;;  %v9847_v19 = vld [vmem:[#allocation53_spill] sm:$0xff] }
 0xe2b   :  { %5082 = vmatpush1.bf16.msra.mxu1 %v3925_v47  ;;  %v3945_v47 = vld [vmem:[#allocation3 + $0x3d0] sm:$0xff] }
 0xe2c   :  { %5083 = vmatprep.subr.bf16.mxu1 %v3928_v21 }
 0xe2e   :  { %5015 = vmatmul.mubr.bf16.gmra.mrb[8].mxu1 %v8947_v58  ;;  %v3931_v58 = vld [vmem:[#allocation3 + $0x360] sm:$0xff] }
 0xe2f   :  { %5024 = vmatprep.mubr.bf16.mxu1 %v8955_v33  ;;  %5084 = vmatpush1.bf16.msra.mxu1 %v3927_v30  ;;  %v3948_v30 = vld [vmem:[#allocation3 + $0x3e8] sm:$0xff] }
 0xe30   :  { %5085 = vmatprep.subr.bf16.mxu1 %v3930_v57 }
 0xe31   :  { %v9100_v63 = vpop.f32.mrb[224].mxu1 }
 0xe32   :  { %v9102_v12 = vpop.f32.mrb[225].mxu1 }
 0xe33   :  { %5086 = vmatpush1.bf16.msra.mxu1 %v3929_v2  ;;  %v9104_v56 = vpop.f32.mrb[226].mxu1 }
 0xe34   :  { %v9108_v45 = vpop.f32.mrb[227].mxu1  ;;  %5087 = vmatprep.subr.bf16.mxu1 %v3932_v5  ;;  %v3958_v5 = vld [vmem:[#allocation3 + $0x438] sm:$0xff] }
 0xe36   :  { %5025 = vmatmul.mubr.bf16.gmra.mrb[12].mxu1 %v8953_v40  ;;  %v3935_v40 = vld [vmem:[#allocation3 + $0x380] sm:$0xff] }
 0xe37   :  { %5034 = vmatprep.mubr.bf16.mxu1 %v9842_v46  ;;  %5088 = vmatpush1.bf16.msra.mxu1 %v3931_v58 }
 0xe38   :  { %5089 = vmatprep.subr.bf16.mxu1 %v3934_v31  ;;  %v3947_v31 = vld [vmem:[#allocation3 + $0x3e0] sm:$0xff] }
 0xe39   :  { %v9114_v14 = vpop.f32.mrb[228].mxu1 }
 0xe3a   :  { %v9116_v1 = vpop.f32.mrb[229].mxu1 }
 0xe3b   :  { %5090 = vmatpush1.bf16.msra.mxu1 %v3933_v49  ;;  %v9118_v15 = vpop.f32.mrb[230].mxu1  ;;  %v3950_v49 = vld [vmem:[#allocation3 + $0x3f8] sm:$0xff] }
 0xe3c   :  { %v9122_v10 = vpop.f32.mrb[231].mxu1  ;;  %5091 = vmatprep.subr.bf16.mxu1 %v3936_v13 }
 0xe3e   :  { %5035 = vmatmul.mubr.bf16.gmra.mrb[16].mxu1 %v9843_v3 }
 0xe3f   :  { %5044 = vmatprep.mubr.bf16.mxu1 %v9844_v38  ;;  %5092 = vmatpush1.bf16.msra.mxu1 %v3935_v40 }
 0xe40   :  { %5093 = vmatprep.subr.bf16.mxu1 %v3938_v50  ;;  %v9848_v50 = vld [vmem:[#allocation48_spill] sm:$0xff] }
 0xe41   :  { %v9128_v52 = vpop.f32.mrb[232].mxu1 }
 0xe42   :  { %v9130_v53 = vpop.f32.mrb[233].mxu1 }
 0xe43   :  { %5094 = vmatpush1.bf16.msra.mxu1 %v3937_v42  ;;  %v9132_v60 = vpop.f32.mrb[234].mxu1  ;;  %v3949_v42 = vld [vmem:[#allocation3 + $0x3f0] sm:$0xff] }
 0xe44   :  { %v9136_v51 = vpop.f32.mrb[235].mxu1  ;;  %5095 = vmatprep.subr.bf16.mxu1 %v3940_v35 }
 0xe46   :  { %5045 = vmatmul.mubr.bf16.gmra.mrb[20].mxu1 %v9845_v55 }
 0xe47   :  { %5054 = vmatprep.mubr.bf16.mxu1 %v9846_v29  ;;  %5096 = vmatpush1.bf16.msra.mxu1 %v3939_v18  ;;  %v3956_v29 = vld [vmem:[#allocation3 + $0x428] sm:$0xff] }
 0xe48   :  { %5097 = vmatprep.subr.bf16.mxu1 %v3942_v61  ;;  %v3952_v61 = vld [vmem:[#allocation3 + $0x408] sm:$0xff] }
 0xe49   :  { %v9142_v20 = vpop.f32.mrb[236].mxu1  ;;  %v9166_v46 = vpop.f32.mrb[192].mxu0 }
 0xe4a   :  { %v9144_v34 = vpop.f32.mrb[237].mxu1  ;;  %v9170_v13 = vpop.f32.mrb[193].mxu0 }
 0xe4b   :  { %5098 = vmatpush1.bf16.msra.mxu1 %v3941_v48  ;;  %v9146_v7 = vpop.f32.mrb[238].mxu1  ;;  %v9173_v40 = vpop.f32.mrb[194].mxu0 }
 0xe4c   :  { %v9150_v62 = vpop.f32.mrb[239].mxu1  ;;  %5099 = vmatprep.subr.bf16.mxu1 %v3944_v54  ;;  %v9178_v38 = vpop.f32.mrb[195].mxu0  ;;  %v3951_v54 = vld [vmem:[#allocation3 + $0x400] sm:$0xff] }
 0xe4e   :  { %5055 = vmatmul.mubr.bf16.gmra.mrb[24].mxu1 %v9847_v19  ;;  %v3954_v19 = vld [vmem:[#allocation3 + $0x418] sm:$0xff] }
 0xe4f   :  { %5064 = vmatprep.mubr.bf16.mxu1 %v8997_v44  ;;  %5100 = vmatpush1.bf16.msra.mxu1 %v3943_v43 }
 0xe50   :  { %5101 = vmatprep.subr.bf16.mxu1 %v3946_v6 }
 0xe51   :  { %v9156_v21 = vpop.f32.mrb[240].mxu1  ;;  %v9192_v43 = vpop.f32.mrb[196].mxu0 }
 0xe52   :  { %v9158_v57 = vpop.f32.mrb[241].mxu1 }
 0xe53   :  { %5102 = vmatpush1.bf16.msra.mxu1 %v3945_v47  ;;  %v9160_v2 = vpop.f32.mrb[242].mxu1  ;;  %v9196_v47 = vpop.f32.mrb[197].mxu0 }
 0xe54   :  { %v9164_v58 = vpop.f32.mrb[243].mxu1  ;;  %5103 = vmatprep.subr.bf16.mxu1 %v3948_v30  ;;  %v9849_v30 = vld [vmem:[#allocation47_spill] sm:$0xff] }
 0xe56   :  { %5065 = vmatmul.mubr.bf16.gmra.mrb[28].mxu1 %v8995_v25 }
 0xe57   :  { %5104 = vmatpush1.bf16.msra.mxu1 %v3947_v31  ;;  %5107 = vmatprep.mubr.bf16.mxu1 %v9848_v50  ;;  %v9199_v31 = vpop.f32.mrb[198].mxu0  ;;  %v3955_v50 = vld [vmem:[#allocation3 + $0x420] sm:$0xff] }
 0xe58   :  { %5105 = vmatprep.subr.bf16.mxu1 %v3950_v49  ;;  %v9850_v49 = vld [vmem:[#allocation52_spill] sm:$0xff] }
 0xe59   :  { %v9182_v18 = vpop.f32.mrb[244].mxu1 }
 0xe5a   :  { %v9184_v55 = vpop.f32.mrb[245].mxu1 }
 0xe5b   :  { %5106 = vmatpush1.bf16.msra.mxu1 %v3949_v42  ;;  %v9186_v25 = vpop.f32.mrb[246].mxu1  ;;  %v9204_v42 = vpop.f32.mrb[199].mxu0 }
 0xe5c   :  { %v9190_v48 = vpop.f32.mrb[247].mxu1  ;;  %5188 = vmatprep.subr.bf16.mxu1 %v3952_v61  ;;  %v3953_v61 = vld [vmem:[#allocation3 + $0x410] sm:$0xff] }
 0xe5e   :  { %5108 = vmatmul.mubr.bf16.vlgmr.msra.gmra.mrb[0].mxu1 %v9849_v30 }
 0xe5f   :  { %5117 = vmatprep.mubr.bf16.mxu1 %v9850_v49  ;;  %5189 = vmatpush1.bf16.msra.mxu1 %v3951_v54  ;;  %v3959_v54 = vld [vmem:[#allocation3 + $0x440] sm:$0xff] }
 0xe60   :  { %5190 = vmatprep.subr.bf16.mxu1 %v3954_v19  ;;  %v9218_v19 = vpop.f32.mrb[200].mxu0 }
 0xe61   :  { %v9208_v35 = vpop.f32.mrb[248].mxu1  ;;  %v9222_v44 = vpop.f32.mrb[201].mxu0 }
 0xe62   :  { %v9210_v6 = vpop.f32.mrb[249].mxu1 }
 0xe63   :  { %5191 = vmatpush1.bf16.msra.mxu1 %v3953_v61  ;;  %v9212_v30 = vpop.f32.mrb[250].mxu1  ;;  %v9225_v61 = vpop.f32.mrb[202].mxu0 }
 0xe64   :  { %v9216_v49 = vpop.f32.mrb[251].mxu1  ;;  %5192 = vmatprep.subr.bf16.mxu1 %v3956_v29  ;;  %v9230_v29 = vpop.f32.mrb[203].mxu0 }
 0xe66   :  { %5118 = vmatmul.mubr.bf16.gmra.mrb[4].mxu1 %v9851_v39 }
 0xe67   :  { %5127 = vmatprep.mubr.bf16.mxu1 %v9852_v27  ;;  %5193 = vmatpush1.bf16.msra.mxu1 %v3955_v50  ;;  %v9861_v27 = vld [vmem:[#allocation60_spill] sm:$0xff] }
 0xe68   :  { %5194 = vmatprep.subr.bf16.mxu1 %v3958_v5  ;;  %v9244_v5 = vpop.f32.mrb[204].mxu0 }
 0xe69   :  { %v9234_v36 = vpop.f32.mrb[252].mxu1  ;;  %9853 = vst [vmem:[#allocation46_spill] sm:$0xff] %v9244_v5  ;;  %v9248_v33 = vpop.f32.mrb[205].mxu0  ;;  %v3970_v5 = vld [vmem:[#allocation3 + $0x498] sm:$0xff] }
 0xe6a   :  { %v9236_v24 = vpop.f32.mrb[253].mxu1 }
 0xe6b   :  { %5195 = vmatpush1.bf16.msra.mxu1 %v3957_v8  ;;  %v9238_v39 = vpop.f32.mrb[254].mxu1  ;;  %v9251_v8 = vpop.f32.mrb[206].mxu0 }
 0xe6c   :  { %v9242_v50 = vpop.f32.mrb[255].mxu1  ;;  %5196 = vmatprep.subr.bf16.mxu1 %v3960_v41  ;;  %9855 = vst [vmem:[#allocation45_spill] sm:$0xff] %v9251_v8  ;;  %v9256_v41 = vpop.f32.mrb[207].mxu0 }
 0xe6e   :  { %5128 = vmatmul.mubr.bf16.gmra.mrb[8].mxu1 %v9854_v28  ;;  %v9260_v28 = vpop.f32.mrb[208].mxu0 }
 0xe6f   :  { %5137 = vmatprep.mubr.bf16.mxu1 %v9856_v23  ;;  %5197 = vmatpush1.bf16.msra.mxu1 %v3959_v54  ;;  %9857 = vst [vmem:[#allocation50_spill] sm:$0xff] %v9260_v28  ;;  %v9262_v9 = vpop.f32.mrb[209].mxu0  ;;  %v9859_v23 = vld [vmem:[#allocation57_spill] sm:$0xff]  ;;  %v3972_v28 = vld [vmem:[#allocation3 + $0x4a8] sm:$0xff] }
 0xe70   :  { %5198 = vmatprep.subr.bf16.mxu1 %v3962_v26  ;;  %9858 = vst [vmem:[#allocation49_spill] sm:$0xff] %v9262_v9  ;;  %v9265_v54 = vpop.f32.mrb[210].mxu0  ;;  %v9867_v26 = vld [vmem:[#allocation62_spill] sm:$0xff] }
 0xe71   :  { %9860 = vst [vmem:[#allocation54_spill] sm:$0xff] %v9265_v54  ;;  %v9270_v3 = vpop.f32.mrb[211].mxu0  ;;  %v3971_v54 = vld [vmem:[#allocation3 + $0x4a0] sm:$0xff]  ;;  %v3974_v9 = vld [vmem:[#allocation3 + $0x4b8] sm:$0xff] }
 0xe72   :  { %9862 = vst [vmem:[#allocation53_spill] sm:$0xff] %v9270_v3 }
 0xe73   :  { %5199 = vmatpush1.bf16.msra.mxu1 %v3961_v22 }
 0xe74   :  { %5200 = vmatprep.subr.bf16.mxu1 %v3964_v17  ;;  %v3965_v17 = vld [vmem:[#allocation3 + $0x470] sm:$0xff] }
 0xe76   :  { %5138 = vmatmul.mubr.bf16.gmra.mrb[12].mxu1 %v9859_v23  ;;  %v9274_v23 = vpop.f32.mrb[212].mxu0 }
 0xe77   :  { %5147 = vmatprep.mubr.bf16.mxu1 %v9861_v27  ;;  %5201 = vmatpush1.bf16.msra.mxu1 %v3963_v16  ;;  %9863 = vst [vmem:[#allocation48_spill] sm:$0xff] %v9274_v23  ;;  %v9276_v8 = vpop.f32.mrb[213].mxu0  ;;  %v9865_v16 = vld [vmem:[#allocation59_spill] sm:$0xff] }
 0xe78   :  { %5202 = vmatprep.subr.bf16.mxu1 %v3966_v11  ;;  %9864 = vst [vmem:[#allocation47_spill] sm:$0xff] %v9276_v8  ;;  %v9279_v27 = vpop.f32.mrb[214].mxu0  ;;  %v3975_v23 = vld [vmem:[#allocation3 + $0x4c0] sm:$0xff] }
 0xe79   :  { %9866 = vst [vmem:[#allocation52_spill] sm:$0xff] %v9279_v27  ;;  %v9284_v22 = vpop.f32.mrb[215].mxu0  ;;  %v3978_v27 = vld [vmem:[#allocation3 + $0x4d8] sm:$0xff] }
 0xe7b   :  { %5203 = vmatpush1.bf16.msra.mxu1 %v3965_v17  ;;  %v3976_v17 = vld [vmem:[#allocation3 + $0x4c8] sm:$0xff] }
 0xe7c   :  { %5204 = vmatprep.subr.bf16.mxu1 %v3968_v4  ;;  %v3969_v4 = vld [vmem:[#allocation3 + $0x490] sm:$0xff] }
 0xe7e   :  { %5148 = vmatmul.mubr.bf16.gmra.mrb[16].mxu1 %v9865_v16  ;;  %v9288_v16 = vpop.f32.mrb[216].mxu0 }
 0xe7f   :  { %5157 = vmatprep.mubr.bf16.mxu1 %v9867_v26  ;;  %5205 = vmatpush1.bf16.msra.mxu1 %v3967_v59  ;;  %9868 = vst [vmem:[#allocation51_spill] sm:$0xff] %v9288_v16  ;;  %v9290_v3 = vpop.f32.mrb[217].mxu0  ;;  %v9869_v59 = vld [vmem:[#allocation61_spill] sm:$0xff]  ;;  %v3979_v16 = vld [vmem:[#allocation3 + $0x4e0] sm:$0xff] }
 0xe80   :  { %5206 = vmatprep.subr.bf16.mxu1 %v3970_v5  ;;  %v9293_v26 = vpop.f32.mrb[218].mxu0 }
 0xe81   :  { %v9298_v11 = vpop.f32.mrb[219].mxu0 }
 0xe83   :  { %5207 = vmatpush1.bf16.msra.mxu1 %v3969_v4  ;;  %v3980_v4 = vld [vmem:[#allocation3 + $0x4e8] sm:$0xff] }
 0xe84   :  { %5208 = vmatprep.subr.bf16.mxu1 %v3972_v28  ;;  %v3973_v28 = vld [vmem:[#allocation3 + $0x4b0] sm:$0xff] }
 0xe86   :  { %5158 = vmatmul.mubr.bf16.gmra.mrb[20].mxu1 %v9869_v59  ;;  %v9302_v59 = vpop.f32.mrb[220].mxu0 }
 0xe87   :  { %5167 = vmatprep.mubr.bf16.mxu1 %v9027_v32  ;;  %5209 = vmatpush1.bf16.msra.mxu1 %v3971_v54  ;;  %9870 = vst [vmem:[#allocation56_spill] sm:$0xff] %v9302_v59  ;;  %v9304_v8 = vpop.f32.mrb[221].mxu0  ;;  %v9871_v32 = vld [vmem:[#allocation63_spill] sm:$0xff]  ;;  %v3986_v59 = vld [vmem:[#allocation3 + $0x518] sm:$0xff] }
 0xe88   :  { %5210 = vmatprep.subr.bf16.mxu1 %v3974_v9  ;;  %v9307_v54 = vpop.f32.mrb[222].mxu0  ;;  %v3984_v9 = vld [vmem:[#allocation3 + $0x508] sm:$0xff] }
 0xe89   :  { %v9312_v5 = vpop.f32.mrb[223].mxu0 }
 0xe8b   :  { %5211 = vmatpush1.bf16.msra.mxu1 %v3973_v28  ;;  %v4532_v28 = vpack.c.bf16 %v9312_v5, %v9304_v8 }
 0xe8c   :  { %5212 = vmatprep.subr.bf16.mxu1 %v3976_v17  ;;  %v3977_v17 = vld [vmem:[#allocation3 + $0x4d0] sm:$0xff] }
 0xe8e   :  { %5168 = vmatmul.mubr.bf16.gmra.mrb[24].mxu1 %v9871_v32  ;;  %v3982_v32 = vld [vmem:[#allocation3 + $0x4f8] sm:$0xff] }
 0xe8f   :  { %5177 = vmatprep.mubr.bf16.mxu1 %v9035_v37  ;;  %5213 = vmatpush1.bf16.msra.mxu1 %v3975_v23  ;;  %v9872_v37 = vpack.c.bf16 %v9108_v45, %v9102_v12  ;;  %v3981_v23 = vld [vmem:[#allocation3 + $0x4f0] sm:$0xff]  ;;  %v3988_v12 = vld [vmem:[#allocation3 + $0x528] sm:$0xff]  ;;  %v3987_v45 = vld [vmem:[#allocation3 + $0x520] sm:$0xff] }
 0xe90   :  { %5214 = vmatprep.subr.bf16.mxu1 %v3978_v27  ;;  %v3983_v27 = vld [vmem:[#allocation3 + $0x500] sm:$0xff] }
 0xe93   :  { %5215 = vmatpush1.bf16.msra.mxu1 %v3977_v17  ;;  %v9873_v17 = vpack.c.bf16 %v9104_v56, %v9100_v63  ;;  %v9876_v63 = vpack.c.bf16 %v9136_v51, %v9130_v53  ;;  %v3989_v56 = vld [vmem:[#allocation3 + $0x530] sm:$0xff]  ;;  %v3996_v53 = vld [vmem:[#allocation3 + $0x568] sm:$0xff]  ;;  %v3995_v51 = vld [vmem:[#allocation3 + $0x560] sm:$0xff] }
 0xe94   :  { %5216 = vmatprep.subr.bf16.mxu1 %v3980_v4  ;;  %v9874_v4 = vpack.c.bf16 %v9122_v10, %v9116_v1  ;;  %v3992_v1 = vld [vmem:[#allocation3 + $0x548] sm:$0xff]  ;;  %v3991_v10 = vld [vmem:[#allocation3 + $0x540] sm:$0xff] }
 0xe96   :  { %5178 = vmatmul.mubr.bf16.gmra.mrb[28].mxu1 %v9033_v0  ;;  %v3985_v0 = vld [vmem:[#allocation3 + $0x510] sm:$0xff] }
 0xe97   :  { %5217 = vmatpush1.bf16.msra.mxu1 %v3979_v16  ;;  %5220 = vmatprep.mubr.bf16.mxu1 %v9872_v37  ;;  %v3990_v16 = vld [vmem:[#allocation3 + $0x538] sm:$0xff] }
 0xe98   :  { %5218 = vmatprep.subr.bf16.mxu1 %v3982_v32  ;;  %v9877_v32 = vpack.c.bf16 %v9132_v60, %v9128_v52  ;;  %v3998_v37 = vld [vmem:[#allocation3 + $0x578] sm:$0xff]  ;;  %v9880_v52 = vpack.c.bf16 %v9164_v58, %v9158_v57  ;;  %v3997_v60 = vld [vmem:[#allocation3 + $0x570] sm:$0xff]  ;;  %v4004_v57 = vld [vmem:[#allocation3 + $0x5a8] sm:$0xff] }
 0xe99   :  { %v4003_v58 = vld [vmem:[#allocation3 + $0x5a0] sm:$0xff] }
 0xe9b   :  { %5219 = vmatpush1.bf16.msra.mxu1 %v3981_v23  ;;  %v9879_v23 = vpack.c.bf16 %v9146_v7, %v9142_v20  ;;  %v9882_v20 = vpack.c.bf16 %v9190_v48, %v9184_v55  ;;  %v4001_v7 = vld [vmem:[#allocation3 + $0x590] sm:$0xff]  ;;  %v4008_v55 = vld [vmem:[#allocation3 + $0x5c8] sm:$0xff]  ;;  %v4007_v48 = vld [vmem:[#allocation3 + $0x5c0] sm:$0xff] }
 0xe9c   :  { %5301 = vmatprep.subr.bf16.mxu1 %v3984_v9  ;;  %v9875_v9 = vpack.c.bf16 %v9118_v15, %v9114_v14  ;;  %v9878_v14 = vpack.c.bf16 %v9150_v62, %v9144_v34  ;;  %v3993_v15 = vld [vmem:[#allocation3 + $0x550] sm:$0xff]  ;;  %v4000_v34 = vld [vmem:[#allocation3 + $0x588] sm:$0xff]  ;;  %v3999_v62 = vld [vmem:[#allocation3 + $0x580] sm:$0xff] }
 0xe9e   :  { %5221 = vmatmul.mubr.bf16.vlgmr.msra.gmra.mrb[0].mxu1 %v9873_v17  ;;  %v9881_v17 = vpack.c.bf16 %v9160_v2, %v9156_v21  ;;  %v9884_v21 = vpack.c.bf16 %v9216_v49, %v9210_v6  ;;  %v4005_v2 = vld [vmem:[#allocation3 + $0x5b0] sm:$0xff]  ;;  %v4012_v6 = vld [vmem:[#allocation3 + $0x5e8] sm:$0xff]  ;;  %v4011_v49 = vld [vmem:[#allocation3 + $0x5e0] sm:$0xff] }
 0xe9f   :  { %5230 = vmatprep.mubr.bf16.mxu1 %v9874_v4  ;;  %5302 = vmatpush1.bf16.msra.mxu1 %v3983_v27  ;;  %v4002_v27 = vld [vmem:[#allocation3 + $0x598] sm:$0xff] }
 0xea0   :  { %5303 = vmatprep.subr.bf16.mxu1 %v3986_v59  ;;  %v3994_v59 = vld [vmem:[#allocation3 + $0x558] sm:$0xff] }
 0xea1   :  { %v4006_v4 = vld [vmem:[#allocation3 + $0x5b8] sm:$0xff] }
 0xea3   :  { %5304 = vmatpush1.bf16.msra.mxu1 %v3985_v0  ;;  %v9883_v0 = vpack.c.bf16 %v9186_v25, %v9182_v18  ;;  %v9886_v18 = vpack.c.bf16 %v9242_v50, %v9236_v24  ;;  %v4009_v25 = vld [vmem:[#allocation3 + $0x5d0] sm:$0xff]  ;;  %v9890_v50 = vpack.c.bf16 %v9204_v42, %v9196_v47 }
 0xea4   :  { %5305 = vmatprep.subr.bf16.mxu1 %v3988_v12  ;;  %v4010_v12 = vld [vmem:[#allocation3 + $0x5d8] sm:$0xff]  ;;  %v4013_v24 = vld [vmem:[#allocation3 + $0x5f0] sm:$0xff] }
 0xea5   :  { %v9898_v42 = vld [vmem:[#allocation53_spill] sm:$0xff] }
 0xea6   :  { %5231 = vmatmul.mubr.bf16.gmra.mrb[4].mxu1 %v9875_v9  ;;  %v9887_v9 = vpack.c.bf16 %v9238_v39, %v9234_v36  ;;  %v9891_v36 = vpack.c.bf16 %v9199_v31, %v9192_v43  ;;  %v9892_v39 = vpack.c.bf16 %v9230_v29, %v9222_v44  ;;  %v9901_v31 = vld [vmem:[#allocation54_spill] sm:$0xff]  ;;  %v9904_v29 = vld [vmem:[#allocation47_spill] sm:$0xff] }
 0xea7   :  { %5240 = vmatprep.mubr.bf16.mxu1 %v9876_v63  ;;  %5306 = vmatpush1.bf16.msra.mxu1 %v3987_v45  ;;  %v9885_v45 = vpack.c.bf16 %v9212_v30, %v9208_v35  ;;  %v9888_v35 = vpack.c.bf16 %v9178_v38, %v9170_v13  ;;  %v9889_v30 = vpack.c.bf16 %v9173_v40, %v9166_v46  ;;  %v9895_v40 = vld [vmem:[#allocation45_spill] sm:$0xff]  ;;  %v9896_v38 = vld [vmem:[#allocation46_spill] sm:$0xff] }
 0xea8   :  { %5307 = vmatprep.subr.bf16.mxu1 %v3990_v16  ;;  %v4014_v16 = vld [vmem:[#allocation3 + $0x5f8] sm:$0xff]  ;;  %v9893_v13 = vpack.c.bf16 %v9225_v61, %v9218_v19  ;;  %v9894_v46 = vpack.c.bf16 %v9256_v41, %v9248_v33  ;;  %v9897_v47 = vpack.c.bf16 %v9895_v40, %v9896_v38  ;;  %v9905_v19 = vpack.c.bf16 %v9284_v22, %v9904_v29  ;;  %v9906_v61 = vld [vmem:[#allocation52_spill] sm:$0xff] }
 0xea9   :  { %v9899_v63 = vld [vmem:[#allocation49_spill] sm:$0xff]  ;;  %v9909_v41 = vpack.c.bf16 %v9298_v11, %v9290_v3 }
 0xeaa   :  { %v9900_v43 = vpack.c.bf16 %v9898_v42, %v9899_v63 }
 0xeab   :  { %5308 = vmatpush1.bf16.msra.mxu1 %v3989_v56  ;;  %v9902_v56 = vld [vmem:[#allocation50_spill] sm:$0xff] }
 0xeac   :  { %5309 = vmatprep.subr.bf16.mxu1 %v3992_v1  ;;  %v9903_v44 = vpack.c.bf16 %v9901_v31, %v9902_v56  ;;  %v9907_v1 = vld [vmem:[#allocation48_spill] sm:$0xff] }
 0xead   :  { %v9908_v33 = vpack.c.bf16 %v9906_v61, %v9907_v1 }
 0xeae   :  { %5241 = vmatmul.mubr.bf16.gmra.mrb[8].mxu1 %v9877_v32  ;;  %v9912_v32 = vld [vmem:[#allocation56_spill] sm:$0xff] }
 0xeaf   :  { %5250 = vmatprep.mubr.bf16.mxu1 %v9878_v14  ;;  %5310 = vmatpush1.bf16.msra.mxu1 %v3991_v10  ;;  %v9910_v10 = vld [vmem:[#allocation51_spill] sm:$0xff]  ;;  %v9913_v22 = vpack.c.bf16 %v9307_v54, %v9912_v32 }
 0xeb0   :  { %5311 = vmatprep.subr.bf16.mxu1 %v3994_v59  ;;  %v9911_v59 = vpack.c.bf16 %v9293_v26, %v9910_v10  ;;  %v4016_v14 = vld [vmem:[#allocation14 + $0x4] ss:$8 sm:$0x3] }
 0xeb3   :  { %5312 = vmatpush1.bf16.msra.mxu1 %v3993_v15  ;;  %v9914_v15 = vld [vmem:[#allocation43_spill] sm:$0xff] }
 0xeb4   :  { %5313 = vmatprep.subr.bf16.mxu1 %v3996_v53  ;;  %v9414_v53 = vrot.slane %v4016_v14, %v9914_v15 }
 0xeb6   :  { %5251 = vmatmul.mubr.bf16.gmra.mrb[12].mxu1 %v9879_v23 }
 0xeb7   :  { %5260 = vmatprep.mubr.bf16.mxu1 %v9880_v52  ;;  %5314 = vmatpush1.bf16.msra.mxu1 %v3995_v51  ;;  %v9915_v51 = vld [vmem:[#allocation44_spill] sm:$0xff] }
 0xeb8   :  { %5315 = vmatprep.subr.bf16.mxu1 %v3998_v37  ;;  %v9417_v37 = vrot.slane %v4016_v14, %v9915_v51 }
 0xebb   :  { %5316 = vmatpush1.bf16.msra.mxu1 %v3997_v60 }
 0xebc   :  { %5317 = vmatprep.subr.bf16.mxu1 %v4000_v34 }
 0xebe   :  { %5261 = vmatmul.mubr.bf16.gmra.mrb[16].mxu1 %v9881_v17 }
 0xebf   :  { %5270 = vmatprep.mubr.bf16.mxu1 %v9882_v20  ;;  %5318 = vmatpush1.bf16.msra.mxu1 %v3999_v62 }
 0xec0   :  { %5319 = vmatprep.subr.bf16.mxu1 %v4002_v27 }
 0xec3   :  { %5320 = vmatpush1.bf16.msra.mxu1 %v4001_v7 }
 0xec4   :  { %5321 = vmatprep.subr.bf16.mxu1 %v4004_v57 }
 0xec6   :  { %5271 = vmatmul.mubr.bf16.gmra.mrb[20].mxu1 %v9883_v0 }
 0xec7   :  { %5280 = vmatprep.mubr.bf16.mxu1 %v9884_v21  ;;  %5322 = vmatpush1.bf16.msra.mxu1 %v4003_v58 }
 0xec8   :  { %5323 = vmatprep.subr.bf16.mxu1 %v4006_v4 }
 0xecb   :  { %5324 = vmatpush1.bf16.msra.mxu1 %v4005_v2 }
 0xecc   :  { %5325 = vmatprep.subr.bf16.mxu1 %v4008_v55 }
 0xece   :  { %5281 = vmatmul.mubr.bf16.gmra.mrb[24].mxu1 %v9885_v45 }
 0xecf   :  { %5290 = vmatprep.mubr.bf16.mxu1 %v9886_v18  ;;  %5326 = vmatpush1.bf16.msra.mxu1 %v4007_v48 }
 0xed0   :  { %5327 = vmatprep.subr.bf16.mxu1 %v4010_v12 }
 0xed3   :  { %5328 = vmatpush1.bf16.msra.mxu1 %v4009_v25 }
 0xed4   :  { %5329 = vmatprep.subr.bf16.mxu1 %v4012_v6 }
 0xed6   :  { %5291 = vmatmul.mubr.bf16.gmra.mrb[28].mxu1 %v9887_v9 }
 0xed7   :  { %5330 = vmatpush1.bf16.msra.mxu1 %v4011_v49  ;;  %5333 = vmatprep.mubr.bf16.mxu1 %v9888_v35 }
 0xed8   :  { %5331 = vmatprep.subr.bf16.mxu1 %v4014_v16 }
 0xedb   :  { %5332 = vmatpush1.bf16.msra.mxu1 %v4013_v24 }
 0xede   :  { %5334 = vmatmul.mubr.bf16.vlgmr.msra.gmra.mrb[0].mxu1 %v9889_v30 }
 0xedf   :  { %5343 = vmatprep.mubr.bf16.mxu1 %v9890_v50 }
 0xee6   :  { %5344 = vmatmul.mubr.bf16.gmra.mrb[4].mxu1 %v9891_v36 }
 0xee7   :  { %5353 = vmatprep.mubr.bf16.mxu1 %v9892_v39 }
 0xeee   :  { %5354 = vmatmul.mubr.bf16.gmra.mrb[8].mxu1 %v9893_v13 }
 0xeef   :  { %5363 = vmatprep.mubr.bf16.mxu1 %v9894_v46 }
 0xef6   :  { %5364 = vmatmul.mubr.bf16.gmra.mrb[12].mxu1 %v9897_v47 }
 0xef7   :  { %5373 = vmatprep.mubr.bf16.mxu1 %v9900_v43 }
 0xefe   :  { %5374 = vmatmul.mubr.bf16.gmra.mrb[16].mxu1 %v9903_v44 }
 0xeff   :  { %5383 = vmatprep.mubr.bf16.mxu1 %v9905_v19 }
 0xf06   :  { %5384 = vmatmul.mubr.bf16.gmra.mrb[20].mxu1 %v9908_v33 }
 0xf07   :  { %5393 = vmatprep.mubr.bf16.mxu1 %v9909_v41 }
 0xf0e   :  { %5394 = vmatmul.mubr.bf16.gmra.mrb[24].mxu1 %v9911_v59 }
 0xf0f   :  { %5403 = vmatprep.mubr.bf16.mxu1 %v4532_v28 }
 0xf16   :  { %5404 = vmatmul.mubr.bf16.gmra.mrb[28].mxu1 %v9913_v22 }
 0xfb1   :  { %v5335_v3 = vpop.f32.mrb[0].mxu1 }
 0xfb2   :  { %v7295_v11 = vadd.f32 %v5335_v3, %v9414_v53  ;;  %v5337_v26 = vpop.f32.mrb[1].mxu1 }
 0xfb3   :  { %v7296_v23 = vadd.f32 %v5337_v26, %v9417_v37  ;;  %v5339_v52 = vpop.f32.mrb[2].mxu1 }
 0xfb4   :  { %v7297_v8 = vadd.f32 %v5339_v52, %v9414_v53  ;;  %v5341_v5 = vpop.f32.mrb[3].mxu1  ;;  %v5414_v28 = vmax.f32 %v7295_v11, 0.0 }
 0xfb5   :  { %v7298_v54 = vadd.f32 %v5341_v5, %v9417_v37  ;;  %v5415_v34 = vmax.f32 %v7296_v23, 0.0 }
 0xfb6   :  { %v5416_v60 = vmax.f32 %v7297_v8, 0.0 }
 0xfb7   :  { %v5417_v62 = vmax.f32 %v7298_v54, 0.0 }
 0xfb8   :  { %v9423_v27 = vpack.c.bf16 %v5416_v60, %v5414_v28 }
 0xfb9   :  { %v9425_v17 = vpack.c.bf16 %v5417_v62, %v5415_v34  ;;  %v5345_v20 = vpop.f32.mrb[4].mxu1 }
 0xfba   :  { %v7299_v7 = vadd.f32 %v5345_v20, %v9414_v53  ;;  %v5347_v57 = vpop.f32.mrb[5].mxu1 }
 0xfbb   :  { %v7300_v58 = vadd.f32 %v5347_v57, %v9417_v37  ;;  %v5349_v4 = vpop.f32.mrb[6].mxu1  ;;  %5514 = vmatprep.subr.bf16.mxu0 %v9425_v17 }
 0xfbc   :  { %v7301_v0 = vadd.f32 %v5349_v4, %v9414_v53  ;;  %v5351_v21 = vpop.f32.mrb[7].mxu1  ;;  %v5418_v55 = vmax.f32 %v7299_v7, 0.0 }
 0xfbd   :  { %v7302_v2 = vadd.f32 %v5351_v21, %v9417_v37  ;;  %v5419_v12 = vmax.f32 %v7300_v58, 0.0 }
 0xfbe   :  { %v5420_v48 = vmax.f32 %v7301_v0, 0.0 }
 0xfbf   :  { %v5421_v45 = vmax.f32 %v7302_v2, 0.0 }
 0xfc0   :  { %v9431_v18 = vpack.c.bf16 %v5420_v48, %v5418_v55 }
 0xfc1   :  { %v9433_v25 = vpack.c.bf16 %v5421_v45, %v5419_v12  ;;  %v5355_v6 = vpop.f32.mrb[8].mxu1 }
 0xfc2   :  { %v7303_v49 = vadd.f32 %v5355_v6, %v9414_v53  ;;  %v5357_v16 = vpop.f32.mrb[9].mxu1 }
 0xfc3   :  { %v7304_v9 = vadd.f32 %v5357_v16, %v9417_v37  ;;  %v5359_v35 = vpop.f32.mrb[10].mxu1 }
 0xfc4   :  { %v7305_v24 = vadd.f32 %v5359_v35, %v9414_v53  ;;  %v5361_v30 = vpop.f32.mrb[11].mxu1  ;;  %v5422_v36 = vmax.f32 %v7303_v49, 0.0 }
 0xfc5   :  { %v7306_v50 = vadd.f32 %v5361_v30, %v9417_v37  ;;  %v5423_v13 = vmax.f32 %v7304_v9, 0.0 }
 0xfc6   :  { %v5424_v39 = vmax.f32 %v7305_v24, 0.0 }
 0xfc7   :  { %v5425_v46 = vmax.f32 %v7306_v50, 0.0 }
 0xfc8   :  { %v9439_v40 = vpack.c.bf16 %v5424_v39, %v5422_v36 }
 0xfc9   :  { %v9441_v38 = vpack.c.bf16 %v5425_v46, %v5423_v13  ;;  %v5365_v47 = vpop.f32.mrb[12].mxu1 }
 0xfca   :  { %v7307_v42 = vadd.f32 %v5365_v47, %v9414_v53  ;;  %v5367_v63 = vpop.f32.mrb[13].mxu1 }
 0xfcb   :  { %v7308_v43 = vadd.f32 %v5367_v63, %v9417_v37  ;;  %v5369_v31 = vpop.f32.mrb[14].mxu1 }
 0xfcc   :  { %v7309_v56 = vadd.f32 %v5369_v31, %v9414_v53  ;;  %v5371_v44 = vpop.f32.mrb[15].mxu1  ;;  %v5426_v19 = vmax.f32 %v7307_v42, 0.0 }
 0xfcd   :  { %v7310_v29 = vadd.f32 %v5371_v44, %v9417_v37  ;;  %v5427_v1 = vmax.f32 %v7308_v43, 0.0 }
 0xfce   :  { %v5428_v61 = vmax.f32 %v7309_v56, 0.0 }
 0xfcf   :  { %v5429_v33 = vmax.f32 %v7310_v29, 0.0 }
 0xfd0   :  { %v9447_v41 = vpack.c.bf16 %v5428_v61, %v5426_v19 }
 0xfd1   :  { %v9449_v10 = vpack.c.bf16 %v5429_v33, %v5427_v1  ;;  %v5375_v59 = vpop.f32.mrb[16].mxu1 }
 0xfd2   :  { %v7311_v32 = vadd.f32 %v5375_v59, %v9414_v53  ;;  %v5377_v22 = vpop.f32.mrb[17].mxu1 }
 0xfd3   :  { %v7312_v14 = vadd.f32 %v5377_v22, %v9417_v37  ;;  %v5379_v15 = vpop.f32.mrb[18].mxu1  ;;  %v9916_v22 = vmov 0  }
 0xfd4   :  { %v7313_v51 = vadd.f32 %v5379_v15, %v9414_v53  ;;  %v5381_v3 = vpop.f32.mrb[19].mxu1  ;;  %v5430_v26 = vmax.f32 %v7311_v32, 0.0  ;;  %5546 = vmatprep.mubr.bf16.mxu0 %v9916_v22 }
 0xfd5   :  { %v7314_v11 = vadd.f32 %v5381_v3, %v9417_v37  ;;  %v5431_v52 = vmax.f32 %v7312_v14, 0.0 }
 0xfd6   :  { %v5432_v23 = vmax.f32 %v7313_v51, 0.0 }
 0xfd7   :  { %v5433_v8 = vmax.f32 %v7314_v11, 0.0 }
 0xfd8   :  { %v9455_v5 = vpack.c.bf16 %v5432_v23, %v5430_v26 }
 0xfd9   :  { %v9457_v54 = vpack.c.bf16 %v5433_v8, %v5431_v52  ;;  %v5385_v28 = vpop.f32.mrb[20].mxu1 }
 0xfda   :  { %v7315_v60 = vadd.f32 %v5385_v28, %v9414_v53  ;;  %v5387_v34 = vpop.f32.mrb[21].mxu1 }
 0xfdb   :  { %v7316_v62 = vadd.f32 %v5387_v34, %v9417_v37  ;;  %v5389_v20 = vpop.f32.mrb[22].mxu1 }
 0xfdc   :  { %v7317_v7 = vadd.f32 %v5389_v20, %v9414_v53  ;;  %v5391_v57 = vpop.f32.mrb[23].mxu1  ;;  %v5434_v4 = vmax.f32 %v7315_v60, 0.0 }
 0xfdd   :  { %v7318_v58 = vadd.f32 %v5391_v57, %v9417_v37  ;;  %v5435_v21 = vmax.f32 %v7316_v62, 0.0 }
 0xfde   :  { %v5436_v0 = vmax.f32 %v7317_v7, 0.0 }
 0xfdf   :  { %v5437_v2 = vmax.f32 %v7318_v58, 0.0 }
 0xfe0   :  { %v9463_v55 = vpack.c.bf16 %v5436_v0, %v5434_v4 }
 0xfe1   :  { %v9465_v48 = vpack.c.bf16 %v5437_v2, %v5435_v21  ;;  %v5395_v12 = vpop.f32.mrb[24].mxu1 }
 0xfe2   :  { %v7319_v45 = vadd.f32 %v5395_v12, %v9414_v53  ;;  %v5397_v6 = vpop.f32.mrb[25].mxu1 }
 0xfe3   :  { %v7320_v49 = vadd.f32 %v5397_v6, %v9417_v37  ;;  %v5399_v16 = vpop.f32.mrb[26].mxu1 }
 0xfe4   :  { %v7321_v9 = vadd.f32 %v5399_v16, %v9414_v53  ;;  %v5401_v35 = vpop.f32.mrb[27].mxu1  ;;  %v5438_v30 = vmax.f32 %v7319_v45, 0.0 }
 0xfe5   :  { %v7322_v24 = vadd.f32 %v5401_v35, %v9417_v37  ;;  %v5439_v36 = vmax.f32 %v7320_v49, 0.0 }
 0xfe6   :  { %v5440_v50 = vmax.f32 %v7321_v9, 0.0 }
 0xfe7   :  { %v5441_v39 = vmax.f32 %v7322_v24, 0.0 }
 0xfe8   :  { %v9471_v13 = vpack.c.bf16 %v5440_v50, %v5438_v30 }
 0xfe9   :  { %v9473_v46 = vpack.c.bf16 %v5441_v39, %v5439_v36  ;;  %v5405_v47 = vpop.f32.mrb[28].mxu1 }
 0xfea   :  { %v7323_v42 = vadd.f32 %v5405_v47, %v9414_v53  ;;  %v5407_v63 = vpop.f32.mrb[29].mxu1 }
 0xfeb   :  { %v7324_v43 = vadd.f32 %v5407_v63, %v9417_v37  ;;  %v5409_v31 = vpop.f32.mrb[30].mxu1 }
 0xfec   :  { %v7325_v56 = vadd.f32 %v5409_v31, %v9414_v53  ;;  %v5411_v44 = vpop.f32.mrb[31].mxu1  ;;  %v5442_v19 = vmax.f32 %v7323_v42, 0.0 }
 0xfed   :  { %v7326_v29 = vadd.f32 %v5411_v44, %v9417_v37  ;;  %v5443_v1 = vmax.f32 %v7324_v43, 0.0 }
 0xfee   :  { %v5444_v61 = vmax.f32 %v7325_v56, 0.0 }
 0xfef   :  { %v5445_v33 = vmax.f32 %v7326_v29, 0.0 }
 0xff0   :  { %v9479_v59 = vpack.c.bf16 %v5444_v61, %v5442_v19 }
 0xff1   :  { %v9481_v32 = vpack.c.bf16 %v5445_v33, %v5443_v1 }
 0xff2   :  { %7980 = dma.done.wait [#allocation7 + $0x2], 6144 }
 0xff3   :  { %7981 = vsyncadd [#allocation7 + $0x2], 4294961152  ;;  %5515 = vmatpush1.bf16.msra.mxu0 %v9423_v27  ;;  %v9917_v53 = vld [vmem:[#allocation35_spill] sm:$0xff]  ;;  %v9918_v37 = vld [vmem:[#allocation36_spill] sm:$0xff] }
 0xff4   :  { %5516 = vmatprep.subr.bf16.mxu0 %v9433_v25  ;;  %v9919_v14 = vld [vmem:[#allocation37_spill] sm:$0xff]  ;;  %v9920_v15 = vld [vmem:[#allocation38_spill] sm:$0xff]  ;;  %v9921_v51 = vld [vmem:[#allocation39_spill] sm:$0xff] }
 0xff5   :  { %v9922_v3 = vld [vmem:[#allocation40_spill] sm:$0xff]  ;;  %v9923_v11 = vld [vmem:[#allocation41_spill] sm:$0xff]  ;;  %v9924_v26 = vld [vmem:[#allocation42_spill] sm:$0xff] }
 0xff7   :  { %5517 = vmatpush1.bf16.msra.mxu0 %v9431_v18 }
 0xff8   :  { %5518 = vmatprep.subr.bf16.mxu0 %v9441_v38 }
 0xffb   :  { %5519 = vmatpush1.bf16.msra.mxu0 %v9439_v40 }
 0xffc   :  { %5520 = vmatprep.subr.bf16.mxu0 %v9449_v10 }
 0xfff   :  { %5521 = vmatpush1.bf16.msra.mxu0 %v9447_v41 }
0x1000   :  { %5522 = vmatprep.subr.bf16.mxu0 %v9457_v54 }
0x1003   :  { %5523 = vmatpush1.bf16.msra.mxu0 %v9455_v5 }
0x1004   :  { %5524 = vmatprep.subr.bf16.mxu0 %v9465_v48 }
0x1007   :  { %5525 = vmatpush1.bf16.msra.mxu0 %v9463_v55 }
0x1008   :  { %5526 = vmatprep.subr.bf16.mxu0 %v9473_v46 }
0x100b   :  { %5527 = vmatpush1.bf16.msra.mxu0 %v9471_v13 }
0x100c   :  { %5528 = vmatprep.subr.bf16.mxu0 %v9481_v32 }
0x100f   :  { %5529 = vmatpush1.bf16.msra.mxu0 %v9479_v59 }
0x1012   :  { %5547 = vmatmul.mubr.bf16.vlgmr.msra.gmra.mrb[224].mxu0 %v9917_v53 }
0x1013   :  { %5556 = vmatprep.mubr.bf16.mxu0 %v9916_v22 }
0x101a   :  { %5557 = vmatmul.mubr.bf16.gmra.mrb[228].mxu0 %v9918_v37 }
0x101b   :  { %5566 = vmatprep.mubr.bf16.mxu0 %v9916_v22 }
0x1022   :  { %5567 = vmatmul.mubr.bf16.gmra.mrb[232].mxu0 %v9919_v14 }
0x1023   :  { %5576 = vmatprep.mubr.bf16.mxu0 %v9916_v22 }
0x102a   :  { %5577 = vmatmul.mubr.bf16.gmra.mrb[236].mxu0 %v9920_v15 }
0x102b   :  { %5586 = vmatprep.mubr.bf16.mxu0 %v9916_v22 }
0x1032   :  { %5587 = vmatmul.mubr.bf16.gmra.mrb[240].mxu0 %v9921_v51 }
0x1033   :  { %5596 = vmatprep.mubr.bf16.mxu0 %v9916_v22 }
0x103a   :  { %5597 = vmatmul.mubr.bf16.gmra.mrb[244].mxu0 %v9922_v3 }
0x103b   :  { %5606 = vmatprep.mubr.bf16.mxu0 %v9916_v22 }
0x1042   :  { %5607 = vmatmul.mubr.bf16.gmra.mrb[248].mxu0 %v9923_v11 }
0x1043   :  { %5616 = vmatprep.mubr.bf16.mxu0 %v9916_v22 }
0x104a   :  { %5617 = vmatmul.mubr.bf16.gmra.mrb[252].mxu0 %v9924_v26 }
0x104b   :  { %5675 = vmatprep.mubr.bf16.mxu0 %v9916_v22 }
0x10e5   :  { %v5548_v23 = vpop.f32.mrb[224].mxu0 }
0x10e6   :  { %v5550_v52 = vpop.f32.mrb[225].mxu0 }
0x10e7   :  { %v5552_v8 = vpop.f32.mrb[226].mxu0 }
0x10e8   :  { %v9516_v28 = vpack.c.bf16 %v5552_v8, %v5548_v23  ;;  %v5554_v60 = vpop.f32.mrb[227].mxu0 }
0x10e9   :  { %v9518_v34 = vpack.c.bf16 %v5554_v60, %v5550_v52 }
0x10eb   :  { %5643 = vmatprep.subr.bf16.mxu0 %v9518_v34 }
0x10ec   :  { %5644 = vmatpush1.bf16.msra.mxu0 %v9516_v28 }
0x10ed   :  { %v5558_v62 = vpop.f32.mrb[228].mxu0 }
0x10ee   :  { %v5560_v20 = vpop.f32.mrb[229].mxu0 }
0x10ef   :  { %v5562_v7 = vpop.f32.mrb[230].mxu0 }
0x10f0   :  { %v9522_v57 = vpack.c.bf16 %v5562_v7, %v5558_v62  ;;  %v5564_v58 = vpop.f32.mrb[231].mxu0 }
0x10f1   :  { %v9524_v4 = vpack.c.bf16 %v5564_v58, %v5560_v20 }
0x10f3   :  { %5645 = vmatprep.subr.bf16.mxu0 %v9524_v4 }
0x10f4   :  { %5646 = vmatpush1.bf16.msra.mxu0 %v9522_v57 }
0x10f5   :  { %v5568_v0 = vpop.f32.mrb[232].mxu0 }
0x10f6   :  { %v5570_v21 = vpop.f32.mrb[233].mxu0 }
0x10f7   :  { %v5572_v2 = vpop.f32.mrb[234].mxu0 }
0x10f8   :  { %v9528_v12 = vpack.c.bf16 %v5572_v2, %v5568_v0  ;;  %v5574_v45 = vpop.f32.mrb[235].mxu0  ;;  %v5465_v2 = vld [vmem:[#allocation4] sm:$0xff] }
0x10f9   :  { %v9530_v6 = vpack.c.bf16 %v5574_v45, %v5570_v21  ;;  %v5473_v21 = vld [vmem:[#allocation4 + $0x40] sm:$0xff]  ;;  %v5474_v45 = vld [vmem:[#allocation4 + $0x48] sm:$0xff] }
0x10fb   :  { %5647 = vmatprep.subr.bf16.mxu0 %v9530_v6 }
0x10fc   :  { %5648 = vmatpush1.bf16.msra.mxu0 %v9528_v12 }
0x10fd   :  { %v5578_v49 = vpop.f32.mrb[236].mxu0 }
0x10fe   :  { %v5580_v16 = vpop.f32.mrb[237].mxu0 }
0x10ff   :  { %v5582_v9 = vpop.f32.mrb[238].mxu0 }
0x1100   :  { %v9534_v35 = vpack.c.bf16 %v5582_v9, %v5578_v49  ;;  %v5584_v24 = vpop.f32.mrb[239].mxu0  ;;  %v5466_v49 = vld [vmem:[#allocation4 + $0x8] sm:$0xff]  ;;  %v5467_v9 = vld [vmem:[#allocation4 + $0x10] sm:$0xff] }
0x1101   :  { %v9536_v30 = vpack.c.bf16 %v5584_v24, %v5580_v16  ;;  %v5475_v16 = vld [vmem:[#allocation4 + $0x50] sm:$0xff]  ;;  %v5476_v24 = vld [vmem:[#allocation4 + $0x58] sm:$0xff] }
0x1103   :  { %5649 = vmatprep.subr.bf16.mxu0 %v9536_v30 }
0x1104   :  { %5650 = vmatpush1.bf16.msra.mxu0 %v9534_v35 }
0x1105   :  { %v5588_v50 = vpop.f32.mrb[240].mxu0 }
0x1106   :  { %v5590_v36 = vpop.f32.mrb[241].mxu0 }
0x1107   :  { %v5592_v39 = vpop.f32.mrb[242].mxu0 }
0x1108   :  { %v9540_v47 = vpack.c.bf16 %v5592_v39, %v5588_v50  ;;  %v5594_v42 = vpop.f32.mrb[243].mxu0  ;;  %v5468_v50 = vld [vmem:[#allocation4 + $0x18] sm:$0xff]  ;;  %v5478_v39 = vld [vmem:[#allocation4 + $0x68] sm:$0xff] }
0x1109   :  { %v9542_v63 = vpack.c.bf16 %v5594_v42, %v5590_v36  ;;  %v5477_v36 = vld [vmem:[#allocation4 + $0x60] sm:$0xff]  ;;  %v5470_v42 = vld [vmem:[#allocation4 + $0x28] sm:$0xff] }
0x110b   :  { %5651 = vmatprep.subr.bf16.mxu0 %v9542_v63 }
0x110c   :  { %5652 = vmatpush1.bf16.msra.mxu0 %v9540_v47 }
0x110d   :  { %v5598_v43 = vpop.f32.mrb[244].mxu0 }
0x110e   :  { %v5600_v31 = vpop.f32.mrb[245].mxu0 }
0x110f   :  { %v5602_v56 = vpop.f32.mrb[246].mxu0 }
0x1110   :  { %v9546_v44 = vpack.c.bf16 %v5602_v56, %v5598_v43  ;;  %v5604_v29 = vpop.f32.mrb[247].mxu0  ;;  %v5479_v43 = vld [vmem:[#allocation4 + $0x70] sm:$0xff]  ;;  %v5472_v56 = vld [vmem:[#allocation4 + $0x38] sm:$0xff] }
0x1111   :  { %v9548_v19 = vpack.c.bf16 %v5604_v29, %v5600_v31  ;;  %v5480_v31 = vld [vmem:[#allocation4 + $0x78] sm:$0xff]  ;;  %v5489_v29 = vld [vmem:[#allocation4 + $0xc0] sm:$0xff] }
0x1113   :  { %5653 = vmatprep.subr.bf16.mxu0 %v9548_v19 }
0x1114   :  { %5654 = vmatpush1.bf16.msra.mxu0 %v9546_v44 }
0x1115   :  { %v5608_v61 = vpop.f32.mrb[248].mxu0 }
0x1116   :  { %v5610_v1 = vpop.f32.mrb[249].mxu0 }
0x1117   :  { %v5612_v33 = vpop.f32.mrb[250].mxu0 }
0x1118   :  { %v9552_v23 = vpack.c.bf16 %v5612_v33, %v5608_v61  ;;  %v5614_v52 = vpop.f32.mrb[251].mxu0  ;;  %v5483_v61 = vld [vmem:[#allocation4 + $0x90] sm:$0xff]  ;;  %v5488_v33 = vld [vmem:[#allocation4 + $0xb8] sm:$0xff] }
0x1119   :  { %v9554_v8 = vpack.c.bf16 %v5614_v52, %v5610_v1  ;;  %v5495_v1 = vld [vmem:[#allocation4 + $0xf0] sm:$0xff]  ;;  %v5505_v52 = vld [vmem:[#allocation4 + $0x140] sm:$0xff] }
0x111b   :  { %5655 = vmatprep.subr.bf16.mxu0 %v9554_v8 }
0x111c   :  { %5656 = vmatpush1.bf16.msra.mxu0 %v9552_v23 }
0x111d   :  { %v5618_v60 = vpop.f32.mrb[252].mxu0 }
0x111e   :  { %v5620_v62 = vpop.f32.mrb[253].mxu0 }
0x111f   :  { %v5622_v20 = vpop.f32.mrb[254].mxu0 }
0x1120   :  { %v9558_v7 = vpack.c.bf16 %v5622_v20, %v5618_v60  ;;  %v5624_v58 = vpop.f32.mrb[255].mxu0 }
0x1121   :  { %v9560_v0 = vpack.c.bf16 %v5624_v58, %v5620_v62 }
0x1123   :  { %5657 = vmatprep.subr.bf16.mxu0 %v9560_v0 }
0x1124   :  { %5658 = vmatpush1.bf16.msra.mxu0 %v9558_v7 }
0x1125   :  { %6751 = vmatprep.subr.bf16.mxu0 %v5473_v21 }
0x1127   :  { %5676 = vmatmul.mubr.bf16.vlgmr.msra.gmra.mrb[0].mxu0 %v9917_v53  ;;  %v5469_v53 = vld [vmem:[#allocation4 + $0x20] sm:$0xff] }
0x1128   :  { %5685 = vmatprep.mubr.bf16.mxu0 %v9916_v22  ;;  %6752 = vmatpush3.bf16.msra.mxu0 %v5465_v2 }
0x1129   :  { %6753 = vmatprep.subr.bf16.mxu0 %v5474_v45 }
0x112c   :  { %6754 = vmatpush3.bf16.msra.mxu0 %v5466_v49 }
0x112d   :  { %6755 = vmatprep.subr.bf16.mxu0 %v5475_v16 }
0x112f   :  { %5686 = vmatmul.mubr.bf16.gmra.mrb[4].mxu0 %v9918_v37  ;;  %v5471_v37 = vld [vmem:[#allocation4 + $0x30] sm:$0xff] }
0x1130   :  { %5695 = vmatprep.mubr.bf16.mxu0 %v9916_v22  ;;  %6756 = vmatpush3.bf16.msra.mxu0 %v5467_v9 }
0x1131   :  { %6757 = vmatprep.subr.bf16.mxu0 %v5476_v24 }
0x1134   :  { %6758 = vmatpush3.bf16.msra.mxu0 %v5468_v50 }
0x1135   :  { %6759 = vmatprep.subr.bf16.mxu0 %v5477_v36 }
0x1137   :  { %5696 = vmatmul.mubr.bf16.gmra.mrb[8].mxu0 %v9919_v14  ;;  %v5481_v14 = vld [vmem:[#allocation4 + $0x80] sm:$0xff] }
0x1138   :  { %5705 = vmatprep.mubr.bf16.mxu0 %v9916_v22  ;;  %6760 = vmatpush3.bf16.msra.mxu0 %v5469_v53 }
0x1139   :  { %6761 = vmatprep.subr.bf16.mxu0 %v5478_v39 }
0x113c   :  { %6762 = vmatpush3.bf16.msra.mxu0 %v5470_v42 }
0x113d   :  { %6763 = vmatprep.subr.bf16.mxu0 %v5479_v43 }
0x113f   :  { %5706 = vmatmul.mubr.bf16.gmra.mrb[12].mxu0 %v9920_v15  ;;  %v5490_v15 = vld [vmem:[#allocation4 + $0xc8] sm:$0xff] }
0x1140   :  { %5715 = vmatprep.mubr.bf16.mxu0 %v9916_v22  ;;  %6764 = vmatpush3.bf16.msra.mxu0 %v5471_v37 }
0x1141   :  { %6765 = vmatprep.subr.bf16.mxu0 %v5480_v31 }
0x1144   :  { %6766 = vmatpush3.bf16.msra.mxu0 %v5472_v56 }
0x1145   :  { %6815 = vmatprep.subr.bf16.mxu0 %v5489_v29 }
0x1147   :  { %5716 = vmatmul.mubr.bf16.gmra.mrb[16].mxu0 %v9921_v51  ;;  %v5482_v51 = vld [vmem:[#allocation4 + $0x88] sm:$0xff] }
0x1148   :  { %5725 = vmatprep.mubr.bf16.mxu0 %v9916_v22 }
0x114f   :  { %5726 = vmatmul.mubr.bf16.gmra.mrb[20].mxu0 %v9922_v3  ;;  %v5491_v3 = vld [vmem:[#allocation4 + $0xd0] sm:$0xff] }
0x1150   :  { %5735 = vmatprep.mubr.bf16.mxu0 %v9916_v22 }
0x1157   :  { %5736 = vmatmul.mubr.bf16.gmra.mrb[24].mxu0 %v9923_v11  ;;  %v5492_v11 = vld [vmem:[#allocation4 + $0xd8] sm:$0xff] }
0x1158   :  { %5745 = vmatprep.mubr.bf16.mxu0 %v9916_v22  ;;  %v5493_v22 = vld [vmem:[#allocation4 + $0xe0] sm:$0xff] }
0x115f   :  { %5746 = vmatmul.mubr.bf16.gmra.mrb[28].mxu0 %v9924_v26  ;;  %v5486_v26 = vld [vmem:[#allocation4 + $0xa8] sm:$0xff] }
0x1160   :  { %5900 = vmatprep.mubr.bf16.mxu0 %v9425_v17  ;;  %v5484_v17 = vld [vmem:[#allocation4 + $0x98] sm:$0xff] }
0x1167   :  { %5901 = vmatmul.mubr.bf16.vlgmr.msra.gmra.mrb[32].mxu0 %v9423_v27  ;;  %v5485_v27 = vld [vmem:[#allocation4 + $0xa0] sm:$0xff] }
0x1168   :  { %5908 = vmatprep.mubr.bf16.mxu0 %v9433_v25  ;;  %6816 = vmatpush3.bf16.msra.mxu0 %v5481_v14  ;;  %v5494_v25 = vld [vmem:[#allocation4 + $0xe8] sm:$0xff] }
0x1169   :  { %6817 = vmatprep.subr.bf16.mxu0 %v5490_v15 }
0x116c   :  { %6818 = vmatpush3.bf16.msra.mxu0 %v5482_v51 }
0x116d   :  { %6819 = vmatprep.subr.bf16.mxu0 %v5491_v3 }
0x116f   :  { %5909 = vmatmul.mubr.bf16.gmra.mrb[36].mxu0 %v9431_v18  ;;  %v5487_v18 = vld [vmem:[#allocation4 + $0xb0] sm:$0xff] }
0x1170   :  { %5916 = vmatprep.mubr.bf16.mxu0 %v9441_v38  ;;  %6820 = vmatpush3.bf16.msra.mxu0 %v5483_v61  ;;  %v5496_v38 = vld [vmem:[#allocation4 + $0xf8] sm:$0xff] }
0x1171   :  { %6821 = vmatprep.subr.bf16.mxu0 %v5492_v11 }
0x1174   :  { %6822 = vmatpush3.bf16.msra.mxu0 %v5484_v17 }
0x1175   :  { %6823 = vmatprep.subr.bf16.mxu0 %v5493_v22 }
0x1177   :  { %5917 = vmatmul.mubr.bf16.gmra.mrb[40].mxu0 %v9439_v40  ;;  %v5497_v40 = vld [vmem:[#allocation4 + $0x100] sm:$0xff] }
0x1178   :  { %5924 = vmatprep.mubr.bf16.mxu0 %v9449_v10  ;;  %6824 = vmatpush3.bf16.msra.mxu0 %v5485_v27  ;;  %v5498_v10 = vld [vmem:[#allocation4 + $0x108] sm:$0xff] }
0x1179   :  { %6825 = vmatprep.subr.bf16.mxu0 %v5494_v25 }
0x117c   :  { %6826 = vmatpush3.bf16.msra.mxu0 %v5486_v26 }
0x117d   :  { %6827 = vmatprep.subr.bf16.mxu0 %v5495_v1 }
0x117f   :  { %5925 = vmatmul.mubr.bf16.gmra.mrb[44].mxu0 %v9447_v41  ;;  %v5506_v41 = vld [vmem:[#allocation4 + $0x148] sm:$0xff] }
0x1180   :  { %5932 = vmatprep.mubr.bf16.mxu0 %v9457_v54  ;;  %6828 = vmatpush3.bf16.msra.mxu0 %v5487_v18  ;;  %v5499_v54 = vld [vmem:[#allocation4 + $0x110] sm:$0xff] }
0x1181   :  { %6829 = vmatprep.subr.bf16.mxu0 %v5496_v38 }
0x1184   :  { %6830 = vmatpush3.bf16.msra.mxu0 %v5488_v33 }
0x1185   :  { %6879 = vmatprep.subr.bf16.mxu0 %v5505_v52 }
0x1187   :  { %5933 = vmatmul.mubr.bf16.gmra.mrb[48].mxu0 %v9455_v5  ;;  %v5507_v5 = vld [vmem:[#allocation4 + $0x150] sm:$0xff] }
0x1188   :  { %5940 = vmatprep.mubr.bf16.mxu0 %v9465_v48  ;;  %v5500_v48 = vld [vmem:[#allocation4 + $0x118] sm:$0xff] }
0x118f   :  { %5941 = vmatmul.mubr.bf16.gmra.mrb[52].mxu0 %v9463_v55  ;;  %v5508_v55 = vld [vmem:[#allocation4 + $0x158] sm:$0xff] }
0x1190   :  { %5948 = vmatprep.mubr.bf16.mxu0 %v9473_v46  ;;  %v5501_v46 = vld [vmem:[#allocation4 + $0x120] sm:$0xff] }
0x1197   :  { %5949 = vmatmul.mubr.bf16.gmra.mrb[56].mxu0 %v9471_v13  ;;  %v5509_v13 = vld [vmem:[#allocation4 + $0x160] sm:$0xff] }
0x1198   :  { %5956 = vmatprep.mubr.bf16.mxu0 %v9481_v32  ;;  %v5502_v32 = vld [vmem:[#allocation4 + $0x128] sm:$0xff] }
0x119f   :  { %5957 = vmatmul.mubr.bf16.gmra.mrb[60].mxu0 %v9479_v59  ;;  %v5510_v59 = vld [vmem:[#allocation4 + $0x168] sm:$0xff] }
0x11a0   :  { %5997 = vmatprep.mubr.bf16.mxu0 %v9518_v34  ;;  %v5503_v34 = vld [vmem:[#allocation4 + $0x130] sm:$0xff] }
0x11a7   :  { %5998 = vmatmul.mubr.bf16.vlgmr.msra.gmra.mrb[64].mxu0 %v9516_v28  ;;  %v5511_v28 = vld [vmem:[#allocation4 + $0x170] sm:$0xff] }
0x11a8   :  { %6005 = vmatprep.mubr.bf16.mxu0 %v9524_v4  ;;  %6880 = vmatpush3.bf16.msra.mxu0 %v5497_v40  ;;  %v5504_v4 = vld [vmem:[#allocation4 + $0x138] sm:$0xff] }
0x11a9   :  { %6881 = vmatprep.subr.bf16.mxu0 %v5506_v41 }
0x11ac   :  { %6882 = vmatpush3.bf16.msra.mxu0 %v5498_v10 }
0x11ad   :  { %6883 = vmatprep.subr.bf16.mxu0 %v5507_v5 }
0x11af   :  { %6006 = vmatmul.mubr.bf16.gmra.mrb[68].mxu0 %v9522_v57  ;;  %v5512_v57 = vld [vmem:[#allocation4 + $0x178] sm:$0xff] }
0x11b0   :  { %6013 = vmatprep.mubr.bf16.mxu0 %v9530_v6  ;;  %6884 = vmatpush3.bf16.msra.mxu0 %v5499_v54 }
0x11b1   :  { %6885 = vmatprep.subr.bf16.mxu0 %v5508_v55 }
0x11b4   :  { %6886 = vmatpush3.bf16.msra.mxu0 %v5500_v48 }
0x11b5   :  { %6887 = vmatprep.subr.bf16.mxu0 %v5509_v13 }
0x11b7   :  { %6014 = vmatmul.mubr.bf16.gmra.mrb[72].mxu0 %v9528_v12 }
0x11b8   :  { %6021 = vmatprep.mubr.bf16.mxu0 %v9536_v30  ;;  %6888 = vmatpush3.bf16.msra.mxu0 %v5501_v46 }
0x11b9   :  { %6889 = vmatprep.subr.bf16.mxu0 %v5510_v59 }
0x11bc   :  { %6890 = vmatpush3.bf16.msra.mxu0 %v5502_v32 }
0x11bd   :  { %6891 = vmatprep.subr.bf16.mxu0 %v5511_v28 }
0x11bf   :  { %6022 = vmatmul.mubr.bf16.gmra.mrb[76].mxu0 %v9534_v35 }
0x11c0   :  { %6029 = vmatprep.mubr.bf16.mxu0 %v9542_v63  ;;  %6892 = vmatpush3.bf16.msra.mxu0 %v5503_v34 }
0x11c1   :  { %6893 = vmatprep.subr.bf16.mxu0 %v5512_v57 }
0x11c4   :  { %6894 = vmatpush3.bf16.msra.mxu0 %v5504_v4 }
0x11c7   :  { %6030 = vmatmul.mubr.bf16.gmra.mrb[80].mxu0 %v9540_v47 }
0x11c8   :  { %6037 = vmatprep.mubr.bf16.mxu0 %v9548_v19 }
0x11cf   :  { %6038 = vmatmul.mubr.bf16.gmra.mrb[84].mxu0 %v9546_v44 }
0x11d0   :  { %6045 = vmatprep.mubr.bf16.mxu0 %v9554_v8 }
0x11d7   :  { %6046 = vmatmul.mubr.bf16.gmra.mrb[88].mxu0 %v9552_v23 }
0x11d8   :  { %6053 = vmatprep.mubr.bf16.mxu0 %v9560_v0 }
0x11df   :  { %6054 = vmatmul.mubr.bf16.gmra.mrb[92].mxu0 %v9558_v7 }
0x11fa   :  { %v5677_v12 = vpop.f32.mrb[0].mxu0 }
0x11fb   :  { %v5679_v6 = vpop.f32.mrb[1].mxu0 }
0x11fc   :  { %v5681_v35 = vpop.f32.mrb[2].mxu0 }
0x11fd   :  { %v5756_v30 = vpack.c.bf16 %v5681_v35, %v5677_v12  ;;  %v5683_v63 = vpop.f32.mrb[3].mxu0 }
0x11fe   :  { %v5757_v60 = vpack.c.bf16 %v5683_v63, %v5679_v6 }
0x1200   :  { %6094 = vmatprep.mubr.bf16.mxu0 %v5757_v60 }
0x1201   :  { %6095 = vmatmul.mubr.bf16.vlgmr.msra.gmra.mrb[96].mxu0 %v5756_v30 }
0x1202   :  { %v5687_v47 = vpop.f32.mrb[4].mxu0 }
0x1203   :  { %v5689_v19 = vpop.f32.mrb[5].mxu0 }
0x1204   :  { %v5691_v62 = vpop.f32.mrb[6].mxu0 }
0x1205   :  { %v5758_v44 = vpack.c.bf16 %v5691_v62, %v5687_v47  ;;  %v5693_v20 = vpop.f32.mrb[7].mxu0 }
0x1206   :  { %v5759_v8 = vpack.c.bf16 %v5693_v20, %v5689_v19 }
0x1208   :  { %6102 = vmatprep.mubr.bf16.mxu0 %v5759_v8 }
0x1209   :  { %6103 = vmatmul.mubr.bf16.gmra.mrb[100].mxu0 %v5758_v44 }
0x120a   :  { %v5697_v23 = vpop.f32.mrb[8].mxu0 }
0x120b   :  { %v5699_v58 = vpop.f32.mrb[9].mxu0 }
0x120c   :  { %v5701_v0 = vpop.f32.mrb[10].mxu0 }
0x120d   :  { %v5760_v7 = vpack.c.bf16 %v5701_v0, %v5697_v23  ;;  %v5703_v21 = vpop.f32.mrb[11].mxu0 }
0x120e   :  { %v5761_v2 = vpack.c.bf16 %v5703_v21, %v5699_v58 }
0x1210   :  { %6110 = vmatprep.mubr.bf16.mxu0 %v5761_v2 }
0x1211   :  { %6111 = vmatmul.mubr.bf16.gmra.mrb[104].mxu0 %v5760_v7 }
0x1212   :  { %v5707_v45 = vpop.f32.mrb[12].mxu0 }
0x1213   :  { %v5709_v49 = vpop.f32.mrb[13].mxu0 }
0x1214   :  { %v5711_v16 = vpop.f32.mrb[14].mxu0 }
0x1215   :  { %v5762_v9 = vpack.c.bf16 %v5711_v16, %v5707_v45  ;;  %v5713_v24 = vpop.f32.mrb[15].mxu0 }
0x1216   :  { %v5763_v50 = vpack.c.bf16 %v5713_v24, %v5709_v49 }
0x1218   :  { %6118 = vmatprep.mubr.bf16.mxu0 %v5763_v50 }
0x1219   :  { %6119 = vmatmul.mubr.bf16.gmra.mrb[108].mxu0 %v5762_v9 }
0x121a   :  { %v5717_v36 = vpop.f32.mrb[16].mxu0 }
0x121b   :  { %v5719_v53 = vpop.f32.mrb[17].mxu0 }
0x121c   :  { %v5721_v39 = vpop.f32.mrb[18].mxu0 }
0x121d   :  { %v5764_v42 = vpack.c.bf16 %v5721_v39, %v5717_v36  ;;  %v5723_v43 = vpop.f32.mrb[19].mxu0 }
0x121e   :  { %v5765_v37 = vpack.c.bf16 %v5723_v43, %v5719_v53 }
0x1220   :  { %6126 = vmatprep.mubr.bf16.mxu0 %v5765_v37 }
0x1221   :  { %6127 = vmatmul.mubr.bf16.gmra.mrb[112].mxu0 %v5764_v42 }
0x1222   :  { %v5727_v31 = vpop.f32.mrb[20].mxu0 }
0x1223   :  { %v5729_v56 = vpop.f32.mrb[21].mxu0 }
0x1224   :  { %v5731_v29 = vpop.f32.mrb[22].mxu0 }
0x1225   :  { %v5766_v14 = vpack.c.bf16 %v5731_v29, %v5727_v31  ;;  %v5733_v15 = vpop.f32.mrb[23].mxu0  ;;  %v9627_v29 = vld [vmem:[#allocation14 + $0x5] ss:$0 sm:$0xff] }
0x1226   :  { %v5767_v51 = vpack.c.bf16 %v5733_v15, %v5729_v56 }
0x1228   :  { %6134 = vmatprep.mubr.bf16.mxu0 %v5767_v51 }
0x1229   :  { %6135 = vmatmul.mubr.bf16.gmra.mrb[116].mxu0 %v5766_v14 }
0x122a   :  { %v5737_v3 = vpop.f32.mrb[24].mxu0 }
0x122b   :  { %v5739_v61 = vpop.f32.mrb[25].mxu0 }
0x122c   :  { %v5741_v11 = vpop.f32.mrb[26].mxu0 }
0x122d   :  { %v5768_v17 = vpack.c.bf16 %v5741_v11, %v5737_v3  ;;  %v5743_v22 = vpop.f32.mrb[27].mxu0 }
0x122e   :  { %v5769_v27 = vpack.c.bf16 %v5743_v22, %v5739_v61 }
0x1230   :  { %6142 = vmatprep.mubr.bf16.mxu0 %v5769_v27 }
0x1231   :  { %6143 = vmatmul.mubr.bf16.gmra.mrb[120].mxu0 %v5768_v17 }
0x1232   :  { %v5747_v25 = vpop.f32.mrb[28].mxu0 }
0x1233   :  { %v5749_v26 = vpop.f32.mrb[29].mxu0 }
0x1234   :  { %v5751_v1 = vpop.f32.mrb[30].mxu0 }
0x1235   :  { %v5770_v18 = vpack.c.bf16 %v5751_v1, %v5747_v25  ;;  %v5753_v38 = vpop.f32.mrb[31].mxu0 }
0x1236   :  { %v5771_v33 = vpack.c.bf16 %v5753_v38, %v5749_v26 }
0x1238   :  { %6150 = vmatprep.mubr.bf16.mxu0 %v5771_v33 }
0x1239   :  { %6151 = vmatmul.mubr.bf16.gmra.mrb[124].mxu0 %v5770_v18 }
0x123a   :  { %v6767_v52 = vpop.f32.mrb[32].mxu0 }
0x123b   :  { %v6768_v40 = vpop.f32.mrb[33].mxu0 }
0x123c   :  { %v6769_v41 = vadd.f32 %v6768_v40, %v6767_v52  ;;  %v6770_v10 = vpop.f32.mrb[34].mxu0 }
0x123d   :  { %v6771_v5 = vpop.f32.mrb[35].mxu0 }
0x123e   :  { %v6772_v54 = vadd.f32 %v6771_v5, %v6770_v10  ;;  %v5903_v51 = vadd.f32 %v6769_v41, %v9627_v29 }
0x1240   :  { %v5906_v17 = vadd.f32 %v6772_v54, %v9627_v29 }
0x1242   :  { %v6773_v55 = vpop.f32.mrb[36].mxu0 }
0x1243   :  { %v6774_v48 = vpop.f32.mrb[37].mxu0 }
0x1244   :  { %v6775_v13 = vadd.f32 %v6774_v48, %v6773_v55  ;;  %v6776_v46 = vpop.f32.mrb[38].mxu0 }
0x1245   :  { %v6777_v59 = vpop.f32.mrb[39].mxu0 }
0x1246   :  { %v6778_v32 = vadd.f32 %v6777_v59, %v6776_v46  ;;  %v5911_v18 = vadd.f32 %v6775_v13, %v9627_v29 }
0x1248   :  { %v5914_v40 = vadd.f32 %v6778_v32, %v9627_v29 }
0x124a   :  { %v6779_v28 = vpop.f32.mrb[40].mxu0 }
0x124b   :  { %v6780_v34 = vpop.f32.mrb[41].mxu0 }
0x124c   :  { %v6781_v57 = vadd.f32 %v6780_v34, %v6779_v28  ;;  %v6782_v4 = vpop.f32.mrb[42].mxu0 }
0x124d   :  { %v6783_v12 = vpop.f32.mrb[43].mxu0 }
0x124e   :  { %v6784_v6 = vadd.f32 %v6783_v12, %v6782_v4  ;;  %v5919_v48 = vadd.f32 %v6781_v57, %v9627_v29 }
0x1250   :  { %v5922_v34 = vadd.f32 %v6784_v6, %v9627_v29 }
0x1252   :  { %v6785_v35 = vpop.f32.mrb[44].mxu0 }
0x1253   :  { %v6786_v30 = vpop.f32.mrb[45].mxu0 }
0x1254   :  { %v6787_v63 = vadd.f32 %v6786_v30, %v6785_v35  ;;  %v6788_v60 = vpop.f32.mrb[46].mxu0 }
0x1255   :  { %v6789_v47 = vpop.f32.mrb[47].mxu0 }
0x1256   :  { %v6790_v19 = vadd.f32 %v6789_v47, %v6788_v60  ;;  %v5927_v30 = vadd.f32 %v6787_v63, %v9627_v29 }
0x125a   :  { %v6791_v62 = vpop.f32.mrb[48].mxu0 }
0x125b   :  { %v6792_v44 = vpop.f32.mrb[49].mxu0 }
0x125c   :  { %v9611_v20 = vadd.f32 %v6792_v44, %v6791_v62  ;;  %v6794_v8 = vpop.f32.mrb[50].mxu0  ;;  %v5930_v44 = vadd.f32 %v6790_v19, %v9627_v29 }
0x125d   :  { %v6795_v23 = vpop.f32.mrb[51].mxu0 }
0x125e   :  { %v9613_v58 = vadd.f32 %v6795_v23, %v6794_v8 }
0x1260   :  { %v5938_v63 = vadd.f32 %v9613_v58, %v9627_v29 }
0x1262   :  { %v6797_v0 = vpop.f32.mrb[52].mxu0 }
0x1263   :  { %v6798_v7 = vpop.f32.mrb[53].mxu0 }
0x1264   :  { %v9615_v21 = vadd.f32 %v6798_v7, %v6797_v0  ;;  %v6800_v2 = vpop.f32.mrb[54].mxu0  ;;  %v5935_v7 = vadd.f32 %v9611_v20, %v9627_v29 }
0x1265   :  { %v6801_v45 = vpop.f32.mrb[55].mxu0 }
0x1266   :  { %v9617_v49 = vadd.f32 %v6801_v45, %v6800_v2 }
0x1268   :  { %v5946_v20 = vadd.f32 %v9617_v49, %v9627_v29 }
0x126a   :  { %v6803_v16 = vpop.f32.mrb[56].mxu0 }
0x126b   :  { %v6804_v9 = vpop.f32.mrb[57].mxu0 }
0x126c   :  { %v9619_v24 = vadd.f32 %v6804_v9, %v6803_v16  ;;  %v6806_v50 = vpop.f32.mrb[58].mxu0 }
0x126d   :  { %v6807_v36 = vpop.f32.mrb[59].mxu0 }
0x126e   :  { %v9621_v53 = vadd.f32 %v6807_v36, %v6806_v50 }
0x1272   :  { %v6809_v39 = vpop.f32.mrb[60].mxu0 }
0x1273   :  { %v6810_v42 = vpop.f32.mrb[61].mxu0 }
0x1274   :  { %v9623_v43 = vadd.f32 %v6810_v42, %v6809_v39  ;;  %v6812_v37 = vpop.f32.mrb[62].mxu0  ;;  %v5943_v42 = vadd.f32 %v9615_v21, %v9627_v29  ;;  %v5954_v21 = vadd.f32 %v9621_v53, %v9627_v29 }
0x1275   :  { %v6813_v31 = vpop.f32.mrb[63].mxu0 }
0x1276   :  { %v9625_v56 = vadd.f32 %v6813_v31, %v6812_v37 }
0x127a   :  { %v6831_v14 = vpop.f32.mrb[64].mxu0 }
0x127b   :  { %v6832_v15 = vpop.f32.mrb[65].mxu0 }
0x127c   :  { %v6833_v3 = vadd.f32 %v6832_v15, %v6831_v14  ;;  %v6834_v61 = vpop.f32.mrb[66].mxu0 }
0x127d   :  { %v6835_v11 = vpop.f32.mrb[67].mxu0 }
0x127e   :  { %v9631_v22 = vadd.f32 %v6833_v3, %v5903_v51  ;;  %v6836_v27 = vadd.f32 %v6835_v11, %v6834_v61  ;;  %v5951_v11 = vadd.f32 %v9619_v24, %v9627_v29  ;;  %v5962_v24 = vadd.f32 %v9625_v56, %v9627_v29 }
0x1280   :  { %v9633_v25 = vadd.f32 %v6836_v27, %v5906_v17 }
0x1282   :  { %v6837_v26 = vpop.f32.mrb[68].mxu0 }
0x1283   :  { %v6838_v1 = vpop.f32.mrb[69].mxu0 }
0x1284   :  { %v6839_v38 = vadd.f32 %v6838_v1, %v6837_v26  ;;  %v6840_v33 = vpop.f32.mrb[70].mxu0 }
0x1285   :  { %v6841_v52 = vpop.f32.mrb[71].mxu0 }
0x1286   :  { %v9637_v41 = vadd.f32 %v6839_v38, %v5911_v18  ;;  %v6842_v10 = vadd.f32 %v6841_v52, %v6840_v33  ;;  %v5959_v52 = vadd.f32 %v9623_v43, %v9627_v29 }
0x1288   :  { %v9639_v5 = vadd.f32 %v6842_v10, %v5914_v40 }
0x128a   :  { %v6843_v54 = vpop.f32.mrb[72].mxu0 }
0x128b   :  { %v6844_v55 = vpop.f32.mrb[73].mxu0 }
0x128c   :  { %v6845_v46 = vadd.f32 %v6844_v55, %v6843_v54  ;;  %v6846_v59 = vpop.f32.mrb[74].mxu0 }
0x128d   :  { %v6847_v28 = vpop.f32.mrb[75].mxu0 }
0x128e   :  { %v9643_v13 = vadd.f32 %v6845_v46, %v5919_v48  ;;  %v6848_v4 = vadd.f32 %v6847_v28, %v6846_v59 }
0x1290   :  { %v9645_v12 = vadd.f32 %v6848_v4, %v5922_v34 }
0x1292   :  { %v6849_v32 = vpop.f32.mrb[76].mxu0 }
0x1293   :  { %v6850_v35 = vpop.f32.mrb[77].mxu0 }
0x1294   :  { %v6851_v60 = vadd.f32 %v6850_v35, %v6849_v32  ;;  %v6852_v47 = vpop.f32.mrb[78].mxu0 }
0x1295   :  { %v6853_v62 = vpop.f32.mrb[79].mxu0 }
0x1296   :  { %v9649_v57 = vadd.f32 %v6851_v60, %v5927_v30  ;;  %v6854_v8 = vadd.f32 %v6853_v62, %v6852_v47 }
0x1298   :  { %v9651_v23 = vadd.f32 %v6854_v8, %v5930_v44 }
0x129a   :  { %v6855_v6 = vpop.f32.mrb[80].mxu0 }
0x129b   :  { %v6856_v0 = vpop.f32.mrb[81].mxu0 }
0x129c   :  { %v6857_v2 = vadd.f32 %v6856_v0, %v6855_v6  ;;  %v6858_v45 = vpop.f32.mrb[82].mxu0 }
0x129d   :  { %v6859_v16 = vpop.f32.mrb[83].mxu0 }
0x129e   :  { %v9657_v9 = vadd.f32 %v6857_v2, %v5935_v7  ;;  %v6860_v50 = vadd.f32 %v6859_v16, %v6858_v45 }
0x12a0   :  { %v9659_v19 = vadd.f32 %v6860_v50, %v5938_v63 }
0x12a2   :  { %v6861_v36 = vpop.f32.mrb[84].mxu0 }
0x12a3   :  { %v6862_v39 = vpop.f32.mrb[85].mxu0 }
0x12a4   :  { %v6863_v37 = vadd.f32 %v6862_v39, %v6861_v36  ;;  %v6864_v31 = vpop.f32.mrb[86].mxu0 }
0x12a5   :  { %v6865_v14 = vpop.f32.mrb[87].mxu0 }
0x12a6   :  { %v9665_v15 = vadd.f32 %v6863_v37, %v5943_v42  ;;  %v6866_v51 = vadd.f32 %v6865_v14, %v6864_v31 }
0x12a8   :  { %v9667_v58 = vadd.f32 %v6866_v51, %v5946_v20 }
0x12aa   :  { %v6867_v3 = vpop.f32.mrb[88].mxu0 }
0x12ab   :  { %v6868_v61 = vpop.f32.mrb[89].mxu0 }
0x12ac   :  { %v6869_v17 = vadd.f32 %v6868_v61, %v6867_v3  ;;  %v6870_v27 = vpop.f32.mrb[90].mxu0 }
0x12ad   :  { %v6871_v26 = vpop.f32.mrb[91].mxu0 }
0x12ae   :  { %v9673_v1 = vadd.f32 %v6869_v17, %v5951_v11  ;;  %v6872_v18 = vadd.f32 %v6871_v26, %v6870_v27 }
0x12b0   :  { %v9675_v49 = vadd.f32 %v6872_v18, %v5954_v21 }
0x12b2   :  { %v6873_v38 = vpop.f32.mrb[92].mxu0 }
0x12b3   :  { %v6874_v33 = vpop.f32.mrb[93].mxu0 }
0x12b4   :  { %v6875_v40 = vadd.f32 %v6874_v33, %v6873_v38  ;;  %v6876_v10 = vpop.f32.mrb[94].mxu0 }
0x12b5   :  { %v6877_v54 = vpop.f32.mrb[95].mxu0 }
0x12b6   :  { %v9681_v55 = vadd.f32 %v6875_v40, %v5959_v52  ;;  %v6878_v48 = vadd.f32 %v6877_v54, %v6876_v10 }
0x12b8   :  { %v9683_v53 = vadd.f32 %v6878_v48, %v5962_v24 }
0x12d4   :  { %v6895_v46 = vpop.f32.mrb[96].mxu0 }
0x12d5   :  { %v6896_v59 = vpop.f32.mrb[97].mxu0 }
0x12d6   :  { %v6897_v28 = vadd.f32 %v6896_v59, %v6895_v46  ;;  %v6898_v34 = vpop.f32.mrb[98].mxu0 }
0x12d7   :  { %v6899_v4 = vpop.f32.mrb[99].mxu0 }
0x12d8   :  { %v6097_v32 = vadd.f32 %v6897_v28, %v9631_v22  ;;  %v6900_v35 = vadd.f32 %v6899_v4, %v6898_v34 }
0x12da   :  { %v6100_v43 = vadd.f32 %v6900_v35, %v9633_v25  ;;  %v6159_v30 = vmax.f32 %v6097_v32, 0.0 }
0x12dc   :  { %v6160_v60 = vmax.f32 %v6100_v43, 0.0  ;;  %v6901_v47 = vpop.f32.mrb[100].mxu0 }
0x12dd   :  { %v6902_v62 = vpop.f32.mrb[101].mxu0 }
0x12de   :  { %v9687_v56 = vpack.c.bf16 %v6160_v60, %v6159_v30  ;;  %v6903_v29 = vadd.f32 %v6902_v62, %v6901_v47  ;;  %v6904_v44 = vpop.f32.mrb[102].mxu0 }
0x12df   :  { %v6905_v8 = vpop.f32.mrb[103].mxu0 }
0x12e0   :  { %v6105_v6 = vadd.f32 %v6903_v29, %v9637_v41  ;;  %v6906_v0 = vadd.f32 %v6905_v8, %v6904_v44 }
0x12e2   :  { %v6108_v7 = vadd.f32 %v6906_v0, %v9639_v5  ;;  %v6161_v2 = vmax.f32 %v6105_v6, 0.0 }
0x12e4   :  { %v6162_v45 = vmax.f32 %v6108_v7, 0.0  ;;  %v6907_v22 = vpop.f32.mrb[104].mxu0 }
0x12e5   :  { %v6908_v16 = vpop.f32.mrb[105].mxu0 }
0x12e6   :  { %v9691_v63 = vpack.c.bf16 %v6162_v45, %v6161_v2  ;;  %v6909_v25 = vadd.f32 %v6908_v16, %v6907_v22  ;;  %v6910_v50 = vpop.f32.mrb[106].mxu0 }
0x12e7   :  { %v6911_v36 = vpop.f32.mrb[107].mxu0 }
0x12e8   :  { %v6113_v39 = vadd.f32 %v6909_v25, %v9643_v13  ;;  %v6912_v42 = vadd.f32 %v6911_v36, %v6910_v50 }
0x12ea   :  { %v6116_v37 = vadd.f32 %v6912_v42, %v9645_v12  ;;  %v6163_v31 = vmax.f32 %v6113_v39, 0.0 }
0x12ec   :  { %v6164_v14 = vmax.f32 %v6116_v37, 0.0  ;;  %v6913_v41 = vpop.f32.mrb[108].mxu0 }
0x12ed   :  { %v6914_v20 = vpop.f32.mrb[109].mxu0 }
0x12ee   :  { %v9695_v51 = vpack.c.bf16 %v6164_v14, %v6163_v31  ;;  %v6915_v5 = vadd.f32 %v6914_v20, %v6913_v41  ;;  %v6916_v3 = vpop.f32.mrb[110].mxu0 }
0x12ef   :  { %v6917_v61 = vpop.f32.mrb[111].mxu0 }
0x12f0   :  { %v6121_v11 = vadd.f32 %v6915_v5, %v9649_v57  ;;  %v6918_v17 = vadd.f32 %v6917_v61, %v6916_v3 }
0x12f2   :  { %v6124_v27 = vadd.f32 %v6918_v17, %v9651_v23  ;;  %v6165_v26 = vmax.f32 %v6121_v11, 0.0 }
0x12f4   :  { %v6166_v21 = vmax.f32 %v6124_v27, 0.0  ;;  %v6919_v13 = vpop.f32.mrb[112].mxu0 }
0x12f5   :  { %v6920_v18 = vpop.f32.mrb[113].mxu0 }
0x12f6   :  { %v9699_v38 = vpack.c.bf16 %v6166_v21, %v6165_v26  ;;  %v6921_v12 = vadd.f32 %v6920_v18, %v6919_v13  ;;  %v6922_v33 = vpop.f32.mrb[114].mxu0 }
0x12f7   :  { %v6923_v52 = vpop.f32.mrb[115].mxu0 }
0x12f8   :  { %v6129_v40 = vadd.f32 %v6921_v12, %v9657_v9  ;;  %v6924_v10 = vadd.f32 %v6923_v52, %v6922_v33 }
0x12fa   :  { %v6132_v54 = vadd.f32 %v6924_v10, %v9659_v19  ;;  %v6167_v24 = vmax.f32 %v6129_v40, 0.0 }
0x12fc   :  { %v6168_v48 = vmax.f32 %v6132_v54, 0.0  ;;  %v6925_v57 = vpop.f32.mrb[116].mxu0 }
0x12fd   :  { %v6926_v46 = vpop.f32.mrb[117].mxu0 }
0x12fe   :  { %v9703_v59 = vpack.c.bf16 %v6168_v48, %v6167_v24  ;;  %v6927_v23 = vadd.f32 %v6926_v46, %v6925_v57  ;;  %v6928_v28 = vpop.f32.mrb[118].mxu0 }
0x12ff   :  { %v6929_v34 = vpop.f32.mrb[119].mxu0 }
0x1300   :  { %v6137_v4 = vadd.f32 %v6927_v23, %v9665_v15  ;;  %v6930_v32 = vadd.f32 %v6929_v34, %v6928_v28 }
0x1302   :  { %v6140_v35 = vadd.f32 %v6930_v32, %v9667_v58  ;;  %v6169_v43 = vmax.f32 %v6137_v4, 0.0 }
0x1304   :  { %v6170_v30 = vmax.f32 %v6140_v35, 0.0  ;;  %v6931_v9 = vpop.f32.mrb[120].mxu0 }
0x1305   :  { %v6932_v60 = vpop.f32.mrb[121].mxu0 }
0x1306   :  { %v9707_v47 = vpack.c.bf16 %v6170_v30, %v6169_v43  ;;  %v6933_v19 = vadd.f32 %v6932_v60, %v6931_v9  ;;  %v6934_v62 = vpop.f32.mrb[122].mxu0 }
0x1307   :  { %v6935_v29 = vpop.f32.mrb[123].mxu0 }
0x1308   :  { %v6145_v44 = vadd.f32 %v6933_v19, %v9673_v1  ;;  %v6936_v8 = vadd.f32 %v6935_v29, %v6934_v62 }
0x130a   :  { %v6148_v6 = vadd.f32 %v6936_v8, %v9675_v49  ;;  %v6171_v0 = vmax.f32 %v6145_v44, 0.0 }
0x130c   :  { %v6172_v7 = vmax.f32 %v6148_v6, 0.0  ;;  %v6937_v15 = vpop.f32.mrb[124].mxu0 }
0x130d   :  { %v6938_v2 = vpop.f32.mrb[125].mxu0 }
0x130e   :  { %v9711_v45 = vpack.c.bf16 %v6172_v7, %v6171_v0  ;;  %v6939_v58 = vadd.f32 %v6938_v2, %v6937_v15  ;;  %v6940_v22 = vpop.f32.mrb[126].mxu0 }
0x130f   :  { %v6941_v16 = vpop.f32.mrb[127].mxu0 }
0x1310   :  { %v6153_v25 = vadd.f32 %v6939_v58, %v9681_v55  ;;  %v6942_v50 = vadd.f32 %v6941_v16, %v6940_v22 }
0x1312   :  { %v6156_v36 = vadd.f32 %v6942_v50, %v9683_v53  ;;  %v6173_v39 = vmax.f32 %v6153_v25, 0.0 }
0x1314   :  { %v6174_v42 = vmax.f32 %v6156_v36, 0.0 }
0x1316   :  { %v9715_v1 = vpack.c.bf16 %v6174_v42, %v6173_v39 }
0x1317   :  { %7982 = dma.done.wait [#allocation7 + $0x3], 4096 }
0x1318   :  { %7983 = vsyncadd [#allocation7 + $0x3], 4294963200  ;;  %v6187_v49 = vunpack.c.l.bf16 %v9687_v56  ;;  %v6188_v37 = vunpack.c.h.bf16 %v9687_v56  ;;  %v6189_v31 = vunpack.c.l.bf16 %v9691_v63  ;;  %v6190_v14 = vunpack.c.h.bf16 %v9691_v63  ;;  %v6203_v41 = vld [vmem:[#allocation5] sm:$0xff]  ;;  %v6204_v20 = vld [vmem:[#allocation5 + $0x8] sm:$0xff]  ;;  %s8006_s1 = smov [#allocation16]  }
0x1319   :  { %v6205_v55 = vld [vmem:[#allocation5 + $0x10] sm:$0xff]  ;;  %v6191_v5 = vunpack.c.l.bf16 %v9695_v51  ;;  %v6206_v53 = vld [vmem:[#allocation5 + $0x18] sm:$0xff]  ;;  %v6207_v17 = vld [vmem:[#allocation5 + $0x20] sm:$0xff]  ;;  %v6192_v27 = vunpack.c.h.bf16 %v9695_v51  ;;  %v6193_v56 = vunpack.c.l.bf16 %v9699_v38  ;;  %v6194_v48 = vunpack.c.h.bf16 %v9699_v38  ;;  %s6337_s5 = sshll.u32 %s8006_s1, 4  ;;  %s6338_s5 = int_to_ptr.vmem [resolvable:$true] %s6337_s5 }
0x131a   :  { %v6219_v3 = vmul.f32 %v6203_v41, %v6187_v49  ;;  %v6220_v61 = vmul.f32 %v6204_v20, %v6188_v37  ;;  %v6221_v11 = vmul.f32 %v6205_v55, %v6189_v31  ;;  %v6222_v26 = vmul.f32 %v6206_v53, %v6190_v14  ;;  %v6208_v13 = vld [vmem:[#allocation5 + $0x28] sm:$0xff]  ;;  %v6259_v63 = vld [vmem:[#allocation5 + $0x80] sm:$0xff]  ;;  %v6209_v52 = vld [vmem:[#allocation5 + $0x30] sm:$0xff]  ;;  %s7952_s10 = scalar_lea.vmem %s6338_s5, 32  ;;  %p7953_p7 = scmp.lt.s32.totalorder %s6338_s5, %s6338_s5 }
0x131b   :  { %v6223_v18 = vmul.f32 %v6207_v17, %v6191_v5  ;;  %v6260_v33 = vld [vmem:[#allocation5 + $0x88] sm:$0xff]  ;;  %v6261_v40 = vld [vmem:[#allocation5 + $0x90] sm:$0xff]  ;;  %v6262_v10 = vld [vmem:[#allocation5 + $0x98] sm:$0xff]  ;;  %v6275_v54 = vmul.f32 %v6259_v63, %v6187_v49  ;;  %v6224_v57 = vmul.f32 %v6208_v13, %v6192_v27  ;;  %v6195_v32 = vunpack.c.l.bf16 %v9703_v59 }
0x131c   :  { %v6235_v21 = vadd.f32 %v6220_v61, %v6219_v3  ;;  %v6276_v24 = vmul.f32 %v6260_v33, %v6188_v37  ;;  %v6263_v23 = vld [vmem:[#allocation5 + $0xa0] sm:$0xff]  ;;  %v6277_v51 = vmul.f32 %v6261_v40, %v6189_v31  ;;  %v6210_v28 = vld [vmem:[#allocation5 + $0x38] sm:$0xff]  ;;  %v6278_v34 = vmul.f32 %v6262_v10, %v6190_v14  ;;  %v6264_v30 = vld [vmem:[#allocation5 + $0xa8] sm:$0xff] }
0x131d   :  { %v6225_v35 = vmul.f32 %v6209_v52, %v6193_v56  ;;  %v6211_v9 = vld [vmem:[#allocation5 + $0x40] sm:$0xff]  ;;  %v6279_v60 = vmul.f32 %v6263_v23, %v6191_v5  ;;  %v6196_v62 = vunpack.c.h.bf16 %v9703_v59  ;;  %v6226_v29 = vmul.f32 %v6210_v28, %v6194_v48  ;;  %v6265_v38 = vld [vmem:[#allocation5 + $0xb0] sm:$0xff]  ;;  %v6212_v8 = vld [vmem:[#allocation5 + $0x48] sm:$0xff] }
0x131e   :  { %v6236_v12 = vadd.f32 %v6235_v21, %v6221_v11  ;;  %v6291_v4 = vadd.f32 %v6276_v24, %v6275_v54  ;;  %v6280_v6 = vmul.f32 %v6264_v30, %v6192_v27  ;;  %v6197_v7 = vunpack.c.l.bf16 %v9707_v47  ;;  %v6266_v58 = vld [vmem:[#allocation5 + $0xb8] sm:$0xff]  ;;  %v6213_v22 = vld [vmem:[#allocation5 + $0x50] sm:$0xff]  ;;  %v6267_v42 = vld [vmem:[#allocation5 + $0xc0] sm:$0xff] }
0x131f   :  { %v6227_v15 = vmul.f32 %v6211_v9, %v6195_v32  ;;  %v6281_v16 = vmul.f32 %v6265_v38, %v6193_v56  ;;  %v6198_v50 = vunpack.c.h.bf16 %v9707_v47  ;;  %v6228_v36 = vmul.f32 %v6212_v8, %v6196_v62  ;;  %v6214_v59 = vld [vmem:[#allocation5 + $0x58] sm:$0xff]  ;;  %v6268_v20 = vld [vmem:[#allocation5 + $0xc8] sm:$0xff]  ;;  %v6215_v55 = vld [vmem:[#allocation5 + $0x60] sm:$0xff] }
0x1320   :  { %v6237_v46 = vadd.f32 %v6236_v12, %v6222_v26  ;;  %v6292_v19 = vadd.f32 %v6291_v4, %v6277_v51  ;;  %v6282_v49 = vmul.f32 %v6266_v58, %v6194_v48  ;;  %v6199_v31 = vunpack.c.l.bf16 %v9711_v45  ;;  %v6269_v17 = vld [vmem:[#allocation5 + $0xd0] sm:$0xff]  ;;  %v6216_v47 = vld [vmem:[#allocation5 + $0x68] sm:$0xff]  ;;  %v6271_v54 = vld [vmem:[#allocation5 + $0xe0] sm:$0xff] }
0x1321   :  { %v6229_v14 = vmul.f32 %v6213_v22, %v6197_v7  ;;  %v6283_v5 = vmul.f32 %v6267_v42, %v6195_v32  ;;  %v6200_v3 = vunpack.c.h.bf16 %v9711_v45  ;;  %v6230_v61 = vmul.f32 %v6214_v59, %v6198_v50  ;;  %v6217_v12 = vld [vmem:[#allocation5 + $0x70] sm:$0xff]  ;;  %v6218_v45 = vld [vmem:[#allocation5 + $0x78] sm:$0xff]  ;;  %v6272_v23 = vld [vmem:[#allocation5 + $0xe8] sm:$0xff] }
0x1322   :  { %v6238_v43 = vadd.f32 %v6237_v46, %v6223_v18  ;;  %v6293_v0 = vadd.f32 %v6292_v19, %v6278_v34  ;;  %v6284_v27 = vmul.f32 %v6268_v20, %v6196_v62  ;;  %v6201_v21 = vunpack.c.l.bf16 %v9715_v1  ;;  %v6270_v18 = vld [vmem:[#allocation5 + $0xd8] sm:$0xff]  ;;  %v6273_v32 = vld [vmem:[#allocation5 + $0xf0] sm:$0xff]  ;;  %v6316_v42 = vld [vmem:[%s9755_s4] sm:$0x1]  ;;  %s7948_s4 = scalar_lea.vmem %s6338_s5, 16 }
0x1323   :  { %v6231_v13 = vmul.f32 %v6215_v55, %v6199_v31  ;;  %v6285_v63 = vmul.f32 %v6269_v17, %v6197_v7  ;;  %v6202_v52 = vunpack.c.h.bf16 %v9715_v1  ;;  %v6232_v40 = vmul.f32 %v6216_v47, %v6200_v3  ;;  %v6274_v9 = vld [vmem:[#allocation5 + $0xf8] sm:$0xff]  ;;  %p7949_p6 = scmp.ne.s32.totalorder %s6338_s5, %s7948_s4  ;;  %p7954_p8 = scmp.lt.s32.totalorder %s7952_s10, %s7948_s4 }
0x1324   :  { %v6239_v44 = vadd.f32 %v6238_v43, %v6224_v57  ;;  %v6294_v25 = vadd.f32 %v6293_v0, %v6279_v60  ;;  %v6286_v24 = vmul.f32 %v6270_v18, %v6198_v50  ;;  %v6233_v57 = vmul.f32 %v6217_v12, %v6201_v21 }
0x1325   :  { %v6287_v51 = vmul.f32 %v6271_v54, %v6199_v31  ;;  %v6234_v34 = vmul.f32 %v6218_v45, %v6202_v52  ;;  %v6289_v60 = vmul.f32 %v6273_v32, %v6201_v21  ;;  %v6290_v62 = vmul.f32 %v6274_v9, %v6202_v52  ;;  %p7955_p9 = por %p7954_p8, %p7953_p7 }
0x1326   :  { %v6240_v2 = vadd.f32 %v6239_v44, %v6225_v35  ;;  %v6295_v37 = vadd.f32 %v6294_v25, %v6280_v6  ;;  %v6288_v35 = vmul.f32 %v6272_v23, %v6200_v3  ;;  %vm6314_vm0 = vcmask 7168  }
0x1327   :  { %vm6318_vm1 = vcmask 8192   ;;  %p7956_p10 = pnand %p7955_p9, %p7949_p6 }
0x1328   :  { %v6241_v39 = vadd.f32 %v6240_v2, %v6226_v29  ;;  %v6296_v53 = vadd.f32 %v6295_v37, %v6281_v16 }
0x132a   :  { %v6242_v41 = vadd.f32 %v6241_v39, %v6227_v15  ;;  %v6297_v26 = vadd.f32 %v6296_v53, %v6282_v49 }
0x132c   :  { %v6243_v11 = vadd.f32 %v6242_v41, %v6228_v36  ;;  %v6298_v33 = vadd.f32 %v6297_v26, %v6283_v5 }
0x132e   :  { %v6244_v56 = vadd.f32 %v6243_v11, %v6229_v14  ;;  %v6299_v48 = vadd.f32 %v6298_v33, %v6284_v27 }
0x1330   :  { %v6245_v10 = vadd.f32 %v6244_v56, %v6230_v61  ;;  %v6300_v28 = vadd.f32 %v6299_v48, %v6285_v63 }
0x1332   :  { %v6246_v46 = vadd.f32 %v6245_v10, %v6231_v13  ;;  %v6301_v43 = vadd.f32 %v6300_v28, %v6286_v24 }
0x1334   :  { %v6247_v4 = vadd.f32 %v6246_v46, %v6232_v40  ;;  %v6302_v1 = vadd.f32 %v6301_v43, %v6287_v51 }
0x1336   :  { %v6248_v30 = vadd.f32 %v6247_v4, %v6233_v57  ;;  %v6303_v29 = vadd.f32 %v6302_v1, %v6288_v35 }
0x1338   :  { %v6249_v19 = vadd.f32 %v6248_v30, %v6234_v34  ;;  %v6304_v38 = vadd.f32 %v6303_v29, %v6289_v60 }
0x133a   :  { %v6250_v44 = vrot.slane %v6249_v19, 4  ;;  %v6305_v6 = vadd.f32 %v6304_v38, %v6290_v62 }
0x133c   :  { %v6251_v8 = vadd.f32 %v6250_v44, %v6249_v19  ;;  %v6306_v7 = vrot.slane %v6305_v6, 4 }
0x133e   :  { %v6252_v0 = vrot.slane %v6251_v8, 2  ;;  %v6307_v2 = vadd.f32 %v6306_v7, %v6305_v6 }
0x1340   :  { %v6253_v15 = vadd.f32 %v6252_v0, %v6251_v8  ;;  %v6308_v22 = vrot.slane %v6307_v2, 2 }
0x1342   :  { %v6254_v58 = vrot.slane %v6253_v15, 1  ;;  %v6309_v25 = vadd.f32 %v6308_v22, %v6307_v2 }
0x1344   :  { %v6255_v16 = vadd.f32 %v6254_v58, %v6253_v15  ;;  %v6310_v50 = vrot.slane %v6309_v25, 1 }
0x1346   :  { %6256 = vadd.xlane.f32.xlu0 %v6255_v16  ;;  %v6311_v36 = vadd.f32 %v6310_v50, %v6309_v25 }
0x134a   :  { %6312 = vadd.xlane.f32.xlu0 %v6311_v36 }
0x13d3   :  { %v6257_v39 = vpop.xlane.xlu0 %6256 }
0x13d7   :  { %v6313_v59 = vpop.xlane.xlu0 %6312 }
0x13d8   :  { %v6315_v49 = vsel %vm6314_vm0, %v6257_v39, %v6313_v59 }
0x13d9   :  { %v6317_v37 = vadd.f32 %v6316_v42, %v6315_v49 }
0x13db   :  { %v6319_v31 = vsel %vm6318_vm1, %v6317_v37, -inf }
0x13dc   :  { %6320 = vmax.xlane.f32.xlu1 %v6319_v31 }
0x1469   :  { %v6321_v14 = vpop.xlane.xlu1 %6320 }
0x146a   :  { %v6322_v41 = vsub.f32 %v6317_v37, %v6321_v14 }
0x146c   :  { %v6323_v20 = vmul.f32 1.442695, %v6322_v41 }
0x146e   :  { %7812 = vpow2.f32 %v6323_v20 }
0x1478   :  { %v7813_v55 = vpop.eup %7812 }
0x1479   :  { %v6325_v5 = vsel %vm6318_vm1, %v7813_v55, 0.0 }
0x147a   :  { %6326 = vadd.xlane.f32.xlu1 %v6325_v5 }
0x1507   :  { %v6327_v53 = vpop.xlane.xlu1 %6326 }
0x1508   :  { %7814 = vrcp.f32 %v6327_v53 }
0x1512   :  { %v7815_v3 = vpop.eup %7814 }
0x1513   :  { %v6329_v61 = vmul.f32 %v7815_v3, %v7813_v55 }
0x1515   :  { %6330 = vst.msk [vmem:[#allocation16] sm:$0x1] %vm6318_vm1, %v6329_v61 }
0x1516   :  { %7959 = shalt.err (!%p7956_p10)
}
0x1517   :  { %s7960_s22 = scalar_lea.hbm %s9760_s9, 16 }
0x1518   :  { %p7961_p11 = scmp.ne.s32.totalorder %s9760_s9, %s7960_s22  ;;  %p7964_p12 = scmp.lt.u32.totalorder %s7960_s22, %s9760_s9 }
0x151a   :  { %p7966_p13 = pnand %p7964_p12, %p7961_p11 }
0x151c   :  { %7969 = shalt.err (!%p7966_p13)
}
0x151d   :  { %6340 = dma.vmem_to_hbm [thread:$0]  %s6338_s5, 16, %s9760_s9, [#allocation10]  }
0x151e   :  { %7984 = dma.done.wait [#allocation10], 16  }
0x151f   :  { %7985 = vsyncadd [#allocation10], 4294967280 }
0x1520   :  { %6344 = vsyncpa [#allocation9], 1 }
0x1521   :  { %6345 = vsyncpa [#allocation12], 1 }
0x1522   :  { %6346 = vsyncpa [#allocation15], 1 }
0x1523   :  { %6347 = vsyncpa [#allocation10], 1 }
0x1524   :  { %6348 = vsyncmov [#allocation7] }
0x1527   :  { %s6349_s18 = vpop.sfrf %6348 }
0x1528   :  { %p6491_p0 = scmp.ne.s32.totalorder %s6349_s18, 0 }
0x152a   :  { %6353 = shalt.err (%p6491_p0)  }
0x152b   :  { %6355 = vsyncmov [#allocation7 + $0x1] }
0x152e   :  { %s6356_s19 = vpop.sfrf %6355 }
0x152f   :  { %p6492_p1 = scmp.ne.s32.totalorder %s6356_s19, 0 }
0x1531   :  { %6360 = shalt.err (%p6492_p1)  }
0x1532   :  { %6362 = vsyncmov [#allocation7 + $0x2] }
0x1535   :  { %s6363_s20 = vpop.sfrf %6362 }
0x1536   :  { %p6493_p2 = scmp.ne.s32.totalorder %s6363_s20, 0 }
0x1538   :  { %6367 = shalt.err (%p6493_p2)  }
0x1539   :  { %6369 = vsyncmov [#allocation7 + $0x3] }
0x153c   :  { %s6370_s9 = vpop.sfrf %6369 }
0x153d   :  { %p6494_p3 = scmp.ne.s32.totalorder %s6370_s9, 0 }
0x153f   :  { %6374 = shalt.err (%p6494_p3)  }

</bundles_post_ra>
